<compile_context>
chip_gen: v7x
topology: tpu7x:2x2x1
jax: 0.10.0
libtpu: 0.0.40
codegen_flags: <defaults>
</compile_context>

<pallas_src>
import jax
import jax.numpy as jnp
import numpy as np
from jax.experimental import pallas as pl
from jax.experimental.pallas import tpu as pltpu

# ---------------- static model configuration (small, deterministic) -----------
NB = 2                                   # batch
C = 32                                   # d_model
M = 4                                    # n_heads
DH = C // M                              # head dim
L = 2                                    # n_levels
P = 2                                    # n_points
MLP = M * L * P                          # 16 sampling slots per query
NREP = M * P                             # 8 sampling slots per level
D_FFN = 64                               # FFN hidden dim
NUM_LAYERS = 2
LQ = 64                                  # number of object queries
SPATIAL_SHAPES = ((8, 8), (4, 4))        # per-level (H, W) of the encoder memory
LEVEL_START = (0, SPATIAL_SHAPES[0][0] * SPATIAL_SHAPES[0][1])
S = sum(h * w for h, w in SPATIAL_SHAPES)        # 80 memory tokens
LN_EPS = 1e-5
SA_SCALE = 1.0 / float(DH) ** 0.5

# original (reference) per-layer parameter names; sampling-slot column order is
# (level, head, point), offset/attention projection columns are
# [16 x-offsets | 16 y-offsets | 16 attention logits].
REF_PARAM_NAMES = ("w_qk", "b_qk", "w_vsa", "b_vsa", "w_osa", "b_osa", "g_sa", "be_sa",
                   "w_val", "b_val", "w_oa", "b_oa", "w_out", "b_out", "g_ca", "be_ca",
                   "w1", "b1", "w2", "b2", "g_ffn", "be_ffn")

# kernel-side (repacked, lane-dense) parameter names
PARAM_NAMES = ("w_q", "b_q", "w_k", "b_k", "w_v", "b_v", "w_osa", "b_osa", "g_sa", "be_sa",
               "w_val", "b_val", "w_off", "b_off", "w_logit", "b_logit", "w_out", "b_out",
               "g_ca", "be_ca", "w1", "b1", "w2", "b2", "g_ffn", "be_ffn")

CONST_NAMES = ("hrm", "sum_sa", "exp_sa", "same_head",
               "rx0", "ry0", "rh0", "rx1", "ry1", "rh1",
               "ex0", "ey0", "ex1", "ey1", "vhm0", "vhm1")

N_DATA = 8
N_CONST = len(CONST_NAMES)
N_PARAM = len(PARAM_NAMES)


# ------------------------------- Pallas kernel --------------------------------
def _ln(x, g, b):
    mu = jnp.mean(x, axis=-1, keepdims=True)
    xc = x - mu
    var = jnp.mean(xc * xc, axis=-1, keepdims=True)
    return xc * jax.lax.rsqrt(var + LN_EPS) * g + b


def decoder_stack_kernel(*refs):
    data_refs = refs[:N_DATA]
    const_refs = refs[N_DATA:N_DATA + N_CONST]
    param_refs = refs[N_DATA + N_CONST:N_DATA + N_CONST + N_PARAM]
    out_ref = refs[N_DATA + N_CONST + N_PARAM]

    (tgt_ref, qpos_ref, src_ref, keep_ref,
     bpxr0_ref, bpyr0_ref, bpxr1_ref, bpyr1_ref) = data_refs
    cr = dict(zip(CONST_NAMES, const_refs))
    pr = dict(zip(PARAM_NAMES, param_refs))

    tgt = tgt_ref[0]                       # (LQ, C) activation carried across layers
    qpos = qpos_ref[0]                     # (LQ, C)
    src = src_ref[0]                       # (S, C)
    keep = keep_ref[0]                     # (S, C)   0.0 where padded, 1.0 elsewhere
    bpxr = (bpxr0_ref[0], bpxr1_ref[0])    # (LQ, NREP*Wl)  ref_x*W - 0.5 - pixel_x (per col)
    bpyr = (bpyr0_ref[0], bpyr1_ref[0])    # (LQ, NREP*Hl)

    hrm = cr["hrm"][...]                   # (M*LQ, C) head row mask for stacked K / V

    for lyr in range(NUM_LAYERS):          # static unrolled layer loop, params VMEM-resident
        prm = {n: pr[n][lyr] for n in PARAM_NAMES}

        # ------------------- 1) query self-attention (lane-packed heads) -------------------
        q_in = tgt + qpos
        q = jnp.dot(q_in, prm["w_q"], preferred_element_type=jnp.float32) + prm["b_q"]
        k = jnp.dot(q_in, prm["w_k"], preferred_element_type=jnp.float32) + prm["b_k"]
        v = jnp.dot(tgt, prm["w_v"], preferred_element_type=jnp.float32) + prm["b_v"]

        k_stack = jnp.concatenate([k] * M, axis=0) * hrm                       # (M*LQ, C)
        v_stack = jnp.dot(jnp.concatenate([v] * M, axis=0) * hrm, prm["w_osa"],
                          preferred_element_type=jnp.float32)                  # (M*LQ, C)

        s_all = jax.lax.dot_general(q, k_stack, (((1,), (1,)), ((), ())),
                                    preferred_element_type=jnp.float32)        # (LQ, M*LQ)
        e_all = jnp.exp(s_all - jnp.max(s_all, axis=-1, keepdims=True))
        inv_h = pl.reciprocal(
            jnp.dot(e_all, cr["sum_sa"][...], preferred_element_type=jnp.float32),
            approx=True)                                                       # (LQ, 2M)
        p_all = e_all * jnp.dot(inv_h, cr["exp_sa"][...],
                                preferred_element_type=jnp.float32)            # (LQ, M*LQ)
        self_out = jnp.dot(p_all, v_stack, preferred_element_type=jnp.float32) + prm["b_osa"]
        tgt = _ln(tgt + self_out, prm["g_sa"], prm["be_sa"])

        # ----------------------- 2) deformable cross-attention -----------------------------
        q_ca = tgt + qpos
        value = (jnp.dot(src, prm["w_val"], preferred_element_type=jnp.float32)
                 + prm["b_val"]) * keep                                        # (S, C)
        off = jnp.dot(q_ca, prm["w_off"], preferred_element_type=jnp.float32) + prm["b_off"]
        logits = (jnp.dot(q_ca, prm["w_logit"], preferred_element_type=jnp.float32)
                  + prm["b_logit"])                                            # (LQ, MLP)
        e = jnp.exp(logits - jnp.max(logits, axis=-1, keepdims=True))
        aw = e * pl.reciprocal(
            jnp.dot(e, cr["same_head"][...], preferred_element_type=jnp.float32),
            approx=True)                                                       # (LQ, MLP)

        sampled = jnp.zeros((LQ, C), jnp.float32)
        for l, (Hl, Wl) in enumerate(SPATIAL_SHAPES):
            Sl = Hl * Wl
            s0 = LEVEL_START[l]
            # pixel-distance fields: x/y-offset column selection + slot repetition folded
            # into the constant rx/ry matrices, pixel coordinate folded into bpxr/bpyr.
            pxd = jnp.dot(off, cr[f"rx{l}"][...],
                          preferred_element_type=jnp.float32) + bpxr[l]        # (LQ, NREP*Wl)
            pyd = jnp.dot(off, cr[f"ry{l}"][...],
                          preferred_element_type=jnp.float32) + bpyr[l]        # (LQ, NREP*Hl)
            tx = jnp.maximum(0.0, 1.0 - jnp.abs(pxd))
            ty = jnp.maximum(0.0, 1.0 - jnp.abs(pyd)) * jnp.dot(
                aw, cr[f"rh{l}"][...], preferred_element_type=jnp.float32)
            # separable tent expanded to each slot's pixel grid with constant 0/1 matmuls
            tent = (jnp.dot(tx, cr[f"ex{l}"][...], preferred_element_type=jnp.float32) *
                    jnp.dot(ty, cr[f"ey{l}"][...], preferred_element_type=jnp.float32))
            # one matmul per level: head-masked, row-stacked value (point sum & head
            # placement fall out of the contraction)
            v_l = value[s0:s0 + Sl, :]
            v_mt = jnp.concatenate([v_l] * NREP, axis=0) * cr[f"vhm{l}"][...]  # (NREP*Sl, C)
            sampled = sampled + jnp.dot(tent, v_mt, preferred_element_type=jnp.float32)

        attn_out = jnp.dot(sampled, prm["w_out"],
                           preferred_element_type=jnp.float32) + prm["b_out"]
        tgt = _ln(tgt + attn_out, prm["g_ca"], prm["be_ca"])

        # --------------------------------- 3) FFN ------------------------------------------
        h = jnp.maximum(jnp.dot(tgt, prm["w1"], preferred_element_type=jnp.float32)
                        + prm["b1"], 0.0)
        ffn = jnp.dot(h, prm["w2"], preferred_element_type=jnp.float32) + prm["b2"]
        tgt = _ln(tgt + ffn, prm["g_ffn"], prm["be_ffn"])

    out_ref[0] = tgt.astype(out_ref.dtype)


# ---------------------------- host-built constants ----------------------------
def build_constants():
    hrm = np.zeros((M * LQ, C), np.float32)          # row-block head mask for stacked K/V
    sum_sa = np.zeros((M * LQ, 2 * M), np.float32)   # per-head column sums (8-lane padded)
    exp_sa = np.zeros((2 * M, M * LQ), np.float32)   # broadcast reciprocal back per head
    for m in range(M):
        hrm[m * LQ:(m + 1) * LQ, m * DH:(m + 1) * DH] = 1.0
        sum_sa[m * LQ:(m + 1) * LQ, m] = 1.0
        sum_sa[m * LQ:(m + 1) * LQ, M + m] = 1.0     # duplicated column keeps padding finite
        exp_sa[m, m * LQ:(m + 1) * LQ] = 1.0
    same_head = np.zeros((MLP, MLP), np.float32)     # grouped-softmax sum over (level,point)
    for i in range(MLP):
        for j in range(MLP):
            if (i // P) % M == (j // P) % M:
                same_head[i, j] = 1.0
    consts = {"hrm": hrm, "sum_sa": sum_sa, "exp_sa": exp_sa, "same_head": same_head}

    for l, (Hl, Wl) in enumerate(SPATIAL_SHAPES):
        Sl = Hl * Wl
        rx = np.zeros((2 * MLP, NREP * Wl), np.float32)   # x-offset select + repeat Wl times
        ry = np.zeros((2 * MLP, NREP * Hl), np.float32)   # y-offset select + repeat Hl times
        rh = np.zeros((MLP, NREP * Hl), np.float32)       # attention weight repeat Hl times
        ex = np.zeros((NREP * Wl, NREP * Sl), np.float32)  # x-tent -> per-slot pixel grid
        ey = np.zeros((NREP * Hl, NREP * Sl), np.float32)  # y-tent -> per-slot pixel grid
        vhm = np.zeros((NREP * Sl, C), np.float32)         # head mask for row-stacked value
        for r in range(NREP):
            rx[l * NREP + r, r * Wl:(r + 1) * Wl] = 1.0
            ry[MLP + l * NREP + r, r * Hl:(r + 1) * Hl] = 1.0
            rh[l * NREP + r, r * Hl:(r + 1) * Hl] = 1.0
            m = r // P
            vhm[r * Sl:(r + 1) * Sl, m * DH:(m + 1) * DH] = 1.0
            for s in range(Sl):
                ex[r * Wl + (s % Wl), r * Sl + s] = 1.0
                ey[r * Hl + (s // Wl), r * Sl + s] = 1.0
        consts.update({f"rx{l}": rx, f"ry{l}": ry, f"rh{l}": rh,
                       f"ex{l}": ex, f"ey{l}": ey, f"vhm{l}": vhm})
    return {k: jnp.asarray(v) for k, v in consts.items()}


def repack_layer_params(layer_params):
    """Stack per-layer params on a leading layer axis, in lane-dense kernel form."""
    def stack(fn):
        return jnp.stack([fn(p) for p in layer_params], axis=0)
    return {
        "w_q": stack(lambda p: p["w_qk"][:, :C] * SA_SCALE),
        "b_q": stack(lambda p: p["b_qk"][:, :C] * SA_SCALE),
        "w_k": stack(lambda p: p["w_qk"][:, C:]),
        "b_k": stack(lambda p: p["b_qk"][:, C:]),
        "w_v": stack(lambda p: p["w_vsa"]),
        "b_v": stack(lambda p: p["b_vsa"]),
        "w_osa": stack(lambda p: p["w_osa"]),
        "b_osa": stack(lambda p: p["b_osa"]),
        "g_sa": stack(lambda p: p["g_sa"]),
        "be_sa": stack(lambda p: p["be_sa"]),
        "w_val": stack(lambda p: p["w_val"]),
        "b_val": stack(lambda p: p["b_val"]),
        "w_off": stack(lambda p: p["w_oa"][:, :2 * MLP]),
        "b_off": stack(lambda p: p["b_oa"][:, :2 * MLP]),
        "w_logit": stack(lambda p: p["w_oa"][:, 2 * MLP:]),
        "b_logit": stack(lambda p: p["b_oa"][:, 2 * MLP:]),
        "w_out": stack(lambda p: p["w_out"]),
        "b_out": stack(lambda p: p["b_out"]),
        "g_ca": stack(lambda p: p["g_ca"]),
        "be_ca": stack(lambda p: p["be_ca"]),
        "w1": stack(lambda p: p["w1"]),
        "b1": stack(lambda p: p["b1"]),
        "w2": stack(lambda p: p["w2"]),
        "b2": stack(lambda p: p["b2"]),
        "g_ffn": stack(lambda p: p["g_ffn"]),
        "be_ffn": stack(lambda p: p["be_ffn"]),
    }


# ------------------------------ pallas_call wrapper ----------------------------
def run_decoder_stack(data, consts, stacked):
    const_arrs = [consts[n] for n in CONST_NAMES]
    param_arrs = [stacked[n] for n in PARAM_NAMES]

    def dspec(x):                         # per-batch data (block index follows b)
        zeros = (0,) * (x.ndim - 1)
        return pl.BlockSpec((1,) + tuple(x.shape[1:]), lambda b, _z=zeros: (b,) + _z)

    def cspec(x):                         # grid-invariant constants / stacked params
        zeros = (0,) * x.ndim
        return pl.BlockSpec(tuple(x.shape), lambda b, _z=zeros: _z)

    in_specs = ([dspec(x) for x in data]
                + [cspec(x) for x in const_arrs]
                + [cspec(x) for x in param_arrs])

    return pl.pallas_call(
        decoder_stack_kernel,
        out_shape=jax.ShapeDtypeStruct((NB, LQ, C), jnp.float32),
        grid=(NB,),                       # batch only; layers are an in-kernel loop
        in_specs=in_specs,
        out_specs=pl.BlockSpec((1, LQ, C), lambda b: (b, 0, 0)),
        compiler_params=pltpu.CompilerParams(dimension_semantics=("parallel",)),
    )(*data, *const_arrs, *param_arrs)


def deformable_transformer_decoder(tgt, reference_points, src, src_spatial_shapes,
                                   src_level_start_index, src_valid_ratios, pos_embeds,
                                   layer_params, query_pos=None, src_padding_mask=None):
    """Mirrors DeformableTransformerDecoder.forward (bbox_embed=None, return_intermediate=False)."""
    del src_spatial_shapes, src_level_start_index      # static module config (SPATIAL_SHAPES)
    # TODO(synk): pos_embeds is accepted for signature parity but unused, matching the standard
    # Deformable-DETR decoder layer which ignores the encoder positional embeddings.
    del pos_embeds

    # reference_points_input = reference_points[:, :, None] * src_valid_ratios[:, None]
    # (constant across layers since bbox_embed is None) -> precompute per-slot pixel bases,
    # with the per-column pixel coordinate already subtracted (folded into the tent distance).
    ref_in = reference_points[:, :, None, :] * src_valid_ratios[:, None, :, :]    # (N, LQ, L, 2)
    wls = jnp.asarray([float(w) for (_, w) in SPATIAL_SHAPES], jnp.float32)
    hls = jnp.asarray([float(h) for (h, _) in SPATIAL_SHAPES], jnp.float32)
    bpx = jnp.repeat(ref_in[..., 0] * wls - 0.5, NREP, axis=-1)                    # (N, LQ, MLP)
    bpy = jnp.repeat(ref_in[..., 1] * hls - 0.5, NREP, axis=-1)

    bpxr, bpyr = [], []
    for l, (Hl, Wl) in enumerate(SPATIAL_SHAPES):
        xs = jnp.tile(jnp.arange(Wl, dtype=jnp.float32), NREP)
        ys = jnp.tile(jnp.arange(Hl, dtype=jnp.float32), NREP)
        bpxr.append(jnp.repeat(bpx[..., l * NREP:(l + 1) * NREP], Wl, axis=-1) - xs)
        bpyr.append(jnp.repeat(bpy[..., l * NREP:(l + 1) * NREP], Hl, axis=-1) - ys)

    keep = jnp.ones((NB, S, C), jnp.float32) * (1.0 - src_padding_mask.astype(jnp.float32)[..., None])

    data = [tgt, query_pos, src, keep, bpxr[0], bpyr[0], bpxr[1], bpyr[1]]
    consts = build_constants()
    stacked = repack_layer_params(layer_params)
    output = run_decoder_stack(data, consts, stacked)
    return output, reference_points


# ------------------------- pure-JAX reference (for checking) ------------------
def _ln_ref(x, g, b):
    mu = jnp.mean(x, axis=-1, keepdims=True)
    xc = x - mu
    var = jnp.mean(xc * xc, axis=-1, keepdims=True)
    return xc * jax.lax.rsqrt(var + LN_EPS) * g + b


def _ref_layer(tgt, qpos, src, mask, base_px, base_py, prm):
    # self-attention
    q_in = tgt + qpos
    qk = q_in @ prm["w_qk"] + prm["b_qk"][0]
    q, k = qk[:, :C], qk[:, C:]
    v = tgt @ prm["w_vsa"] + prm["b_vsa"][0]
    heads = []
    for m in range(M):
        s = (q[:, m * DH:(m + 1) * DH] * SA_SCALE) @ k[:, m * DH:(m + 1) * DH].T
        heads.append(jax.nn.softmax(s, axis=-1) @ v[:, m * DH:(m + 1) * DH])
    sa = jnp.concatenate(heads, axis=-1) @ prm["w_osa"] + prm["b_osa"][0]
    tgt = _ln_ref(tgt + sa, prm["g_sa"][0], prm["be_sa"][0])

    # deformable cross-attention (straightforward per-slot tent formulation)
    q_ca = tgt + qpos
    value = (src @ prm["w_val"] + prm["b_val"][0]) * (1.0 - mask)
    oa = q_ca @ prm["w_oa"] + prm["b_oa"][0]
    px = oa[:, :MLP] + base_px
    py = oa[:, MLP:2 * MLP] + base_py
    logits = oa[:, 2 * MLP:].reshape(LQ, L, M, P).transpose(0, 2, 1, 3)      # (LQ, M, L, P)
    aw = jax.nn.softmax(logits.reshape(LQ, M, L * P), axis=-1).reshape(LQ, M, L, P)
    attn = jnp.zeros((LQ, C), jnp.float32)
    for m in range(M):
        o_m = jnp.zeros((LQ, DH), jnp.float32)
        for l, (Hl, Wl) in enumerate(SPATIAL_SHAPES):
            s0, Sl = LEVEL_START[l], Hl * Wl
            v_lm = value[s0:s0 + Sl, m * DH:(m + 1) * DH]
            idx = jnp.arange(Sl, dtype=jnp.float32)
            ys = jnp.floor(idx / Wl)
            xs = idx - ys * Wl
            for p in range(P):
                slot = (l * M + m) * P + p
                tent = (jnp.maximum(0.0, 1.0 - jnp.abs(px[:, slot][:, None] - xs[None, :])) *
                        jnp.maximum(0.0, 1.0 - jnp.abs(py[:, slot][:, None] - ys[None, :])))
                o_m = o_m + aw[:, m, l, p][:, None] * (tent @ v_lm)
        attn = attn.at[:, m * DH:(m + 1) * DH].set(o_m)
    attn = attn @ prm["w_out"] + prm["b_out"][0]
    tgt = _ln_ref(tgt + attn, prm["g_ca"][0], prm["be_ca"][0])

    # ffn
    h = jax.nn.relu(tgt @ prm["w1"] + prm["b1"][0])
    return _ln_ref(tgt + h @ prm["w2"] + prm["b2"][0], prm["g_ffn"][0], prm["be_ffn"][0])


def reference_decoder(tgt, reference_points, src, src_valid_ratios, query_pos,
                      src_padding_mask, layer_params):
    ref_in = reference_points[:, :, None, :] * src_valid_ratios[:, None, :, :]
    wls = jnp.asarray([float(w) for (_, w) in SPATIAL_SHAPES], jnp.float32)
    hls = jnp.asarray([float(h) for (h, _) in SPATIAL_SHAPES], jnp.float32)
    base_px = jnp.repeat(ref_in[..., 0] * wls - 0.5, NREP, axis=-1)
    base_py = jnp.repeat(ref_in[..., 1] * hls - 0.5, NREP, axis=-1)
    mask_f = src_padding_mask.astype(jnp.float32)[..., None]
    out = tgt
    for prm in layer_params:
        out = jax.vmap(_ref_layer, in_axes=(0, 0, 0, 0, 0, 0, None))(
            out, query_pos, src, mask_f, base_px, base_py, prm)
    return out, reference_points


# ------------------------------ parameter init --------------------------------
def init_layer_params(key):
    ks = iter(jax.random.split(key, 32))

    def w(shape, s):
        return s * jax.random.normal(next(ks), shape, jnp.float32)

    # TODO(synk): PyTorch's xavier_uniform_/grid-based sampling_offsets init is replaced by a
    # deterministic random init of identical shapes (synthetic weights for this benchmark).
    return dict(
        w_qk=w((C, 2 * C), 0.1), b_qk=w((1, 2 * C), 0.02),
        w_vsa=w((C, C), 0.1), b_vsa=w((1, C), 0.02),
        w_osa=w((C, C), 0.1), b_osa=w((1, C), 0.02),
        g_sa=1.0 + w((1, C), 0.05), be_sa=w((1, C), 0.05),
        w_val=w((C, C), 0.1), b_val=w((1, C), 0.02),
        w_oa=w((C, 3 * MLP), 0.05), b_oa=w((1, 3 * MLP), 0.3),
        w_out=w((C, C), 0.1), b_out=w((1, C), 0.02),
        g_ca=1.0 + w((1, C), 0.05), be_ca=w((1, C), 0.05),
        w1=w((C, D_FFN), 0.1), b1=w((1, D_FFN), 0.02),
        w2=w((D_FFN, C), 0.1), b2=w((1, C), 0.02),
        g_ffn=1.0 + w((1, C), 0.05), be_ffn=w((1, C), 0.05),
    )


# ------------------------------------ main -------------------------------------
if __name__ == "__main__":
    key = jax.random.PRNGKey(0)
    k_tgt, k_qp, k_src, k_ref, k_vr, k_par = jax.random.split(key, 6)

    tgt = jax.random.normal(k_tgt, (NB, LQ, C), jnp.float32)
    query_pos = 0.1 * jax.random.normal(k_qp, (NB, LQ, C), jnp.float32)
    src = jax.random.normal(k_src, (NB, S, C), jnp.float32)
    reference_points = jax.random.uniform(k_ref, (NB, LQ, 2), jnp.float32, 0.05, 0.95)
    src_valid_ratios = 0.8 + 0.2 * jax.random.uniform(k_vr, (NB, L, 2), jnp.float32)
    src_padding_mask = jnp.zeros((NB, S), jnp.bool_).at[1, S - 8:].set(True)
    pos_embeds = None

    layer_params = [init_layer_params(k) for k in jax.random.split(k_par, NUM_LAYERS)]

    out, ref_pts = deformable_transformer_decoder(
        tgt, reference_points, src, SPATIAL_SHAPES, LEVEL_START, src_valid_ratios,
        pos_embeds, layer_params, query_pos=query_pos, src_padding_mask=src_padding_mask)
    out = jax.block_until_ready(out)

    ref_out, _ = reference_decoder(tgt, reference_points, src, src_valid_ratios,
                                   query_pos, src_padding_mask, layer_params)
    ref_out = jax.block_until_ready(ref_out)

    np.testing.assert_allclose(np.asarray(out), np.asarray(ref_out), rtol=2e-2, atol=2e-2)
    print("KERNEL_OK")
</pallas_src>

<mosaic_0001>
module attributes {stable_mosaic.version = 11 : i64} {
  func.func @decoder_stack_kernel(%arg0: i32, %arg1: memref<1x64x32xf32, #tpu.memory_space<vmem>>, %arg2: memref<1x64x32xf32, #tpu.memory_space<vmem>>, %arg3: memref<1x80x32xf32, #tpu.memory_space<vmem>>, %arg4: memref<1x80x32xf32, #tpu.memory_space<vmem>>, %arg5: memref<1x64x64xf32, #tpu.memory_space<vmem>>, %arg6: memref<1x64x64xf32, #tpu.memory_space<vmem>>, %arg7: memref<1x64x32xf32, #tpu.memory_space<vmem>>, %arg8: memref<1x64x32xf32, #tpu.memory_space<vmem>>, %arg9: memref<256x32xf32, #tpu.memory_space<vmem>>, %arg10: memref<256x8xf32, #tpu.memory_space<vmem>>, %arg11: memref<8x256xf32, #tpu.memory_space<vmem>>, %arg12: memref<16x16xf32, #tpu.memory_space<vmem>>, %arg13: memref<32x64xf32, #tpu.memory_space<vmem>>, %arg14: memref<32x64xf32, #tpu.memory_space<vmem>>, %arg15: memref<16x64xf32, #tpu.memory_space<vmem>>, %arg16: memref<32x32xf32, #tpu.memory_space<vmem>>, %arg17: memref<32x32xf32, #tpu.memory_space<vmem>>, %arg18: memref<16x32xf32, #tpu.memory_space<vmem>>, %arg19: memref<64x512xf32, #tpu.memory_space<vmem>>, %arg20: memref<64x512xf32, #tpu.memory_space<vmem>>, %arg21: memref<32x128xf32, #tpu.memory_space<vmem>>, %arg22: memref<32x128xf32, #tpu.memory_space<vmem>>, %arg23: memref<512x32xf32, #tpu.memory_space<vmem>>, %arg24: memref<128x32xf32, #tpu.memory_space<vmem>>, %arg25: memref<2x32x32xf32, #tpu.memory_space<vmem>>, %arg26: memref<2x1x32xf32, #tpu.memory_space<vmem>>, %arg27: memref<2x32x32xf32, #tpu.memory_space<vmem>>, %arg28: memref<2x1x32xf32, #tpu.memory_space<vmem>>, %arg29: memref<2x32x32xf32, #tpu.memory_space<vmem>>, %arg30: memref<2x1x32xf32, #tpu.memory_space<vmem>>, %arg31: memref<2x32x32xf32, #tpu.memory_space<vmem>>, %arg32: memref<2x1x32xf32, #tpu.memory_space<vmem>>, %arg33: memref<2x1x32xf32, #tpu.memory_space<vmem>>, %arg34: memref<2x1x32xf32, #tpu.memory_space<vmem>>, %arg35: memref<2x32x32xf32, #tpu.memory_space<vmem>>, %arg36: memref<2x1x32xf32, #tpu.memory_space<vmem>>, %arg37: memref<2x32x32xf32, #tpu.memory_space<vmem>>, %arg38: memref<2x1x32xf32, #tpu.memory_space<vmem>>, %arg39: memref<2x32x16xf32, #tpu.memory_space<vmem>>, %arg40: memref<2x1x16xf32, #tpu.memory_space<vmem>>, %arg41: memref<2x32x32xf32, #tpu.memory_space<vmem>>, %arg42: memref<2x1x32xf32, #tpu.memory_space<vmem>>, %arg43: memref<2x1x32xf32, #tpu.memory_space<vmem>>, %arg44: memref<2x1x32xf32, #tpu.memory_space<vmem>>, %arg45: memref<2x32x64xf32, #tpu.memory_space<vmem>>, %arg46: memref<2x1x64xf32, #tpu.memory_space<vmem>>, %arg47: memref<2x64x32xf32, #tpu.memory_space<vmem>>, %arg48: memref<2x1x32xf32, #tpu.memory_space<vmem>>, %arg49: memref<2x1x32xf32, #tpu.memory_space<vmem>>, %arg50: memref<2x1x32xf32, #tpu.memory_space<vmem>>, %arg51: memref<1x64x32xf32, #tpu.memory_space<vmem>>) attributes {dimension_semantics = [#tpu.dimension_semantics<parallel>], iteration_bounds = array<i64: 2>, scalar_prefetch = 0 : i64, scratch_operands = 0 : i64, tpu.core_type = #tpu.core_type<tc>, window_params = [{transform_indices = @transform_0, window_bounds = array<i64: 1, 64, 32>}, {transform_indices = @transform_1, window_bounds = array<i64: 1, 64, 32>}, {transform_indices = @transform_2, window_bounds = array<i64: 1, 80, 32>}, {transform_indices = @transform_3, window_bounds = array<i64: 1, 80, 32>}, {transform_indices = @transform_4, window_bounds = array<i64: 1, 64, 64>}, {transform_indices = @transform_5, window_bounds = array<i64: 1, 64, 64>}, {transform_indices = @transform_6, window_bounds = array<i64: 1, 64, 32>}, {transform_indices = @transform_7, window_bounds = array<i64: 1, 64, 32>}, {pipeline_mode = #tpu.pipeline_mode<synchronous>, transform_indices = @transform_8, window_bounds = array<i64: 256, 32>}, {pipeline_mode = #tpu.pipeline_mode<synchronous>, transform_indices = @transform_9, window_bounds = array<i64: 256, 8>}, {pipeline_mode = #tpu.pipeline_mode<synchronous>, transform_indices = @transform_10, window_bounds = array<i64: 8, 256>}, {pipeline_mode = #tpu.pipeline_mode<synchronous>, transform_indices = @transform_11, window_bounds = array<i64: 16, 16>}, {pipeline_mode = #tpu.pipeline_mode<synchronous>, transform_indices = @transform_12, window_bounds = array<i64: 32, 64>}, {pipeline_mode = #tpu.pipeline_mode<synchronous>, transform_indices = @transform_13, window_bounds = array<i64: 32, 64>}, {pipeline_mode = #tpu.pipeline_mode<synchronous>, transform_indices = @transform_14, window_bounds = array<i64: 16, 64>}, {pipeline_mode = #tpu.pipeline_mode<synchronous>, transform_indices = @transform_15, window_bounds = array<i64: 32, 32>}, {pipeline_mode = #tpu.pipeline_mode<synchronous>, transform_indices = @transform_16, window_bounds = array<i64: 32, 32>}, {pipeline_mode = #tpu.pipeline_mode<synchronous>, transform_indices = @transform_17, window_bounds = array<i64: 16, 32>}, {pipeline_mode = #tpu.pipeline_mode<synchronous>, transform_indices = @transform_18, window_bounds = array<i64: 64, 512>}, {pipeline_mode = #tpu.pipeline_mode<synchronous>, transform_indices = @transform_19, window_bounds = array<i64: 64, 512>}, {pipeline_mode = #tpu.pipeline_mode<synchronous>, transform_indices = @transform_20, window_bounds = array<i64: 32, 128>}, {pipeline_mode = #tpu.pipeline_mode<synchronous>, transform_indices = @transform_21, window_bounds = array<i64: 32, 128>}, {pipeline_mode = #tpu.pipeline_mode<synchronous>, transform_indices = @transform_22, window_bounds = array<i64: 512, 32>}, {pipeline_mode = #tpu.pipeline_mode<synchronous>, transform_indices = @transform_23, window_bounds = array<i64: 128, 32>}, {pipeline_mode = #tpu.pipeline_mode<synchronous>, transform_indices = @transform_24, window_bounds = array<i64: 2, 32, 32>}, {pipeline_mode = #tpu.pipeline_mode<synchronous>, transform_indices = @transform_25, window_bounds = array<i64: 2, 1, 32>}, {pipeline_mode = #tpu.pipeline_mode<synchronous>, transform_indices = @transform_26, window_bounds = array<i64: 2, 32, 32>}, {pipeline_mode = #tpu.pipeline_mode<synchronous>, transform_indices = @transform_27, window_bounds = array<i64: 2, 1, 32>}, {pipeline_mode = #tpu.pipeline_mode<synchronous>, transform_indices = @transform_28, window_bounds = array<i64: 2, 32, 32>}, {pipeline_mode = #tpu.pipeline_mode<synchronous>, transform_indices = @transform_29, window_bounds = array<i64: 2, 1, 32>}, {pipeline_mode = #tpu.pipeline_mode<synchronous>, transform_indices = @transform_30, window_bounds = array<i64: 2, 32, 32>}, {pipeline_mode = #tpu.pipeline_mode<synchronous>, transform_indices = @transform_31, window_bounds = array<i64: 2, 1, 32>}, {pipeline_mode = #tpu.pipeline_mode<synchronous>, transform_indices = @transform_32, window_bounds = array<i64: 2, 1, 32>}, {pipeline_mode = #tpu.pipeline_mode<synchronous>, transform_indices = @transform_33, window_bounds = array<i64: 2, 1, 32>}, {pipeline_mode = #tpu.pipeline_mode<synchronous>, transform_indices = @transform_34, window_bounds = array<i64: 2, 32, 32>}, {pipeline_mode = #tpu.pipeline_mode<synchronous>, transform_indices = @transform_35, window_bounds = array<i64: 2, 1, 32>}, {pipeline_mode = #tpu.pipeline_mode<synchronous>, transform_indices = @transform_36, window_bounds = array<i64: 2, 32, 32>}, {pipeline_mode = #tpu.pipeline_mode<synchronous>, transform_indices = @transform_37, window_bounds = array<i64: 2, 1, 32>}, {pipeline_mode = #tpu.pipeline_mode<synchronous>, transform_indices = @transform_38, window_bounds = array<i64: 2, 32, 16>}, {pipeline_mode = #tpu.pipeline_mode<synchronous>, transform_indices = @transform_39, window_bounds = array<i64: 2, 1, 16>}, {pipeline_mode = #tpu.pipeline_mode<synchronous>, transform_indices = @transform_40, window_bounds = array<i64: 2, 32, 32>}, {pipeline_mode = #tpu.pipeline_mode<synchronous>, transform_indices = @transform_41, window_bounds = array<i64: 2, 1, 32>}, {pipeline_mode = #tpu.pipeline_mode<synchronous>, transform_indices = @transform_42, window_bounds = array<i64: 2, 1, 32>}, {pipeline_mode = #tpu.pipeline_mode<synchronous>, transform_indices = @transform_43, window_bounds = array<i64: 2, 1, 32>}, {pipeline_mode = #tpu.pipeline_mode<synchronous>, transform_indices = @transform_44, window_bounds = array<i64: 2, 32, 64>}, {pipeline_mode = #tpu.pipeline_mode<synchronous>, transform_indices = @transform_45, window_bounds = array<i64: 2, 1, 64>}, {pipeline_mode = #tpu.pipeline_mode<synchronous>, transform_indices = @transform_46, window_bounds = array<i64: 2, 64, 32>}, {pipeline_mode = #tpu.pipeline_mode<synchronous>, transform_indices = @transform_47, window_bounds = array<i64: 2, 1, 32>}, {pipeline_mode = #tpu.pipeline_mode<synchronous>, transform_indices = @transform_48, window_bounds = array<i64: 2, 1, 32>}, {pipeline_mode = #tpu.pipeline_mode<synchronous>, transform_indices = @transform_49, window_bounds = array<i64: 2, 1, 32>}, {transform_indices = @transform_50, window_bounds = array<i64: 1, 64, 32>}]} {
    %c0 = arith.constant 0 : index
    %c0_0 = arith.constant 0 : index
    %c0_1 = arith.constant 0 : index
    %0 = vector.load %arg1[%c0, %c0_0, %c0_1] : memref<1x64x32xf32, #tpu.memory_space<vmem>>, vector<1x64x32xf32>
    %1 = vector.shape_cast %0 : vector<1x64x32xf32> to vector<64x32xf32>
    %c0_2 = arith.constant 0 : index
    %c0_3 = arith.constant 0 : index
    %c0_4 = arith.constant 0 : index
    %2 = vector.load %arg2[%c0_2, %c0_3, %c0_4] : memref<1x64x32xf32, #tpu.memory_space<vmem>>, vector<1x64x32xf32>
    %3 = vector.shape_cast %2 : vector<1x64x32xf32> to vector<64x32xf32>
    %c0_5 = arith.constant 0 : index
    %c0_6 = arith.constant 0 : index
    %c0_7 = arith.constant 0 : index
    %4 = vector.load %arg3[%c0_5, %c0_6, %c0_7] : memref<1x80x32xf32, #tpu.memory_space<vmem>>, vector<1x80x32xf32>
    %5 = vector.shape_cast %4 : vector<1x80x32xf32> to vector<80x32xf32>
    %c0_8 = arith.constant 0 : index
    %c0_9 = arith.constant 0 : index
    %c0_10 = arith.constant 0 : index
    %6 = vector.load %arg4[%c0_8, %c0_9, %c0_10] : memref<1x80x32xf32, #tpu.memory_space<vmem>>, vector<1x80x32xf32>
    %7 = vector.shape_cast %6 : vector<1x80x32xf32> to vector<80x32xf32>
    %c0_11 = arith.constant 0 : index
    %c0_12 = arith.constant 0 : index
    %c0_13 = arith.constant 0 : index
    %8 = vector.load %arg5[%c0_11, %c0_12, %c0_13] : memref<1x64x64xf32, #tpu.memory_space<vmem>>, vector<1x64x64xf32>
    %9 = vector.shape_cast %8 : vector<1x64x64xf32> to vector<64x64xf32>
    %c0_14 = arith.constant 0 : index
    %c0_15 = arith.constant 0 : index
    %c0_16 = arith.constant 0 : index
    %10 = vector.load %arg7[%c0_14, %c0_15, %c0_16] : memref<1x64x32xf32, #tpu.memory_space<vmem>>, vector<1x64x32xf32>
    %11 = vector.shape_cast %10 : vector<1x64x32xf32> to vector<64x32xf32>
    %c0_17 = arith.constant 0 : index
    %c0_18 = arith.constant 0 : index
    %c0_19 = arith.constant 0 : index
    %12 = vector.load %arg6[%c0_17, %c0_18, %c0_19] : memref<1x64x64xf32, #tpu.memory_space<vmem>>, vector<1x64x64xf32>
    %13 = vector.shape_cast %12 : vector<1x64x64xf32> to vector<64x64xf32>
    %c0_20 = arith.constant 0 : index
    %c0_21 = arith.constant 0 : index
    %c0_22 = arith.constant 0 : index
    %14 = vector.load %arg8[%c0_20, %c0_21, %c0_22] : memref<1x64x32xf32, #tpu.memory_space<vmem>>, vector<1x64x32xf32>
    %15 = vector.shape_cast %14 : vector<1x64x32xf32> to vector<64x32xf32>
    %c0_23 = arith.constant 0 : index
    %c0_24 = arith.constant 0 : index
    %16 = vector.load %arg9[%c0_23, %c0_24] : memref<256x32xf32, #tpu.memory_space<vmem>>, vector<256x32xf32>
    %c0_25 = arith.constant 0 : index
    %c0_26 = arith.constant 0 : index
    %c0_27 = arith.constant 0 : index
    %17 = vector.load %arg25[%c0_25, %c0_26, %c0_27] : memref<2x32x32xf32, #tpu.memory_space<vmem>>, vector<1x32x32xf32>
    %18 = vector.shape_cast %17 : vector<1x32x32xf32> to vector<32x32xf32>
    %c0_28 = arith.constant 0 : index
    %c0_29 = arith.constant 0 : index
    %c0_30 = arith.constant 0 : index
    %19 = vector.load %arg26[%c0_28, %c0_29, %c0_30] : memref<2x1x32xf32, #tpu.memory_space<vmem>>, vector<1x1x32xf32>
    %20 = vector.shape_cast %19 : vector<1x1x32xf32> to vector<1x32xf32>
    %c0_31 = arith.constant 0 : index
    %c0_32 = arith.constant 0 : index
    %c0_33 = arith.constant 0 : index
    %21 = vector.load %arg27[%c0_31, %c0_32, %c0_33] : memref<2x32x32xf32, #tpu.memory_space<vmem>>, vector<1x32x32xf32>
    %22 = vector.shape_cast %21 : vector<1x32x32xf32> to vector<32x32xf32>
    %c0_34 = arith.constant 0 : index
    %c0_35 = arith.constant 0 : index
    %c0_36 = arith.constant 0 : index
    %23 = vector.load %arg28[%c0_34, %c0_35, %c0_36] : memref<2x1x32xf32, #tpu.memory_space<vmem>>, vector<1x1x32xf32>
    %24 = vector.shape_cast %23 : vector<1x1x32xf32> to vector<1x32xf32>
    %c0_37 = arith.constant 0 : index
    %c0_38 = arith.constant 0 : index
    %c0_39 = arith.constant 0 : index
    %25 = vector.load %arg29[%c0_37, %c0_38, %c0_39] : memref<2x32x32xf32, #tpu.memory_space<vmem>>, vector<1x32x32xf32>
    %26 = vector.shape_cast %25 : vector<1x32x32xf32> to vector<32x32xf32>
    %c0_40 = arith.constant 0 : index
    %c0_41 = arith.constant 0 : index
    %c0_42 = arith.constant 0 : index
    %27 = vector.load %arg30[%c0_40, %c0_41, %c0_42] : memref<2x1x32xf32, #tpu.memory_space<vmem>>, vector<1x1x32xf32>
    %28 = vector.shape_cast %27 : vector<1x1x32xf32> to vector<1x32xf32>
    %c0_43 = arith.constant 0 : index
    %c0_44 = arith.constant 0 : index
    %c0_45 = arith.constant 0 : index
    %29 = vector.load %arg31[%c0_43, %c0_44, %c0_45] : memref<2x32x32xf32, #tpu.memory_space<vmem>>, vector<1x32x32xf32>
    %30 = vector.shape_cast %29 : vector<1x32x32xf32> to vector<32x32xf32>
    %c0_46 = arith.constant 0 : index
    %c0_47 = arith.constant 0 : index
    %c0_48 = arith.constant 0 : index
    %31 = vector.load %arg32[%c0_46, %c0_47, %c0_48] : memref<2x1x32xf32, #tpu.memory_space<vmem>>, vector<1x1x32xf32>
    %32 = vector.shape_cast %31 : vector<1x1x32xf32> to vector<1x32xf32>
    %c0_49 = arith.constant 0 : index
    %c0_50 = arith.constant 0 : index
    %c0_51 = arith.constant 0 : index
    %33 = vector.load %arg33[%c0_49, %c0_50, %c0_51] : memref<2x1x32xf32, #tpu.memory_space<vmem>>, vector<1x1x32xf32>
    %34 = vector.shape_cast %33 : vector<1x1x32xf32> to vector<1x32xf32>
    %c0_52 = arith.constant 0 : index
    %c0_53 = arith.constant 0 : index
    %c0_54 = arith.constant 0 : index
    %35 = vector.load %arg34[%c0_52, %c0_53, %c0_54] : memref<2x1x32xf32, #tpu.memory_space<vmem>>, vector<1x1x32xf32>
    %36 = vector.shape_cast %35 : vector<1x1x32xf32> to vector<1x32xf32>
    %c0_55 = arith.constant 0 : index
    %c0_56 = arith.constant 0 : index
    %c0_57 = arith.constant 0 : index
    %37 = vector.load %arg35[%c0_55, %c0_56, %c0_57] : memref<2x32x32xf32, #tpu.memory_space<vmem>>, vector<1x32x32xf32>
    %38 = vector.shape_cast %37 : vector<1x32x32xf32> to vector<32x32xf32>
    %c0_58 = arith.constant 0 : index
    %c0_59 = arith.constant 0 : index
    %c0_60 = arith.constant 0 : index
    %39 = vector.load %arg36[%c0_58, %c0_59, %c0_60] : memref<2x1x32xf32, #tpu.memory_space<vmem>>, vector<1x1x32xf32>
    %40 = vector.shape_cast %39 : vector<1x1x32xf32> to vector<1x32xf32>
    %c0_61 = arith.constant 0 : index
    %c0_62 = arith.constant 0 : index
    %c0_63 = arith.constant 0 : index
    %41 = vector.load %arg37[%c0_61, %c0_62, %c0_63] : memref<2x32x32xf32, #tpu.memory_space<vmem>>, vector<1x32x32xf32>
    %42 = vector.shape_cast %41 : vector<1x32x32xf32> to vector<32x32xf32>
    %c0_64 = arith.constant 0 : index
    %c0_65 = arith.constant 0 : index
    %c0_66 = arith.constant 0 : index
    %43 = vector.load %arg38[%c0_64, %c0_65, %c0_66] : memref<2x1x32xf32, #tpu.memory_space<vmem>>, vector<1x1x32xf32>
    %44 = vector.shape_cast %43 : vector<1x1x32xf32> to vector<1x32xf32>
    %c0_67 = arith.constant 0 : index
    %c0_68 = arith.constant 0 : index
    %c0_69 = arith.constant 0 : index
    %45 = vector.load %arg39[%c0_67, %c0_68, %c0_69] : memref<2x32x16xf32, #tpu.memory_space<vmem>>, vector<1x32x16xf32>
    %46 = vector.shape_cast %45 : vector<1x32x16xf32> to vector<32x16xf32>
    %c0_70 = arith.constant 0 : index
    %c0_71 = arith.constant 0 : index
    %c0_72 = arith.constant 0 : index
    %47 = vector.load %arg40[%c0_70, %c0_71, %c0_72] : memref<2x1x16xf32, #tpu.memory_space<vmem>>, vector<1x1x16xf32>
    %48 = vector.shape_cast %47 : vector<1x1x16xf32> to vector<1x16xf32>
    %c0_73 = arith.constant 0 : index
    %c0_74 = arith.constant 0 : index
    %c0_75 = arith.constant 0 : index
    %49 = vector.load %arg41[%c0_73, %c0_74, %c0_75] : memref<2x32x32xf32, #tpu.memory_space<vmem>>, vector<1x32x32xf32>
    %50 = vector.shape_cast %49 : vector<1x32x32xf32> to vector<32x32xf32>
    %c0_76 = arith.constant 0 : index
    %c0_77 = arith.constant 0 : index
    %c0_78 = arith.constant 0 : index
    %51 = vector.load %arg42[%c0_76, %c0_77, %c0_78] : memref<2x1x32xf32, #tpu.memory_space<vmem>>, vector<1x1x32xf32>
    %52 = vector.shape_cast %51 : vector<1x1x32xf32> to vector<1x32xf32>
    %c0_79 = arith.constant 0 : index
    %c0_80 = arith.constant 0 : index
    %c0_81 = arith.constant 0 : index
    %53 = vector.load %arg43[%c0_79, %c0_80, %c0_81] : memref<2x1x32xf32, #tpu.memory_space<vmem>>, vector<1x1x32xf32>
    %54 = vector.shape_cast %53 : vector<1x1x32xf32> to vector<1x32xf32>
    %c0_82 = arith.constant 0 : index
    %c0_83 = arith.constant 0 : index
    %c0_84 = arith.constant 0 : index
    %55 = vector.load %arg44[%c0_82, %c0_83, %c0_84] : memref<2x1x32xf32, #tpu.memory_space<vmem>>, vector<1x1x32xf32>
    %56 = vector.shape_cast %55 : vector<1x1x32xf32> to vector<1x32xf32>
    %c0_85 = arith.constant 0 : index
    %c0_86 = arith.constant 0 : index
    %c0_87 = arith.constant 0 : index
    %57 = vector.load %arg45[%c0_85, %c0_86, %c0_87] : memref<2x32x64xf32, #tpu.memory_space<vmem>>, vector<1x32x64xf32>
    %58 = vector.shape_cast %57 : vector<1x32x64xf32> to vector<32x64xf32>
    %c0_88 = arith.constant 0 : index
    %c0_89 = arith.constant 0 : index
    %c0_90 = arith.constant 0 : index
    %59 = vector.load %arg46[%c0_88, %c0_89, %c0_90] : memref<2x1x64xf32, #tpu.memory_space<vmem>>, vector<1x1x64xf32>
    %60 = vector.shape_cast %59 : vector<1x1x64xf32> to vector<1x64xf32>
    %c0_91 = arith.constant 0 : index
    %c0_92 = arith.constant 0 : index
    %c0_93 = arith.constant 0 : index
    %61 = vector.load %arg47[%c0_91, %c0_92, %c0_93] : memref<2x64x32xf32, #tpu.memory_space<vmem>>, vector<1x64x32xf32>
    %62 = vector.shape_cast %61 : vector<1x64x32xf32> to vector<64x32xf32>
    %c0_94 = arith.constant 0 : index
    %c0_95 = arith.constant 0 : index
    %c0_96 = arith.constant 0 : index
    %63 = vector.load %arg48[%c0_94, %c0_95, %c0_96] : memref<2x1x32xf32, #tpu.memory_space<vmem>>, vector<1x1x32xf32>
    %64 = vector.shape_cast %63 : vector<1x1x32xf32> to vector<1x32xf32>
    %c0_97 = arith.constant 0 : index
    %c0_98 = arith.constant 0 : index
    %c0_99 = arith.constant 0 : index
    %65 = vector.load %arg49[%c0_97, %c0_98, %c0_99] : memref<2x1x32xf32, #tpu.memory_space<vmem>>, vector<1x1x32xf32>
    %66 = vector.shape_cast %65 : vector<1x1x32xf32> to vector<1x32xf32>
    %c0_100 = arith.constant 0 : index
    %c0_101 = arith.constant 0 : index
    %c0_102 = arith.constant 0 : index
    %67 = vector.load %arg50[%c0_100, %c0_101, %c0_102] : memref<2x1x32xf32, #tpu.memory_space<vmem>>, vector<1x1x32xf32>
    %68 = vector.shape_cast %67 : vector<1x1x32xf32> to vector<1x32xf32>
    %69 = arith.addf %1, %3 : vector<64x32xf32>
    %cst = arith.constant dense<0.000000e+00> : vector<64x32xf32>
    %70 = tpu.matmul %69, %18, %cst {dimension_numbers = #tpu.dot_dimension_numbers<[1], [0], [0], [1], [0, 0, 1, 1], [], []>} : vector<64x32xf32>, vector<32x32xf32>, vector<64x32xf32> -> vector<64x32xf32>
    %71 = vector.broadcast %20 : vector<1x32xf32> to vector<64x32xf32>
    %72 = arith.addf %70, %71 : vector<64x32xf32>
    %cst_103 = arith.constant dense<0.000000e+00> : vector<64x32xf32>
    %73 = tpu.matmul %69, %22, %cst_103 {dimension_numbers = #tpu.dot_dimension_numbers<[1], [0], [0], [1], [0, 0, 1, 1], [], []>} : vector<64x32xf32>, vector<32x32xf32>, vector<64x32xf32> -> vector<64x32xf32>
    %74 = vector.broadcast %24 : vector<1x32xf32> to vector<64x32xf32>
    %75 = arith.addf %73, %74 : vector<64x32xf32>
    %cst_104 = arith.constant dense<0.000000e+00> : vector<64x32xf32>
    %76 = tpu.matmul %1, %26, %cst_104 {dimension_numbers = #tpu.dot_dimension_numbers<[1], [0], [0], [1], [0, 0, 1, 1], [], []>} : vector<64x32xf32>, vector<32x32xf32>, vector<64x32xf32> -> vector<64x32xf32>
    %77 = vector.broadcast %28 : vector<1x32xf32> to vector<64x32xf32>
    %78 = arith.addf %76, %77 : vector<64x32xf32>
    %79 = tpu.concatenate %75, %75, %75, %75 in 0 : vector<64x32xf32>, vector<64x32xf32>, vector<64x32xf32>, vector<64x32xf32> -> vector<256x32xf32>
    %80 = arith.mulf %79, %16 : vector<256x32xf32>
    %81 = tpu.concatenate %78, %78, %78, %78 in 0 : vector<64x32xf32>, vector<64x32xf32>, vector<64x32xf32>, vector<64x32xf32> -> vector<256x32xf32>
    %82 = arith.mulf %81, %16 : vector<256x32xf32>
    %cst_105 = arith.constant dense<0.000000e+00> : vector<256x32xf32>
    %83 = tpu.matmul %82, %30, %cst_105 {dimension_numbers = #tpu.dot_dimension_numbers<[1], [0], [0], [1], [0, 0, 1, 1], [], []>} : vector<256x32xf32>, vector<32x32xf32>, vector<256x32xf32> -> vector<256x32xf32>
    %cst_106 = arith.constant dense<0.000000e+00> : vector<64x256xf32>
    %84 = tpu.matmul %72, %80, %cst_106 {dimension_numbers = #tpu.dot_dimension_numbers<[1], [1], [0], [0], [0, 0, 1, 0], [], []>} : vector<64x32xf32>, vector<256x32xf32>, vector<64x256xf32> -> vector<64x256xf32>
    %cst_107 = arith.constant dense<0xFF800000> : vector<64xf32>
    %85 = vector.multi_reduction <maximumf>, %84, %cst_107 [1] : vector<64x256xf32> to vector<64xf32>
    %86 = vector.shape_cast %85 : vector<64xf32> to vector<64x1xf32>
    %87 = vector.broadcast %86 : vector<64x1xf32> to vector<64x256xf32>
    %88 = arith.subf %84, %87 : vector<64x256xf32>
    %89 = math.exp %88 : vector<64x256xf32>
    %c0_108 = arith.constant 0 : index
    %c0_109 = arith.constant 0 : index
    %90 = vector.load %arg10[%c0_108, %c0_109] : memref<256x8xf32, #tpu.memory_space<vmem>>, vector<256x8xf32>
    %cst_110 = arith.constant dense<0.000000e+00> : vector<64x8xf32>
    %91 = tpu.matmul %89, %90, %cst_110 {dimension_numbers = #tpu.dot_dimension_numbers<[1], [0], [0], [1], [0, 0, 1, 1], [], []>} : vector<64x256xf32>, vector<256x8xf32>, vector<64x8xf32> -> vector<64x8xf32>
    %92 = tpu.reciprocal %91 {approx = true} : vector<64x8xf32> -> vector<64x8xf32>
    %c0_111 = arith.constant 0 : index
    %c0_112 = arith.constant 0 : index
    %93 = vector.load %arg11[%c0_111, %c0_112] : memref<8x256xf32, #tpu.memory_space<vmem>>, vector<8x256xf32>
    %cst_113 = arith.constant dense<0.000000e+00> : vector<64x256xf32>
    %94 = tpu.matmul %92, %93, %cst_113 {dimension_numbers = #tpu.dot_dimension_numbers<[1], [0], [0], [1], [0, 0, 1, 1], [], []>} : vector<64x8xf32>, vector<8x256xf32>, vector<64x256xf32> -> vector<64x256xf32>
    %95 = arith.mulf %89, %94 : vector<64x256xf32>
    %cst_114 = arith.constant dense<0.000000e+00> : vector<64x32xf32>
    %96 = tpu.matmul %95, %83, %cst_114 {dimension_numbers = #tpu.dot_dimension_numbers<[1], [0], [0], [1], [0, 0, 1, 1], [], []>} : vector<64x256xf32>, vector<256x32xf32>, vector<64x32xf32> -> vector<64x32xf32>
    %97 = vector.broadcast %32 : vector<1x32xf32> to vector<64x32xf32>
    %98 = arith.addf %96, %97 : vector<64x32xf32>
    %99 = arith.addf %1, %98 : vector<64x32xf32>
    %cst_115 = arith.constant dense<0.000000e+00> : vector<64xf32>
    %100 = vector.multi_reduction <add>, %99, %cst_115 [1] : vector<64x32xf32> to vector<64xf32>
    %101 = vector.shape_cast %100 : vector<64xf32> to vector<64x1xf32>
    %cst_116 = arith.constant 3.200000e+01 : f32
    %102 = vector.broadcast %cst_116 : f32 to vector<64x1xf32>
    %103 = arith.divf %101, %102 : vector<64x1xf32>
    %104 = vector.broadcast %103 : vector<64x1xf32> to vector<64x32xf32>
    %105 = arith.subf %99, %104 : vector<64x32xf32>
    %106 = arith.mulf %105, %105 : vector<64x32xf32>
    %cst_117 = arith.constant dense<0.000000e+00> : vector<64xf32>
    %107 = vector.multi_reduction <add>, %106, %cst_117 [1] : vector<64x32xf32> to vector<64xf32>
    %108 = vector.shape_cast %107 : vector<64xf32> to vector<64x1xf32>
    %cst_118 = arith.constant 3.200000e+01 : f32
    %109 = vector.broadcast %cst_118 : f32 to vector<64x1xf32>
    %110 = arith.divf %108, %109 : vector<64x1xf32>
    %cst_119 = arith.constant 9.99999974E-6 : f32
    %111 = vector.broadcast %cst_119 : f32 to vector<64x1xf32>
    %112 = arith.addf %110, %111 : vector<64x1xf32>
    %113 = math.rsqrt %112 : vector<64x1xf32>
    %114 = vector.broadcast %113 : vector<64x1xf32> to vector<64x32xf32>
    %115 = arith.mulf %105, %114 : vector<64x32xf32>
    %116 = vector.broadcast %34 : vector<1x32xf32> to vector<64x32xf32>
    %117 = arith.mulf %115, %116 : vector<64x32xf32>
    %118 = vector.broadcast %36 : vector<1x32xf32> to vector<64x32xf32>
    %119 = arith.addf %117, %118 : vector<64x32xf32>
    %120 = arith.addf %119, %3 : vector<64x32xf32>
    %cst_120 = arith.constant dense<0.000000e+00> : vector<80x32xf32>
    %121 = tpu.matmul %5, %38, %cst_120 {dimension_numbers = #tpu.dot_dimension_numbers<[1], [0], [0], [1], [0, 0, 1, 1], [], []>} : vector<80x32xf32>, vector<32x32xf32>, vector<80x32xf32> -> vector<80x32xf32>
    %122 = vector.broadcast %40 : vector<1x32xf32> to vector<80x32xf32>
    %123 = arith.addf %121, %122 : vector<80x32xf32>
    %124 = arith.mulf %123, %7 : vector<80x32xf32>
    %cst_121 = arith.constant dense<0.000000e+00> : vector<64x32xf32>
    %125 = tpu.matmul %120, %42, %cst_121 {dimension_numbers = #tpu.dot_dimension_numbers<[1], [0], [0], [1], [0, 0, 1, 1], [], []>} : vector<64x32xf32>, vector<32x32xf32>, vector<64x32xf32> -> vector<64x32xf32>
    %126 = vector.broadcast %44 : vector<1x32xf32> to vector<64x32xf32>
    %127 = arith.addf %125, %126 : vector<64x32xf32>
    %cst_122 = arith.constant dense<0.000000e+00> : vector<64x16xf32>
    %128 = tpu.matmul %120, %46, %cst_122 {dimension_numbers = #tpu.dot_dimension_numbers<[1], [0], [0], [1], [0, 0, 1, 1], [], []>} : vector<64x32xf32>, vector<32x16xf32>, vector<64x16xf32> -> vector<64x16xf32>
    %129 = vector.broadcast %48 : vector<1x16xf32> to vector<64x16xf32>
    %130 = arith.addf %128, %129 : vector<64x16xf32>
    %cst_123 = arith.constant dense<0xFF800000> : vector<64xf32>
    %131 = vector.multi_reduction <maximumf>, %130, %cst_123 [1] : vector<64x16xf32> to vector<64xf32>
    %132 = vector.shape_cast %131 : vector<64xf32> to vector<64x1xf32>
    %133 = vector.broadcast %132 : vector<64x1xf32> to vector<64x16xf32>
    %134 = arith.subf %130, %133 : vector<64x16xf32>
    %135 = math.exp %134 : vector<64x16xf32>
    %c0_124 = arith.constant 0 : index
    %c0_125 = arith.constant 0 : index
    %136 = vector.load %arg12[%c0_124, %c0_125] : memref<16x16xf32, #tpu.memory_space<vmem>>, vector<16x16xf32>
    %cst_126 = arith.constant dense<0.000000e+00> : vector<64x16xf32>
    %137 = tpu.matmul %135, %136, %cst_126 {dimension_numbers = #tpu.dot_dimension_numbers<[1], [0], [0], [1], [0, 0, 1, 1], [], []>} : vector<64x16xf32>, vector<16x16xf32>, vector<64x16xf32> -> vector<64x16xf32>
    %138 = tpu.reciprocal %137 {approx = true} : vector<64x16xf32> -> vector<64x16xf32>
    %139 = arith.mulf %135, %138 : vector<64x16xf32>
    %cst_127 = arith.constant 0.000000e+00 : f32
    %140 = vector.broadcast %cst_127 : f32 to vector<64x32xf32>
    %c0_128 = arith.constant 0 : index
    %c0_129 = arith.constant 0 : index
    %141 = vector.load %arg13[%c0_128, %c0_129] : memref<32x64xf32, #tpu.memory_space<vmem>>, vector<32x64xf32>
    %cst_130 = arith.constant dense<0.000000e+00> : vector<64x64xf32>
    %142 = tpu.matmul %127, %141, %cst_130 {dimension_numbers = #tpu.dot_dimension_numbers<[1], [0], [0], [1], [0, 0, 1, 1], [], []>} : vector<64x32xf32>, vector<32x64xf32>, vector<64x64xf32> -> vector<64x64xf32>
    %143 = arith.addf %142, %9 : vector<64x64xf32>
    %c0_131 = arith.constant 0 : index
    %c0_132 = arith.constant 0 : index
    %144 = vector.load %arg14[%c0_131, %c0_132] : memref<32x64xf32, #tpu.memory_space<vmem>>, vector<32x64xf32>
    %cst_133 = arith.constant dense<0.000000e+00> : vector<64x64xf32>
    %145 = tpu.matmul %127, %144, %cst_133 {dimension_numbers = #tpu.dot_dimension_numbers<[1], [0], [0], [1], [0, 0, 1, 1], [], []>} : vector<64x32xf32>, vector<32x64xf32>, vector<64x64xf32> -> vector<64x64xf32>
    %146 = arith.addf %145, %13 : vector<64x64xf32>
    %147 = math.absf %143 : vector<64x64xf32>
    %cst_134 = arith.constant 1.000000e+00 : f32
    %148 = vector.broadcast %cst_134 : f32 to vector<64x64xf32>
    %149 = arith.subf %148, %147 : vector<64x64xf32>
    %cst_135 = arith.constant 0.000000e+00 : f32
    %150 = vector.broadcast %cst_135 : f32 to vector<64x64xf32>
    %151 = arith.maximumf %150, %149 : vector<64x64xf32>
    %152 = math.absf %146 : vector<64x64xf32>
    %cst_136 = arith.constant 1.000000e+00 : f32
    %153 = vector.broadcast %cst_136 : f32 to vector<64x64xf32>
    %154 = arith.subf %153, %152 : vector<64x64xf32>
    %cst_137 = arith.constant 0.000000e+00 : f32
    %155 = vector.broadcast %cst_137 : f32 to vector<64x64xf32>
    %156 = arith.maximumf %155, %154 : vector<64x64xf32>
    %c0_138 = arith.constant 0 : index
    %c0_139 = arith.constant 0 : index
    %157 = vector.load %arg15[%c0_138, %c0_139] : memref<16x64xf32, #tpu.memory_space<vmem>>, vector<16x64xf32>
    %cst_140 = arith.constant dense<0.000000e+00> : vector<64x64xf32>
    %158 = tpu.matmul %139, %157, %cst_140 {dimension_numbers = #tpu.dot_dimension_numbers<[1], [0], [0], [1], [0, 0, 1, 1], [], []>} : vector<64x16xf32>, vector<16x64xf32>, vector<64x64xf32> -> vector<64x64xf32>
    %159 = arith.mulf %156, %158 : vector<64x64xf32>
    %c0_141 = arith.constant 0 : index
    %c0_142 = arith.constant 0 : index
    %160 = vector.load %arg19[%c0_141, %c0_142] : memref<64x512xf32, #tpu.memory_space<vmem>>, vector<64x512xf32>
    %cst_143 = arith.constant dense<0.000000e+00> : vector<64x512xf32>
    %161 = tpu.matmul %151, %160, %cst_143 {dimension_numbers = #tpu.dot_dimension_numbers<[1], [0], [0], [1], [0, 0, 1, 1], [], []>} : vector<64x64xf32>, vector<64x512xf32>, vector<64x512xf32> -> vector<64x512xf32>
    %c0_144 = arith.constant 0 : index
    %c0_145 = arith.constant 0 : index
    %162 = vector.load %arg20[%c0_144, %c0_145] : memref<64x512xf32, #tpu.memory_space<vmem>>, vector<64x512xf32>
    %cst_146 = arith.constant dense<0.000000e+00> : vector<64x512xf32>
    %163 = tpu.matmul %159, %162, %cst_146 {dimension_numbers = #tpu.dot_dimension_numbers<[1], [0], [0], [1], [0, 0, 1, 1], [], []>} : vector<64x64xf32>, vector<64x512xf32>, vector<64x512xf32> -> vector<64x512xf32>
    %164 = arith.mulf %161, %163 : vector<64x512xf32>
    %165 = vector.extract_strided_slice %124 {offsets = [0, 0], sizes = [64, 32], strides = [1, 1]} : vector<80x32xf32> to vector<64x32xf32>
    %166 = tpu.concatenate %165, %165, %165, %165, %165, %165, %165, %165 in 0 : vector<64x32xf32>, vector<64x32xf32>, vector<64x32xf32>, vector<64x32xf32>, vector<64x32xf32>, vector<64x32xf32>, vector<64x32xf32>, vector<64x32xf32> -> vector<512x32xf32>
    %c0_147 = arith.constant 0 : index
    %c0_148 = arith.constant 0 : index
    %167 = vector.load %arg23[%c0_147, %c0_148] : memref<512x32xf32, #tpu.memory_space<vmem>>, vector<512x32xf32>
    %168 = arith.mulf %166, %167 : vector<512x32xf32>
    %cst_149 = arith.constant dense<0.000000e+00> : vector<64x32xf32>
    %169 = tpu.matmul %164, %168, %cst_149 {dimension_numbers = #tpu.dot_dimension_numbers<[1], [0], [0], [1], [0, 0, 1, 1], [], []>} : vector<64x512xf32>, vector<512x32xf32>, vector<64x32xf32> -> vector<64x32xf32>
    %170 = arith.addf %140, %169 : vector<64x32xf32>
    %c0_150 = arith.constant 0 : index
    %c0_151 = arith.constant 0 : index
    %171 = vector.load %arg16[%c0_150, %c0_151] : memref<32x32xf32, #tpu.memory_space<vmem>>, vector<32x32xf32>
    %cst_152 = arith.constant dense<0.000000e+00> : vector<64x32xf32>
    %172 = tpu.matmul %127, %171, %cst_152 {dimension_numbers = #tpu.dot_dimension_numbers<[1], [0], [0], [1], [0, 0, 1, 1], [], []>} : vector<64x32xf32>, vector<32x32xf32>, vector<64x32xf32> -> vector<64x32xf32>
    %173 = arith.addf %172, %11 : vector<64x32xf32>
    %c0_153 = arith.constant 0 : index
    %c0_154 = arith.constant 0 : index
    %174 = vector.load %arg17[%c0_153, %c0_154] : memref<32x32xf32, #tpu.memory_space<vmem>>, vector<32x32xf32>
    %cst_155 = arith.constant dense<0.000000e+00> : vector<64x32xf32>
    %175 = tpu.matmul %127, %174, %cst_155 {dimension_numbers = #tpu.dot_dimension_numbers<[1], [0], [0], [1], [0, 0, 1, 1], [], []>} : vector<64x32xf32>, vector<32x32xf32>, vector<64x32xf32> -> vector<64x32xf32>
    %176 = arith.addf %175, %15 : vector<64x32xf32>
    %177 = math.absf %173 : vector<64x32xf32>
    %cst_156 = arith.constant 1.000000e+00 : f32
    %178 = vector.broadcast %cst_156 : f32 to vector<64x32xf32>
    %179 = arith.subf %178, %177 : vector<64x32xf32>
    %cst_157 = arith.constant 0.000000e+00 : f32
    %180 = vector.broadcast %cst_157 : f32 to vector<64x32xf32>
    %181 = arith.maximumf %180, %179 : vector<64x32xf32>
    %182 = math.absf %176 : vector<64x32xf32>
    %cst_158 = arith.constant 1.000000e+00 : f32
    %183 = vector.broadcast %cst_158 : f32 to vector<64x32xf32>
    %184 = arith.subf %183, %182 : vector<64x32xf32>
    %cst_159 = arith.constant 0.000000e+00 : f32
    %185 = vector.broadcast %cst_159 : f32 to vector<64x32xf32>
    %186 = arith.maximumf %185, %184 : vector<64x32xf32>
    %c0_160 = arith.constant 0 : index
    %c0_161 = arith.constant 0 : index
    %187 = vector.load %arg18[%c0_160, %c0_161] : memref<16x32xf32, #tpu.memory_space<vmem>>, vector<16x32xf32>
    %cst_162 = arith.constant dense<0.000000e+00> : vector<64x32xf32>
    %188 = tpu.matmul %139, %187, %cst_162 {dimension_numbers = #tpu.dot_dimension_numbers<[1], [0], [0], [1], [0, 0, 1, 1], [], []>} : vector<64x16xf32>, vector<16x32xf32>, vector<64x32xf32> -> vector<64x32xf32>
    %189 = arith.mulf %186, %188 : vector<64x32xf32>
    %c0_163 = arith.constant 0 : index
    %c0_164 = arith.constant 0 : index
    %190 = vector.load %arg21[%c0_163, %c0_164] : memref<32x128xf32, #tpu.memory_space<vmem>>, vector<32x128xf32>
    %cst_165 = arith.constant dense<0.000000e+00> : vector<64x128xf32>
    %191 = tpu.matmul %181, %190, %cst_165 {dimension_numbers = #tpu.dot_dimension_numbers<[1], [0], [0], [1], [0, 0, 1, 1], [], []>} : vector<64x32xf32>, vector<32x128xf32>, vector<64x128xf32> -> vector<64x128xf32>
    %c0_166 = arith.constant 0 : index
    %c0_167 = arith.constant 0 : index
    %192 = vector.load %arg22[%c0_166, %c0_167] : memref<32x128xf32, #tpu.memory_space<vmem>>, vector<32x128xf32>
    %cst_168 = arith.constant dense<0.000000e+00> : vector<64x128xf32>
    %193 = tpu.matmul %189, %192, %cst_168 {dimension_numbers = #tpu.dot_dimension_numbers<[1], [0], [0], [1], [0, 0, 1, 1], [], []>} : vector<64x32xf32>, vector<32x128xf32>, vector<64x128xf32> -> vector<64x128xf32>
    %194 = arith.mulf %191, %193 : vector<64x128xf32>
    %195 = vector.extract_strided_slice %124 {offsets = [64, 0], sizes = [16, 32], strides = [1, 1]} : vector<80x32xf32> to vector<16x32xf32>
    %196 = tpu.concatenate %195, %195, %195, %195, %195, %195, %195, %195 in 0 : vector<16x32xf32>, vector<16x32xf32>, vector<16x32xf32>, vector<16x32xf32>, vector<16x32xf32>, vector<16x32xf32>, vector<16x32xf32>, vector<16x32xf32> -> vector<128x32xf32>
    %c0_169 = arith.constant 0 : index
    %c0_170 = arith.constant 0 : index
    %197 = vector.load %arg24[%c0_169, %c0_170] : memref<128x32xf32, #tpu.memory_space<vmem>>, vector<128x32xf32>
    %198 = arith.mulf %196, %197 : vector<128x32xf32>
    %cst_171 = arith.constant dense<0.000000e+00> : vector<64x32xf32>
    %199 = tpu.matmul %194, %198, %cst_171 {dimension_numbers = #tpu.dot_dimension_numbers<[1], [0], [0], [1], [0, 0, 1, 1], [], []>} : vector<64x128xf32>, vector<128x32xf32>, vector<64x32xf32> -> vector<64x32xf32>
    %200 = arith.addf %170, %199 : vector<64x32xf32>
    %cst_172 = arith.constant dense<0.000000e+00> : vector<64x32xf32>
    %201 = tpu.matmul %200, %50, %cst_172 {dimension_numbers = #tpu.dot_dimension_numbers<[1], [0], [0], [1], [0, 0, 1, 1], [], []>} : vector<64x32xf32>, vector<32x32xf32>, vector<64x32xf32> -> vector<64x32xf32>
    %202 = vector.broadcast %52 : vector<1x32xf32> to vector<64x32xf32>
    %203 = arith.addf %201, %202 : vector<64x32xf32>
    %204 = arith.addf %119, %203 : vector<64x32xf32>
    %cst_173 = arith.constant dense<0.000000e+00> : vector<64xf32>
    %205 = vector.multi_reduction <add>, %204, %cst_173 [1] : vector<64x32xf32> to vector<64xf32>
    %206 = vector.shape_cast %205 : vector<64xf32> to vector<64x1xf32>
    %cst_174 = arith.constant 3.200000e+01 : f32
    %207 = vector.broadcast %cst_174 : f32 to vector<64x1xf32>
    %208 = arith.divf %206, %207 : vector<64x1xf32>
    %209 = vector.broadcast %208 : vector<64x1xf32> to vector<64x32xf32>
    %210 = arith.subf %204, %209 : vector<64x32xf32>
    %211 = arith.mulf %210, %210 : vector<64x32xf32>
    %cst_175 = arith.constant dense<0.000000e+00> : vector<64xf32>
    %212 = vector.multi_reduction <add>, %211, %cst_175 [1] : vector<64x32xf32> to vector<64xf32>
    %213 = vector.shape_cast %212 : vector<64xf32> to vector<64x1xf32>
    %cst_176 = arith.constant 3.200000e+01 : f32
    %214 = vector.broadcast %cst_176 : f32 to vector<64x1xf32>
    %215 = arith.divf %213, %214 : vector<64x1xf32>
    %cst_177 = arith.constant 9.99999974E-6 : f32
    %216 = vector.broadcast %cst_177 : f32 to vector<64x1xf32>
    %217 = arith.addf %215, %216 : vector<64x1xf32>
    %218 = math.rsqrt %217 : vector<64x1xf32>
    %219 = vector.broadcast %218 : vector<64x1xf32> to vector<64x32xf32>
    %220 = arith.mulf %210, %219 : vector<64x32xf32>
    %221 = vector.broadcast %54 : vector<1x32xf32> to vector<64x32xf32>
    %222 = arith.mulf %220, %221 : vector<64x32xf32>
    %223 = vector.broadcast %56 : vector<1x32xf32> to vector<64x32xf32>
    %224 = arith.addf %222, %223 : vector<64x32xf32>
    %cst_178 = arith.constant dense<0.000000e+00> : vector<64x64xf32>
    %225 = tpu.matmul %224, %58, %cst_178 {dimension_numbers = #tpu.dot_dimension_numbers<[1], [0], [0], [1], [0, 0, 1, 1], [], []>} : vector<64x32xf32>, vector<32x64xf32>, vector<64x64xf32> -> vector<64x64xf32>
    %226 = vector.broadcast %60 : vector<1x64xf32> to vector<64x64xf32>
    %227 = arith.addf %225, %226 : vector<64x64xf32>
    %cst_179 = arith.constant 0.000000e+00 : f32
    %228 = vector.broadcast %cst_179 : f32 to vector<64x64xf32>
    %229 = arith.maximumf %227, %228 : vector<64x64xf32>
    %cst_180 = arith.constant dense<0.000000e+00> : vector<64x32xf32>
    %230 = tpu.matmul %229, %62, %cst_180 {dimension_numbers = #tpu.dot_dimension_numbers<[1], [0], [0], [1], [0, 0, 1, 1], [], []>} : vector<64x64xf32>, vector<64x32xf32>, vector<64x32xf32> -> vector<64x32xf32>
    %231 = vector.broadcast %64 : vector<1x32xf32> to vector<64x32xf32>
    %232 = arith.addf %230, %231 : vector<64x32xf32>
    %233 = arith.addf %224, %232 : vector<64x32xf32>
    %cst_181 = arith.constant dense<0.000000e+00> : vector<64xf32>
    %234 = vector.multi_reduction <add>, %233, %cst_181 [1] : vector<64x32xf32> to vector<64xf32>
    %235 = vector.shape_cast %234 : vector<64xf32> to vector<64x1xf32>
    %cst_182 = arith.constant 3.200000e+01 : f32
    %236 = vector.broadcast %cst_182 : f32 to vector<64x1xf32>
    %237 = arith.divf %235, %236 : vector<64x1xf32>
    %238 = vector.broadcast %237 : vector<64x1xf32> to vector<64x32xf32>
    %239 = arith.subf %233, %238 : vector<64x32xf32>
    %240 = arith.mulf %239, %239 : vector<64x32xf32>
    %cst_183 = arith.constant dense<0.000000e+00> : vector<64xf32>
    %241 = vector.multi_reduction <add>, %240, %cst_183 [1] : vector<64x32xf32> to vector<64xf32>
    %242 = vector.shape_cast %241 : vector<64xf32> to vector<64x1xf32>
    %cst_184 = arith.constant 3.200000e+01 : f32
    %243 = vector.broadcast %cst_184 : f32 to vector<64x1xf32>
    %244 = arith.divf %242, %243 : vector<64x1xf32>
    %cst_185 = arith.constant 9.99999974E-6 : f32
    %245 = vector.broadcast %cst_185 : f32 to vector<64x1xf32>
    %246 = arith.addf %244, %245 : vector<64x1xf32>
    %247 = math.rsqrt %246 : vector<64x1xf32>
    %248 = vector.broadcast %247 : vector<64x1xf32> to vector<64x32xf32>
    %249 = arith.mulf %239, %248 : vector<64x32xf32>
    %250 = vector.broadcast %66 : vector<1x32xf32> to vector<64x32xf32>
    %251 = arith.mulf %249, %250 : vector<64x32xf32>
    %252 = vector.broadcast %68 : vector<1x32xf32> to vector<64x32xf32>
    %253 = arith.addf %251, %252 : vector<64x32xf32>
    %c1 = arith.constant 1 : index
    %c0_186 = arith.constant 0 : index
    %c0_187 = arith.constant 0 : index
    %254 = vector.load %arg25[%c1, %c0_186, %c0_187] : memref<2x32x32xf32, #tpu.memory_space<vmem>>, vector<1x32x32xf32>
    %255 = vector.shape_cast %254 : vector<1x32x32xf32> to vector<32x32xf32>
    %c1_188 = arith.constant 1 : index
    %c0_189 = arith.constant 0 : index
    %c0_190 = arith.constant 0 : index
    %256 = vector.load %arg26[%c1_188, %c0_189, %c0_190] : memref<2x1x32xf32, #tpu.memory_space<vmem>>, vector<1x1x32xf32>
    %257 = vector.shape_cast %256 : vector<1x1x32xf32> to vector<1x32xf32>
    %c1_191 = arith.constant 1 : index
    %c0_192 = arith.constant 0 : index
    %c0_193 = arith.constant 0 : index
    %258 = vector.load %arg27[%c1_191, %c0_192, %c0_193] : memref<2x32x32xf32, #tpu.memory_space<vmem>>, vector<1x32x32xf32>
    %259 = vector.shape_cast %258 : vector<1x32x32xf32> to vector<32x32xf32>
    %c1_194 = arith.constant 1 : index
    %c0_195 = arith.constant 0 : index
    %c0_196 = arith.constant 0 : index
    %260 = vector.load %arg28[%c1_194, %c0_195, %c0_196] : memref<2x1x32xf32, #tpu.memory_space<vmem>>, vector<1x1x32xf32>
    %261 = vector.shape_cast %260 : vector<1x1x32xf32> to vector<1x32xf32>
    %c1_197 = arith.constant 1 : index
    %c0_198 = arith.constant 0 : index
    %c0_199 = arith.constant 0 : index
    %262 = vector.load %arg29[%c1_197, %c0_198, %c0_199] : memref<2x32x32xf32, #tpu.memory_space<vmem>>, vector<1x32x32xf32>
    %263 = vector.shape_cast %262 : vector<1x32x32xf32> to vector<32x32xf32>
    %c1_200 = arith.constant 1 : index
    %c0_201 = arith.constant 0 : index
    %c0_202 = arith.constant 0 : index
    %264 = vector.load %arg30[%c1_200, %c0_201, %c0_202] : memref<2x1x32xf32, #tpu.memory_space<vmem>>, vector<1x1x32xf32>
    %265 = vector.shape_cast %264 : vector<1x1x32xf32> to vector<1x32xf32>
    %c1_203 = arith.constant 1 : index
    %c0_204 = arith.constant 0 : index
    %c0_205 = arith.constant 0 : index
    %266 = vector.load %arg31[%c1_203, %c0_204, %c0_205] : memref<2x32x32xf32, #tpu.memory_space<vmem>>, vector<1x32x32xf32>
    %267 = vector.shape_cast %266 : vector<1x32x32xf32> to vector<32x32xf32>
    %c1_206 = arith.constant 1 : index
    %c0_207 = arith.constant 0 : index
    %c0_208 = arith.constant 0 : index
    %268 = vector.load %arg32[%c1_206, %c0_207, %c0_208] : memref<2x1x32xf32, #tpu.memory_space<vmem>>, vector<1x1x32xf32>
    %269 = vector.shape_cast %268 : vector<1x1x32xf32> to vector<1x32xf32>
    %c1_209 = arith.constant 1 : index
    %c0_210 = arith.constant 0 : index
    %c0_211 = arith.constant 0 : index
    %270 = vector.load %arg33[%c1_209, %c0_210, %c0_211] : memref<2x1x32xf32, #tpu.memory_space<vmem>>, vector<1x1x32xf32>
    %271 = vector.shape_cast %270 : vector<1x1x32xf32> to vector<1x32xf32>
    %c1_212 = arith.constant 1 : index
    %c0_213 = arith.constant 0 : index
    %c0_214 = arith.constant 0 : index
    %272 = vector.load %arg34[%c1_212, %c0_213, %c0_214] : memref<2x1x32xf32, #tpu.memory_space<vmem>>, vector<1x1x32xf32>
    %273 = vector.shape_cast %272 : vector<1x1x32xf32> to vector<1x32xf32>
    %c1_215 = arith.constant 1 : index
    %c0_216 = arith.constant 0 : index
    %c0_217 = arith.constant 0 : index
    %274 = vector.load %arg35[%c1_215, %c0_216, %c0_217] : memref<2x32x32xf32, #tpu.memory_space<vmem>>, vector<1x32x32xf32>
    %275 = vector.shape_cast %274 : vector<1x32x32xf32> to vector<32x32xf32>
    %c1_218 = arith.constant 1 : index
    %c0_219 = arith.constant 0 : index
    %c0_220 = arith.constant 0 : index
    %276 = vector.load %arg36[%c1_218, %c0_219, %c0_220] : memref<2x1x32xf32, #tpu.memory_space<vmem>>, vector<1x1x32xf32>
    %277 = vector.shape_cast %276 : vector<1x1x32xf32> to vector<1x32xf32>
    %c1_221 = arith.constant 1 : index
    %c0_222 = arith.constant 0 : index
    %c0_223 = arith.constant 0 : index
    %278 = vector.load %arg37[%c1_221, %c0_222, %c0_223] : memref<2x32x32xf32, #tpu.memory_space<vmem>>, vector<1x32x32xf32>
    %279 = vector.shape_cast %278 : vector<1x32x32xf32> to vector<32x32xf32>
    %c1_224 = arith.constant 1 : index
    %c0_225 = arith.constant 0 : index
    %c0_226 = arith.constant 0 : index
    %280 = vector.load %arg38[%c1_224, %c0_225, %c0_226] : memref<2x1x32xf32, #tpu.memory_space<vmem>>, vector<1x1x32xf32>
    %281 = vector.shape_cast %280 : vector<1x1x32xf32> to vector<1x32xf32>
    %c1_227 = arith.constant 1 : index
    %c0_228 = arith.constant 0 : index
    %c0_229 = arith.constant 0 : index
    %282 = vector.load %arg39[%c1_227, %c0_228, %c0_229] : memref<2x32x16xf32, #tpu.memory_space<vmem>>, vector<1x32x16xf32>
    %283 = vector.shape_cast %282 : vector<1x32x16xf32> to vector<32x16xf32>
    %c1_230 = arith.constant 1 : index
    %c0_231 = arith.constant 0 : index
    %c0_232 = arith.constant 0 : index
    %284 = vector.load %arg40[%c1_230, %c0_231, %c0_232] : memref<2x1x16xf32, #tpu.memory_space<vmem>>, vector<1x1x16xf32>
    %285 = vector.shape_cast %284 : vector<1x1x16xf32> to vector<1x16xf32>
    %c1_233 = arith.constant 1 : index
    %c0_234 = arith.constant 0 : index
    %c0_235 = arith.constant 0 : index
    %286 = vector.load %arg41[%c1_233, %c0_234, %c0_235] : memref<2x32x32xf32, #tpu.memory_space<vmem>>, vector<1x32x32xf32>
    %287 = vector.shape_cast %286 : vector<1x32x32xf32> to vector<32x32xf32>
    %c1_236 = arith.constant 1 : index
    %c0_237 = arith.constant 0 : index
    %c0_238 = arith.constant 0 : index
    %288 = vector.load %arg42[%c1_236, %c0_237, %c0_238] : memref<2x1x32xf32, #tpu.memory_space<vmem>>, vector<1x1x32xf32>
    %289 = vector.shape_cast %288 : vector<1x1x32xf32> to vector<1x32xf32>
    %c1_239 = arith.constant 1 : index
    %c0_240 = arith.constant 0 : index
    %c0_241 = arith.constant 0 : index
    %290 = vector.load %arg43[%c1_239, %c0_240, %c0_241] : memref<2x1x32xf32, #tpu.memory_space<vmem>>, vector<1x1x32xf32>
    %291 = vector.shape_cast %290 : vector<1x1x32xf32> to vector<1x32xf32>
    %c1_242 = arith.constant 1 : index
    %c0_243 = arith.constant 0 : index
    %c0_244 = arith.constant 0 : index
    %292 = vector.load %arg44[%c1_242, %c0_243, %c0_244] : memref<2x1x32xf32, #tpu.memory_space<vmem>>, vector<1x1x32xf32>
    %293 = vector.shape_cast %292 : vector<1x1x32xf32> to vector<1x32xf32>
    %c1_245 = arith.constant 1 : index
    %c0_246 = arith.constant 0 : index
    %c0_247 = arith.constant 0 : index
    %294 = vector.load %arg45[%c1_245, %c0_246, %c0_247] : memref<2x32x64xf32, #tpu.memory_space<vmem>>, vector<1x32x64xf32>
    %295 = vector.shape_cast %294 : vector<1x32x64xf32> to vector<32x64xf32>
    %c1_248 = arith.constant 1 : index
    %c0_249 = arith.constant 0 : index
    %c0_250 = arith.constant 0 : index
    %296 = vector.load %arg46[%c1_248, %c0_249, %c0_250] : memref<2x1x64xf32, #tpu.memory_space<vmem>>, vector<1x1x64xf32>
    %297 = vector.shape_cast %296 : vector<1x1x64xf32> to vector<1x64xf32>
    %c1_251 = arith.constant 1 : index
    %c0_252 = arith.constant 0 : index
    %c0_253 = arith.constant 0 : index
    %298 = vector.load %arg47[%c1_251, %c0_252, %c0_253] : memref<2x64x32xf32, #tpu.memory_space<vmem>>, vector<1x64x32xf32>
    %299 = vector.shape_cast %298 : vector<1x64x32xf32> to vector<64x32xf32>
    %c1_254 = arith.constant 1 : index
    %c0_255 = arith.constant 0 : index
    %c0_256 = arith.constant 0 : index
    %300 = vector.load %arg48[%c1_254, %c0_255, %c0_256] : memref<2x1x32xf32, #tpu.memory_space<vmem>>, vector<1x1x32xf32>
    %301 = vector.shape_cast %300 : vector<1x1x32xf32> to vector<1x32xf32>
    %c1_257 = arith.constant 1 : index
    %c0_258 = arith.constant 0 : index
    %c0_259 = arith.constant 0 : index
    %302 = vector.load %arg49[%c1_257, %c0_258, %c0_259] : memref<2x1x32xf32, #tpu.memory_space<vmem>>, vector<1x1x32xf32>
    %303 = vector.shape_cast %302 : vector<1x1x32xf32> to vector<1x32xf32>
    %c1_260 = arith.constant 1 : index
    %c0_261 = arith.constant 0 : index
    %c0_262 = arith.constant 0 : index
    %304 = vector.load %arg50[%c1_260, %c0_261, %c0_262] : memref<2x1x32xf32, #tpu.memory_space<vmem>>, vector<1x1x32xf32>
    %305 = vector.shape_cast %304 : vector<1x1x32xf32> to vector<1x32xf32>
    %306 = arith.addf %253, %3 : vector<64x32xf32>
    %cst_263 = arith.constant dense<0.000000e+00> : vector<64x32xf32>
    %307 = tpu.matmul %306, %255, %cst_263 {dimension_numbers = #tpu.dot_dimension_numbers<[1], [0], [0], [1], [0, 0, 1, 1], [], []>} : vector<64x32xf32>, vector<32x32xf32>, vector<64x32xf32> -> vector<64x32xf32>
    %308 = vector.broadcast %257 : vector<1x32xf32> to vector<64x32xf32>
    %309 = arith.addf %307, %308 : vector<64x32xf32>
    %cst_264 = arith.constant dense<0.000000e+00> : vector<64x32xf32>
    %310 = tpu.matmul %306, %259, %cst_264 {dimension_numbers = #tpu.dot_dimension_numbers<[1], [0], [0], [1], [0, 0, 1, 1], [], []>} : vector<64x32xf32>, vector<32x32xf32>, vector<64x32xf32> -> vector<64x32xf32>
    %311 = vector.broadcast %261 : vector<1x32xf32> to vector<64x32xf32>
    %312 = arith.addf %310, %311 : vector<64x32xf32>
    %cst_265 = arith.constant dense<0.000000e+00> : vector<64x32xf32>
    %313 = tpu.matmul %253, %263, %cst_265 {dimension_numbers = #tpu.dot_dimension_numbers<[1], [0], [0], [1], [0, 0, 1, 1], [], []>} : vector<64x32xf32>, vector<32x32xf32>, vector<64x32xf32> -> vector<64x32xf32>
    %314 = vector.broadcast %265 : vector<1x32xf32> to vector<64x32xf32>
    %315 = arith.addf %313, %314 : vector<64x32xf32>
    %316 = tpu.concatenate %312, %312, %312, %312 in 0 : vector<64x32xf32>, vector<64x32xf32>, vector<64x32xf32>, vector<64x32xf32> -> vector<256x32xf32>
    %317 = arith.mulf %316, %16 : vector<256x32xf32>
    %318 = tpu.concatenate %315, %315, %315, %315 in 0 : vector<64x32xf32>, vector<64x32xf32>, vector<64x32xf32>, vector<64x32xf32> -> vector<256x32xf32>
    %319 = arith.mulf %318, %16 : vector<256x32xf32>
    %cst_266 = arith.constant dense<0.000000e+00> : vector<256x32xf32>
    %320 = tpu.matmul %319, %267, %cst_266 {dimension_numbers = #tpu.dot_dimension_numbers<[1], [0], [0], [1], [0, 0, 1, 1], [], []>} : vector<256x32xf32>, vector<32x32xf32>, vector<256x32xf32> -> vector<256x32xf32>
    %cst_267 = arith.constant dense<0.000000e+00> : vector<64x256xf32>
    %321 = tpu.matmul %309, %317, %cst_267 {dimension_numbers = #tpu.dot_dimension_numbers<[1], [1], [0], [0], [0, 0, 1, 0], [], []>} : vector<64x32xf32>, vector<256x32xf32>, vector<64x256xf32> -> vector<64x256xf32>
    %cst_268 = arith.constant dense<0xFF800000> : vector<64xf32>
    %322 = vector.multi_reduction <maximumf>, %321, %cst_268 [1] : vector<64x256xf32> to vector<64xf32>
    %323 = vector.shape_cast %322 : vector<64xf32> to vector<64x1xf32>
    %324 = vector.broadcast %323 : vector<64x1xf32> to vector<64x256xf32>
    %325 = arith.subf %321, %324 : vector<64x256xf32>
    %326 = math.exp %325 : vector<64x256xf32>
    %c0_269 = arith.constant 0 : index
    %c0_270 = arith.constant 0 : index
    %327 = vector.load %arg10[%c0_269, %c0_270] : memref<256x8xf32, #tpu.memory_space<vmem>>, vector<256x8xf32>
    %cst_271 = arith.constant dense<0.000000e+00> : vector<64x8xf32>
    %328 = tpu.matmul %326, %327, %cst_271 {dimension_numbers = #tpu.dot_dimension_numbers<[1], [0], [0], [1], [0, 0, 1, 1], [], []>} : vector<64x256xf32>, vector<256x8xf32>, vector<64x8xf32> -> vector<64x8xf32>
    %329 = tpu.reciprocal %328 {approx = true} : vector<64x8xf32> -> vector<64x8xf32>
    %c0_272 = arith.constant 0 : index
    %c0_273 = arith.constant 0 : index
    %330 = vector.load %arg11[%c0_272, %c0_273] : memref<8x256xf32, #tpu.memory_space<vmem>>, vector<8x256xf32>
    %cst_274 = arith.constant dense<0.000000e+00> : vector<64x256xf32>
    %331 = tpu.matmul %329, %330, %cst_274 {dimension_numbers = #tpu.dot_dimension_numbers<[1], [0], [0], [1], [0, 0, 1, 1], [], []>} : vector<64x8xf32>, vector<8x256xf32>, vector<64x256xf32> -> vector<64x256xf32>
    %332 = arith.mulf %326, %331 : vector<64x256xf32>
    %cst_275 = arith.constant dense<0.000000e+00> : vector<64x32xf32>
    %333 = tpu.matmul %332, %320, %cst_275 {dimension_numbers = #tpu.dot_dimension_numbers<[1], [0], [0], [1], [0, 0, 1, 1], [], []>} : vector<64x256xf32>, vector<256x32xf32>, vector<64x32xf32> -> vector<64x32xf32>
    %334 = vector.broadcast %269 : vector<1x32xf32> to vector<64x32xf32>
    %335 = arith.addf %333, %334 : vector<64x32xf32>
    %336 = arith.addf %253, %335 : vector<64x32xf32>
    %cst_276 = arith.constant dense<0.000000e+00> : vector<64xf32>
    %337 = vector.multi_reduction <add>, %336, %cst_276 [1] : vector<64x32xf32> to vector<64xf32>
    %338 = vector.shape_cast %337 : vector<64xf32> to vector<64x1xf32>
    %cst_277 = arith.constant 3.200000e+01 : f32
    %339 = vector.broadcast %cst_277 : f32 to vector<64x1xf32>
    %340 = arith.divf %338, %339 : vector<64x1xf32>
    %341 = vector.broadcast %340 : vector<64x1xf32> to vector<64x32xf32>
    %342 = arith.subf %336, %341 : vector<64x32xf32>
    %343 = arith.mulf %342, %342 : vector<64x32xf32>
    %cst_278 = arith.constant dense<0.000000e+00> : vector<64xf32>
    %344 = vector.multi_reduction <add>, %343, %cst_278 [1] : vector<64x32xf32> to vector<64xf32>
    %345 = vector.shape_cast %344 : vector<64xf32> to vector<64x1xf32>
    %cst_279 = arith.constant 3.200000e+01 : f32
    %346 = vector.broadcast %cst_279 : f32 to vector<64x1xf32>
    %347 = arith.divf %345, %346 : vector<64x1xf32>
    %cst_280 = arith.constant 9.99999974E-6 : f32
    %348 = vector.broadcast %cst_280 : f32 to vector<64x1xf32>
    %349 = arith.addf %347, %348 : vector<64x1xf32>
    %350 = math.rsqrt %349 : vector<64x1xf32>
    %351 = vector.broadcast %350 : vector<64x1xf32> to vector<64x32xf32>
    %352 = arith.mulf %342, %351 : vector<64x32xf32>
    %353 = vector.broadcast %271 : vector<1x32xf32> to vector<64x32xf32>
    %354 = arith.mulf %352, %353 : vector<64x32xf32>
    %355 = vector.broadcast %273 : vector<1x32xf32> to vector<64x32xf32>
    %356 = arith.addf %354, %355 : vector<64x32xf32>
    %357 = arith.addf %356, %3 : vector<64x32xf32>
    %cst_281 = arith.constant dense<0.000000e+00> : vector<80x32xf32>
    %358 = tpu.matmul %5, %275, %cst_281 {dimension_numbers = #tpu.dot_dimension_numbers<[1], [0], [0], [1], [0, 0, 1, 1], [], []>} : vector<80x32xf32>, vector<32x32xf32>, vector<80x32xf32> -> vector<80x32xf32>
    %359 = vector.broadcast %277 : vector<1x32xf32> to vector<80x32xf32>
    %360 = arith.addf %358, %359 : vector<80x32xf32>
    %361 = arith.mulf %360, %7 : vector<80x32xf32>
    %cst_282 = arith.constant dense<0.000000e+00> : vector<64x32xf32>
    %362 = tpu.matmul %357, %279, %cst_282 {dimension_numbers = #tpu.dot_dimension_numbers<[1], [0], [0], [1], [0, 0, 1, 1], [], []>} : vector<64x32xf32>, vector<32x32xf32>, vector<64x32xf32> -> vector<64x32xf32>
    %363 = vector.broadcast %281 : vector<1x32xf32> to vector<64x32xf32>
    %364 = arith.addf %362, %363 : vector<64x32xf32>
    %cst_283 = arith.constant dense<0.000000e+00> : vector<64x16xf32>
    %365 = tpu.matmul %357, %283, %cst_283 {dimension_numbers = #tpu.dot_dimension_numbers<[1], [0], [0], [1], [0, 0, 1, 1], [], []>} : vector<64x32xf32>, vector<32x16xf32>, vector<64x16xf32> -> vector<64x16xf32>
    %366 = vector.broadcast %285 : vector<1x16xf32> to vector<64x16xf32>
    %367 = arith.addf %365, %366 : vector<64x16xf32>
    %cst_284 = arith.constant dense<0xFF800000> : vector<64xf32>
    %368 = vector.multi_reduction <maximumf>, %367, %cst_284 [1] : vector<64x16xf32> to vector<64xf32>
    %369 = vector.shape_cast %368 : vector<64xf32> to vector<64x1xf32>
    %370 = vector.broadcast %369 : vector<64x1xf32> to vector<64x16xf32>
    %371 = arith.subf %367, %370 : vector<64x16xf32>
    %372 = math.exp %371 : vector<64x16xf32>
    %c0_285 = arith.constant 0 : index
    %c0_286 = arith.constant 0 : index
    %373 = vector.load %arg12[%c0_285, %c0_286] : memref<16x16xf32, #tpu.memory_space<vmem>>, vector<16x16xf32>
    %cst_287 = arith.constant dense<0.000000e+00> : vector<64x16xf32>
    %374 = tpu.matmul %372, %373, %cst_287 {dimension_numbers = #tpu.dot_dimension_numbers<[1], [0], [0], [1], [0, 0, 1, 1], [], []>} : vector<64x16xf32>, vector<16x16xf32>, vector<64x16xf32> -> vector<64x16xf32>
    %375 = tpu.reciprocal %374 {approx = true} : vector<64x16xf32> -> vector<64x16xf32>
    %376 = arith.mulf %372, %375 : vector<64x16xf32>
    %cst_288 = arith.constant 0.000000e+00 : f32
    %377 = vector.broadcast %cst_288 : f32 to vector<64x32xf32>
    %c0_289 = arith.constant 0 : index
    %c0_290 = arith.constant 0 : index
    %378 = vector.load %arg13[%c0_289, %c0_290] : memref<32x64xf32, #tpu.memory_space<vmem>>, vector<32x64xf32>
    %cst_291 = arith.constant dense<0.000000e+00> : vector<64x64xf32>
    %379 = tpu.matmul %364, %378, %cst_291 {dimension_numbers = #tpu.dot_dimension_numbers<[1], [0], [0], [1], [0, 0, 1, 1], [], []>} : vector<64x32xf32>, vector<32x64xf32>, vector<64x64xf32> -> vector<64x64xf32>
    %380 = arith.addf %379, %9 : vector<64x64xf32>
    %c0_292 = arith.constant 0 : index
    %c0_293 = arith.constant 0 : index
    %381 = vector.load %arg14[%c0_292, %c0_293] : memref<32x64xf32, #tpu.memory_space<vmem>>, vector<32x64xf32>
    %cst_294 = arith.constant dense<0.000000e+00> : vector<64x64xf32>
    %382 = tpu.matmul %364, %381, %cst_294 {dimension_numbers = #tpu.dot_dimension_numbers<[1], [0], [0], [1], [0, 0, 1, 1], [], []>} : vector<64x32xf32>, vector<32x64xf32>, vector<64x64xf32> -> vector<64x64xf32>
    %383 = arith.addf %382, %13 : vector<64x64xf32>
    %384 = math.absf %380 : vector<64x64xf32>
    %cst_295 = arith.constant 1.000000e+00 : f32
    %385 = vector.broadcast %cst_295 : f32 to vector<64x64xf32>
    %386 = arith.subf %385, %384 : vector<64x64xf32>
    %cst_296 = arith.constant 0.000000e+00 : f32
    %387 = vector.broadcast %cst_296 : f32 to vector<64x64xf32>
    %388 = arith.maximumf %387, %386 : vector<64x64xf32>
    %389 = math.absf %383 : vector<64x64xf32>
    %cst_297 = arith.constant 1.000000e+00 : f32
    %390 = vector.broadcast %cst_297 : f32 to vector<64x64xf32>
    %391 = arith.subf %390, %389 : vector<64x64xf32>
    %cst_298 = arith.constant 0.000000e+00 : f32
    %392 = vector.broadcast %cst_298 : f32 to vector<64x64xf32>
    %393 = arith.maximumf %392, %391 : vector<64x64xf32>
    %c0_299 = arith.constant 0 : index
    %c0_300 = arith.constant 0 : index
    %394 = vector.load %arg15[%c0_299, %c0_300] : memref<16x64xf32, #tpu.memory_space<vmem>>, vector<16x64xf32>
    %cst_301 = arith.constant dense<0.000000e+00> : vector<64x64xf32>
    %395 = tpu.matmul %376, %394, %cst_301 {dimension_numbers = #tpu.dot_dimension_numbers<[1], [0], [0], [1], [0, 0, 1, 1], [], []>} : vector<64x16xf32>, vector<16x64xf32>, vector<64x64xf32> -> vector<64x64xf32>
    %396 = arith.mulf %393, %395 : vector<64x64xf32>
    %c0_302 = arith.constant 0 : index
    %c0_303 = arith.constant 0 : index
    %397 = vector.load %arg19[%c0_302, %c0_303] : memref<64x512xf32, #tpu.memory_space<vmem>>, vector<64x512xf32>
    %cst_304 = arith.constant dense<0.000000e+00> : vector<64x512xf32>
    %398 = tpu.matmul %388, %397, %cst_304 {dimension_numbers = #tpu.dot_dimension_numbers<[1], [0], [0], [1], [0, 0, 1, 1], [], []>} : vector<64x64xf32>, vector<64x512xf32>, vector<64x512xf32> -> vector<64x512xf32>
    %c0_305 = arith.constant 0 : index
    %c0_306 = arith.constant 0 : index
    %399 = vector.load %arg20[%c0_305, %c0_306] : memref<64x512xf32, #tpu.memory_space<vmem>>, vector<64x512xf32>
    %cst_307 = arith.constant dense<0.000000e+00> : vector<64x512xf32>
    %400 = tpu.matmul %396, %399, %cst_307 {dimension_numbers = #tpu.dot_dimension_numbers<[1], [0], [0], [1], [0, 0, 1, 1], [], []>} : vector<64x64xf32>, vector<64x512xf32>, vector<64x512xf32> -> vector<64x512xf32>
    %401 = arith.mulf %398, %400 : vector<64x512xf32>
    %402 = vector.extract_strided_slice %361 {offsets = [0, 0], sizes = [64, 32], strides = [1, 1]} : vector<80x32xf32> to vector<64x32xf32>
    %403 = tpu.concatenate %402, %402, %402, %402, %402, %402, %402, %402 in 0 : vector<64x32xf32>, vector<64x32xf32>, vector<64x32xf32>, vector<64x32xf32>, vector<64x32xf32>, vector<64x32xf32>, vector<64x32xf32>, vector<64x32xf32> -> vector<512x32xf32>
    %c0_308 = arith.constant 0 : index
    %c0_309 = arith.constant 0 : index
    %404 = vector.load %arg23[%c0_308, %c0_309] : memref<512x32xf32, #tpu.memory_space<vmem>>, vector<512x32xf32>
    %405 = arith.mulf %403, %404 : vector<512x32xf32>
    %cst_310 = arith.constant dense<0.000000e+00> : vector<64x32xf32>
    %406 = tpu.matmul %401, %405, %cst_310 {dimension_numbers = #tpu.dot_dimension_numbers<[1], [0], [0], [1], [0, 0, 1, 1], [], []>} : vector<64x512xf32>, vector<512x32xf32>, vector<64x32xf32> -> vector<64x32xf32>
    %407 = arith.addf %377, %406 : vector<64x32xf32>
    %c0_311 = arith.constant 0 : index
    %c0_312 = arith.constant 0 : index
    %408 = vector.load %arg16[%c0_311, %c0_312] : memref<32x32xf32, #tpu.memory_space<vmem>>, vector<32x32xf32>
    %cst_313 = arith.constant dense<0.000000e+00> : vector<64x32xf32>
    %409 = tpu.matmul %364, %408, %cst_313 {dimension_numbers = #tpu.dot_dimension_numbers<[1], [0], [0], [1], [0, 0, 1, 1], [], []>} : vector<64x32xf32>, vector<32x32xf32>, vector<64x32xf32> -> vector<64x32xf32>
    %410 = arith.addf %409, %11 : vector<64x32xf32>
    %c0_314 = arith.constant 0 : index
    %c0_315 = arith.constant 0 : index
    %411 = vector.load %arg17[%c0_314, %c0_315] : memref<32x32xf32, #tpu.memory_space<vmem>>, vector<32x32xf32>
    %cst_316 = arith.constant dense<0.000000e+00> : vector<64x32xf32>
    %412 = tpu.matmul %364, %411, %cst_316 {dimension_numbers = #tpu.dot_dimension_numbers<[1], [0], [0], [1], [0, 0, 1, 1], [], []>} : vector<64x32xf32>, vector<32x32xf32>, vector<64x32xf32> -> vector<64x32xf32>
    %413 = arith.addf %412, %15 : vector<64x32xf32>
    %414 = math.absf %410 : vector<64x32xf32>
    %cst_317 = arith.constant 1.000000e+00 : f32
    %415 = vector.broadcast %cst_317 : f32 to vector<64x32xf32>
    %416 = arith.subf %415, %414 : vector<64x32xf32>
    %cst_318 = arith.constant 0.000000e+00 : f32
    %417 = vector.broadcast %cst_318 : f32 to vector<64x32xf32>
    %418 = arith.maximumf %417, %416 : vector<64x32xf32>
    %419 = math.absf %413 : vector<64x32xf32>
    %cst_319 = arith.constant 1.000000e+00 : f32
    %420 = vector.broadcast %cst_319 : f32 to vector<64x32xf32>
    %421 = arith.subf %420, %419 : vector<64x32xf32>
    %cst_320 = arith.constant 0.000000e+00 : f32
    %422 = vector.broadcast %cst_320 : f32 to vector<64x32xf32>
    %423 = arith.maximumf %422, %421 : vector<64x32xf32>
    %c0_321 = arith.constant 0 : index
    %c0_322 = arith.constant 0 : index
    %424 = vector.load %arg18[%c0_321, %c0_322] : memref<16x32xf32, #tpu.memory_space<vmem>>, vector<16x32xf32>
    %cst_323 = arith.constant dense<0.000000e+00> : vector<64x32xf32>
    %425 = tpu.matmul %376, %424, %cst_323 {dimension_numbers = #tpu.dot_dimension_numbers<[1], [0], [0], [1], [0, 0, 1, 1], [], []>} : vector<64x16xf32>, vector<16x32xf32>, vector<64x32xf32> -> vector<64x32xf32>
    %426 = arith.mulf %423, %425 : vector<64x32xf32>
    %c0_324 = arith.constant 0 : index
    %c0_325 = arith.constant 0 : index
    %427 = vector.load %arg21[%c0_324, %c0_325] : memref<32x128xf32, #tpu.memory_space<vmem>>, vector<32x128xf32>
    %cst_326 = arith.constant dense<0.000000e+00> : vector<64x128xf32>
    %428 = tpu.matmul %418, %427, %cst_326 {dimension_numbers = #tpu.dot_dimension_numbers<[1], [0], [0], [1], [0, 0, 1, 1], [], []>} : vector<64x32xf32>, vector<32x128xf32>, vector<64x128xf32> -> vector<64x128xf32>
    %c0_327 = arith.constant 0 : index
    %c0_328 = arith.constant 0 : index
    %429 = vector.load %arg22[%c0_327, %c0_328] : memref<32x128xf32, #tpu.memory_space<vmem>>, vector<32x128xf32>
    %cst_329 = arith.constant dense<0.000000e+00> : vector<64x128xf32>
    %430 = tpu.matmul %426, %429, %cst_329 {dimension_numbers = #tpu.dot_dimension_numbers<[1], [0], [0], [1], [0, 0, 1, 1], [], []>} : vector<64x32xf32>, vector<32x128xf32>, vector<64x128xf32> -> vector<64x128xf32>
    %431 = arith.mulf %428, %430 : vector<64x128xf32>
    %432 = vector.extract_strided_slice %361 {offsets = [64, 0], sizes = [16, 32], strides = [1, 1]} : vector<80x32xf32> to vector<16x32xf32>
    %433 = tpu.concatenate %432, %432, %432, %432, %432, %432, %432, %432 in 0 : vector<16x32xf32>, vector<16x32xf32>, vector<16x32xf32>, vector<16x32xf32>, vector<16x32xf32>, vector<16x32xf32>, vector<16x32xf32>, vector<16x32xf32> -> vector<128x32xf32>
    %c0_330 = arith.constant 0 : index
    %c0_331 = arith.constant 0 : index
    %434 = vector.load %arg24[%c0_330, %c0_331] : memref<128x32xf32, #tpu.memory_space<vmem>>, vector<128x32xf32>
    %435 = arith.mulf %433, %434 : vector<128x32xf32>
    %cst_332 = arith.constant dense<0.000000e+00> : vector<64x32xf32>
    %436 = tpu.matmul %431, %435, %cst_332 {dimension_numbers = #tpu.dot_dimension_numbers<[1], [0], [0], [1], [0, 0, 1, 1], [], []>} : vector<64x128xf32>, vector<128x32xf32>, vector<64x32xf32> -> vector<64x32xf32>
    %437 = arith.addf %407, %436 : vector<64x32xf32>
    %cst_333 = arith.constant dense<0.000000e+00> : vector<64x32xf32>
    %438 = tpu.matmul %437, %287, %cst_333 {dimension_numbers = #tpu.dot_dimension_numbers<[1], [0], [0], [1], [0, 0, 1, 1], [], []>} : vector<64x32xf32>, vector<32x32xf32>, vector<64x32xf32> -> vector<64x32xf32>
    %439 = vector.broadcast %289 : vector<1x32xf32> to vector<64x32xf32>
    %440 = arith.addf %438, %439 : vector<64x32xf32>
    %441 = arith.addf %356, %440 : vector<64x32xf32>
    %cst_334 = arith.constant dense<0.000000e+00> : vector<64xf32>
    %442 = vector.multi_reduction <add>, %441, %cst_334 [1] : vector<64x32xf32> to vector<64xf32>
    %443 = vector.shape_cast %442 : vector<64xf32> to vector<64x1xf32>
    %cst_335 = arith.constant 3.200000e+01 : f32
    %444 = vector.broadcast %cst_335 : f32 to vector<64x1xf32>
    %445 = arith.divf %443, %444 : vector<64x1xf32>
    %446 = vector.broadcast %445 : vector<64x1xf32> to vector<64x32xf32>
    %447 = arith.subf %441, %446 : vector<64x32xf32>
    %448 = arith.mulf %447, %447 : vector<64x32xf32>
    %cst_336 = arith.constant dense<0.000000e+00> : vector<64xf32>
    %449 = vector.multi_reduction <add>, %448, %cst_336 [1] : vector<64x32xf32> to vector<64xf32>
    %450 = vector.shape_cast %449 : vector<64xf32> to vector<64x1xf32>
    %cst_337 = arith.constant 3.200000e+01 : f32
    %451 = vector.broadcast %cst_337 : f32 to vector<64x1xf32>
    %452 = arith.divf %450, %451 : vector<64x1xf32>
    %cst_338 = arith.constant 9.99999974E-6 : f32
    %453 = vector.broadcast %cst_338 : f32 to vector<64x1xf32>
    %454 = arith.addf %452, %453 : vector<64x1xf32>
    %455 = math.rsqrt %454 : vector<64x1xf32>
    %456 = vector.broadcast %455 : vector<64x1xf32> to vector<64x32xf32>
    %457 = arith.mulf %447, %456 : vector<64x32xf32>
    %458 = vector.broadcast %291 : vector<1x32xf32> to vector<64x32xf32>
    %459 = arith.mulf %457, %458 : vector<64x32xf32>
    %460 = vector.broadcast %293 : vector<1x32xf32> to vector<64x32xf32>
    %461 = arith.addf %459, %460 : vector<64x32xf32>
    %cst_339 = arith.constant dense<0.000000e+00> : vector<64x64xf32>
    %462 = tpu.matmul %461, %295, %cst_339 {dimension_numbers = #tpu.dot_dimension_numbers<[1], [0], [0], [1], [0, 0, 1, 1], [], []>} : vector<64x32xf32>, vector<32x64xf32>, vector<64x64xf32> -> vector<64x64xf32>
    %463 = vector.broadcast %297 : vector<1x64xf32> to vector<64x64xf32>
    %464 = arith.addf %462, %463 : vector<64x64xf32>
    %cst_340 = arith.constant 0.000000e+00 : f32
    %465 = vector.broadcast %cst_340 : f32 to vector<64x64xf32>
    %466 = arith.maximumf %464, %465 : vector<64x64xf32>
    %cst_341 = arith.constant dense<0.000000e+00> : vector<64x32xf32>
    %467 = tpu.matmul %466, %299, %cst_341 {dimension_numbers = #tpu.dot_dimension_numbers<[1], [0], [0], [1], [0, 0, 1, 1], [], []>} : vector<64x64xf32>, vector<64x32xf32>, vector<64x32xf32> -> vector<64x32xf32>
    %468 = vector.broadcast %301 : vector<1x32xf32> to vector<64x32xf32>
    %469 = arith.addf %467, %468 : vector<64x32xf32>
    %470 = arith.addf %461, %469 : vector<64x32xf32>
    %cst_342 = arith.constant dense<0.000000e+00> : vector<64xf32>
    %471 = vector.multi_reduction <add>, %470, %cst_342 [1] : vector<64x32xf32> to vector<64xf32>
    %472 = vector.shape_cast %471 : vector<64xf32> to vector<64x1xf32>
    %cst_343 = arith.constant 3.200000e+01 : f32
    %473 = vector.broadcast %cst_343 : f32 to vector<64x1xf32>
    %474 = arith.divf %472, %473 : vector<64x1xf32>
    %475 = vector.broadcast %474 : vector<64x1xf32> to vector<64x32xf32>
    %476 = arith.subf %470, %475 : vector<64x32xf32>
    %477 = arith.mulf %476, %476 : vector<64x32xf32>
    %cst_344 = arith.constant dense<0.000000e+00> : vector<64xf32>
    %478 = vector.multi_reduction <add>, %477, %cst_344 [1] : vector<64x32xf32> to vector<64xf32>
    %479 = vector.shape_cast %478 : vector<64xf32> to vector<64x1xf32>
    %cst_345 = arith.constant 3.200000e+01 : f32
    %480 = vector.broadcast %cst_345 : f32 to vector<64x1xf32>
    %481 = arith.divf %479, %480 : vector<64x1xf32>
    %cst_346 = arith.constant 9.99999974E-6 : f32
    %482 = vector.broadcast %cst_346 : f32 to vector<64x1xf32>
    %483 = arith.addf %481, %482 : vector<64x1xf32>
    %484 = math.rsqrt %483 : vector<64x1xf32>
    %485 = vector.broadcast %484 : vector<64x1xf32> to vector<64x32xf32>
    %486 = arith.mulf %476, %485 : vector<64x32xf32>
    %487 = vector.broadcast %303 : vector<1x32xf32> to vector<64x32xf32>
    %488 = arith.mulf %486, %487 : vector<64x32xf32>
    %489 = vector.broadcast %305 : vector<1x32xf32> to vector<64x32xf32>
    %490 = arith.addf %488, %489 : vector<64x32xf32>
    %c0_347 = arith.constant 0 : index
    %c0_348 = arith.constant 0 : index
    %c0_349 = arith.constant 0 : index
    %491 = vector.load %arg51[%c0_347, %c0_348, %c0_349] : memref<1x64x32xf32, #tpu.memory_space<vmem>>, vector<1x64x32xf32>
    %492 = vector.shape_cast %491 : vector<1x64x32xf32> to vector<64x32xf32>
    %493 = vector.shape_cast %490 : vector<64x32xf32> to vector<1x64x32xf32>
    tpu.vector_store %arg51[%c0_347, %c0_348, %c0_349], %493 {strides = array<i32>} : memref<1x64x32xf32, #tpu.memory_space<vmem>>, vector<1x64x32xf32>,
    return
  }
  func.func @transform_0(%arg0: i32) -> (i32, i32, i32) {
    %c0_i32 = arith.constant 0 : i32
    %c0_i32_0 = arith.constant 0 : i32
    %c0_i32_1 = arith.constant 0 : i32
    return %arg0, %c0_i32, %c0_i32_0 : i32, i32, i32
  }
  func.func @transform_1(%arg0: i32) -> (i32, i32, i32) {
    %c0_i32 = arith.constant 0 : i32
    %c0_i32_0 = arith.constant 0 : i32
    %c0_i32_1 = arith.constant 0 : i32
    return %arg0, %c0_i32, %c0_i32_0 : i32, i32, i32
  }
  func.func @transform_2(%arg0: i32) -> (i32, i32, i32) {
    %c0_i32 = arith.constant 0 : i32
    %c0_i32_0 = arith.constant 0 : i32
    %c0_i32_1 = arith.constant 0 : i32
    return %arg0, %c0_i32, %c0_i32_0 : i32, i32, i32
  }
  func.func @transform_3(%arg0: i32) -> (i32, i32, i32) {
    %c0_i32 = arith.constant 0 : i32
    %c0_i32_0 = arith.constant 0 : i32
    %c0_i32_1 = arith.constant 0 : i32
    return %arg0, %c0_i32, %c0_i32_0 : i32, i32, i32
  }
  func.func @transform_4(%arg0: i32) -> (i32, i32, i32) {
    %c0_i32 = arith.constant 0 : i32
    %c0_i32_0 = arith.constant 0 : i32
    %c0_i32_1 = arith.constant 0 : i32
    return %arg0, %c0_i32, %c0_i32_0 : i32, i32, i32
  }
  func.func @transform_5(%arg0: i32) -> (i32, i32, i32) {
    %c0_i32 = arith.constant 0 : i32
    %c0_i32_0 = arith.constant 0 : i32
    %c0_i32_1 = arith.constant 0 : i32
    return %arg0, %c0_i32, %c0_i32_0 : i32, i32, i32
  }
  func.func @transform_6(%arg0: i32) -> (i32, i32, i32) {
    %c0_i32 = arith.constant 0 : i32
    %c0_i32_0 = arith.constant 0 : i32
    %c0_i32_1 = arith.constant 0 : i32
    return %arg0, %c0_i32, %c0_i32_0 : i32, i32, i32
  }
  func.func @transform_7(%arg0: i32) -> (i32, i32, i32) {
    %c0_i32 = arith.constant 0 : i32
    %c0_i32_0 = arith.constant 0 : i32
    %c0_i32_1 = arith.constant 0 : i32
    return %arg0, %c0_i32, %c0_i32_0 : i32, i32, i32
  }
  func.func @transform_8(%arg0: i32) -> (i32, i32) {
    %c0_i32 = arith.constant 0 : i32
    %c0_i32_0 = arith.constant 0 : i32
    %c0_i32_1 = arith.constant 0 : i32
    return %c0_i32, %c0_i32_0 : i32, i32
  }
  func.func @transform_9(%arg0: i32) -> (i32, i32) {
    %c0_i32 = arith.constant 0 : i32
    %c0_i32_0 = arith.constant 0 : i32
    %c0_i32_1 = arith.constant 0 : i32
    return %c0_i32, %c0_i32_0 : i32, i32
  }
  func.func @transform_10(%arg0: i32) -> (i32, i32) {
    %c0_i32 = arith.constant 0 : i32
    %c0_i32_0 = arith.constant 0 : i32
    %c0_i32_1 = arith.constant 0 : i32
    return %c0_i32, %c0_i32_0 : i32, i32
  }
  func.func @transform_11(%arg0: i32) -> (i32, i32) {
    %c0_i32 = arith.constant 0 : i32
    %c0_i32_0 = arith.constant 0 : i32
    %c0_i32_1 = arith.constant 0 : i32
    return %c0_i32, %c0_i32_0 : i32, i32
  }
  func.func @transform_12(%arg0: i32) -> (i32, i32) {
    %c0_i32 = arith.constant 0 : i32
    %c0_i32_0 = arith.constant 0 : i32
    %c0_i32_1 = arith.constant 0 : i32
    return %c0_i32, %c0_i32_0 : i32, i32
  }
  func.func @transform_13(%arg0: i32) -> (i32, i32) {
    %c0_i32 = arith.constant 0 : i32
    %c0_i32_0 = arith.constant 0 : i32
    %c0_i32_1 = arith.constant 0 : i32
    return %c0_i32, %c0_i32_0 : i32, i32
  }
  func.func @transform_14(%arg0: i32) -> (i32, i32) {
    %c0_i32 = arith.constant 0 : i32
    %c0_i32_0 = arith.constant 0 : i32
    %c0_i32_1 = arith.constant 0 : i32
    return %c0_i32, %c0_i32_0 : i32, i32
  }
  func.func @transform_15(%arg0: i32) -> (i32, i32) {
    %c0_i32 = arith.constant 0 : i32
    %c0_i32_0 = arith.constant 0 : i32
    %c0_i32_1 = arith.constant 0 : i32
    return %c0_i32, %c0_i32_0 : i32, i32
  }
  func.func @transform_16(%arg0: i32) -> (i32, i32) {
    %c0_i32 = arith.constant 0 : i32
    %c0_i32_0 = arith.constant 0 : i32
    %c0_i32_1 = arith.constant 0 : i32
    return %c0_i32, %c0_i32_0 : i32, i32
  }
  func.func @transform_17(%arg0: i32) -> (i32, i32) {
    %c0_i32 = arith.constant 0 : i32
    %c0_i32_0 = arith.constant 0 : i32
    %c0_i32_1 = arith.constant 0 : i32
    return %c0_i32, %c0_i32_0 : i32, i32
  }
  func.func @transform_18(%arg0: i32) -> (i32, i32) {
    %c0_i32 = arith.constant 0 : i32
    %c0_i32_0 = arith.constant 0 : i32
    %c0_i32_1 = arith.constant 0 : i32
    return %c0_i32, %c0_i32_0 : i32, i32
  }
  func.func @transform_19(%arg0: i32) -> (i32, i32) {
    %c0_i32 = arith.constant 0 : i32
    %c0_i32_0 = arith.constant 0 : i32
    %c0_i32_1 = arith.constant 0 : i32
    return %c0_i32, %c0_i32_0 : i32, i32
  }
  func.func @transform_20(%arg0: i32) -> (i32, i32) {
    %c0_i32 = arith.constant 0 : i32
    %c0_i32_0 = arith.constant 0 : i32
    %c0_i32_1 = arith.constant 0 : i32
    return %c0_i32, %c0_i32_0 : i32, i32
  }
  func.func @transform_21(%arg0: i32) -> (i32, i32) {
    %c0_i32 = arith.constant 0 : i32
    %c0_i32_0 = arith.constant 0 : i32
    %c0_i32_1 = arith.constant 0 : i32
    return %c0_i32, %c0_i32_0 : i32, i32
  }
  func.func @transform_22(%arg0: i32) -> (i32, i32) {
    %c0_i32 = arith.constant 0 : i32
    %c0_i32_0 = arith.constant 0 : i32
    %c0_i32_1 = arith.constant 0 : i32
    return %c0_i32, %c0_i32_0 : i32, i32
  }
  func.func @transform_23(%arg0: i32) -> (i32, i32) {
    %c0_i32 = arith.constant 0 : i32
    %c0_i32_0 = arith.constant 0 : i32
    %c0_i32_1 = arith.constant 0 : i32
    return %c0_i32, %c0_i32_0 : i32, i32
  }
  func.func @transform_24(%arg0: i32) -> (i32, i32, i32) {
    %c0_i32 = arith.constant 0 : i32
    %c0_i32_0 = arith.constant 0 : i32
    %c0_i32_1 = arith.constant 0 : i32
    %c0_i32_2 = arith.constant 0 : i32
    return %c0_i32, %c0_i32_0, %c0_i32_1 : i32, i32, i32
  }
  func.func @transform_25(%arg0: i32) -> (i32, i32, i32) {
    %c0_i32 = arith.constant 0 : i32
    %c0_i32_0 = arith.constant 0 : i32
    %c0_i32_1 = arith.constant 0 : i32
    %c0_i32_2 = arith.constant 0 : i32
    return %c0_i32, %c0_i32_0, %c0_i32_1 : i32, i32, i32
  }
  func.func @transform_26(%arg0: i32) -> (i32, i32, i32) {
    %c0_i32 = arith.constant 0 : i32
    %c0_i32_0 = arith.constant 0 : i32
    %c0_i32_1 = arith.constant 0 : i32
    %c0_i32_2 = arith.constant 0 : i32
    return %c0_i32, %c0_i32_0, %c0_i32_1 : i32, i32, i32
  }
  func.func @transform_27(%arg0: i32) -> (i32, i32, i32) {
    %c0_i32 = arith.constant 0 : i32
    %c0_i32_0 = arith.constant 0 : i32
    %c0_i32_1 = arith.constant 0 : i32
    %c0_i32_2 = arith.constant 0 : i32
    return %c0_i32, %c0_i32_0, %c0_i32_1 : i32, i32, i32
  }
  func.func @transform_28(%arg0: i32) -> (i32, i32, i32) {
    %c0_i32 = arith.constant 0 : i32
    %c0_i32_0 = arith.constant 0 : i32
    %c0_i32_1 = arith.constant 0 : i32
    %c0_i32_2 = arith.constant 0 : i32
    return %c0_i32, %c0_i32_0, %c0_i32_1 : i32, i32, i32
  }
  func.func @transform_29(%arg0: i32) -> (i32, i32, i32) {
    %c0_i32 = arith.constant 0 : i32
    %c0_i32_0 = arith.constant 0 : i32
    %c0_i32_1 = arith.constant 0 : i32
    %c0_i32_2 = arith.constant 0 : i32
    return %c0_i32, %c0_i32_0, %c0_i32_1 : i32, i32, i32
  }
  func.func @transform_30(%arg0: i32) -> (i32, i32, i32) {
    %c0_i32 = arith.constant 0 : i32
    %c0_i32_0 = arith.constant 0 : i32
    %c0_i32_1 = arith.constant 0 : i32
    %c0_i32_2 = arith.constant 0 : i32
    return %c0_i32, %c0_i32_0, %c0_i32_1 : i32, i32, i32
  }
  func.func @transform_31(%arg0: i32) -> (i32, i32, i32) {
    %c0_i32 = arith.constant 0 : i32
    %c0_i32_0 = arith.constant 0 : i32
    %c0_i32_1 = arith.constant 0 : i32
    %c0_i32_2 = arith.constant 0 : i32
    return %c0_i32, %c0_i32_0, %c0_i32_1 : i32, i32, i32
  }
  func.func @transform_32(%arg0: i32) -> (i32, i32, i32) {
    %c0_i32 = arith.constant 0 : i32
    %c0_i32_0 = arith.constant 0 : i32
    %c0_i32_1 = arith.constant 0 : i32
    %c0_i32_2 = arith.constant 0 : i32
    return %c0_i32, %c0_i32_0, %c0_i32_1 : i32, i32, i32
  }
  func.func @transform_33(%arg0: i32) -> (i32, i32, i32) {
    %c0_i32 = arith.constant 0 : i32
    %c0_i32_0 = arith.constant 0 : i32
    %c0_i32_1 = arith.constant 0 : i32
    %c0_i32_2 = arith.constant 0 : i32
    return %c0_i32, %c0_i32_0, %c0_i32_1 : i32, i32, i32
  }
  func.func @transform_34(%arg0: i32) -> (i32, i32, i32) {
    %c0_i32 = arith.constant 0 : i32
    %c0_i32_0 = arith.constant 0 : i32
    %c0_i32_1 = arith.constant 0 : i32
    %c0_i32_2 = arith.constant 0 : i32
    return %c0_i32, %c0_i32_0, %c0_i32_1 : i32, i32, i32
  }
  func.func @transform_35(%arg0: i32) -> (i32, i32, i32) {
    %c0_i32 = arith.constant 0 : i32
    %c0_i32_0 = arith.constant 0 : i32
    %c0_i32_1 = arith.constant 0 : i32
    %c0_i32_2 = arith.constant 0 : i32
    return %c0_i32, %c0_i32_0, %c0_i32_1 : i32, i32, i32
  }
  func.func @transform_36(%arg0: i32) -> (i32, i32, i32) {
    %c0_i32 = arith.constant 0 : i32
    %c0_i32_0 = arith.constant 0 : i32
    %c0_i32_1 = arith.constant 0 : i32
    %c0_i32_2 = arith.constant 0 : i32
    return %c0_i32, %c0_i32_0, %c0_i32_1 : i32, i32, i32
  }
  func.func @transform_37(%arg0: i32) -> (i32, i32, i32) {
    %c0_i32 = arith.constant 0 : i32
    %c0_i32_0 = arith.constant 0 : i32
    %c0_i32_1 = arith.constant 0 : i32
    %c0_i32_2 = arith.constant 0 : i32
    return %c0_i32, %c0_i32_0, %c0_i32_1 : i32, i32, i32
  }
  func.func @transform_38(%arg0: i32) -> (i32, i32, i32) {
    %c0_i32 = arith.constant 0 : i32
    %c0_i32_0 = arith.constant 0 : i32
    %c0_i32_1 = arith.constant 0 : i32
    %c0_i32_2 = arith.constant 0 : i32
    return %c0_i32, %c0_i32_0, %c0_i32_1 : i32, i32, i32
  }
  func.func @transform_39(%arg0: i32) -> (i32, i32, i32) {
    %c0_i32 = arith.constant 0 : i32
    %c0_i32_0 = arith.constant 0 : i32
    %c0_i32_1 = arith.constant 0 : i32
    %c0_i32_2 = arith.constant 0 : i32
    return %c0_i32, %c0_i32_0, %c0_i32_1 : i32, i32, i32
  }
  func.func @transform_40(%arg0: i32) -> (i32, i32, i32) {
    %c0_i32 = arith.constant 0 : i32
    %c0_i32_0 = arith.constant 0 : i32
    %c0_i32_1 = arith.constant 0 : i32
    %c0_i32_2 = arith.constant 0 : i32
    return %c0_i32, %c0_i32_0, %c0_i32_1 : i32, i32, i32
  }
  func.func @transform_41(%arg0: i32) -> (i32, i32, i32) {
    %c0_i32 = arith.constant 0 : i32
    %c0_i32_0 = arith.constant 0 : i32
    %c0_i32_1 = arith.constant 0 : i32
    %c0_i32_2 = arith.constant 0 : i32
    return %c0_i32, %c0_i32_0, %c0_i32_1 : i32, i32, i32
  }
  func.func @transform_42(%arg0: i32) -> (i32, i32, i32) {
    %c0_i32 = arith.constant 0 : i32
    %c0_i32_0 = arith.constant 0 : i32
    %c0_i32_1 = arith.constant 0 : i32
    %c0_i32_2 = arith.constant 0 : i32
    return %c0_i32, %c0_i32_0, %c0_i32_1 : i32, i32, i32
  }
  func.func @transform_43(%arg0: i32) -> (i32, i32, i32) {
    %c0_i32 = arith.constant 0 : i32
    %c0_i32_0 = arith.constant 0 : i32
    %c0_i32_1 = arith.constant 0 : i32
    %c0_i32_2 = arith.constant 0 : i32
    return %c0_i32, %c0_i32_0, %c0_i32_1 : i32, i32, i32
  }
  func.func @transform_44(%arg0: i32) -> (i32, i32, i32) {
    %c0_i32 = arith.constant 0 : i32
    %c0_i32_0 = arith.constant 0 : i32
    %c0_i32_1 = arith.constant 0 : i32
    %c0_i32_2 = arith.constant 0 : i32
    return %c0_i32, %c0_i32_0, %c0_i32_1 : i32, i32, i32
  }
  func.func @transform_45(%arg0: i32) -> (i32, i32, i32) {
    %c0_i32 = arith.constant 0 : i32
    %c0_i32_0 = arith.constant 0 : i32
    %c0_i32_1 = arith.constant 0 : i32
    %c0_i32_2 = arith.constant 0 : i32
    return %c0_i32, %c0_i32_0, %c0_i32_1 : i32, i32, i32
  }
  func.func @transform_46(%arg0: i32) -> (i32, i32, i32) {
    %c0_i32 = arith.constant 0 : i32
    %c0_i32_0 = arith.constant 0 : i32
    %c0_i32_1 = arith.constant 0 : i32
    %c0_i32_2 = arith.constant 0 : i32
    return %c0_i32, %c0_i32_0, %c0_i32_1 : i32, i32, i32
  }
  func.func @transform_47(%arg0: i32) -> (i32, i32, i32) {
    %c0_i32 = arith.constant 0 : i32
    %c0_i32_0 = arith.constant 0 : i32
    %c0_i32_1 = arith.constant 0 : i32
    %c0_i32_2 = arith.constant 0 : i32
    return %c0_i32, %c0_i32_0, %c0_i32_1 : i32, i32, i32
  }
  func.func @transform_48(%arg0: i32) -> (i32, i32, i32) {
    %c0_i32 = arith.constant 0 : i32
    %c0_i32_0 = arith.constant 0 : i32
    %c0_i32_1 = arith.constant 0 : i32
    %c0_i32_2 = arith.constant 0 : i32
    return %c0_i32, %c0_i32_0, %c0_i32_1 : i32, i32, i32
  }
  func.func @transform_49(%arg0: i32) -> (i32, i32, i32) {
    %c0_i32 = arith.constant 0 : i32
    %c0_i32_0 = arith.constant 0 : i32
    %c0_i32_1 = arith.constant 0 : i32
    %c0_i32_2 = arith.constant 0 : i32
    return %c0_i32, %c0_i32_0, %c0_i32_1 : i32, i32, i32
  }
  func.func @transform_50(%arg0: i32) -> (i32, i32, i32) {
    %c0_i32 = arith.constant 0 : i32
    %c0_i32_0 = arith.constant 0 : i32
    %c0_i32_1 = arith.constant 0 : i32
    return %arg0, %c0_i32, %c0_i32_0 : i32, i32, i32
  }
}

</mosaic_0001>

<bundles_post_ra>
// kernel: tpu_custom_call.1
= control target key start
LH: loop header
LB: loop body
LE: loop exit
PB: predicated region body
PF: predicated region fallthrough
CT: control target
= control target key end

     0   :  { %s16436_s6 = smov 1   ;;  %s16437_s10 = smov 2   ;;  %s21797_s0 = inlined_call_operand.smem [shape: u32[51], index: -1, kind: input, shape index: {}] }
   0x1   :  { %s16503_s5 = sld [smem:[%s21797_s0]]   ;;  %s16438_s14 = smov 3  }
   0x2   :  { %s16508_s9 = sld [smem:[%s21797_s0 + %s16436_s6]]   ;;  %s16439_s18 = smov 4  }
   0x3   :  { %s16513_s13 = sld [smem:[%s21797_s0 + %s16437_s10]]   ;;  %s16440_s22 = smov 5  }
   0x4   :  { %s16518_s17 = sld [smem:[%s21797_s0 + %s16438_s14]]   ;;  %s16441_s26 = smov 6  }
   0x5   :  { %s16523_s21 = sld [smem:[%s21797_s0 + %s16439_s18]]   ;;  %s16442_s30 = smov 7  }
   0x6   :  { %s16528_s25 = sld [smem:[%s21797_s0 + %s16440_s22]]   ;;  %s16443_s4 = smov 8  }
   0x7   :  { %22126 = sst [smem:[#allocation16_spill]] %s16503_s5  ;;  %s16444_s10 = smov 9  }
   0x8   :  { %22127 = sst [smem:[#allocation17_spill]] %s16508_s9  ;;  %s16445_s15 = smov 10  }
   0x9   :  { %22128 = sst [smem:[#allocation18_spill]] %s16513_s13  ;;  %s16446_s20 = smov 11  }
   0xa   :  { %22129 = sst [smem:[#allocation19_spill]] %s16518_s17  ;;  %s16448_s1 = smov 13  }
   0xb   :  { %22130 = sst [smem:[#allocation20_spill]] %s16523_s21  ;;  %s16449_s7 = smov 14  }
   0xc   :  { %22131 = sst [smem:[#allocation21_spill]] %s16528_s25  ;;  %s16451_s22 = smov 16  }
   0xd   :  { %s16533_s29 = sld [smem:[%s21797_s0 + %s16441_s26]]   ;;  %s16447_s26 = smov 12  }
   0xe   :  { %s16538_s3 = sld [smem:[%s21797_s0 + %s16442_s30]]   ;;  %s16452_s28 = smov 17  }
   0xf   :  { %s16543_s8 = sld [smem:[%s21797_s0 + %s16443_s4]]  }
  0x10   :  { %s16548_s14 = sld [smem:[%s21797_s0 + %s16444_s10]]  }
  0x11   :  { %s16553_s19 = sld [smem:[%s21797_s0 + %s16445_s15]]   ;;  %s16450_s15 = smov 15  }
  0x12   :  { %s16558_s24 = sld [smem:[%s21797_s0 + %s16446_s20]]  }
  0x13   :  { %22132 = sst [smem:[#allocation22_spill]] %s16533_s29 }
  0x14   :  { %22133 = sst [smem:[#allocation23_spill]] %s16538_s3 }
  0x15   :  { %s16563_s30 = sld [smem:[%s21797_s0 + %s16447_s26]]  }
  0x16   :  { %22134 = sst [smem:[#allocation24_spill]] %s16548_s14 }
  0x17   :  { %22135 = sst [smem:[#allocation25_spill]] %s16553_s19 }
  0x18   :  { %22136 = sst [smem:[#allocation26_spill]] %s16558_s24 }
  0x19   :  { %s16568_s6 = sld [smem:[%s21797_s0 + %s16448_s1]]  }
  0x1a   :  { %s16573_s12 = sld [smem:[%s21797_s0 + %s16449_s7]]   ;;  %s16453_s7 = smov 18  }
  0x1b   :  { %22137 = sst [smem:[#allocation27_spill]] %s16563_s30 }
  0x1c   :  { %s16578_s20 = sld [smem:[%s21797_s0 + %s16450_s15]]   ;;  %s16454_s15 = smov 19  }
  0x1d   :  { %s16583_s27 = sld [smem:[%s21797_s0 + %s16451_s22]]   ;;  %s16455_s22 = smov 20  }
  0x1e   :  { %s16588_s4 = sld [smem:[%s21797_s0 + %s16452_s28]]   ;;  %s16456_s28 = smov 21  }
  0x1f   :  { %22138 = sst [smem:[#allocation28_spill]] %s16568_s6 }
  0x20   :  { %22139 = sst [smem:[#allocation29_spill]] %s16573_s12 }
  0x21   :  { %s16593_s3 = sld [smem:[%s21797_s0 + %s16453_s7]]   ;;  %s16457_s7 = smov 22  }
  0x22   :  { %22140 = sst [smem:[#allocation30_spill]] %s16578_s20 }
  0x23   :  { %22141 = sst [smem:[#allocation31_spill]] %s16583_s27 }
  0x24   :  { %22142 = sst [smem:[#allocation32_spill]] %s16588_s4 }
  0x25   :  { %s16598_s29 = sld [smem:[%s21797_s0 + %s16454_s15]]   ;;  %s16458_s15 = smov 23  }
  0x26   :  { %s16603_s25 = sld [smem:[%s21797_s0 + %s16455_s22]]   ;;  %s16459_s22 = smov 24  }
  0x27   :  { %22143 = sst [smem:[#allocation33_spill]] %s16593_s3 }
  0x28   :  { %s16608_s4 = sld [smem:[%s21797_s0 + %s16456_s28]]   ;;  %s16460_s28 = smov 25  }
  0x29   :  { %s16613_s27 = sld [smem:[%s21797_s0 + %s16457_s7]]   ;;  %s16461_s7 = smov 26  }
  0x2a   :  { %s16618_s20 = sld [smem:[%s21797_s0 + %s16458_s15]]   ;;  %s16462_s15 = smov 27  }
  0x2b   :  { %22144 = sst [smem:[#allocation34_spill]] %s16598_s29 }
  0x2c   :  { %22145 = sst [smem:[#allocation35_spill]] %s16603_s25 }
  0x2d   :  { %s16623_s25 = sld [smem:[%s21797_s0 + %s16459_s22]]   ;;  %s16463_s22 = smov 28  }
  0x2e   :  { %22146 = sst [smem:[#allocation36_spill]] %s16608_s4 }
  0x2f   :  { %22147 = sst [smem:[#allocation37_spill]] %s16613_s27 }
  0x30   :  { %22148 = sst [smem:[#allocation38_spill]] %s16618_s20 }
  0x31   :  { %s16628_s4 = sld [smem:[%s21797_s0 + %s16460_s28]]   ;;  %s16464_s28 = smov 29  }
  0x32   :  { %s16633_s29 = sld [smem:[%s21797_s0 + %s16461_s7]]   ;;  %s16465_s7 = smov 30  }
  0x33   :  { %s16638_s20 = sld [smem:[%s21797_s0 + %s16462_s15]]   ;;  %s16466_s15 = smov 31  }
  0x34   :  { %s16643_s27 = sld [smem:[%s21797_s0 + %s16463_s22]]   ;;  %s16467_s22 = smov 32  }
  0x35   :  { %s16648_s17 = sld [smem:[%s21797_s0 + %s16464_s28]]   ;;  %s16468_s28 = smov 33  }
  0x36   :  { %s16653_s21 = sld [smem:[%s21797_s0 + %s16465_s7]]   ;;  %s16469_s7 = smov 34  }
  0x37   :  { %s16658_s3 = sld [smem:[%s21797_s0 + %s16466_s15]]   ;;  %s16470_s15 = smov 35  }
  0x38   :  { %s16663_s12 = sld [smem:[%s21797_s0 + %s16467_s22]]   ;;  %s16471_s22 = smov 36  }
  0x39   :  { %s16668_s6 = sld [smem:[%s21797_s0 + %s16468_s28]]   ;;  %s16472_s28 = smov 37  }
  0x3a   :  { %s16673_s24 = sld [smem:[%s21797_s0 + %s16469_s7]]   ;;  %s16473_s7 = smov 38  }
  0x3b   :  { %s16678_s13 = sld [smem:[%s21797_s0 + %s16470_s15]]   ;;  %s16474_s15 = smov 39  }
  0x3c   :  { %s16683_s30 = sld [smem:[%s21797_s0 + %s16471_s22]]   ;;  %s16475_s22 = smov 40  }
  0x3d   :  { %22149 = sst [smem:[#allocation39_spill]] %s16658_s3 }
  0x3e   :  { %22150 = sst [smem:[#allocation40_spill]] %s16663_s12 }
  0x3f   :  { %22151 = sst [smem:[#allocation41_spill]] %s16668_s6 }
  0x40   :  { %22152 = sst [smem:[#allocation42_spill]] %s16673_s24 }
  0x41   :  { %22153 = sst [smem:[#allocation43_spill]] %s16678_s13 }
  0x42   :  { %22154 = sst [smem:[#allocation44_spill]] %s16683_s30 }
  0x43   :  { %s16688_s6 = sld [smem:[%s21797_s0 + %s16472_s28]]   ;;  %s16476_s28 = smov 41  }
  0x44   :  { %s16693_s24 = sld [smem:[%s21797_s0 + %s16473_s7]]   ;;  %s16477_s7 = smov 42  }
  0x45   :  { %s16698_s13 = sld [smem:[%s21797_s0 + %s16474_s15]]   ;;  %s16478_s15 = smov 43  }
  0x46   :  { %s16703_s12 = sld [smem:[%s21797_s0 + %s16475_s22]]   ;;  %s16479_s22 = smov 44  }
  0x49   :  { %22155 = sst [smem:[#allocation45_spill]] %s16688_s6 }
  0x4a   :  { %22156 = sst [smem:[#allocation46_spill]] %s16693_s24 }
  0x4b   :  { %22157 = sst [smem:[#allocation47_spill]] %s16698_s13 }
  0x4c   :  { %22158 = sst [smem:[#allocation48_spill]] %s16703_s12 }
  0x4d   :  { %s16708_s6 = sld [smem:[%s21797_s0 + %s16476_s28]]   ;;  %s16480_s28 = smov 45  }
  0x4e   :  { %s16713_s24 = sld [smem:[%s21797_s0 + %s16477_s7]]   ;;  %s16481_s7 = smov 46  }
  0x4f   :  { %s16718_s13 = sld [smem:[%s21797_s0 + %s16478_s15]]   ;;  %s16482_s15 = smov 47  }
  0x50   :  { %s16723_s12 = sld [smem:[%s21797_s0 + %s16479_s22]]   ;;  %s16483_s22 = smov 48  }
  0x51   :  { %s16733_s30 = sld [smem:[%s21797_s0 + %s16481_s7]]   ;;  %s16485_s7 = smov 50  }
  0x52   :  { %s16738_s3 = sld [smem:[%s21797_s0 + %s16482_s15]]  }
  0x53   :  { %22159 = sst [smem:[#allocation49_spill]] %s16708_s6 }
  0x54   :  { %22160 = sst [smem:[#allocation50_spill]] %s16713_s24 }
  0x55   :  { %22161 = sst [smem:[#allocation51_spill]] %s16718_s13 }
  0x56   :  { %22162 = sst [smem:[#allocation52_spill]] %s16723_s12 }
  0x57   :  { %s16728_s6 = sld [smem:[%s21797_s0 + %s16480_s28]]   ;;  %s16484_s28 = smov 49  }
  0x58   :  { %22164 = sst [smem:[#allocation54_spill]] %s16733_s30 }
  0x59   :  { %22165 = sst [smem:[#allocation55_spill]] %s16738_s3 }
  0x5a   :  { %s16743_s12 = sld [smem:[%s21797_s0 + %s16483_s22]]  }
  0x5b   :  { %s16748_s19 = sld [smem:[%s21797_s0 + %s16484_s28]]  }
  0x5c   :  { %s16753_s30 = sld [smem:[%s21797_s0 + %s16485_s7]]  }
  0x5d   :  { %22163 = sst [smem:[#allocation53_spill]] %s16728_s6 }
  0x60   :  { %22166 = sst [smem:[#allocation56_spill]] %s16743_s12 }
  0x61   :  { %22167 = sst [smem:[#allocation57_spill]] %s16748_s19 }
  0x62   :  { %22168 = sst [smem:[#allocation58_spill]] %s16753_s30 }
  0x63   :  { %106 = vsyncpa [#allocation3], 0 }
  0x64   :  { %107 = vsyncpa [#allocation5], 0 }
  0x65   :  { %108 = vsyncpa [#allocation8], 0 }
  0x66   :  { %109 = vsyncpa [#allocation11], 0  ;;  %s16755_s15 = smov 0  }
  0x67 LB: > { %s22169_s24 = sld [smem:[#allocation50_spill]]  ;;  %s22170_s19 = sld [smem:[#allocation57_spill]]  ;;  %s16434_s15 = sphi %s16755_s15, %s115_s15  }
  0x68   : > { %s22171_s14 = sld [smem:[#allocation24_spill]]  ;;  %s22172_s13 = sld [smem:[#allocation51_spill]] }
  0x69   : > { %s22173_s12 = sld [smem:[#allocation56_spill]]  ;;  %s22174_s6 = sld [smem:[#allocation53_spill]] }
  0x6a   : > { %s22175_s3 = sld [smem:[#allocation55_spill]]  ;;  %22176 = sst [smem:[#allocation59_spill]] %s16434_s15 }
  0x6b   : > { %s16761_s16 = sadd.s32 4294967295, %s16434_s15   ;;  %p12167_p0 = scmp.ge.s32.totalorder %s16434_s15, 1 }
  0x6c   : > { %p1236_p1 = scmp.lt.s32.totalorder %s16434_s15, 3  ;;  %p21825_p2 = scmp.eq.s32.totalorder %s16761_s16, 0 }
  0x6d   : > { %s16486_s18 = smov [#allocation4]   ;;  %s16487_s23 = smov [#allocation7]  }
  0x6e   : > { %p16766_p3 = pnand %p12167_p0, %p1236_p1  ;;  %s1363_s22 = sshll.u32 %s16486_s18, 4  ;;  %s16770_s22 = int_to_ptr.vmem [resolvable:$true] %s1363_s22 }
  0x6f   : > { %s1395_s26 = sshll.u32 %s16487_s23, 4  ;;  %s16488_s1 = smov [#allocation2]   ;;  %s16774_s26 = int_to_ptr.vmem [resolvable:$true] %s1395_s26 }
  0x70   : > { %s22177_s0 = scalar_select %p16766_p3, 1, 0 }
  0x71   : > { %p15692_p4 = pneg %p16766_p3  ;;  %s1350_s2 = sshll.u32 %s16488_s1, 4  ;;  %s16782_s2 = int_to_ptr.vmem [resolvable:$true] %s1350_s2 }
  0x72   : > { %s16489_s7 = smov [#allocation6]   ;;  %s16244_s11 = scalar_lea.hbm %s22172_s13, 32 }
  0x73   : > { %p16778_p5 = pnand %p21825_p2, %p15692_p4  ;;  %s16784_s10 = sshll.u32 %s16489_s7, 4  ;;  %s1380_s10 = int_to_ptr.vmem [resolvable:$true] %s16784_s10 }
  0x74   : > { %p16245_p6 = scmp.ne.s32.totalorder %s22172_s13, %s16244_s11  ;;  %p16251_p10 = scmp.lt.u32.totalorder %s16244_s11, %s22172_s13 }
  0x75   : > { %p16790_p7 = pneg %p16778_p5 }
  0x77   : > { %p16247_p8 = pnand %p16790_p7, %p16245_p6 }
  0x79   : > { %p16248_p9 = pneg %p16247_p8 }
  0x7b   : > { %p16253_p11 = pnand %p16251_p10, %p16248_p9 }
  0x7d   : > { %16256 = shalt.err (!%p16253_p11)
}
  0x7e   : > { %s16257_s23 = scalar_lea.vmem %s16770_s22, 32  ;;  %p16265_p1 = scmp.lt.s32.totalorder %s16770_s22, %s16770_s22 }
  0x7f   : > { %p16258_p12 = scmp.ne.s32.totalorder %s16770_s22, %s16257_s23  ;;  %p16266_p4 = scmp.lt.s32.totalorder %s16257_s23, %s16257_s23 }
  0x81   : > { %p16260_p13 = pnand %p16258_p12, %p16790_p7  ;;  %p16267_p2 = por %p16266_p4, %p16265_p1 }
  0x83   : > { %p16261_p0 = pneg %p16260_p13 }
  0x85   : > { %p16268_p3 = pnand %p16267_p2, %p16261_p0 }
  0x87   : > { %16271 = shalt.err (!%p16268_p3)
}
  0x88   : > { %s16490_s1 = smov 16   ;;  %s16491_s7 = smov 1  }
  0x89   : > { %15698 = dma.hbm_to_vmem [thread:$0]  (!%p16778_p5), %s22172_s13, 32, %s16770_s22, [#allocation5], %s16490_s1, %s16490_s1, %s16491_s7  }
  0x8a   : > { %s16272_s11 = scalar_lea.hbm %s22175_s3, 32 }
  0x8b   : > { %p16273_p6 = scmp.ne.s32.totalorder %s22175_s3, %s16272_s11  ;;  %p16279_p3 = scmp.lt.u32.totalorder %s16272_s11, %s22175_s3 }
  0x8d   : > { %p16275_p8 = pnand %p16273_p6, %p16790_p7 }
  0x8f   : > { %p16276_p2 = pneg %p16275_p8 }
  0x91   : > { %p16281_p9 = pnand %p16279_p3, %p16276_p2 }
  0x93   : > { %16284 = shalt.err (!%p16281_p9)
}
  0x94   : > { %s16285_s23 = scalar_lea.vmem %s16774_s26, 32  ;;  %p16293_p13 = scmp.lt.s32.totalorder %s16774_s26, %s16774_s26 }
  0x95   : > { %p16286_p10 = scmp.ne.s32.totalorder %s16774_s26, %s16285_s23  ;;  %p16294_p0 = scmp.lt.s32.totalorder %s16285_s23, %s16285_s23 }
  0x97   : > { %p16288_p11 = pnand %p16286_p10, %p16790_p7  ;;  %p16295_p1 = por %p16294_p0, %p16293_p13 }
  0x99   : > { %p16289_p12 = pneg %p16288_p11 }
  0x9b   : > { %p16296_p4 = pnand %p16295_p1, %p16289_p12 }
  0x9d   : > { %16299 = shalt.err (!%p16296_p4)
}
  0x9e   : > { %15704 = dma.hbm_to_vmem [thread:$0]  (!%p16778_p5), %s22175_s3, 32, %s16774_s26, [#allocation8], %s16490_s1, %s16490_s1, %s16491_s7  }
  0x9f   : > { %s16300_s22 = scalar_lea.hbm %s22169_s24, 32 }
  0xa0   : > { %p16301_p6 = scmp.ne.s32.totalorder %s22169_s24, %s16300_s22  ;;  %p16307_p3 = scmp.lt.u32.totalorder %s16300_s22, %s22169_s24 }
  0xa2   : > { %p16303_p8 = pnand %p16301_p6, %p16790_p7 }
  0xa4   : > { %p16304_p2 = pneg %p16303_p8 }
  0xa6   : > { %p16309_p9 = pnand %p16307_p3, %p16304_p2 }
  0xa8   : > { %16312 = shalt.err (!%p16309_p9)
}
  0xa9   : > { %s16313_s11 = scalar_lea.vmem %s16782_s2, 32  ;;  %p16321_p13 = scmp.lt.s32.totalorder %s16782_s2, %s16782_s2 }
  0xaa   : > { %p16314_p10 = scmp.ne.s32.totalorder %s16782_s2, %s16313_s11  ;;  %p16322_p0 = scmp.lt.s32.totalorder %s16313_s11, %s16313_s11 }
  0xac   : > { %p16316_p11 = pnand %p16314_p10, %p16790_p7  ;;  %p16323_p1 = por %p16322_p0, %p16321_p13 }
  0xae   : > { %p16317_p12 = pneg %p16316_p11 }
  0xb0   : > { %p16324_p4 = pnand %p16323_p1, %p16317_p12 }
  0xb2   : > { %16327 = shalt.err (!%p16324_p4)
}
  0xb3   : > { %15695 = dma.hbm_to_vmem [thread:$0]  (!%p16778_p5), %s22169_s24, 32, %s16782_s2, [#allocation3], %s16490_s1, %s16490_s1, %s16491_s7  }
  0xb4   : > { %s16328_s26 = scalar_lea.hbm %s22174_s6, 32 }
  0xb5   : > { %p16329_p6 = scmp.ne.s32.totalorder %s22174_s6, %s16328_s26  ;;  %p16335_p3 = scmp.lt.u32.totalorder %s16328_s26, %s22174_s6 }
  0xb7   : > { %p16331_p8 = pnand %p16329_p6, %p16790_p7 }
  0xb9   : > { %p16332_p2 = pneg %p16331_p8 }
  0xbb   : > { %p16337_p9 = pnand %p16335_p3, %p16332_p2 }
  0xbd   : > { %16340 = shalt.err (!%p16337_p9)
}
  0xbe   : > { %s16341_s23 = scalar_lea.vmem %s1380_s10, 32  ;;  %p16349_p13 = scmp.lt.s32.totalorder %s1380_s10, %s1380_s10 }
  0xbf   : > { %p16342_p10 = scmp.ne.s32.totalorder %s1380_s10, %s16341_s23  ;;  %p16350_p0 = scmp.lt.s32.totalorder %s16341_s23, %s16341_s23 }
  0xc1   : > { %p16344_p11 = pnand %p16342_p10, %p16790_p7  ;;  %p16351_p1 = por %p16350_p0, %p16349_p13 }
  0xc3   : > { %p16345_p12 = pneg %p16344_p11 }
  0xc5   : > { %p16352_p4 = pnand %p16351_p1, %p16345_p12 }
  0xc7   : > { %16355 = shalt.err (!%p16352_p4)
}
  0xc8   : > { %15701 = dma.hbm_to_vmem [thread:$0]  (!%p16778_p5), %s22174_s6, 32, %s1380_s10, [#allocation5], %s16490_s1, %s16490_s1, %s16491_s7  }
  0xc9   : > { %s16492_s2 = smov [#allocation9]   ;;  %s16493_s11 = smov [#allocation10]  }
  0xca   : > { %s1408_s22 = sshll.u32 %s16492_s2, 4  ;;  %s1421_s26 = sshll.u32 %s16493_s11, 4  ;;  %s1409_s22 = int_to_ptr.vmem [resolvable:$true] %s1408_s22  ;;  %s1422_s26 = int_to_ptr.vmem [resolvable:$true] %s1421_s26 }
  0xcb   : > { %s16356_s23 = scalar_lea.hbm %s22173_s12, 32 }
  0xcc   : > { %p16357_p6 = scmp.ne.s32.totalorder %s22173_s12, %s16356_s23  ;;  %p16363_p3 = scmp.lt.u32.totalorder %s16356_s23, %s22173_s12 }
  0xce   : > { %p16359_p8 = pnand %p16357_p6, %p16790_p7 }
  0xd0   : > { %p16360_p2 = pneg %p16359_p8 }
  0xd2   : > { %p16365_p9 = pnand %p16363_p3, %p16360_p2 }
  0xd4   : > { %16368 = shalt.err (!%p16365_p9)
}
  0xd5   : > { %s16369_s3 = scalar_lea.vmem %s1409_s22, 32  ;;  %p16377_p13 = scmp.lt.s32.totalorder %s1409_s22, %s1409_s22 }
  0xd6   : > { %p16370_p10 = scmp.ne.s32.totalorder %s1409_s22, %s16369_s3  ;;  %p16378_p0 = scmp.lt.s32.totalorder %s16369_s3, %s16369_s3 }
  0xd8   : > { %p16372_p11 = pnand %p16370_p10, %p16790_p7  ;;  %p16379_p1 = por %p16378_p0, %p16377_p13 }
  0xda   : > { %p16373_p12 = pneg %p16372_p11 }
  0xdc   : > { %p16380_p4 = pnand %p16379_p1, %p16373_p12 }
  0xde   : > { %16383 = shalt.err (!%p16380_p4)
}
  0xdf   : > { %15707 = dma.hbm_to_vmem [thread:$0]  (!%p16778_p5), %s22173_s12, 32, %s1409_s22, [#allocation8], %s16490_s1, %s16490_s1, %s16491_s7  }
  0xe0   : > { %s16384_s10 = scalar_lea.hbm %s22170_s19, 32 }
  0xe1   : > { %p16385_p6 = scmp.ne.s32.totalorder %s22170_s19, %s16384_s10  ;;  %p16391_p3 = scmp.lt.u32.totalorder %s16384_s10, %s22170_s19 }
  0xe3   : > { %p16387_p8 = pnand %p16385_p6, %p16790_p7 }
  0xe5   : > { %p16388_p2 = pneg %p16387_p8 }
  0xe7   : > { %p16393_p9 = pnand %p16391_p3, %p16388_p2 }
  0xe9   : > { %16396 = shalt.err (!%p16393_p9)
}
  0xea   : > { %s16397_s3 = scalar_lea.vmem %s1422_s26, 32  ;;  %p16405_p13 = scmp.lt.s32.totalorder %s1422_s26, %s1422_s26 }
  0xeb   : > { %p16398_p10 = scmp.ne.s32.totalorder %s1422_s26, %s16397_s3  ;;  %p16406_p0 = scmp.lt.s32.totalorder %s16397_s3, %s16397_s3 }
  0xed   : > { %p16400_p11 = pnand %p16398_p10, %p16790_p7  ;;  %p16407_p1 = por %p16406_p0, %p16405_p13 }
  0xef   : > { %p16401_p12 = pneg %p16400_p11 }
  0xf1   : > { %p16408_p4 = pnand %p16407_p1, %p16401_p12 }
  0xf3   : > { %16411 = shalt.err (!%p16408_p4)
}
  0xf4   : > { %15710 = dma.hbm_to_vmem [thread:$0]  (!%p16778_p5), %s22170_s19, 32, %s1422_s26, [#allocation11], %s16490_s1, %s16490_s1, %s16491_s7  }
  0xf5   : > { %p22180_p6 = scmp.ne.s32.totalorder %s22177_s0, 0 }
  0xf7   : > { %1501 = sbr.rel (%p22180_p6) target bundleno = 9269 (0x2435), region = 220 }
  0xfe   : > { %p22181_p8 = scmp.eq.s32.totalorder %s16761_s16, 0 }
 0x100   : > { %16417 = dma.done.wait (%p22181_p8), [#allocation3], 32   ;;  %p22182_p7 = pmov %p22181_p8 }
 0x102   : > { %16419 = vsyncadd (%p22182_p7), [#allocation3], 4294967264  ;;  %p22183_p2 = pmov %p22182_p7 }
 0x104   : > { %16421 = dma.done.wait (%p22183_p2), [#allocation5], 64   ;;  %p22184_p3 = pmov %p22183_p2 }
 0x105   : > { %p22185_p9 = pmov %p22183_p2 }
 0x106   : > { %16423 = vsyncadd (%p22184_p3), [#allocation5], 4294967232 }
 0x107   : > { %16425 = dma.done.wait (%p22185_p9), [#allocation8], 64   ;;  %p22186_p5 = pmov %p22183_p2 }
 0x108   : > { %p22187_p10 = pmov %p22183_p2 }
 0x109   : > { %16427 = vsyncadd (%p22186_p5), [#allocation8], 4294967232 }
 0x10a   : > { %16429 = dma.done.wait (%p22187_p10), [#allocation11], 32   ;;  %p22188_p11 = pmov %p22183_p2 }
 0x10b   : > { %s22189_s5 = sld [smem:[#allocation16_spill]]  ;;  %s22190_s9 = sld [smem:[#allocation17_spill]]  ;;  %v1824_v0 = vld [vmem:[%s16633_s29] sm:$0xff]  ;;  %v1825_v1 = vld [vmem:[%s16633_s29 + $0x8] sm:$0xff]  ;;  %v1826_v2 = vld [vmem:[%s16633_s29 + $0x10] sm:$0xff]  ;;  %vm1893_vm0 = vcmask 261120  }
 0x10c   : > { %16431 = vsyncadd (%p22188_p11), [#allocation11], 4294967264  ;;  %p1674_p12 = scmp.lt.s32.totalorder %s16761_s16, 1  ;;  %v14831_v3 = vpack.c.bf16 %v1825_v1, %v1824_v0  ;;  %v1827_v4 = vld [vmem:[%s16633_s29 + $0x18] sm:$0xff]  ;;  %v1819_v13 = vld [vmem:[%s16623_s25] sm:$0xff]  ;;  %s22235_s1 = sld [smem:[#allocation25_spill]] }
 0x10d   : > { %v14835_v7 = vpack.c.bf16 %v1827_v4, %v1826_v2  ;;  %v1820_v15 = vld [vmem:[%s16623_s25 + $0x8] sm:$0xff]  ;;  %v1821_v16 = vld [vmem:[%s16623_s25 + $0x10] sm:$0xff]  ;;  %v1822_v17 = vld [vmem:[%s16623_s25 + $0x18] sm:$0xff]  ;;  %vm3106_vm2 = vcmask 64512   ;;  %s22252_s7 = sld [smem:[#allocation39_spill]]  ;;  %s22253_s2 = sld [smem:[#allocation44_spill]] }
 0x10e   : > { %s22844_s16 = smov (!%p1674_p12, %s16761_s16), 1  ;;  %14832 = vmatprep.subr.bf16.mxu1 %v14831_v3  ;;  %v14823_v22 = vpack.c.bf16 %v1820_v15, %v1819_v13  ;;  %v14827_v23 = vpack.c.bf16 %v1822_v17, %v1821_v16  ;;  %v1829_v25 = vld [vmem:[%s16643_s27] sm:$0xff]  ;;  %v1830_v26 = vld [vmem:[%s16643_s27 + $0x8] sm:$0xff]  ;;  %v1831_v34 = vld [vmem:[%s16643_s27 + $0x10] sm:$0xff]  ;;  %v22192_v13 = vmov 0  ;;  %s22254_s22 = sld [smem:[#allocation46_spill]] }
 0x10f   : > { %s16909_s0 = sshll.u32 %s22844_s16, 6  ;;  %14834 = vmatpush3.bf16.msra.mxu1 %v14831_v3  ;;  %v14839_v31 = vpack.c.bf16 %v1830_v26, %v1829_v25  ;;  %v1832_v35 = vld [vmem:[%s16643_s27 + $0x18] sm:$0xff]  ;;  %v1834_v42 = vld [vmem:[%s16653_s21] sm:$0xff]  ;;  %v1835_v43 = vld [vmem:[%s16653_s21 + $0x8] sm:$0xff]  ;;  %s22255_s11 = sld [smem:[#allocation40_spill]]  ;;  %vm3927_vm3 = vcmask 130048  }
 0x110   : > { %22191 = sst [smem:[#allocation60_spill]] %s16909_s0  ;;  %14836 = vmatprep.subr.bf16.mxu1 %v14835_v7  ;;  %14824 = vmatprep.subr.bf16.mxu0 %v14823_v22  ;;  %v14843_v40 = vpack.c.bf16 %v1832_v35, %v1831_v34  ;;  %v14847_v44 = vpack.c.bf16 %v1835_v43, %v1834_v42  ;;  %v1836_v45 = vld [vmem:[%s16653_s21 + $0x10] sm:$0xff]  ;;  %v1837_v46 = vld [vmem:[%s16653_s21 + $0x18] sm:$0xff]  ;;  %v16980_v48 = vld [vmem:[%s16638_s20] ss:$0 sm:$0xff]  ;;  %s22256_s26 = sld [smem:[#allocation41_spill]] }
 0x111   : > { %s16913_s28 = scalar_lea.vmem %s22189_s5, %s16909_s0  ;;  %s16917_s18 = scalar_lea.vmem %s22190_s9, %s16909_s0  ;;  %14826 = vmatpush3.bf16.msra.mxu0 %v14823_v22  ;;  %v14851_v47 = vpack.c.bf16 %v1837_v46, %v1836_v45  ;;  %v16983_v49 = vld [vmem:[%s16543_s8 + $0x8] sm:$0xff]  ;;  %v16989_v52 = vld [vmem:[%s16543_s8] sm:$0xff]  ;;  %v17013_v63 = vld [vmem:[%s16543_s8 + $0x18] sm:$0xff]  ;;  %vm4584_vm4 = vcmask 523264  }
 0x112   : > { %v16924_v5 = vld [vmem:[%s16913_s28] sm:$0xff]  ;;  %v1720_v9 = vld [vmem:[%s16913_s28 + $0x8] sm:$0xff]  ;;  %v1721_v11 = vld [vmem:[%s16913_s28 + $0x10] sm:$0xff]  ;;  %14828 = vmatprep.subr.bf16.mxu0 %v14827_v23  ;;  %s22258_s23 = sld [smem:[#allocation27_spill]]  ;;  %s22267_s10 = sld [smem:[#allocation42_spill]] }
 0x113   : > { %v1727_v6 = vld [vmem:[%s16917_s18] sm:$0xff]  ;;  %v1728_v10 = vld [vmem:[%s16917_s18 + $0x8] sm:$0xff]  ;;  %v1729_v12 = vld [vmem:[%s16917_s18 + $0x10] sm:$0xff]  ;;  %14838 = vmatpush3.bf16.msra.mxu1 %v14835_v7  ;;  %s22268_s3 = sld [smem:[#allocation18_spill]]  ;;  %s21850_s5 = smul.u32 80, %s22844_s16 }
 0x114   : > { %v1879_v8 = vadd.f32 %v1727_v6, %v16924_v5  ;;  %v1880_v14 = vadd.f32 %v1728_v10, %v1720_v9  ;;  %v1881_v18 = vadd.f32 %v1729_v12, %v1721_v11  ;;  %v1722_v19 = vld [vmem:[%s16913_s28 + $0x18] sm:$0xff]  ;;  %v1723_v21 = vld [vmem:[%s16913_s28 + $0x20] sm:$0xff]  ;;  %v1724_v29 = vld [vmem:[%s16913_s28 + $0x28] sm:$0xff]  ;;  %14848 = vmatprep.subr.bf16.mxu1 %v14847_v44  ;;  %s22271_s9 = sld [smem:[#allocation45_spill]]  ;;  %s22291_s19 = smul.u32 80, %s22844_s16 }
 0x115   : > { %v1730_v20 = vld [vmem:[%s16917_s18 + $0x18] sm:$0xff]  ;;  %v1731_v24 = vld [vmem:[%s16917_s18 + $0x20] sm:$0xff]  ;;  %v1732_v30 = vld [vmem:[%s16917_s18 + $0x28] sm:$0xff]  ;;  %14830 = vmatpush3.bf16.msra.mxu0 %v14827_v23  ;;  %s22275_s12 = sld [smem:[#allocation29_spill]]  ;;  %s22394_s16 = sld [smem:[#allocation30_spill]] }
 0x116   : > { %13933 = vmatprep.mubr.msk.f32.mxu1 %vm1893_vm0, %v1879_v8  ;;  %13913 = vmatprep.mubr.msk.f32.mxu0 %vm1893_vm0, %v1879_v8  ;;  %v1882_v27 = vadd.f32 %v1730_v20, %v1722_v19  ;;  %v1883_v28 = vadd.f32 %v1731_v24, %v1723_v21  ;;  %v1725_v32 = vld [vmem:[%s16913_s28 + $0x30] sm:$0xff]  ;;  %v1884_v36 = vadd.f32 %v1732_v30, %v1724_v29  ;;  %v1726_v38 = vld [vmem:[%s16913_s28 + $0x38] sm:$0xff]  ;;  %v16986_v50 = vld [vmem:[%s16543_s8 + $0x48] sm:$0xff]  ;;  %s22292_s24 = sld [smem:[#allocation37_spill]]  ;;  %s22527_s30 = sld [smem:[#allocation52_spill]] }
 0x117   : > { %13934 = vmatmul.mubr.msk.f32.vlgmr.msra.gmra.mrb[0].mxu1 %vm1893_vm0, %v1880_v14  ;;  %v1733_v33 = vld [vmem:[%s16917_s18 + $0x30] sm:$0xff]  ;;  %v1734_v39 = vld [vmem:[%s16917_s18 + $0x38] sm:$0xff]  ;;  %14840 = vmatprep.subr.bf16.mxu0 %v14839_v31  ;;  %v16992_v53 = vld [vmem:[%s16543_s8 + $0x88] sm:$0xff] }
 0x118   : > { %13936 = vmatprep.mubr.msk.f32.mxu1 %vm1893_vm0, %v1881_v18  ;;  %v1885_v37 = vadd.f32 %v1733_v33, %v1725_v32  ;;  %13914 = vmatmul.mubr.msk.f32.vlgmr.msra.gmra.mrb[0].mxu0 %vm1893_vm0, %v1880_v14  ;;  %v1886_v41 = vadd.f32 %v1734_v39, %v1726_v38  ;;  %v16995_v54 = vld [vmem:[%s16543_s8 + $0xc8] sm:$0xff]  ;;  %v16999_v56 = vld [vmem:[%s16543_s8 + $0x40] sm:$0xff]  ;;  %v17016_v0 = vld [vmem:[%s16543_s8 + $0x58] sm:$0xff] }
 0x119   : > { %13916 = vmatprep.mubr.msk.f32.mxu0 %vm1893_vm0, %v1881_v18  ;;  %14842 = vmatpush3.bf16.msra.mxu0 %v14839_v31  ;;  %v17002_v58 = vld [vmem:[%s16543_s8 + $0x80] sm:$0xff]  ;;  %v17027_v6 = vld [vmem:[%s16543_s8 + $0x10] sm:$0xff]  ;;  %vm17042_vm1 = vmpackc.low %vm1893_vm0, %vm1893_vm0  ;;  %s17933_s6 = scalar_lea.vmem %s22268_s3, %s21850_s5  ;;  %s22273_s3 = sld [smem:[#allocation47_spill]] }
 0x11a   : > { %14844 = vmatprep.subr.bf16.mxu0 %v14843_v40  ;;  %14850 = vmatpush3.bf16.msra.mxu1 %v14847_v44  ;;  %v17005_v59 = vld [vmem:[%s16543_s8 + $0xc0] sm:$0xff]  ;;  %v17030_v7 = vld [vmem:[%s16543_s8 + $0x50] sm:$0xff]  ;;  %v22193_v13 = vsel %vm17042_vm1, 4294967295, %v22192_v13  ;;  %v17056_v20 = vld [vmem:[%s16543_s8 + $0xd8] sm:$0xff]  ;;  %s22274_s5 = sld [smem:[#allocation28_spill]] }
 0x11b   : > { %13937 = vmatmul.mubr.msk.f32.gmra.mrb[2].mxu1 %vm1893_vm0, %v1882_v27  ;;  %14852 = vmatprep.subr.bf16.mxu1 %v14851_v47  ;;  %22194 = vst [vmem:[#allocation61_spill] sm:$0xff] %v22193_v13  ;;  %v17047_v14 = vld [vmem:[%s16543_s8 + $0x90] sm:$0xff]  ;;  %22195 = vst [vmem:[#allocation62_spill] sm:$0xff] %v17056_v20  ;;  %v17068_v24 = vld [vmem:[%s16543_s8 + $0x28] sm:$0xff] }
 0x11c   : > { %13939 = vmatprep.mubr.msk.f32.mxu1 %vm1893_vm0, %v1883_v28  ;;  %13917 = vmatmul.mubr.msk.f32.gmra.mrb[2].mxu0 %vm1893_vm0, %v1882_v27  ;;  %v17050_v15 = vld [vmem:[%s16543_s8 + $0xd0] sm:$0xff]  ;;  %v17084_v30 = vld [vmem:[%s16543_s8 + $0x68] sm:$0xff]  ;;  %v17088_v33 = vld [vmem:[%s16543_s8 + $0x20] sm:$0xff] }
 0x11d   : > { %13919 = vmatprep.mubr.msk.f32.mxu0 %vm1893_vm0, %v1883_v28  ;;  %14846 = vmatpush3.bf16.msra.mxu0 %v14843_v40  ;;  %v17091_v34 = vld [vmem:[%s16543_s8 + $0xa8] sm:$0xff]  ;;  %v17103_v40 = vld [vmem:[%s16543_s8 + $0xa0] sm:$0xff] }
 0x11e   : > { %14854 = vmatpush3.bf16.msra.mxu1 %v14851_v47  ;;  %v17109_v42 = vld [vmem:[%s16543_s8 + $0xe0] sm:$0xff] }
 0x11f   : > { %13940 = vmatmul.mubr.msk.f32.gmra.mrb[4].mxu1 %vm1893_vm0, %v1884_v36  ;;  %22196 = vst [vmem:[#allocation63_spill] sm:$0xff] %v17109_v42 }
 0x120   : > { %13942 = vmatprep.mubr.msk.f32.mxu1 %vm1893_vm0, %v1885_v37  ;;  %13920 = vmatmul.mubr.msk.f32.gmra.mrb[4].mxu0 %vm1893_vm0, %v1884_v36 }
 0x121   : > { %13922 = vmatprep.mubr.msk.f32.mxu0 %vm1893_vm0, %v1885_v37 }
 0x123   : > { %13943 = vmatmul.mubr.msk.f32.gmra.mrb[6].mxu1 %vm1893_vm0, %v1886_v41 }
 0x124   : > { %13923 = vmatmul.mubr.msk.f32.gmra.mrb[6].mxu0 %vm1893_vm0, %v1886_v41 }
 0x125   : > { %13953 = vmatprep.mubr.msk.f32.mxu0 %vm1893_vm0, %v16924_v5 }
 0x128   : > { %13954 = vmatmul.mubr.msk.f32.vlgmr.msra.gmra.mrb[8].mxu0 %vm1893_vm0, %v1720_v9  ;;  %v17034_v9 = vld [vmem:[%s16543_s8 + $0x98] sm:$0xff] }
 0x129   : > { %13956 = vmatprep.mubr.msk.f32.mxu0 %vm1893_vm0, %v1721_v11 }
 0x12c   : > { %13957 = vmatmul.mubr.msk.f32.gmra.mrb[10].mxu0 %vm1893_vm0, %v1722_v19 }
 0x12d   : > { %13959 = vmatprep.mubr.msk.f32.mxu0 %vm1893_vm0, %v1723_v21  ;;  %v17059_v21 = vld [vmem:[%s16628_s4] ss:$0 sm:$0xff] }
 0x130   : > { %13960 = vmatmul.mubr.msk.f32.gmra.mrb[12].mxu0 %vm1893_vm0, %v1724_v29 }
 0x131   : > { %13962 = vmatprep.mubr.msk.f32.mxu0 %vm1893_vm0, %v1725_v32 }
 0x134   : > { %13963 = vmatmul.mubr.msk.f32.gmra.mrb[14].mxu0 %vm1893_vm0, %v1726_v38  ;;  %v17100_v38 = vld [vmem:[%s16543_s8 + $0x60] sm:$0xff] }
 0x1ea   : > { %v13935_v51 = vpop.f32.mrb[0].mxu1 }
 0x1eb   : > { %v2101_v55 = vadd.f32 %v13935_v51, %v16980_v48  ;;  %v2095_v57 = vpop.f32.mrb[1].mxu1  ;;  %v17073_v27 = vpop.f32.mrb[0].mxu0  ;;  %v17120_v51 = vld [vmem:[%s16543_s8 + $0xe8] sm:$0xff] }
 0x1ec   : > { %v2096_v60 = vadd.f32 %v16980_v48, %v2095_v57  ;;  %v1984_v36 = vpop.f32.mrb[1].mxu0  ;;  %22197 = vst [vmem:[#allocation64_spill] sm:$0xff] %v17120_v51 }
 0x1ed   : > { %v2270_v61 = vmul.f32 %v2101_v55, %v16983_v49  ;;  %v17010_v62 = vmul.f32 %v2101_v55, %v16986_v50  ;;  %v2286_v1 = vmul.f32 %v2101_v55, %v16992_v53  ;;  %v17020_v2 = vmul.f32 %v2101_v55, %v16995_v54 }
 0x1ee   : > { %v2269_v3 = vmul.f32 %v2096_v60, %v16989_v52  ;;  %v17024_v4 = vmul.f32 %v2096_v60, %v16999_v56  ;;  %v13938_v5 = vpop.f32.mrb[2].mxu1  ;;  %v2285_v8 = vmul.f32 %v2096_v60, %v17002_v58  ;;  %v17037_v10 = vmul.f32 %v2096_v60, %v17005_v59  ;;  %v17127_v60 = vld [vmem:[%s16543_s8 + $0x38] sm:$0xff] }
 0x1ef   : > { %v2111_v11 = vadd.f32 %v13938_v5, %v16980_v48  ;;  %v2105_v12 = vpop.f32.mrb[3].mxu1  ;;  %v17112_v43 = vadd.f32 %v17059_v21, %v1984_v36  ;;  %v17158_v36 = vld [vmem:[%s16543_s8 + $0xb0] sm:$0xff] }
 0x1f0   : > { %v2106_v16 = vadd.f32 %v16980_v48, %v2105_v12  ;;  %v14855_v17 = vpack.c.bf16 %v2286_v1, %v2285_v8  ;;  %v14858_v18 = vpack.c.bf16 %v2270_v61, %v2269_v3  ;;  %v13918_v3 = vpop.f32.mrb[2].mxu0 }
 0x1f1   : > { %v17062_v22 = vmul.f32 %v2111_v11, %v17013_v63  ;;  %v17065_v23 = vmul.f32 %v2111_v11, %v17016_v0  ;;  %v2288_v25 = vmul.f32 %v2111_v11, %v17034_v9  ;;  %v17106_v41 = vmul.f32 %v2111_v11, %v17056_v20  ;;  %12913 = vmatprep.mubr.msk.f32.mxu0 %vm1893_vm0, %v17112_v43  ;;  %v17141_v11 = vld [vmem:[%s16543_s8 + $0x78] sm:$0xff] }
 0x1f2   : > { %v17076_v28 = vmul.f32 %v2106_v16, %v17027_v6  ;;  %v17079_v29 = vmul.f32 %v2106_v16, %v17030_v7  ;;  %14857 = vmatprep.subr.msk.bf16.mxu0 %vm17042_vm1, %v14855_v17  ;;  %v13941_v31 = vpop.f32.mrb[4].mxu1  ;;  %v2287_v32 = vmul.f32 %v2106_v16, %v17047_v14  ;;  %v17094_v35 = vmul.f32 %v2106_v16, %v17050_v15  ;;  %v17145_v17 = vld [vmem:[%s16543_s8 + $0x30] sm:$0xff] }
 0x1f3   : > { %14860 = vmatpush3.bf16.xpose.msk.msra.mxu0 %vm17042_vm1, %v14858_v18  ;;  %v2121_v37 = vadd.f32 %v13941_v31, %v16980_v48  ;;  %v2115_v39 = vpop.f32.mrb[5].mxu1  ;;  %v17148_v18 = vld [vmem:[%s16543_s8 + $0xb8] sm:$0xff]  ;;  %v17155_v31 = vld [vmem:[%s16543_s8 + $0x70] sm:$0xff]  ;;  %v17167_v47 = vadd.f32 %v13918_v3, %v17059_v21 }
 0x1f4   : > { %v14861_v44 = vpack.c.bf16 %v2288_v25, %v2287_v32  ;;  %v2116_v45 = vadd.f32 %v16980_v48, %v2115_v39  ;;  %v14864_v46 = vpack.c.bf16 %v17062_v22, %v17076_v28  ;;  %v1994_v25 = vpop.f32.mrb[3].mxu0 }
 0x1f5   : > { %v2274_v55 = vmul.f32 %v2121_v37, %v17068_v24  ;;  %v17124_v57 = vmul.f32 %v2121_v37, %v17084_v30  ;;  %v2290_v61 = vmul.f32 %v2121_v37, %v17091_v34  ;;  %v17161_v39 = vmul.f32 %v2121_v37, %v17120_v51  ;;  %22199 = vst [vmem:[#allocation66_spill] sm:$0xff] %v17167_v47  ;;  %v13921_v47 = vpop.f32.mrb[4].mxu0 }
 0x1f6   : > { %14863 = vmatprep.subr.msk.bf16.mxu0 %vm17042_vm1, %v14861_v44  ;;  %v2273_v5 = vmul.f32 %v2116_v45, %v17088_v33  ;;  %v17138_v8 = vmul.f32 %v2116_v45, %v17100_v38  ;;  %v13944_v12 = vpop.f32.mrb[6].mxu1  ;;  %v2289_v16 = vmul.f32 %v2116_v45, %v17103_v40  ;;  %v17151_v22 = vmul.f32 %v2116_v45, %v17109_v42  ;;  %v17164_v44 = vld [vmem:[%s16543_s8 + $0xf0] sm:$0xff]  ;;  %v17176_v42 = vld [vmem:[%s16543_s8 + $0xf8] sm:$0xff] }
 0x1f7   : > { %v2131_v28 = vadd.f32 %v13944_v12, %v16980_v48  ;;  %v2125_v32 = vpop.f32.mrb[7].mxu1  ;;  %22198 = vst [vmem:[#allocation65_spill] sm:$0xff] %v17164_v44  ;;  %v17170_v1 = vadd.f32 %v17059_v21, %v1994_v25  ;;  %22201 = vst [vmem:[#allocation68_spill] sm:$0xff] %v17176_v42  ;;  %v17199_v19 = vadd.f32 %v13921_v47, %v17059_v21 }
 0x1f8   : > { %v14867_v45 = vpack.c.bf16 %v2290_v61, %v2289_v16  ;;  %v2126_v26 = vadd.f32 %v16980_v48, %v2125_v32  ;;  %v14870_v12 = vpack.c.bf16 %v2274_v55, %v2273_v5  ;;  %v2004_v16 = vpop.f32.mrb[5].mxu0 }
 0x1f9   : > { %22200 = vst [vmem:[#allocation67_spill] sm:$0xff] %v17170_v1  ;;  %v2276_v37 = vmul.f32 %v2131_v28, %v17127_v60  ;;  %v17180_v51 = vmul.f32 %v2131_v28, %v17141_v11  ;;  %v2292_v3 = vmul.f32 %v2131_v28, %v17148_v18  ;;  %v17196_v32 = vmul.f32 %v2131_v28, %v17176_v42 }
 0x1fa   : > { %v2275_v61 = vmul.f32 %v2126_v26, %v17145_v17  ;;  %v17187_v48 = vmul.f32 %v2126_v26, %v17155_v31  ;;  %v2291_v55 = vmul.f32 %v2126_v26, %v17158_v36  ;;  %v17191_v5 = vmul.f32 %v2126_v26, %v17164_v44  ;;  %22202 = vst [vmem:[#allocation69_spill] sm:$0xff] %v17199_v19  ;;  %v13924_v44 = vpop.f32.mrb[6].mxu0 }
 0x1fb   : > { %14866 = vmatpush3.bf16.xpose.msk.msra.mxu0 %vm17042_vm1, %v14864_v46  ;;  %v17202_v25 = vadd.f32 %v17059_v21, %v2004_v16  ;;  %v17211_v28 = vadd.f32 %v13924_v44, %v17059_v21  ;;  %v2014_v47 = vpop.f32.mrb[7].mxu0  ;;  %v12216_v16 = vld [vmem:[%s16648_s17] ss:$0 sm:$0xff] }
 0x1fc   : > { %14869 = vmatprep.subr.msk.bf16.mxu0 %vm17042_vm1, %v14867_v45  ;;  %v14873_v20 = vpack.c.bf16 %v2292_v3, %v2291_v55  ;;  %v14876_v1 = vpack.c.bf16 %v2276_v37, %v2275_v61  ;;  %v14897_v46 = vpack.c.bf16 %v17196_v32, %v17191_v5  ;;  %v17214_v19 = vadd.f32 %v17059_v21, %v2014_v47  ;;  %v13955_v42 = vpop.f32.mrb[8].mxu0  ;;  %v2975_v5 = vld [vmem:[%s22171_s14 + $0x80] sm:$0xff]  ;;  %v2976_v32 = vld [vmem:[%s22171_s14 + $0x88] sm:$0xff] }
 0x1fd   : > { %22203 = vst [vmem:[#allocation70_spill] sm:$0xff] %v17202_v25  ;;  %v17217_v25 = vadd.f32 %v13955_v42, %v12216_v16  ;;  %v2230_v45 = vpop.f32.mrb[9].mxu0 }
 0x1fe   : > { %v17221_v37 = vadd.f32 %v12216_v16, %v2230_v45 }
 0x1ff   : > { %v2302_v44 = vmul.f32 %v17217_v25, %v16983_v49  ;;  %v13958_v3 = vpop.f32.mrb[10].mxu0 }
 0x200   : > { %v2301_v61 = vmul.f32 %v17221_v37, %v16989_v52  ;;  %v17229_v55 = vadd.f32 %v13958_v3, %v12216_v16  ;;  %v2240_v42 = vpop.f32.mrb[11].mxu0 }
 0x201   : > { %v17231_v47 = vadd.f32 %v12216_v16, %v2240_v42  ;;  %v2977_v42 = vld [vmem:[%s22171_s14 + $0x90] sm:$0xff] }
 0x202   : > { %13973 = vmatprep.mubr.msk.f32.mxu1 %vm1893_vm0, %v2301_v61 }
 0x203   : > { %14872 = vmatpush3.bf16.xpose.msk.msra.mxu0 %vm17042_vm1, %v14870_v12  ;;  %13974 = vmatmul.mubr.msk.f32.vlgmr.msra.gmra.mrb[8].mxu1 %vm1893_vm0, %v2302_v44  ;;  %v2304_v12 = vmul.f32 %v17229_v55, %v17013_v63  ;;  %v2303_v49 = vmul.f32 %v17231_v47, %v17027_v6  ;;  %v22204_v44 = vpack.c.bf16 %v17020_v2, %v17037_v10 }
 0x204   : > { %14875 = vmatprep.subr.msk.bf16.mxu0 %vm17042_vm1, %v14873_v20  ;;  %v13961_v20 = vpop.f32.mrb[12].mxu0 }
 0x205   : > { %v17239_v45 = vadd.f32 %v13961_v20, %v12216_v16  ;;  %v2250_v26 = vpop.f32.mrb[13].mxu0  ;;  %13976 = vmatprep.mubr.msk.f32.mxu1 %vm1893_vm0, %v2303_v49  ;;  %v2961_v20 = vld [vmem:[%s22171_s14 + $0x10] sm:$0xff]  ;;  %v2962_v49 = vld [vmem:[%s22171_s14 + $0x18] sm:$0xff] }
 0x206   : > { %v17243_v52 = vadd.f32 %v12216_v16, %v2250_v26 }
 0x207   : > { %13977 = vmatmul.mubr.msk.f32.gmra.mrb[10].mxu1 %vm1893_vm0, %v2304_v12  ;;  %v2306_v63 = vmul.f32 %v17239_v45, %v17068_v24  ;;  %v13964_v6 = vpop.f32.mrb[14].mxu0  ;;  %v2309_v24 = vmul.f32 %v17221_v37, %v16999_v56  ;;  %v2311_v56 = vmul.f32 %v17231_v47, %v17030_v7 }
 0x208   : > { %v2305_v3 = vmul.f32 %v17243_v52, %v17088_v33  ;;  %v2260_v26 = vpop.f32.mrb[15].mxu0  ;;  %v22205_v33 = vpack.c.bf16 %v17010_v62, %v17024_v4  ;;  %v2312_v62 = vmul.f32 %v17229_v55, %v17016_v0  ;;  %v2313_v4 = vmul.f32 %v17243_v52, %v17100_v38 }
 0x209   : > { %v17258_v61 = vadd.f32 %v12216_v16, %v2260_v26  ;;  %v2314_v0 = vmul.f32 %v17239_v45, %v17084_v30  ;;  %v22209_v38 = vpack.c.bf16 %v17124_v57, %v17138_v8  ;;  %v2318_v30 = vmul.f32 %v17217_v25, %v16992_v53 }
 0x20a   : > { %13979 = vmatprep.mubr.msk.f32.mxu1 %vm1893_vm0, %v2305_v3  ;;  %v2321_v57 = vmul.f32 %v17243_v52, %v17103_v40  ;;  %v22210_v8 = vpack.c.bf16 %v17180_v51, %v17187_v48  ;;  %v2322_v53 = vmul.f32 %v17239_v45, %v17091_v34  ;;  %v1990_v40 = vadd.f32 %v17073_v27, %v17059_v21  ;;  %v22211_v27 = vld [vmem:[#allocation67_spill] sm:$0xff]  ;;  %v22219_v48 = vld [vmem:[#allocation69_spill] sm:$0xff] }
 0x20b   : > { %14878 = vmatpush3.bf16.xpose.msk.msra.mxu0 %vm17042_vm1, %v14876_v1  ;;  %v17256_v1 = vadd.f32 %v13964_v6, %v12216_v16  ;;  %13980 = vmatmul.mubr.msk.f32.gmra.mrb[12].mxu1 %vm1893_vm0, %v2306_v63  ;;  %v2307_v10 = vmul.f32 %v17258_v61, %v17145_v17  ;;  %v22206_v16 = vpack.c.bf16 %v17106_v41, %v17094_v35  ;;  %v22214_v17 = vld [vmem:[#allocation66_spill] sm:$0xff]  ;;  %v2963_v63 = vld [vmem:[%s22171_s14 + $0x20] sm:$0xff]  ;;  %v2964_v6 = vld [vmem:[%s22171_s14 + $0x28] sm:$0xff] }
 0x20c   : > { %14881 = vmatprep.subr.msk.bf16.mxu0 %vm17042_vm1, %v22204_v44  ;;  %v22207_v35 = vpack.c.bf16 %v17065_v23, %v17079_v29  ;;  %v2315_v7 = vmul.f32 %v17258_v61, %v17155_v31  ;;  %v2317_v29 = vmul.f32 %v17221_v37, %v17002_v58  ;;  %v2319_v58 = vmul.f32 %v17231_v47, %v17047_v14  ;;  %v2981_v3 = vld [vmem:[%s22171_s14 + $0xb0] sm:$0xff] }
 0x20d   : > { %v2308_v2 = vmul.f32 %v17256_v1, %v17127_v60  ;;  %13982 = vmatprep.mubr.msk.f32.mxu1 %vm1893_vm0, %v2307_v10  ;;  %v2310_v60 = vmul.f32 %v17217_v25, %v16986_v50  ;;  %v22208_v50 = vpack.c.bf16 %v17161_v39, %v17151_v22  ;;  %v2316_v23 = vmul.f32 %v17256_v1, %v17141_v11  ;;  %v22213_v11 = vld [vmem:[#allocation63_spill] sm:$0xff]  ;;  %v22216_v22 = vld [vmem:[#allocation65_spill] sm:$0xff]  ;;  %v22218_v39 = vld [vmem:[#allocation68_spill] sm:$0xff] }
 0x20e   : > { %v2320_v41 = vmul.f32 %v17229_v55, %v17034_v9  ;;  %v2323_v9 = vmul.f32 %v17258_v61, %v17158_v36  ;;  %v2324_v14 = vmul.f32 %v17256_v1, %v17148_v18  ;;  %v2325_v51 = vmul.f32 %v17221_v37, %v17005_v59  ;;  %v22212_v59 = vld [vmem:[#allocation62_spill] sm:$0xff] }
 0x20f   : > { %13983 = vmatmul.mubr.msk.f32.gmra.mrb[14].mxu1 %vm1893_vm0, %v2308_v2  ;;  %v2326_v34 = vmul.f32 %v17217_v25, %v16995_v54  ;;  %v2327_v21 = vmul.f32 %v17231_v47, %v17050_v15  ;;  %v2329_v54 = vmul.f32 %v17243_v52, %v22213_v11  ;;  %v22215_v15 = vld [vmem:[#allocation64_spill] sm:$0xff]  ;;  %v2331_v31 = vmul.f32 %v17258_v61, %v22216_v22  ;;  %v22217_v36 = vld [vmem:[#allocation70_spill] sm:$0xff] }
 0x210   : > { %13985 = vmatprep.mubr.msk.f32.mxu1 %vm1893_vm0, %v2309_v24  ;;  %v2330_v18 = vmul.f32 %v17239_v45, %v22215_v15  ;;  %v2332_v25 = vmul.f32 %v17256_v1, %v22218_v39  ;;  %v17408_v37 = vpack.c.bf16 %v2976_v32, %v2975_v5  ;;  %v2978_v47 = vld [vmem:[%s22171_s14 + $0x98] sm:$0xff]  ;;  %v2980_v45 = vld [vmem:[%s22171_s14 + $0xa8] sm:$0xff]  ;;  %v17423_v52 = vpack.c.bf16 %v2962_v49, %v2961_v20  ;;  %v2965_v2 = vld [vmem:[%s22171_s14 + $0x30] sm:$0xff] }
 0x211   : > { %v17415_v12 = vpack.c.bf16 %v2978_v47, %v2977_v42  ;;  %v2982_v1 = vld [vmem:[%s22171_s14 + $0xb8] sm:$0xff]  ;;  %v17433_v26 = vpack.c.bf16 %v2964_v6, %v2963_v63  ;;  %v2983_v24 = vld [vmem:[%s22171_s14 + $0xc0] sm:$0xff] }
 0x212   : > { %22220 = vst [vmem:[#allocation67_spill] sm:$0xff] %v17408_v37  ;;  %14904 = vmatprep.subr.bf16.mxu1 %v17408_v37  ;;  %22223 = vst [vmem:[#allocation66_spill] sm:$0xff] %v17423_v52  ;;  %v17436_v61 = vpack.c.bf16 %v2982_v1, %v2981_v3  ;;  %v2966_v10 = vld [vmem:[%s22171_s14 + $0x38] sm:$0xff] }
 0x213   : > { %14884 = vmatpush3.bf16.xpose.msk.msra.mxu0 %vm17042_vm1, %v22205_v33  ;;  %13986 = vmatmul.mubr.msk.f32.gmra.mrb[16].mxu1 %vm1893_vm0, %v2310_v60  ;;  %22222 = vst [vmem:[#allocation63_spill] sm:$0xff] %v17415_v12  ;;  %22225 = vst [vmem:[#allocation65_spill] sm:$0xff] %v17433_v26  ;;  %v2984_v33 = vld [vmem:[%s22171_s14 + $0xc8] sm:$0xff]  ;;  %v5152_v37 = vld [vmem:[%s22292_s24 + $0x18] sm:$0xff] }
 0x214   : > { %14887 = vmatprep.subr.msk.bf16.mxu0 %vm17042_vm1, %v22206_v16  ;;  %13988 = vmatprep.mubr.msk.f32.mxu1 %vm1893_vm0, %v2311_v56  ;;  %22226 = vst [vmem:[#allocation70_spill] sm:$0xff] %v17436_v61  ;;  %v17443_v16 = vpack.c.bf16 %v2966_v10, %v2965_v2  ;;  %v17446_v60 = vpack.c.bf16 %v2984_v33, %v2983_v24  ;;  %v2967_v56 = vld [vmem:[%s22171_s14 + $0x40] sm:$0xff] }
 0x216   : > { %22227 = vst [vmem:[#allocation68_spill] sm:$0xff] %v17443_v16  ;;  %22228 = vst [vmem:[#allocation69_spill] sm:$0xff] %v17446_v60 }
 0x217   : > { %13989 = vmatmul.mubr.msk.f32.gmra.mrb[18].mxu1 %vm1893_vm0, %v2312_v62  ;;  %v2968_v62 = vld [vmem:[%s22171_s14 + $0x48] sm:$0xff] }
 0x218   : > { %13991 = vmatprep.mubr.msk.f32.mxu1 %vm1893_vm0, %v2313_v4  ;;  %v2985_v4 = vld [vmem:[%s22171_s14 + $0xd0] sm:$0xff] }
 0x21b   : > { %14890 = vmatpush3.bf16.xpose.msk.msra.mxu0 %vm17042_vm1, %v22207_v35  ;;  %13992 = vmatmul.mubr.msk.f32.gmra.mrb[20].mxu1 %vm1893_vm0, %v2314_v0  ;;  %v2986_v35 = vld [vmem:[%s22171_s14 + $0xd8] sm:$0xff] }
 0x21c   : > { %14893 = vmatprep.subr.msk.bf16.mxu0 %vm17042_vm1, %v22208_v50  ;;  %13994 = vmatprep.mubr.msk.f32.mxu1 %vm1893_vm0, %v2315_v7  ;;  %v17453_v50 = vpack.c.bf16 %v2968_v62, %v2967_v56  ;;  %v17456_v0 = vpack.c.bf16 %v2986_v35, %v2985_v4  ;;  %v2969_v7 = vld [vmem:[%s22171_s14 + $0x50] sm:$0xff] }
 0x21e   : > { %22229 = vst [vmem:[#allocation71_spill] sm:$0xff] %v17453_v50  ;;  %22230 = vst [vmem:[#allocation72_spill] sm:$0xff] %v17456_v0 }
 0x21f   : > { %13995 = vmatmul.mubr.msk.f32.gmra.mrb[22].mxu1 %vm1893_vm0, %v2316_v23  ;;  %v2970_v23 = vld [vmem:[%s22171_s14 + $0x58] sm:$0xff] }
 0x220   : > { %13997 = vmatprep.mubr.msk.f32.mxu1 %vm1893_vm0, %v2317_v29  ;;  %v2987_v29 = vld [vmem:[%s22171_s14 + $0xe0] sm:$0xff] }
 0x223   : > { %14896 = vmatpush3.bf16.xpose.msk.msra.mxu0 %vm17042_vm1, %v22209_v38  ;;  %13998 = vmatmul.mubr.msk.f32.gmra.mrb[24].mxu1 %vm1893_vm0, %v2318_v30  ;;  %v2988_v38 = vld [vmem:[%s22171_s14 + $0xe8] sm:$0xff]  ;;  %v17463_v30 = vpack.c.bf16 %v2970_v23, %v2969_v7  ;;  %v2971_v7 = vld [vmem:[%s22171_s14 + $0x60] sm:$0xff] }
 0x224   : > { %14899 = vmatprep.subr.msk.bf16.mxu0 %vm17042_vm1, %v14897_v46  ;;  %14000 = vmatprep.mubr.msk.f32.mxu1 %vm1893_vm0, %v2319_v58  ;;  %v2959_v46 = vld [vmem:[%s22171_s14] sm:$0xff]  ;;  %v17466_v58 = vpack.c.bf16 %v2988_v38, %v2987_v29  ;;  %v2972_v23 = vld [vmem:[%s22171_s14 + $0x68] sm:$0xff] }
 0x225   : > { %22231 = vst [vmem:[#allocation73_spill] sm:$0xff] %v17463_v30 }
 0x226   : > { %22232 = vst [vmem:[#allocation74_spill] sm:$0xff] %v17466_v58 }
 0x227   : > { %14001 = vmatmul.mubr.msk.f32.gmra.mrb[26].mxu1 %vm1893_vm0, %v2320_v41 }
 0x228   : > { %14003 = vmatprep.mubr.msk.f32.mxu1 %vm1893_vm0, %v2321_v57 }
 0x22b   : > { %14902 = vmatpush3.bf16.xpose.msk.msra.mxu0 %vm17042_vm1, %v22210_v8  ;;  %14004 = vmatmul.mubr.msk.f32.gmra.mrb[28].mxu1 %vm1893_vm0, %v2322_v53  ;;  %v3105_v8 = vld [vmem:[%s22235_s1 + $0x8] sm:$0xff] }
 0x22c   : > { %14006 = vmatprep.mubr.msk.f32.mxu1 %vm1893_vm0, %v2323_v9  ;;  %3131 = vmatprep.subr.mxu0 %v3105_v8 }
 0x22f   : > { %14007 = vmatmul.mubr.msk.f32.gmra.mrb[30].mxu1 %vm1893_vm0, %v2324_v14 }
 0x230   : > { %14009 = vmatprep.mubr.msk.f32.mxu1 %vm1893_vm0, %v2325_v51 }
 0x232   : > { %12914 = vmatmul.mubr.msk.f32.vlgmr.msra.gmra.mrb[16].mxu0 %vm1893_vm0, %v17112_v43  ;;  %v2328_v43 = vmul.f32 %v17229_v55, %v22212_v59  ;;  %v2960_v55 = vld [vmem:[%s22171_s14 + $0x8] sm:$0xff]  ;;  %v2974_v59 = vld [vmem:[%s22171_s14 + $0x78] sm:$0xff] }
 0x233   : > { %12915 = vmatprep.mubr.msk.f32.mxu0 %vm1893_vm0, %v1990_v40  ;;  %14010 = vmatmul.mubr.msk.f32.gmra.mrb[32].mxu1 %vm1893_vm0, %v2326_v34 }
 0x234   : > { %14012 = vmatprep.mubr.msk.f32.mxu1 %vm1893_vm0, %v2327_v21 }
 0x236   : > { %12916 = vmatmul.mubr.msk.f32.gmra.mrb[18].mxu0 %vm1893_vm0, %v1990_v40 }
 0x237   : > { %12917 = vmatprep.mubr.msk.f32.mxu0 %vm1893_vm0, %v22211_v27  ;;  %14013 = vmatmul.mubr.msk.f32.gmra.mrb[34].mxu1 %vm1893_vm0, %v2328_v43 }
 0x238   : > { %14015 = vmatprep.mubr.msk.f32.mxu1 %vm1893_vm0, %v2329_v54  ;;  %v2973_v54 = vld [vmem:[%s22171_s14 + $0x70] sm:$0xff] }
 0x23a   : > { %12918 = vmatmul.mubr.msk.f32.gmra.mrb[20].mxu0 %vm1893_vm0, %v22211_v27 }
 0x23b   : > { %12919 = vmatprep.mubr.msk.f32.mxu0 %vm1893_vm0, %v22214_v17  ;;  %14016 = vmatmul.mubr.msk.f32.gmra.mrb[36].mxu1 %vm1893_vm0, %v2330_v18 }
 0x23c   : > { %14018 = vmatprep.mubr.msk.f32.mxu1 %vm1893_vm0, %v2331_v31 }
 0x23e   : > { %12920 = vmatmul.mubr.msk.f32.gmra.mrb[22].mxu0 %vm1893_vm0, %v22214_v17 }
 0x23f   : > { %12921 = vmatprep.mubr.msk.f32.mxu0 %vm1893_vm0, %v22217_v36  ;;  %14019 = vmatmul.mubr.msk.f32.gmra.mrb[38].mxu1 %vm1893_vm0, %v2332_v25 }
 0x242   : > { %12922 = vmatmul.mubr.msk.f32.gmra.mrb[24].mxu0 %vm1893_vm0, %v22217_v36 }
 0x243   : > { %12923 = vmatprep.mubr.msk.f32.mxu0 %vm1893_vm0, %v22219_v48 }
 0x246   : > { %12924 = vmatmul.mubr.msk.f32.gmra.mrb[26].mxu0 %vm1893_vm0, %v22219_v48  ;;  %v2989_v48 = vld [vmem:[%s22171_s14 + $0xf0] sm:$0xff] }
 0x247   : > { %12925 = vmatprep.mubr.msk.f32.mxu0 %vm1893_vm0, %v17214_v19 }
 0x24a   : > { %12926 = vmatmul.mubr.msk.f32.gmra.mrb[28].mxu0 %vm1893_vm0, %v17214_v19  ;;  %v17413_v19 = vpack.c.bf16 %v2960_v55, %v2959_v46 }
 0x24b   : > { %12927 = vmatprep.mubr.msk.f32.mxu0 %vm1893_vm0, %v17211_v28 }
 0x24c   : > { %22221 = vst [vmem:[#allocation62_spill] sm:$0xff] %v17413_v19  ;;  %14906 = vmatpush3.bf16.msra.mxu1 %v17413_v19  ;;  %v5151_v19 = vld [vmem:[%s22292_s24 + $0x10] sm:$0xff] }
 0x24d   : > { %14908 = vmatprep.subr.bf16.mxu1 %v17415_v12  ;;  %v5168_v12 = vld [vmem:[%s22292_s24 + $0x98] sm:$0xff] }
 0x24e   : > { %12928 = vmatmul.mubr.msk.f32.gmra.mrb[30].mxu0 %vm1893_vm0, %v17211_v28  ;;  %v2979_v28 = vld [vmem:[%s22171_s14 + $0xa0] sm:$0xff] }
 0x24f   : > { %v17426_v44 = vpack.c.bf16 %v2980_v45, %v2979_v28 }
 0x250   : > { %14910 = vmatpush3.bf16.msra.mxu1 %v17423_v52 }
 0x251   : > { %22224 = vst [vmem:[#allocation64_spill] sm:$0xff] %v17426_v44  ;;  %14912 = vmatprep.subr.bf16.mxu1 %v17426_v44 }
 0x254   : > { %14914 = vmatpush3.bf16.msra.mxu1 %v17433_v26 }
 0x255   : > { %14916 = vmatprep.subr.bf16.mxu1 %v17436_v61 }
 0x258   : > { %14918 = vmatpush3.bf16.msra.mxu1 %v17443_v16 }
 0x259   : > { %14920 = vmatprep.subr.bf16.mxu1 %v17446_v60 }
 0x25c   : > { %14922 = vmatpush3.bf16.msra.mxu1 %v17453_v50 }
 0x25d   : > { %14924 = vmatprep.subr.bf16.mxu1 %v17456_v0 }
 0x260   : > { %14926 = vmatpush3.bf16.msra.mxu1 %v17463_v30 }
 0x261   : > { %14928 = vmatprep.subr.bf16.mxu1 %v17466_v58 }
 0x2d6   : > { %v17470_v41 = vpop.f32.mrb[8].mxu1 }
 0x2d7   : > { %v17472_v57 = vpop.f32.mrb[9].mxu1 }
 0x2da   : > { %v17476_v53 = vpop.f32.mrb[10].mxu1 }
 0x2db   : > { %v17478_v9 = vpop.f32.mrb[11].mxu1 }
 0x2de   : > { %v17482_v40 = vpop.f32.mrb[12].mxu1 }
 0x2df   : > { %v17484_v51 = vpop.f32.mrb[13].mxu1 }
 0x2e2   : > { %v17488_v21 = vpop.f32.mrb[14].mxu1 }
 0x2e3   : > { %v17490_v27 = vpop.f32.mrb[15].mxu1 }
 0x2e6   : > { %v17494_v43 = vpop.f32.mrb[16].mxu1 }
 0x2e7   : > { %v17496_v11 = vpop.f32.mrb[17].mxu1 }
 0x2ea   : > { %v17500_v17 = vpop.f32.mrb[18].mxu1 }
 0x2eb   : > { %v17502_v15 = vpop.f32.mrb[19].mxu1 }
 0x2ee   : > { %v17506_v22 = vpop.f32.mrb[20].mxu1 }
 0x2ef   : > { %v17508_v31 = vpop.f32.mrb[21].mxu1 }
 0x2f2   : > { %v17512_v39 = vpop.f32.mrb[22].mxu1 }
 0x2f3   : > { %v17514_v25 = vpop.f32.mrb[23].mxu1 }
 0x2f6   : > { %v13999_v5 = vpop.f32.mrb[24].mxu1 }
 0x2f7   : > { %v2575_v32 = vpop.f32.mrb[25].mxu1 }
 0x2f8   : > { %v14935_v46 = vpack.c.bf16 %v13999_v5, %v2575_v32  ;;  %v17562_v5 = vpack.c.bf16 %v2972_v23, %v2971_v7  ;;  %v2990_v7 = vld [vmem:[%s22171_s14 + $0xf8] sm:$0xff]  ;;  %s22290_s14 = sld [smem:[#allocation19_spill]] }
 0x2f9   : > { %v17583_v18 = vpack.c.bf16 %v2990_v7, %v2989_v48 }
 0x2fa   : > { %v17548_v56 = vpop.f32.mrb[26].mxu1  ;;  %22233 = vst [vmem:[#allocation75_spill] sm:$0xff] %v17562_v5  ;;  %14930 = vmatpush3.bf16.msra.mxu1 %v17562_v5 }
 0x2fb   : > { %v17552_v4 = vpop.f32.mrb[27].mxu1  ;;  %22234 = vst [vmem:[#allocation76_spill] sm:$0xff] %v17583_v18  ;;  %14932 = vmatprep.subr.bf16.mxu1 %v17583_v18 }
 0x2fe   : > { %v17558_v29 = vpop.f32.mrb[28].mxu1 }
 0x2ff   : > { %v17564_v32 = vpop.f32.mrb[29].mxu1 }
 0x305   : > { %v17518_v55 = vpop.f32.mrb[16].mxu0 }
 0x306   : > { %v17520_v42 = vpop.f32.mrb[17].mxu0 }
 0x307   : > { %v2887_v47 = vmax.f32 %v17518_v55, %v17520_v42 }
 0x309   : > { %2888 = vmax.xlane.f32.xlu0 %v2887_v47  ;;  %v17524_v20 = vpop.f32.mrb[18].mxu0  ;;  %v3104_v47 = vld [vmem:[%s22235_s1] sm:$0xff] }
 0x30a   : > { %v17526_v49 = vpop.f32.mrb[19].mxu0  ;;  %3132 = vmatpush1.msra.mxu0 %v3104_v47 }
 0x30b   : > { %v2890_v28 = vmax.f32 %v17524_v20, %v17526_v49 }
 0x30d   : > { %2891 = vmax.xlane.f32.xlu0 %v2890_v28  ;;  %v17530_v45 = vpop.f32.mrb[20].mxu0  ;;  %v17591_v28 = vpack.c.bf16 %v2974_v59, %v2973_v54 }
 0x30e   : > { %v17532_v63 = vpop.f32.mrb[21].mxu0 }
 0x30f   : > { %v2893_v6 = vmax.f32 %v17530_v45, %v17532_v63  ;;  %22236 = vst [vmem:[#allocation77_spill] sm:$0xff] %v17591_v28  ;;  %14934 = vmatpush3.bf16.msra.mxu1 %v17591_v28 }
 0x310   : > { %14936 = vmatprep.subr.bf16.mxu1 %v14935_v46 }
 0x311   : > { %2894 = vmax.xlane.f32.xlu1 %v2893_v6  ;;  %v17536_v3 = vpop.f32.mrb[22].mxu0  ;;  %v17570_v6 = vpop.f32.mrb[30].mxu1 }
 0x312   : > { %v17538_v1 = vpop.f32.mrb[23].mxu0 }
 0x313   : > { %v2896_v2 = vmax.f32 %v17536_v3, %v17538_v1 }
 0x315   : > { %2897 = vmax.xlane.f32.xlu1 %v2896_v2  ;;  %v17542_v10 = vpop.f32.mrb[24].mxu0 }
 0x316   : > { %v17544_v24 = vpop.f32.mrb[25].mxu0 }
 0x317   : > { %v2899_v33 = vmax.f32 %v17542_v10, %v17544_v24 }
 0x319   : > { %2900 = vmax.xlane.f32.xlu0 %v2899_v33  ;;  %v17550_v62 = vpop.f32.mrb[26].mxu0  ;;  %v17575_v33 = vpop.f32.mrb[31].mxu1 }
 0x31a   : > { %v17554_v35 = vpop.f32.mrb[27].mxu0  ;;  %v17581_v36 = vpop.f32.mrb[32].mxu1 }
 0x31b   : > { %v2902_v38 = vmax.f32 %v17550_v62, %v17554_v35  ;;  %v17589_v34 = vpop.f32.mrb[33].mxu1 }
 0x31c   : > { %v17605_v54 = vpop.f32.mrb[34].mxu1 }
 0x31d   : > { %2903 = vmax.xlane.f32.xlu1 %v2902_v38  ;;  %v17572_v2 = vpop.f32.mrb[28].mxu0  ;;  %v17607_v14 = vpop.f32.mrb[35].mxu1 }
 0x31e   : > { %v17579_v23 = vpop.f32.mrb[29].mxu0  ;;  %v17613_v18 = vpop.f32.mrb[36].mxu1 }
 0x31f   : > { %v2905_v38 = vmax.f32 %v17572_v2, %v17579_v23  ;;  %v17615_v28 = vpop.f32.mrb[37].mxu1 }
 0x320   : > { %v17619_v5 = vpop.f32.mrb[38].mxu1 }
 0x321   : > { %2906 = vmax.xlane.f32.xlu0 %v2905_v38  ;;  %v17598_v48 = vpop.f32.mrb[30].mxu0 }
 0x322   : > { %v17601_v7 = vpop.f32.mrb[31].mxu0 }
 0x323   : > { %v2908_v59 = vmax.f32 %v17598_v48, %v17601_v7 }
 0x325   : > { %2909 = vmax.xlane.f32.xlu1 %v2908_v59  ;;  %v17621_v59 = vpop.f32.mrb[39].mxu1 }
 0x396   : > { %v2889_v30 = vpop.xlane.xlu0 %2888 }
 0x397   : > { %v2911_v0 = vsub.f32 %v17518_v55, %v2889_v30  ;;  %v2912_v38 = vsub.f32 %v17520_v42, %v2889_v30 }
 0x399   : > { %v2927_v50 = vmul.f32 1.442695, %v2911_v0  ;;  %v2929_v8 = vmul.f32 1.442695, %v2912_v38 }
 0x39a   : > { %v2892_v60 = vpop.xlane.xlu0 %2891 }
 0x39b   : > { %15790 = vpow2.f32 %v2927_v50  ;;  %v2913_v47 = vsub.f32 %v17524_v20, %v2892_v60  ;;  %v2914_v46 = vsub.f32 %v17526_v49, %v2892_v60 }
 0x39c   : > { %15792 = vpow2.f32 %v2929_v8 }
 0x39d   : > { %v2931_v16 = vmul.f32 1.442695, %v2913_v47  ;;  %v2933_v61 = vmul.f32 1.442695, %v2914_v46  ;;  %v22239_v47 = vpack.c.bf16 %v17476_v53, %v17478_v9 }
 0x39e   : > { %v2895_v26 = vpop.xlane.xlu1 %2894 }
 0x39f   : > { %15794 = vpow2.f32 %v2931_v16  ;;  %v2915_v58 = vsub.f32 %v17530_v45, %v2895_v26  ;;  %v2916_v44 = vsub.f32 %v17532_v63, %v2895_v26  ;;  %v22237_v63 = vpack.c.bf16 %v17470_v41, %v17472_v57 }
 0x3a0   : > { %15796 = vpow2.f32 %v2933_v61 }
 0x3a1   : > { %v2935_v55 = vmul.f32 1.442695, %v2915_v58  ;;  %v2937_v30 = vmul.f32 1.442695, %v2916_v44 }
 0x3a2   : > { %v2898_v0 = vpop.xlane.xlu1 %2897 }
 0x3a3   : > { %15798 = vpow2.f32 %v2935_v55  ;;  %v2917_v50 = vsub.f32 %v17536_v3, %v2898_v0  ;;  %v2918_v42 = vsub.f32 %v17538_v1, %v2898_v0  ;;  %v22238_v1 = vpack.c.bf16 %v17548_v56, %v17552_v4 }
 0x3a4   : > { %15800 = vpow2.f32 %v2937_v30  ;;  %v22240_v4 = vpack.c.bf16 %v17558_v29, %v17564_v32  ;;  %v22241_v0 = vpack.c.bf16 %v17482_v40, %v17484_v51  ;;  %v22242_v32 = vpack.c.bf16 %v17570_v6, %v17575_v33 }
 0x3a5   : > { %v17633_v60 = vpop.eup %15790  ;;  %v2939_v20 = vmul.f32 1.442695, %v2917_v50  ;;  %v2941_v49 = vmul.f32 1.442695, %v2918_v42  ;;  %v22244_v33 = vpack.c.bf16 %v17581_v36, %v17589_v34  ;;  %v22247_v36 = vpack.c.bf16 %v17500_v17, %v17502_v15 }
 0x3a6   : > { %v17635_v38 = vpop.eup %15792  ;;  %v2901_v16 = vpop.xlane.xlu0 %2900  ;;  %v22250_v17 = vpack.c.bf16 %v17619_v5, %v17621_v59  ;;  %v22251_v15 = vpack.c.bf16 %v17512_v39, %v17514_v25 }
 0x3a7   : > { %15802 = vpow2.f32 %v2939_v20  ;;  %3055 = vmatprep.mubr.f32.mxu1 %v17635_v38  ;;  %v2919_v26 = vsub.f32 %v17542_v10, %v2901_v16  ;;  %v2920_v44 = vsub.f32 %v17544_v24, %v2901_v16  ;;  %v22243_v20 = vpack.c.bf16 %v17488_v21, %v17490_v27 }
 0x3a8   : > { %15804 = vpow2.f32 %v2941_v49  ;;  %3056 = vmatmul.mubr.f32.vlgmr.msra.gmra.mrb[40].mxu1 %v17633_v60  ;;  %v22246_v27 = vpack.c.bf16 %v17605_v54, %v17607_v14 }
 0x3a9   : > { %v17641_v61 = vpop.eup %15794  ;;  %v2943_v58 = vmul.f32 1.442695, %v2919_v26  ;;  %v2945_v45 = vmul.f32 1.442695, %v2920_v44  ;;  %14938 = vmatpush3.bf16.msra.mxu1 %v22237_v63 }
 0x3aa   : > { %v17646_v3 = vpop.eup %15796  ;;  %14940 = vmatprep.subr.bf16.mxu1 %v22238_v1  ;;  %v2904_v10 = vpop.xlane.xlu1 %2903 }
 0x3ab   : > { %15806 = vpow2.f32 %v2943_v58  ;;  %3060 = vmatprep.mubr.f32.mxu1 %v17646_v3  ;;  %v2921_v24 = vsub.f32 %v17550_v62, %v2904_v10  ;;  %v2922_v46 = vsub.f32 %v17554_v35, %v2904_v10 }
 0x3ac   : > { %15808 = vpow2.f32 %v2945_v45  ;;  %3061 = vmatmul.mubr.f32.gmra.mrb[42].mxu1 %v17641_v61 }
 0x3ad   : > { %v17655_v8 = vpop.eup %15798  ;;  %v2947_v41 = vmul.f32 1.442695, %v2921_v24  ;;  %v2949_v57 = vmul.f32 1.442695, %v2922_v46  ;;  %14942 = vmatpush3.bf16.msra.mxu1 %v22239_v47 }
 0x3ae   : > { %v17660_v56 = vpop.eup %15800  ;;  %14944 = vmatprep.subr.bf16.mxu1 %v22240_v4  ;;  %v2907_v62 = vpop.xlane.xlu0 %2906 }
 0x3af   : > { %15810 = vpow2.f32 %v2947_v41  ;;  %3065 = vmatprep.mubr.f32.mxu1 %v17660_v56  ;;  %v2923_v35 = vsub.f32 %v17572_v2, %v2907_v62  ;;  %v2924_v55 = vsub.f32 %v17579_v23, %v2907_v62 }
 0x3b0   : > { %15812 = vpow2.f32 %v2949_v57  ;;  %3066 = vmatmul.mubr.f32.gmra.mrb[44].mxu1 %v17655_v8 }
 0x3b1   : > { %v17669_v30 = vpop.eup %15802  ;;  %v2951_v53 = vmul.f32 1.442695, %v2923_v35  ;;  %v2953_v9 = vmul.f32 1.442695, %v2924_v55  ;;  %14946 = vmatpush3.bf16.msra.mxu1 %v22241_v0 }
 0x3b2   : > { %v17674_v29 = vpop.eup %15804  ;;  %14948 = vmatprep.subr.bf16.mxu1 %v22242_v32  ;;  %v2910_v2 = vpop.xlane.xlu1 %2909 }
 0x3b3   : > { %15814 = vpow2.f32 %v2951_v53  ;;  %3070 = vmatprep.mubr.f32.mxu1 %v17674_v29  ;;  %v2925_v23 = vsub.f32 %v17598_v48, %v2910_v2  ;;  %v2926_v50 = vsub.f32 %v17601_v7, %v2910_v2  ;;  %v22245_v7 = vpack.c.bf16 %v17494_v43, %v17496_v11 }
 0x3b4   : > { %15816 = vpow2.f32 %v2953_v9  ;;  %3071 = vmatmul.mubr.f32.gmra.mrb[46].mxu1 %v17669_v30  ;;  %v22248_v43 = vpack.c.bf16 %v17613_v18, %v17615_v28  ;;  %v22249_v11 = vpack.c.bf16 %v17506_v22, %v17508_v31  ;;  %v21871_v18 = vmov 0.0  }
 0x3b5   : > { %v17683_v42 = vpop.eup %15806  ;;  %v2955_v40 = vmul.f32 1.442695, %v2925_v23  ;;  %v2957_v51 = vmul.f32 1.442695, %v2926_v50  ;;  %14950 = vmatpush3.bf16.msra.mxu1 %v22243_v20  ;;  %3195 = vmatprep.mubr.f32.mxu0 %v21871_v18 }
 0x3b6   : > { %v17688_v6 = vpop.eup %15808  ;;  %14952 = vmatprep.subr.bf16.mxu1 %v22244_v33 }
 0x3b7   : > { %15818 = vpow2.f32 %v2955_v40  ;;  %3075 = vmatprep.mubr.f32.mxu1 %v17688_v6 }
 0x3b8   : > { %15820 = vpow2.f32 %v2957_v51  ;;  %3076 = vmatmul.mubr.f32.gmra.mrb[48].mxu1 %v17683_v42 }
 0x3b9   : > { %v17695_v48 = vpop.eup %15810  ;;  %14954 = vmatpush3.bf16.msra.mxu1 %v22245_v7 }
 0x3ba   : > { %v17700_v21 = vpop.eup %15812  ;;  %14956 = vmatprep.subr.bf16.mxu1 %v22246_v27 }
 0x3bb   : > { %3080 = vmatprep.mubr.f32.mxu1 %v17700_v21 }
 0x3bc   : > { %3081 = vmatmul.mubr.f32.gmra.mrb[50].mxu1 %v17695_v48 }
 0x3bd   : > { %v17707_v34 = vpop.eup %15814  ;;  %14958 = vmatpush3.bf16.msra.mxu1 %v22247_v36 }
 0x3be   : > { %v17712_v49 = vpop.eup %15816  ;;  %14960 = vmatprep.subr.bf16.mxu1 %v22248_v43 }
 0x3bf   : > { %3085 = vmatprep.mubr.f32.mxu1 %v17712_v49 }
 0x3c0   : > { %3086 = vmatmul.mubr.f32.gmra.mrb[52].mxu1 %v17707_v34 }
 0x3c1   : > { %v17719_v14 = vpop.eup %15818  ;;  %14962 = vmatpush3.bf16.msra.mxu1 %v22249_v11 }
 0x3c2   : > { %v17724_v54 = vpop.eup %15820  ;;  %14964 = vmatprep.subr.bf16.mxu1 %v22250_v17 }
 0x3c3   : > { %3090 = vmatprep.mubr.f32.mxu1 %v17724_v54 }
 0x3c4   : > { %3091 = vmatmul.mubr.f32.gmra.mrb[54].mxu1 %v17719_v14 }
 0x3c5   : > { %14966 = vmatpush3.bf16.msra.mxu1 %v22251_v15 }
 0x47b   : > { %v12961_v28 = vpop.f32.mrb[40].mxu1 }
 0x47c   : > { %v12962_v22 = vpop.f32.mrb[41].mxu1 }
 0x47d   : > { %v12963_v31 = vadd.f32 %v12962_v22, %v12961_v28 }
 0x47f   : > { %15822 = vrcp.f32 %v12963_v31  ;;  %v12964_v16 = vpop.f32.mrb[42].mxu1 }
 0x480   : > { %v12965_v26 = vpop.f32.mrb[43].mxu1 }
 0x481   : > { %v12966_v44 = vadd.f32 %v12965_v26, %v12964_v16 }
 0x483   : > { %15824 = vrcp.f32 %v12966_v44  ;;  %v12967_v5 = vpop.f32.mrb[44].mxu1 }
 0x484   : > { %v12968_v59 = vpop.f32.mrb[45].mxu1 }
 0x485   : > { %v12969_v58 = vadd.f32 %v12968_v59, %v12967_v5 }
 0x487   : > { %15826 = vrcp.f32 %v12969_v58  ;;  %v12970_v45 = vpop.f32.mrb[46].mxu1 }
 0x488   : > { %v12971_v63 = vpop.f32.mrb[47].mxu1 }
 0x489   : > { %v15823_v39 = vpop.eup %15822  ;;  %v12972_v25 = vadd.f32 %v12971_v63, %v12970_v45 }
 0x48a   : > { %12297 = vmatmul.mubr.msk.f32.vlgmr.msra.gmra.mrb[32].mxu0 %vm3106_vm2, %v15823_v39 }
 0x48b   : > { %15828 = vrcp.f32 %v12972_v25  ;;  %v12973_v1 = vpop.f32.mrb[48].mxu1  ;;  %3201 = vmatprep.mubr.f32.mxu0 %v21871_v18  ;;  %v12305_v25 = vld [vmem:[%s22252_s7] ss:$0 sm:$0xff] }
 0x48c   : > { %v12974_v10 = vpop.f32.mrb[49].mxu1 }
 0x48d   : > { %v15825_v24 = vpop.eup %15824  ;;  %v12975_v46 = vadd.f32 %v12974_v10, %v12973_v1 }
 0x48e   : > { %12298 = vmatmul.mubr.msk.f32.gmra.mrb[34].mxu0 %vm3106_vm2, %v15825_v24 }
 0x48f   : > { %15830 = vrcp.f32 %v12975_v46  ;;  %v12976_v41 = vpop.f32.mrb[50].mxu1  ;;  %3207 = vmatprep.mubr.f32.mxu0 %v21871_v18  ;;  %v16046_v46 = vld [vmem:[%s16913_s28] sm:$0xff] }
 0x490   : > { %v12977_v57 = vpop.f32.mrb[51].mxu1 }
 0x491   : > { %v15827_v47 = vpop.eup %15826  ;;  %v12978_v4 = vadd.f32 %v12977_v57, %v12976_v41 }
 0x492   : > { %12299 = vmatmul.mubr.msk.f32.gmra.mrb[36].mxu0 %vm3106_vm2, %v15827_v47 }
 0x493   : > { %15832 = vrcp.f32 %v12978_v4  ;;  %v12979_v62 = vpop.f32.mrb[52].mxu1  ;;  %3213 = vmatprep.mubr.f32.mxu0 %v21871_v18 }
 0x494   : > { %v12980_v35 = vpop.f32.mrb[53].mxu1 }
 0x495   : > { %v15829_v55 = vpop.eup %15828  ;;  %v12981_v53 = vadd.f32 %v12980_v35, %v12979_v62  ;;  %v16047_v62 = vld [vmem:[%s16913_s28 + $0x8] sm:$0xff] }
 0x496   : > { %12300 = vmatmul.mubr.msk.f32.gmra.mrb[38].mxu0 %vm3106_vm2, %v15829_v55 }
 0x497   : > { %15834 = vrcp.f32 %v12981_v53  ;;  %v12982_v9 = vpop.f32.mrb[54].mxu1  ;;  %3219 = vmatprep.mubr.f32.mxu0 %v21871_v18 }
 0x498   : > { %v12983_v0 = vpop.f32.mrb[55].mxu1 }
 0x499   : > { %v15831_v32 = vpop.eup %15830  ;;  %v12984_v2 = vadd.f32 %v12983_v0, %v12982_v9 }
 0x49a   : > { %12301 = vmatmul.mubr.msk.f32.gmra.mrb[40].mxu0 %vm3106_vm2, %v15831_v32 }
 0x49b   : > { %15836 = vrcp.f32 %v12984_v2  ;;  %3225 = vmatprep.mubr.f32.mxu0 %v21871_v18  ;;  %v16048_v2 = vld [vmem:[%s16913_s28 + $0x10] sm:$0xff] }
 0x49d   : > { %v15833_v23 = vpop.eup %15832 }
 0x49e   : > { %12302 = vmatmul.mubr.msk.f32.gmra.mrb[42].mxu0 %vm3106_vm2, %v15833_v23 }
 0x49f   : > { %3231 = vmatprep.mubr.f32.mxu0 %v21871_v18 }
 0x4a1   : > { %v15835_v50 = vpop.eup %15834 }
 0x4a2   : > { %12303 = vmatmul.mubr.msk.f32.gmra.mrb[44].mxu0 %vm3106_vm2, %v15835_v50 }
 0x4a3   : > { %3237 = vmatprep.mubr.f32.mxu0 %v21871_v18 }
 0x4a5   : > { %v15837_v40 = vpop.eup %15836 }
 0x4a6   : > { %12304 = vmatmul.mubr.msk.f32.gmra.mrb[46].mxu0 %vm3106_vm2, %v15837_v40 }
 0x55d   : > { %v3197_v51 = vpop.f32.mrb[32].mxu0 }
 0x55e   : > { %v3199_v20 = vpop.f32.mrb[33].mxu0  ;;  %v3244_v7 = vmul.f32 %v17633_v60, %v3197_v51 }
 0x55f   : > { %v3245_v33 = vmul.f32 %v17635_v38, %v3199_v20 }
 0x561   : > { %v3203_v27 = vpop.f32.mrb[34].mxu0  ;;  %3330 = vmatprep.mubr.f32.mxu1 %v3245_v33 }
 0x562   : > { %v3205_v36 = vpop.f32.mrb[35].mxu0  ;;  %3331 = vmatmul.mubr.f32.vlgmr.msra.gmra.mrb[56].mxu1 %v3244_v7  ;;  %v3246_v11 = vmul.f32 %v17641_v61, %v3203_v27  ;;  %v16049_v7 = vld [vmem:[%s16913_s28 + $0x18] sm:$0xff] }
 0x563   : > { %v3247_v43 = vmul.f32 %v17646_v3, %v3205_v36 }
 0x565   : > { %v3209_v17 = vpop.f32.mrb[36].mxu0  ;;  %3335 = vmatprep.mubr.f32.mxu1 %v3247_v43 }
 0x566   : > { %v3211_v15 = vpop.f32.mrb[37].mxu0  ;;  %3336 = vmatmul.mubr.f32.gmra.mrb[58].mxu1 %v3246_v11  ;;  %v3248_v22 = vmul.f32 %v17655_v8, %v3209_v17 }
 0x567   : > { %v3249_v28 = vmul.f32 %v17660_v56, %v3211_v15 }
 0x569   : > { %v3215_v31 = vpop.f32.mrb[38].mxu0  ;;  %3340 = vmatprep.mubr.f32.mxu1 %v3249_v28  ;;  %v16050_v28 = vld [vmem:[%s16913_s28 + $0x20] sm:$0xff] }
 0x56a   : > { %v3217_v38 = vpop.f32.mrb[39].mxu0  ;;  %3341 = vmatmul.mubr.f32.gmra.mrb[60].mxu1 %v3248_v22  ;;  %v3250_v16 = vmul.f32 %v17669_v30, %v3215_v31 }
 0x56b   : > { %v3251_v60 = vmul.f32 %v17674_v29, %v3217_v38 }
 0x56d   : > { %v3221_v26 = vpop.f32.mrb[40].mxu0  ;;  %3345 = vmatprep.mubr.f32.mxu1 %v3251_v60 }
 0x56e   : > { %v3223_v3 = vpop.f32.mrb[41].mxu0  ;;  %3346 = vmatmul.mubr.f32.gmra.mrb[62].mxu1 %v3250_v16  ;;  %v3252_v44 = vmul.f32 %v17683_v42, %v3221_v26 }
 0x56f   : > { %v3253_v61 = vmul.f32 %v17688_v6, %v3223_v3  ;;  %v16051_v3 = vld [vmem:[%s16913_s28 + $0x28] sm:$0xff] }
 0x571   : > { %v3227_v5 = vpop.f32.mrb[42].mxu0  ;;  %3350 = vmatprep.mubr.f32.mxu1 %v3253_v61 }
 0x572   : > { %v3229_v56 = vpop.f32.mrb[43].mxu0  ;;  %3351 = vmatmul.mubr.f32.gmra.mrb[64].mxu1 %v3252_v44  ;;  %v3254_v59 = vmul.f32 %v17695_v48, %v3227_v5 }
 0x573   : > { %v3255_v8 = vmul.f32 %v17700_v21, %v3229_v56 }
 0x575   : > { %v3233_v58 = vpop.f32.mrb[44].mxu0  ;;  %3355 = vmatprep.mubr.f32.mxu1 %v3255_v8 }
 0x576   : > { %v3235_v30 = vpop.f32.mrb[45].mxu0  ;;  %3356 = vmatmul.mubr.f32.gmra.mrb[66].mxu1 %v3254_v59  ;;  %v3256_v45 = vmul.f32 %v17707_v34, %v3233_v58  ;;  %v16052_v58 = vld [vmem:[%s16913_s28 + $0x30] sm:$0xff] }
 0x577   : > { %v3257_v29 = vmul.f32 %v17712_v49, %v3235_v30 }
 0x579   : > { %v3239_v6 = vpop.f32.mrb[46].mxu0  ;;  %3360 = vmatprep.mubr.f32.mxu1 %v3257_v29 }
 0x57a   : > { %v3241_v42 = vpop.f32.mrb[47].mxu0  ;;  %3361 = vmatmul.mubr.f32.gmra.mrb[68].mxu1 %v3256_v45  ;;  %v3258_v21 = vmul.f32 %v17719_v14, %v3239_v6  ;;  %v16053_v6 = vld [vmem:[%s16913_s28 + $0x38] sm:$0xff]  ;;  %s22269_s28 = sld [smem:[#allocation26_spill]] }
 0x57b   : > { %v3259_v63 = vmul.f32 %v17724_v54, %v3241_v42 }
 0x57d   : > { %3365 = vmatprep.mubr.f32.mxu1 %v3259_v63 }
 0x57e   : > { %3366 = vmatmul.mubr.f32.gmra.mrb[70].mxu1 %v3258_v21 }
 0x635   : > { %v13017_v48 = vpop.f32.mrb[56].mxu1 }
 0x636   : > { %v13018_v39 = vpop.f32.mrb[57].mxu1 }
 0x637   : > { %v13019_v1 = vadd.f32 %v13018_v39, %v13017_v48 }
 0x639   : > { %v13020_v10 = vpop.f32.mrb[58].mxu1  ;;  %v3333_v49 = vadd.f32 %v13019_v1, %v12305_v25 }
 0x63a   : > { %v13021_v24 = vpop.f32.mrb[59].mxu1 }
 0x63b   : > { %v13022_v34 = vadd.f32 %v13021_v24, %v13020_v10  ;;  %v3371_v41 = vadd.f32 %v16046_v46, %v3333_v49 }
 0x63d   : > { %v13023_v57 = vpop.f32.mrb[60].mxu1  ;;  %v3379_v47 = vsel %vm1893_vm0, %v3371_v41, 0.0  ;;  %v3338_v54 = vadd.f32 %v13022_v34, %v12305_v25 }
 0x63e   : > { %v13024_v4 = vpop.f32.mrb[61].mxu1  ;;  %3380 = vadd.xlane.f32.xlu0 %v3379_v47 }
 0x63f   : > { %v13025_v14 = vadd.f32 %v13024_v4, %v13023_v57  ;;  %v3372_v35 = vadd.f32 %v16047_v62, %v3338_v54 }
 0x641   : > { %v13026_v55 = vpop.f32.mrb[62].mxu1  ;;  %v3382_v53 = vsel %vm1893_vm0, %v3372_v35, 0.0  ;;  %v3343_v9 = vadd.f32 %v13025_v14, %v12305_v25 }
 0x642   : > { %v13027_v0 = vpop.f32.mrb[63].mxu1  ;;  %3383 = vadd.xlane.f32.xlu1 %v3382_v53 }
 0x643   : > { %v13028_v32 = vadd.f32 %v13027_v0, %v13026_v55  ;;  %v3373_v23 = vadd.f32 %v16048_v2, %v3343_v9 }
 0x645   : > { %v13029_v50 = vpop.f32.mrb[64].mxu1  ;;  %v3385_v40 = vsel %vm1893_vm0, %v3373_v23, 0.0  ;;  %v3348_v51 = vadd.f32 %v13028_v32, %v12305_v25 }
 0x646   : > { %v13030_v20 = vpop.f32.mrb[65].mxu1  ;;  %3386 = vadd.xlane.f32.xlu0 %v3385_v40 }
 0x647   : > { %v13031_v33 = vadd.f32 %v13030_v20, %v13029_v50  ;;  %v3374_v27 = vadd.f32 %v16049_v7, %v3348_v51 }
 0x649   : > { %v13032_v36 = vpop.f32.mrb[66].mxu1  ;;  %v3388_v43 = vsel %vm1893_vm0, %v3374_v27, 0.0  ;;  %v3353_v11 = vadd.f32 %v13031_v33, %v12305_v25 }
 0x64a   : > { %v13033_v17 = vpop.f32.mrb[67].mxu1  ;;  %3389 = vadd.xlane.f32.xlu1 %v3388_v43 }
 0x64b   : > { %v13034_v15 = vadd.f32 %v13033_v17, %v13032_v36  ;;  %v3375_v22 = vadd.f32 %v16050_v28, %v3353_v11 }
 0x64d   : > { %v13035_v31 = vpop.f32.mrb[68].mxu1  ;;  %v3391_v38 = vsel %vm1893_vm0, %v3375_v22, 0.0  ;;  %v3358_v60 = vadd.f32 %v13034_v15, %v12305_v25 }
 0x64e   : > { %v13036_v16 = vpop.f32.mrb[69].mxu1  ;;  %3392 = vadd.xlane.f32.xlu0 %v3391_v38  ;;  %v1846_v38 = vld [vmem:[%s22253_s2] sm:$0xff] }
 0x64f   : > { %v13037_v26 = vadd.f32 %v13036_v16, %v13035_v31  ;;  %v3376_v61 = vadd.f32 %v16051_v3, %v3358_v60  ;;  %v1847_v60 = vld [vmem:[%s22253_s2 + $0x8] sm:$0xff]  ;;  %v1849_v3 = vld [vmem:[%s22253_s2 + $0x18] sm:$0xff] }
 0x650   : > { %v14975_v16 = vpack.c.bf16 %v1847_v60, %v1846_v38  ;;  %v4124_v38 = vld [vmem:[%s22258_s23 + $0x8] sm:$0xff] }
 0x651   : > { %v13038_v44 = vpop.f32.mrb[70].mxu1  ;;  %v3394_v5 = vsel %vm1893_vm0, %v3376_v61, 0.0  ;;  %v3363_v56 = vadd.f32 %v13037_v26, %v12305_v25  ;;  %v1848_v26 = vld [vmem:[%s22253_s2 + $0x10] sm:$0xff] }
 0x652   : > { %3395 = vadd.xlane.f32.xlu1 %v3394_v5  ;;  %v13039_v8 = vpop.f32.mrb[71].mxu1  ;;  %14976 = vmatprep.subr.bf16.mxu1 %v14975_v16  ;;  %v1852_v5 = vld [vmem:[%s22254_s22 + $0x8] sm:$0xff] }
 0x653   : > { %v13040_v59 = vadd.f32 %v13039_v8, %v13038_v44  ;;  %v3377_v30 = vadd.f32 %v16052_v58, %v3363_v56  ;;  %14978 = vmatpush3.bf16.msra.mxu1 %v14975_v16  ;;  %v1851_v44 = vld [vmem:[%s22254_s22] sm:$0xff] }
 0x654   : > { %v14983_v56 = vpack.c.bf16 %v1852_v5, %v1851_v44 }
 0x655   : > { %v3397_v29 = vsel %vm1893_vm0, %v3377_v30, 0.0  ;;  %v3368_v45 = vadd.f32 %v13040_v59, %v12305_v25 }
 0x656   : > { %3398 = vadd.xlane.f32.xlu0 %v3397_v29 }
 0x657   : > { %v3378_v42 = vadd.f32 %v16053_v6, %v3368_v45 }
 0x659   : > { %v3400_v63 = vsel %vm1893_vm0, %v3378_v42, 0.0 }
 0x65a   : > { %3401 = vadd.xlane.f32.xlu1 %v3400_v63 }
 0x6cb   : > { %v3381_v21 = vpop.xlane.xlu0 %3380 }
 0x6cc   : > { %v3404_v48 = vmul.f32 0.03125, %v3381_v21 }
 0x6ce   : > { %v17783_v39 = vsub.f32 %v3371_v41, %v3404_v48 }
 0x6cf   : > { %v3384_v1 = vpop.xlane.xlu1 %3383 }
 0x6d0   : > { %v3405_v10 = vmul.f32 0.03125, %v3384_v1  ;;  %v3420_v49 = vmul.f32 %v17783_v39, %v17783_v39 }
 0x6d2   : > { %v17787_v24 = vsub.f32 %v3372_v35, %v3405_v10  ;;  %v3428_v34 = vsel %vm1893_vm0, %v3420_v49, 0.0  ;;  %v17830_v10 = vld [vmem:[%s22255_s11] ss:$0 sm:$0xff] }
 0x6d3   : > { %3429 = vadd.xlane.f32.xlu0 %v3428_v34  ;;  %v3387_v25 = vpop.xlane.xlu0 %3386 }
 0x6d4   : > { %v3406_v46 = vmul.f32 0.03125, %v3387_v25  ;;  %v3421_v57 = vmul.f32 %v17787_v24, %v17787_v24 }
 0x6d6   : > { %v17792_v47 = vsub.f32 %v3373_v23, %v3406_v46  ;;  %v3431_v41 = vsel %vm1893_vm0, %v3421_v57, 0.0  ;;  %v17834_v46 = vld [vmem:[%s22256_s26] ss:$0 sm:$0xff] }
 0x6d7   : > { %v3390_v54 = vpop.xlane.xlu1 %3389  ;;  %3432 = vadd.xlane.f32.xlu1 %v3431_v41 }
 0x6d8   : > { %v3407_v4 = vmul.f32 0.03125, %v3390_v54  ;;  %v3422_v14 = vmul.f32 %v17792_v47, %v17792_v47 }
 0x6da   : > { %v17797_v62 = vsub.f32 %v3374_v27, %v3407_v4  ;;  %v3434_v35 = vsel %vm1893_vm0, %v3422_v14, 0.0 }
 0x6db   : > { %3435 = vadd.xlane.f32.xlu0 %v3434_v35  ;;  %v3393_v55 = vpop.xlane.xlu0 %3392 }
 0x6dc   : > { %v3408_v53 = vmul.f32 0.03125, %v3393_v55  ;;  %v3423_v9 = vmul.f32 %v17797_v62, %v17797_v62 }
 0x6de   : > { %v17802_v0 = vsub.f32 %v3375_v22, %v3408_v53  ;;  %v3437_v32 = vsel %vm1893_vm0, %v3423_v9, 0.0  ;;  %v16054_v9 = vld [vmem:[%s16917_s18] sm:$0xff] }
 0x6df   : > { %v3396_v2 = vpop.xlane.xlu1 %3395  ;;  %3438 = vadd.xlane.f32.xlu1 %v3437_v32 }
 0x6e0   : > { %v3409_v23 = vmul.f32 0.03125, %v3396_v2  ;;  %v3424_v50 = vmul.f32 %v17802_v0, %v17802_v0 }
 0x6e2   : > { %v17807_v40 = vsub.f32 %v3376_v61, %v3409_v23  ;;  %v3440_v51 = vsel %vm1893_vm0, %v3424_v50, 0.0  ;;  %v14979_v61 = vpack.c.bf16 %v1849_v3, %v1848_v26  ;;  %v1853_v50 = vld [vmem:[%s22254_s22 + $0x10] sm:$0xff] }
 0x6e3   : > { %3441 = vadd.xlane.f32.xlu0 %v3440_v51  ;;  %v3399_v20 = vpop.xlane.xlu0 %3398  ;;  %v1854_v51 = vld [vmem:[%s22254_s22 + $0x18] sm:$0xff]  ;;  %v16056_v3 = vld [vmem:[%s16917_s18 + $0x10] sm:$0xff] }
 0x6e4   : > { %v3410_v33 = vmul.f32 0.03125, %v3399_v20  ;;  %v3425_v7 = vmul.f32 %v17807_v40, %v17807_v40  ;;  %14980 = vmatprep.subr.bf16.mxu1 %v14979_v61 }
 0x6e5   : > { %14982 = vmatpush3.bf16.msra.mxu1 %v14979_v61 }
 0x6e6   : > { %v17812_v27 = vsub.f32 %v3377_v30, %v3410_v33  ;;  %v3443_v36 = vsel %vm1893_vm0, %v3425_v7, 0.0  ;;  %14984 = vmatprep.subr.bf16.mxu1 %v14983_v56 }
 0x6e7   : > { %3444 = vadd.xlane.f32.xlu1 %v3443_v36  ;;  %v3402_v43 = vpop.xlane.xlu1 %3401  ;;  %v16055_v36 = vld [vmem:[%s16917_s18 + $0x8] sm:$0xff] }
 0x6e8   : > { %v3411_v11 = vmul.f32 0.03125, %v3402_v43  ;;  %v3426_v17 = vmul.f32 %v17812_v27, %v17812_v27 }
 0x6ea   : > { %v17817_v15 = vsub.f32 %v3378_v42, %v3411_v11  ;;  %v3446_v28 = vsel %vm1893_vm0, %v3426_v17, 0.0  ;;  %v14987_v17 = vpack.c.bf16 %v1854_v51, %v1853_v50  ;;  %v1844_v50 = vld [vmem:[%s22267_s10 + $0x18] sm:$0xff] }
 0x6eb   : > { %3447 = vadd.xlane.f32.xlu0 %v3446_v28 }
 0x6ec   : > { %v3427_v22 = vmul.f32 %v17817_v15, %v17817_v15 }
 0x6ee   : > { %v3449_v31 = vsel %vm1893_vm0, %v3427_v22, 0.0 }
 0x6ef   : > { %3450 = vadd.xlane.f32.xlu1 %v3449_v31  ;;  %v4123_v31 = vld [vmem:[%s22258_s23] sm:$0xff] }
 0x6f0   : > { %v17867_v5 = vpack.c.bf16 %v4124_v38, %v4123_v31 }
 0x6f2   : > { %22261 = vst [vmem:[#allocation81_spill] sm:$0xff] %v17867_v5 }
 0x760   : > { %v3430_v8 = vpop.xlane.xlu0 %3429 }
 0x761   : > { %v3452_v59 = vmul.f32 0.03125, %v3430_v8 }
 0x763   : > { %v3460_v58 = vadd.f32 1e-05, %v3452_v59 }
 0x764   : > { %v3433_v30 = vpop.xlane.xlu1 %3432 }
 0x765   : > { %15838 = vrsqrt.f32 %v3460_v58  ;;  %v3453_v29 = vmul.f32 0.03125, %v3433_v30 }
 0x767   : > { %v3461_v45 = vadd.f32 1e-05, %v3453_v29 }
 0x768   : > { %v3436_v6 = vpop.xlane.xlu0 %3435 }
 0x769   : > { %15840 = vrsqrt.f32 %v3461_v45  ;;  %v3454_v42 = vmul.f32 0.03125, %v3436_v6 }
 0x76b   : > { %v3462_v63 = vadd.f32 1e-05, %v3454_v42 }
 0x76c   : > { %v3439_v21 = vpop.xlane.xlu1 %3438 }
 0x76d   : > { %15842 = vrsqrt.f32 %v3462_v63  ;;  %v3455_v48 = vmul.f32 0.03125, %v3439_v21 }
 0x76f   : > { %v15839_v1 = vpop.eup %15838  ;;  %v3463_v49 = vadd.f32 1e-05, %v3455_v48 }
 0x770   : > { %v3442_v34 = vpop.xlane.xlu0 %3441  ;;  %v3476_v25 = vmul.f32 %v15839_v1, %v17783_v39 }
 0x771   : > { %15844 = vrsqrt.f32 %v3463_v49  ;;  %v3456_v57 = vmul.f32 0.03125, %v3442_v34  ;;  %v16059_v34 = vld [vmem:[%s16917_s18 + $0x28] sm:$0xff] }
 0x772   : > { %v3490_v41 = vmul.f32 %v17830_v10, %v3476_v25 }
 0x773   : > { %v15841_v54 = vpop.eup %15840  ;;  %v3464_v4 = vadd.f32 1e-05, %v3456_v57 }
 0x774   : > { %v3477_v14 = vmul.f32 %v15841_v54, %v17787_v24  ;;  %v3445_v35 = vpop.xlane.xlu1 %3444  ;;  %v17839_v55 = vadd.f32 %v17834_v46, %v3490_v41 }
 0x775   : > { %15846 = vrsqrt.f32 %v3464_v4  ;;  %v3457_v53 = vmul.f32 0.03125, %v3445_v35  ;;  %v16060_v4 = vld [vmem:[%s16917_s18 + $0x30] sm:$0xff] }
 0x776   : > { %22257 = vst [vmem:[#allocation78_spill] sm:$0xff] %v17839_v55  ;;  %v3491_v39 = vmul.f32 %v17830_v10, %v3477_v14  ;;  %v17844_v32 = vadd.f32 %v16054_v9, %v17839_v55  ;;  %v1841_v9 = vld [vmem:[%s22267_s10] sm:$0xff]  ;;  %v5170_v55 = vld [vmem:[%s22292_s24 + $0xa8] sm:$0xff] }
 0x777   : > { %v15843_v2 = vpop.eup %15842  ;;  %v3465_v23 = vadd.f32 1e-05, %v3457_v53  ;;  %v16061_v53 = vld [vmem:[%s16917_s18 + $0x38] sm:$0xff] }
 0x778   : > { %v17849_v24 = vadd.f32 %v17834_v46, %v3491_v39  ;;  %v3448_v20 = vpop.xlane.xlu0 %3447  ;;  %14052 = vmatprep.mubr.msk.f32.mxu1 %vm1893_vm0, %v17844_v32  ;;  %v3478_v33 = vmul.f32 %v15843_v2, %v17792_v47  ;;  %v1843_v2 = vld [vmem:[%s22267_s10 + $0x10] sm:$0xff] }
 0x779   : > { %15848 = vrsqrt.f32 %v3465_v23  ;;  %v3458_v7 = vmul.f32 0.03125, %v3448_v20  ;;  %v14971_v51 = vpack.c.bf16 %v1844_v50, %v1843_v2  ;;  %v3976_v20 = vld [vmem:[%s22269_s28] sm:$0xff] }
 0x77a   : > { %22259 = vst [vmem:[#allocation79_spill] sm:$0xff] %v17849_v24  ;;  %v3513_v43 = vadd.f32 %v16055_v36, %v17849_v24  ;;  %v3492_v11 = vmul.f32 %v17830_v10, %v3478_v33  ;;  %v3977_v33 = vld [vmem:[%s22269_s28 + $0x8] sm:$0xff]  ;;  %v5153_v24 = vld [vmem:[%s22292_s24 + $0x20] sm:$0xff]  ;;  %s22398_s28 = sld [smem:[#allocation21_spill]] }
 0x77b   : > { %v15845_v28 = vpop.eup %15844  ;;  %v3466_v22 = vadd.f32 1e-05, %v3458_v7  ;;  %v1735_v7 = vld [vmem:[%s17933_s6] sm:$0xff]  ;;  %v17939_v36 = vpack.c.bf16 %v3977_v33, %v3976_v20  ;;  %v1738_v20 = vld [vmem:[%s17933_s6 + $0x18] sm:$0xff] }
 0x77c   : > { %14053 = vmatmul.mubr.msk.f32.vlgmr.msra.gmra.mrb[72].mxu1 %vm1893_vm0, %v3513_v43  ;;  %v3451_v60 = vpop.xlane.xlu1 %3450  ;;  %v17861_v16 = vadd.f32 %v17834_v46, %v3492_v11  ;;  %v3479_v47 = vmul.f32 %v15845_v28, %v17797_v62  ;;  %14029 = vmatprep.mubr.msk.f32.mxu0 %vm1893_vm0, %v1735_v7  ;;  %v1737_v11 = vld [vmem:[%s17933_s6 + $0x10] sm:$0xff]  ;;  %v1739_v33 = vld [vmem:[%s17933_s6 + $0x20] sm:$0xff]  ;;  %v1740_v7 = vld [vmem:[%s17933_s6 + $0x28] sm:$0xff] }
 0x77d   : > { %15850 = vrsqrt.f32 %v3466_v22  ;;  %v3459_v26 = vmul.f32 0.03125, %v3451_v60  ;;  %14986 = vmatpush3.bf16.msra.mxu1 %v14983_v56  ;;  %v16057_v56 = vld [vmem:[%s16917_s18 + $0x18] sm:$0xff]  ;;  %22272 = vst [vmem:[#allocation88_spill] sm:$0xff] %v17939_v36 }
 0x77e   : > { %22260 = vst [vmem:[#allocation80_spill] sm:$0xff] %v17861_v16  ;;  %v3514_v61 = vadd.f32 %v16056_v3, %v17861_v16  ;;  %v3493_v44 = vmul.f32 %v17830_v10, %v3479_v47  ;;  %14988 = vmatprep.subr.bf16.mxu1 %v14987_v17 }
 0x77f   : > { %v15847_v8 = vpop.eup %15846  ;;  %v3467_v59 = vadd.f32 1e-05, %v3459_v26 }
 0x780   : > { %14055 = vmatprep.mubr.msk.f32.mxu1 %vm1893_vm0, %v3514_v61  ;;  %v17871_v58 = vadd.f32 %v17834_v46, %v3493_v44  ;;  %v3480_v62 = vmul.f32 %v15847_v8, %v17802_v0  ;;  %v16058_v0 = vld [vmem:[%s16917_s18 + $0x20] sm:$0xff]  ;;  %s18833_s15 = scalar_lea.vmem %s22398_s28, %s16909_s0  ;;  %s22403_s28 = sld [smem:[#allocation32_spill]] }
 0x781   : > { %15852 = vrsqrt.f32 %v3467_v59  ;;  %14990 = vmatpush3.bf16.msra.mxu1 %v14987_v17  ;;  %v12319_v17 = vld [vmem:[%s22271_s9] ss:$0 sm:$0xff] }
 0x782   : > { %22262 = vst [vmem:[#allocation82_spill] sm:$0xff] %v17871_v58  ;;  %v3515_v30 = vadd.f32 %v16057_v56, %v17871_v58  ;;  %v3494_v29 = vmul.f32 %v17830_v10, %v3480_v62  ;;  %14996 = vmatprep.subr.bf16.mxu1 %v17867_v5 }
 0x783   : > { %v15849_v45 = vpop.eup %15848 }
 0x784   : > { %14056 = vmatmul.mubr.msk.f32.gmra.mrb[74].mxu1 %vm1893_vm0, %v3515_v30  ;;  %v17880_v6 = vadd.f32 %v17834_v46, %v3494_v29  ;;  %v3481_v42 = vmul.f32 %v15849_v45, %v17807_v40  ;;  %v12328_v29 = vld [vmem:[%s22273_s3] ss:$0 sm:$0xff] }
 0x786   : > { %22263 = vst [vmem:[#allocation83_spill] sm:$0xff] %v17880_v6  ;;  %v3516_v63 = vadd.f32 %v16058_v0, %v17880_v6  ;;  %v3495_v21 = vmul.f32 %v17830_v10, %v3481_v42  ;;  %v5160_v6 = vld [vmem:[%s22292_s24 + $0x58] sm:$0xff] }
 0x787   : > { %v15851_v48 = vpop.eup %15850 }
 0x788   : > { %14058 = vmatprep.mubr.msk.f32.mxu1 %vm1893_vm0, %v3516_v63  ;;  %v17888_v1 = vadd.f32 %v17834_v46, %v3495_v21  ;;  %v3482_v49 = vmul.f32 %v15851_v48, %v17812_v27 }
 0x78a   : > { %22264 = vst [vmem:[#allocation84_spill] sm:$0xff] %v17888_v1  ;;  %v3517_v25 = vadd.f32 %v16059_v34, %v17888_v1  ;;  %v3496_v57 = vmul.f32 %v17830_v10, %v3482_v49 }
 0x78b   : > { %v15853_v40 = vpop.eup %15852 }
 0x78c   : > { %14059 = vmatmul.mubr.msk.f32.gmra.mrb[76].mxu1 %vm1893_vm0, %v3517_v25  ;;  %v17896_v41 = vadd.f32 %v17834_v46, %v3496_v57  ;;  %v3483_v54 = vmul.f32 %v15853_v40, %v17817_v15  ;;  %v4125_v15 = vld [vmem:[%s22258_s23 + $0x10] sm:$0xff] }
 0x78e   : > { %22265 = vst [vmem:[#allocation85_spill] sm:$0xff] %v17896_v41  ;;  %v3518_v14 = vadd.f32 %v16060_v4, %v17896_v41  ;;  %v3497_v35 = vmul.f32 %v17830_v10, %v3483_v54  ;;  %v4126_v10 = vld [vmem:[%s22258_s23 + $0x18] sm:$0xff]  ;;  %s18182_s23 = scalar_lea.vmem %s22290_s14, %s22291_s19  ;;  %s22316_s14 = sld [smem:[#allocation38_spill]] }
 0x78f   : > { %v5176_v41 = vld [vmem:[%s22292_s24 + $0xd8] sm:$0xff]  ;;  %v1754_v16 = vld [vmem:[%s18182_s23 + $0x48] sm:$0xff]  ;;  %s22355_s19 = sld [smem:[#allocation34_spill]] }
 0x790   : > { %14061 = vmatprep.mubr.msk.f32.mxu1 %vm1893_vm0, %v3518_v14  ;;  %v17904_v27 = vadd.f32 %v17834_v46, %v3497_v35  ;;  %v17921_v46 = vpack.c.bf16 %v4126_v10, %v4125_v15 }
 0x792   : > { %22266 = vst [vmem:[#allocation86_spill] sm:$0xff] %v17904_v27  ;;  %v3519_v39 = vadd.f32 %v16061_v53, %v17904_v27  ;;  %22270 = vst [vmem:[#allocation87_spill] sm:$0xff] %v17921_v46 }
 0x794   : > { %14062 = vmatmul.mubr.msk.f32.gmra.mrb[78].mxu1 %vm1893_vm0, %v3519_v39 }
 0x795   : > { %14072 = vmatprep.mubr.msk.f32.mxu1 %vm1893_vm0, %v17844_v32  ;;  %v1842_v32 = vld [vmem:[%s22267_s10 + $0x8] sm:$0xff] }
 0x796   : > { %v14967_v23 = vpack.c.bf16 %v1842_v32, %v1841_v9 }
 0x798   : > { %14073 = vmatmul.mubr.msk.f32.vlgmr.msra.gmra.mrb[80].mxu1 %vm1893_vm0, %v3513_v43  ;;  %14968 = vmatprep.subr.bf16.mxu0 %v14967_v23  ;;  %v1736_v43 = vld [vmem:[%s17933_s6 + $0x8] sm:$0xff] }
 0x799   : > { %14075 = vmatprep.mubr.msk.f32.mxu1 %vm1893_vm0, %v3514_v61  ;;  %14998 = vmatpush3.bf16.msra.mxu1 %v17867_v5  ;;  %v1752_v5 = vld [vmem:[%s18182_s23 + $0x38] sm:$0xff] }
 0x79a   : > { %15000 = vmatprep.subr.bf16.mxu1 %v17921_v46  ;;  %14970 = vmatpush3.bf16.msra.mxu0 %v14967_v23 }
 0x79b   : > { %14972 = vmatprep.subr.bf16.mxu0 %v14971_v51 }
 0x79c   : > { %14076 = vmatmul.mubr.msk.f32.gmra.mrb[82].mxu1 %vm1893_vm0, %v3515_v30 }
 0x79d   : > { %14078 = vmatprep.mubr.msk.f32.mxu1 %vm1893_vm0, %v3516_v63  ;;  %15002 = vmatpush3.bf16.msra.mxu1 %v17921_v46 }
 0x79e   : > { %14974 = vmatpush3.bf16.msra.mxu0 %v14971_v51 }
 0x79f   : > { %14992 = vmatprep.subr.bf16.mxu0 %v17939_v36 }
 0x7a0   : > { %14079 = vmatmul.mubr.msk.f32.gmra.mrb[84].mxu1 %vm1893_vm0, %v3517_v25 }
 0x7a1   : > { %14081 = vmatprep.mubr.msk.f32.mxu1 %vm1893_vm0, %v3518_v14  ;;  %14030 = vmatmul.mubr.msk.f32.vlgmr.msra.gmra.mrb[48].mxu0 %vm1893_vm0, %v1736_v43  ;;  %v1741_v43 = vld [vmem:[%s17933_s6 + $0x30] sm:$0xff] }
 0x7a2   : > { %14994 = vmatpush3.bf16.msra.mxu0 %v17939_v36  ;;  %14032 = vmatprep.mubr.msk.f32.mxu0 %vm1893_vm0, %v1737_v11  ;;  %v1742_v11 = vld [vmem:[%s17933_s6 + $0x38] sm:$0xff]  ;;  %v5182_v36 = vld [vmem:[%s22292_s24 + $0x108] sm:$0xff] }
 0x7a4   : > { %14082 = vmatmul.mubr.msk.f32.gmra.mrb[86].mxu1 %vm1893_vm0, %v3519_v39 }
 0x7a5   : > { %14033 = vmatmul.mubr.msk.f32.gmra.mrb[50].mxu0 %vm1893_vm0, %v1738_v20 }
 0x7a6   : > { %14035 = vmatprep.mubr.msk.f32.mxu0 %vm1893_vm0, %v1739_v33 }
 0x7a9   : > { %14036 = vmatmul.mubr.msk.f32.gmra.mrb[52].mxu0 %vm1893_vm0, %v1740_v7  ;;  %v4258_v7 = vld [vmem:[%s22274_s5 + $0x10] sm:$0xff] }
 0x7aa   : > { %14038 = vmatprep.mubr.msk.f32.mxu0 %vm1893_vm0, %v1741_v43  ;;  %v4259_v43 = vld [vmem:[%s22274_s5 + $0x18] sm:$0xff] }
 0x7ad   : > { %14039 = vmatmul.mubr.msk.f32.gmra.mrb[54].mxu0 %vm1893_vm0, %v1742_v11 }
 0x84f   : > { %v14054_v28 = vpop.f32.mrb[72].mxu1 }
 0x850   : > { %v3777_v22 = vpop.f32.mrb[73].mxu1  ;;  %v17950_v38 = vadd.f32 %v14054_v28, %v12319_v17  ;;  %v1744_v28 = vld [vmem:[%s17933_s6 + $0x48] sm:$0xff] }
 0x851   : > { %v17948_v31 = vadd.f32 %v12319_v17, %v3777_v22  ;;  %v4256_v22 = vld [vmem:[%s22274_s5] sm:$0xff] }
 0x853   : > { %14108 = vmatprep.mubr.msk.f32.mxu1 %vm1893_vm0, %v17948_v31 }
 0x854   : > { %14109 = vmatmul.mubr.msk.f32.vlgmr.msra.gmra.mrb[88].mxu1 %vm1893_vm0, %v17950_v38 }
 0x857   : > { %v14057_v60 = vpop.f32.mrb[74].mxu1 }
 0x858   : > { %v3787_v47 = vpop.f32.mrb[75].mxu1  ;;  %v17958_v3 = vadd.f32 %v14057_v60, %v12319_v17  ;;  %v4257_v60 = vld [vmem:[%s22274_s5 + $0x8] sm:$0xff]  ;;  %s22283_s5 = sld [smem:[#allocation20_spill]] }
 0x859   : > { %v17956_v26 = vadd.f32 %v12319_v17, %v3787_v47  ;;  %v18005_v47 = vpack.c.bf16 %v4257_v60, %v4256_v22 }
 0x85b   : > { %14111 = vmatprep.mubr.msk.f32.mxu1 %vm1893_vm0, %v17956_v26  ;;  %22276 = vst [vmem:[#allocation89_spill] sm:$0xff] %v18005_v47  ;;  %15004 = vmatprep.subr.bf16.mxu0 %v18005_v47 }
 0x85c   : > { %14112 = vmatmul.mubr.msk.f32.gmra.mrb[90].mxu1 %vm1893_vm0, %v17958_v3 }
 0x85e   : > { %s18094_s13 = scalar_lea.vmem %s22283_s5, %s16909_s0  ;;  %s22289_s5 = sld [smem:[#allocation43_spill]] }
 0x85f   : > { %v14060_v61 = vpop.f32.mrb[76].mxu1 }
 0x860   : > { %v3797_v44 = vpop.f32.mrb[77].mxu1  ;;  %v17966_v59 = vadd.f32 %v14060_v61, %v12319_v17 }
 0x861   : > { %v17964_v8 = vadd.f32 %v12319_v17, %v3797_v44 }
 0x863   : > { %14114 = vmatprep.mubr.msk.f32.mxu1 %vm1893_vm0, %v17964_v8 }
 0x864   : > { %14115 = vmatmul.mubr.msk.f32.gmra.mrb[92].mxu1 %vm1893_vm0, %v17966_v59 }
 0x867   : > { %v14063_v62 = vpop.f32.mrb[78].mxu1 }
 0x868   : > { %v3807_v56 = vpop.f32.mrb[79].mxu1  ;;  %v17975_v45 = vadd.f32 %v14063_v62, %v12319_v17  ;;  %v4413_v62 = vld [vmem:[%s22275_s12] sm:$0xff] }
 0x869   : > { %v17972_v30 = vadd.f32 %v12319_v17, %v3807_v56  ;;  %v1743_v17 = vld [vmem:[%s17933_s6 + $0x40] sm:$0xff]  ;;  %v4414_v56 = vld [vmem:[%s22275_s12 + $0x8] sm:$0xff]  ;;  %s22278_s12 = sld [smem:[#allocation33_spill]] }
 0x86a   : > { %14041 = vmatprep.mubr.msk.f32.mxu0 %vm1893_vm0, %v1743_v17 }
 0x86b   : > { %v14074_v42 = vpop.f32.mrb[80].mxu1  ;;  %14117 = vmatprep.mubr.msk.f32.mxu1 %vm1893_vm0, %v17972_v30  ;;  %14042 = vmatmul.mubr.msk.f32.gmra.mrb[56].mxu0 %vm1893_vm0, %v1744_v28  ;;  %v18022_v28 = vpack.c.bf16 %v4259_v43, %v4258_v7 }
 0x86c   : > { %v3888_v0 = vpop.f32.mrb[81].mxu1  ;;  %14118 = vmatmul.mubr.msk.f32.gmra.mrb[94].mxu1 %vm1893_vm0, %v17975_v45  ;;  %v3894_v63 = vadd.f32 %v14074_v42, %v12328_v29 }
 0x86d   : > { %v3889_v21 = vadd.f32 %v12328_v29, %v3888_v0  ;;  %22279 = vst [vmem:[#allocation91_spill] sm:$0xff] %v18022_v28 }
 0x86e   : > { %v3931_v48 = vsel %vm3927_vm3, %v3894_v63, -inf }
 0x86f   : > { %3932 = vmax.xlane.f32.xlu1 %v3931_v48  ;;  %v14077_v49 = vpop.f32.mrb[82].mxu1  ;;  %v3928_v34 = vsel %vm3927_vm3, %v3889_v21, -inf  ;;  %v4553_v22 = vld [vmem:[%s22278_s12 + $0x8] sm:$0xff]  ;;  %v4576_v7 = vld [vmem:[%s22278_s12 + $0xc0] sm:$0xff] }
 0x870   : > { %v3898_v25 = vpop.f32.mrb[83].mxu1  ;;  %3929 = vmax.xlane.f32.xlu0 %v3928_v34  ;;  %v3904_v57 = vadd.f32 %v14077_v49, %v12328_v29  ;;  %v4557_v60 = vld [vmem:[%s22278_s12 + $0x28] sm:$0xff]  ;;  %v4580_v43 = vld [vmem:[%s22278_s12 + $0xe0] sm:$0xff] }
 0x871   : > { %v3899_v40 = vadd.f32 %v12328_v29, %v3898_v25 }
 0x872   : > { %v3937_v54 = vsel %vm3927_vm3, %v3904_v57, -inf }
 0x873   : > { %3938 = vmax.xlane.f32.xlu1 %v3937_v54  ;;  %v14080_v4 = vpop.f32.mrb[84].mxu1  ;;  %v3934_v14 = vsel %vm3927_vm3, %v3899_v40, -inf }
 0x874   : > { %v3908_v35 = vpop.f32.mrb[85].mxu1  ;;  %3935 = vmax.xlane.f32.xlu0 %v3934_v14  ;;  %v3914_v53 = vadd.f32 %v14080_v4, %v12328_v29  ;;  %v18008_v61 = vpop.f32.mrb[48].mxu0 }
 0x875   : > { %v3909_v39 = vadd.f32 %v12328_v29, %v3908_v35  ;;  %v18010_v44 = vpop.f32.mrb[49].mxu0 }
 0x876   : > { %v3943_v15 = vsel %vm3927_vm3, %v3914_v53, -inf }
 0x877   : > { %3944 = vmax.xlane.f32.xlu1 %v3943_v15  ;;  %v14083_v10 = vpop.f32.mrb[86].mxu1  ;;  %v3940_v9 = vsel %vm3927_vm3, %v3909_v39, -inf }
 0x878   : > { %v3918_v32 = vpop.f32.mrb[87].mxu1  ;;  %3941 = vmax.xlane.f32.xlu0 %v3940_v9  ;;  %v3924_v2 = vadd.f32 %v14083_v10, %v12328_v29 }
 0x879   : > { %v3919_v23 = vadd.f32 %v12328_v29, %v3918_v32  ;;  %v18014_v29 = vpack.c.bf16 %v4414_v56, %v4413_v62 }
 0x87a   : > { %v3949_v50 = vsel %vm3927_vm3, %v3924_v2, -inf }
 0x87b   : > { %3950 = vmax.xlane.f32.xlu1 %v3949_v50  ;;  %v3946_v51 = vsel %vm3927_vm3, %v3919_v23, -inf  ;;  %22277 = vst [vmem:[#allocation90_spill] sm:$0xff] %v18014_v29  ;;  %15012 = vmatprep.subr.bf16.mxu1 %v18014_v29 }
 0x87c   : > { %3947 = vmax.xlane.f32.xlu0 %v3946_v51  ;;  %15014 = vmatpush3.bf16.msra.mxu1 %v18014_v29 }
 0x8fc   : > { %v3933_v42 = vpop.xlane.xlu1 %3932 }
 0x8fd   : > { %v3953_v0 = vsub.f32 %v3894_v63, %v3933_v42  ;;  %v3930_v48 = vpop.xlane.xlu0 %3929 }
 0x8fe   : > { %v3952_v49 = vsub.f32 %v3889_v21, %v3930_v48  ;;  %v4552_v48 = vld [vmem:[%s22278_s12] sm:$0xff] }
 0x8ff   : > { %v3962_v34 = vmul.f32 1.442695, %v3953_v0 }
 0x900   : > { %v3960_v25 = vmul.f32 1.442695, %v3952_v49  ;;  %v3939_v54 = vpop.xlane.xlu1 %3938  ;;  %v4556_v49 = vld [vmem:[%s22278_s12 + $0x20] sm:$0xff] }
 0x901   : > { %v3955_v4 = vsub.f32 %v3904_v57, %v3939_v54  ;;  %v3936_v14 = vpop.xlane.xlu0 %3935  ;;  %v4565_v54 = vld [vmem:[%s22278_s12 + $0x68] sm:$0xff] }
 0x902   : > { %15854 = vpow2.f32 %v3960_v25  ;;  %v3954_v35 = vsub.f32 %v3899_v40, %v3936_v14  ;;  %v4561_v25 = vld [vmem:[%s22278_s12 + $0x48] sm:$0xff] }
 0x903   : > { %15856 = vpow2.f32 %v3962_v34  ;;  %v3966_v15 = vmul.f32 1.442695, %v3955_v4  ;;  %v18068_v4 = vpack.c.bf16 %v4556_v49, %v4552_v48  ;;  %v18070_v14 = vpack.c.bf16 %v4565_v54, %v4561_v25 }
 0x904   : > { %v3964_v10 = vmul.f32 1.442695, %v3954_v35  ;;  %v3945_v9 = vpop.xlane.xlu1 %3944  ;;  %v4560_v35 = vld [vmem:[%s22278_s12 + $0x40] sm:$0xff] }
 0x905   : > { %v3957_v32 = vsub.f32 %v3914_v53, %v3945_v9  ;;  %v3942_v50 = vpop.xlane.xlu0 %3941  ;;  %22281 = vst [vmem:[#allocation93_spill] sm:$0xff] %v18068_v4  ;;  %22282 = vst [vmem:[#allocation94_spill] sm:$0xff] %v18070_v14  ;;  %v4573_v9 = vld [vmem:[%s22278_s12 + $0xa8] sm:$0xff] }
 0x906   : > { %15858 = vpow2.f32 %v3964_v10  ;;  %v3956_v51 = vsub.f32 %v3909_v39, %v3942_v50  ;;  %v4569_v10 = vld [vmem:[%s22278_s12 + $0x88] sm:$0xff] }
 0x907   : > { %15860 = vpow2.f32 %v3966_v15  ;;  %v3970_v63 = vmul.f32 1.442695, %v3957_v32  ;;  %v4564_v15 = vld [vmem:[%s22278_s12 + $0x60] sm:$0xff]  ;;  %v18084_v50 = vpack.c.bf16 %v4573_v9, %v4569_v10  ;;  %v1757_v10 = vld [vmem:[%s18094_s13 + $0x10] sm:$0xff] }
 0x908   : > { %v3968_v21 = vmul.f32 1.442695, %v3956_v51  ;;  %v3951_v20 = vpop.xlane.xlu1 %3950  ;;  %v18081_v32 = vpack.c.bf16 %v4564_v15, %v4560_v35  ;;  %v4568_v51 = vld [vmem:[%s22278_s12 + $0x80] sm:$0xff]  ;;  %v1758_v15 = vld [vmem:[%s18094_s13 + $0x18] sm:$0xff] }
 0x909   : > { %v3959_v57 = vsub.f32 %v3924_v2, %v3951_v20  ;;  %v3948_v33 = vpop.xlane.xlu0 %3947  ;;  %22285 = vst [vmem:[#allocation96_spill] sm:$0xff] %v18084_v50  ;;  %v4581_v20 = vld [vmem:[%s22278_s12 + $0xe8] sm:$0xff] }
 0x90a   : > { %15862 = vpow2.f32 %v3968_v21  ;;  %v3958_v40 = vsub.f32 %v3919_v23, %v3948_v33  ;;  %v18036_v23 = vpack.c.bf16 %v4557_v60, %v4553_v22  ;;  %22284 = vst [vmem:[#allocation95_spill] sm:$0xff] %v18081_v32  ;;  %v4577_v21 = vld [vmem:[%s22278_s12 + $0xc8] sm:$0xff]  ;;  %v18113_v22 = vpack.c.bf16 %v4580_v43, %v4576_v7 }
 0x90b   : > { %15864 = vpow2.f32 %v3970_v63  ;;  %v3974_v11 = vmul.f32 1.442695, %v3959_v57  ;;  %v4572_v63 = vld [vmem:[%s22278_s12 + $0xa0] sm:$0xff]  ;;  %v18102_v33 = vpack.c.bf16 %v4581_v20, %v4577_v21 }
 0x90c   : > { %v18020_v17 = vpop.eup %15854  ;;  %v3972_v53 = vmul.f32 1.442695, %v3958_v40  ;;  %22280 = vst [vmem:[#allocation92_spill] sm:$0xff] %v18036_v23  ;;  %v18099_v57 = vpack.c.bf16 %v4572_v63, %v4568_v51  ;;  %v1756_v40 = vld [vmem:[%s18094_s13 + $0x8] sm:$0xff]  ;;  %22288 = vst [vmem:[#allocation99_spill] sm:$0xff] %v18113_v22 }
 0x90d   : > { %v18024_v39 = vpop.eup %15856  ;;  %14088 = vmatprep.mubr.msk.f32.mxu0 %vm3927_vm3, %v18020_v17  ;;  %22287 = vst [vmem:[#allocation98_spill] sm:$0xff] %v18102_v33 }
 0x90e   : > { %15866 = vpow2.f32 %v3972_v53  ;;  %14089 = vmatmul.mubr.msk.f32.vlgmr.msra.gmra.mrb[58].mxu0 %vm3927_vm3, %v18024_v39  ;;  %22286 = vst [vmem:[#allocation97_spill] sm:$0xff] %v18099_v57 }
 0x90f   : > { %15868 = vpow2.f32 %v3974_v11  ;;  %15006 = vmatpush3.bf16.msra.mxu0 %v18005_v47  ;;  %v1755_v11 = vld [vmem:[%s18094_s13] sm:$0xff] }
 0x910   : > { %v18033_v2 = vpop.eup %15858  ;;  %15008 = vmatprep.subr.bf16.mxu0 %v18022_v28 }
 0x911   : > { %v18038_v62 = vpop.eup %15860  ;;  %14091 = vmatprep.mubr.msk.f32.mxu0 %vm3927_vm3, %v18033_v2 }
 0x912   : > { %14092 = vmatmul.mubr.msk.f32.gmra.mrb[60].mxu0 %vm3927_vm3, %v18038_v62 }
 0x913   : > { %15010 = vmatpush3.bf16.msra.mxu0 %v18022_v28  ;;  %v5198_v28 = vld [vmem:[%s22292_s24 + $0x188] sm:$0xff] }
 0x914   : > { %v18045_v56 = vpop.eup %15862  ;;  %15016 = vmatprep.subr.bf16.mxu0 %v18036_v23 }
 0x915   : > { %v18048_v42 = vpop.eup %15864  ;;  %14094 = vmatprep.mubr.msk.f32.mxu0 %vm3927_vm3, %v18045_v56 }
 0x916   : > { %14095 = vmatmul.mubr.msk.f32.gmra.mrb[62].mxu0 %vm3927_vm3, %v18048_v42 }
 0x918   : > { %v18054_v0 = vpop.eup %15866 }
 0x919   : > { %v18058_v34 = vpop.eup %15868  ;;  %14097 = vmatprep.mubr.msk.f32.mxu0 %vm3927_vm3, %v18054_v0 }
 0x91a   : > { %14098 = vmatmul.mubr.msk.f32.gmra.mrb[64].mxu0 %vm3927_vm3, %v18058_v34 }
 0x91b   : > { %14128 = vmatprep.mubr.msk.f32.mxu0 %vm1893_vm0, %v17948_v31 }
 0x91e   : > { %14129 = vmatmul.mubr.msk.f32.vlgmr.msra.gmra.mrb[66].mxu0 %vm1893_vm0, %v17950_v38 }
 0x91f   : > { %14131 = vmatprep.mubr.msk.f32.mxu0 %vm1893_vm0, %v17956_v26  ;;  %15018 = vmatpush1.bf16.msra.mxu0 %v18068_v4 }
 0x920   : > { %15020 = vmatprep.subr.bf16.mxu0 %v18070_v14  ;;  %v5174_v14 = vld [vmem:[%s22292_s24 + $0xc8] sm:$0xff] }
 0x922   : > { %14132 = vmatmul.mubr.msk.f32.gmra.mrb[68].mxu0 %vm1893_vm0, %v17958_v3 }
 0x923   : > { %14134 = vmatprep.mubr.msk.f32.mxu0 %vm1893_vm0, %v17964_v8  ;;  %15022 = vmatpush1.bf16.msra.mxu0 %v18081_v32  ;;  %v5173_v32 = vld [vmem:[%s22292_s24 + $0xc0] sm:$0xff] }
 0x924   : > { %15024 = vmatprep.subr.bf16.mxu0 %v18084_v50  ;;  %v1750_v50 = vld [vmem:[%s18182_s23 + $0x28] sm:$0xff] }
 0x926   : > { %14135 = vmatmul.mubr.msk.f32.gmra.mrb[70].mxu0 %vm1893_vm0, %v17966_v59 }
 0x927   : > { %v14110_v53 = vpop.f32.mrb[88].mxu1  ;;  %14137 = vmatprep.mubr.msk.f32.mxu0 %vm1893_vm0, %v17972_v30  ;;  %15026 = vmatpush1.bf16.msra.mxu0 %v18099_v57  ;;  %v5166_v57 = vld [vmem:[%s22292_s24 + $0x88] sm:$0xff] }
 0x928   : > { %v4223_v60 = vadd.f32 %v14110_v53, %v1756_v40  ;;  %v4217_v48 = vpop.f32.mrb[89].mxu1  ;;  %15028 = vmatprep.subr.bf16.mxu0 %v18102_v33  ;;  %v5165_v33 = vld [vmem:[%s22292_s24 + $0x80] sm:$0xff] }
 0x929   : > { %v4218_v49 = vadd.f32 %v4217_v48, %v1755_v11  ;;  %v1759_v48 = vld [vmem:[%s18094_s13 + $0x20] sm:$0xff] }
 0x92a   : > { %14138 = vmatmul.mubr.msk.f32.gmra.mrb[72].mxu0 %vm1893_vm0, %v17975_v45  ;;  %v4366_v25 = vand.u32 2147483647, %v4223_v60  ;;  %v1760_v60 = vld [vmem:[%s18094_s13 + $0x28] sm:$0xff] }
 0x92b   : > { %v4365_v54 = vand.u32 2147483647, %v4218_v49  ;;  %15030 = vmatpush1.bf16.msra.mxu0 %v18113_v22  ;;  %4673 = vmatprep.mubr.f32.mxu0 %v21871_v18 }
 0x92c   : > { %v18124_v9 = vsub.f32 1.0, %v4366_v25 }
 0x92d   : > { %v18120_v35 = vsub.f32 1.0, %v4365_v54 }
 0x92e   : > { %v21858_v43 = vmax.f32 %v18124_v9, 0.0 }
 0x92f   : > { %v21865_v51 = vmax.f32 %v18120_v35, 0.0  ;;  %v14113_v63 = vpop.f32.mrb[90].mxu1 }
 0x930   : > { %v4233_v21 = vadd.f32 %v14113_v63, %v1758_v15  ;;  %v4227_v20 = vpop.f32.mrb[91].mxu1 }
 0x931   : > { %v4228_v7 = vadd.f32 %v4227_v20, %v1757_v10  ;;  %12369 = vmatmul.mubr.msk.f32.vlgmr.msra.gmra.mrb[74].mxu0 %vm4584_vm4, %v21865_v51  ;;  %v1747_v51 = vld [vmem:[%s18182_s23 + $0x10] sm:$0xff] }
 0x932   : > { %4679 = vmatprep.mubr.f32.mxu0 %v21871_v18  ;;  %v4368_v40 = vand.u32 2147483647, %v4233_v21 }
 0x933   : > { %v4367_v11 = vand.u32 2147483647, %v4228_v7 }
 0x934   : > { %v18140_v49 = vsub.f32 1.0, %v4368_v40  ;;  %v1762_v40 = vld [vmem:[%s18094_s13 + $0x38] sm:$0xff] }
 0x935   : > { %v18132_v53 = vsub.f32 1.0, %v4367_v11  ;;  %12370 = vmatmul.mubr.msk.f32.gmra.mrb[76].mxu0 %vm4584_vm4, %v21858_v43 }
 0x936   : > { %4685 = vmatprep.mubr.f32.mxu0 %v21871_v18  ;;  %v21856_v21 = vmax.f32 %v18140_v49, 0.0 }
 0x937   : > { %v21857_v25 = vmax.f32 %v18132_v53, 0.0  ;;  %v14116_v54 = vpop.f32.mrb[92].mxu1 }
 0x938   : > { %v4243_v15 = vadd.f32 %v14116_v54, %v1760_v60  ;;  %v4237_v10 = vpop.f32.mrb[93].mxu1  ;;  %v1761_v60 = vld [vmem:[%s18094_s13 + $0x30] sm:$0xff] }
 0x939   : > { %v4238_v63 = vadd.f32 %v4237_v10, %v1759_v48  ;;  %12371 = vmatmul.mubr.msk.f32.gmra.mrb[78].mxu0 %vm4584_vm4, %v21857_v25 }
 0x93a   : > { %4691 = vmatprep.mubr.f32.mxu0 %v21871_v18  ;;  %v4370_v20 = vand.u32 2147483647, %v4243_v15 }
 0x93b   : > { %v4369_v7 = vand.u32 2147483647, %v4238_v63 }
 0x93c   : > { %v18156_v48 = vsub.f32 1.0, %v4370_v20 }
 0x93d   : > { %v18148_v11 = vsub.f32 1.0, %v4369_v7  ;;  %12372 = vmatmul.mubr.msk.f32.gmra.mrb[80].mxu0 %vm4584_vm4, %v21856_v21 }
 0x93e   : > { %4697 = vmatprep.mubr.f32.mxu0 %v21871_v18  ;;  %v21863_v21 = vmax.f32 %v18156_v48, 0.0 }
 0x93f   : > { %v21864_v54 = vmax.f32 %v18148_v11, 0.0  ;;  %v14119_v10 = vpop.f32.mrb[94].mxu1 }
 0x940   : > { %v4253_v15 = vadd.f32 %v14119_v10, %v1762_v40  ;;  %v4247_v63 = vpop.f32.mrb[95].mxu1  ;;  %v18174_v10 = vld [vmem:[%s22289_s5] ss:$0 sm:$0xff] }
 0x941   : > { %v4248_v7 = vadd.f32 %v4247_v63, %v1761_v60  ;;  %12373 = vmatmul.mubr.msk.f32.gmra.mrb[82].mxu0 %vm4584_vm4, %v21864_v54  ;;  %v3623_v63 = vadd.f32 %v18174_v10, %v18010_v44  ;;  %v1748_v54 = vld [vmem:[%s18182_s23 + $0x18] sm:$0xff] }
 0x942   : > { %4703 = vmatprep.mubr.f32.mxu0 %v21871_v18  ;;  %v4372_v25 = vand.u32 2147483647, %v4253_v15  ;;  %v3628_v15 = vadd.f32 %v18008_v61, %v18174_v10  ;;  %v14034_v61 = vpop.f32.mrb[50].mxu0 }
 0x943   : > { %v4371_v20 = vand.u32 2147483647, %v4248_v7  ;;  %v1746_v7 = vld [vmem:[%s18182_s23 + $0x8] sm:$0xff]  ;;  %v3638_v44 = vadd.f32 %v14034_v61, %v18174_v10  ;;  %v3632_v22 = vpop.f32.mrb[51].mxu0 }
 0x944   : > { %v18170_v40 = vsub.f32 1.0, %v4372_v25 }
 0x945   : > { %v18164_v43 = vsub.f32 1.0, %v4371_v20  ;;  %12374 = vmatmul.mubr.msk.f32.gmra.mrb[84].mxu0 %vm4584_vm4, %v21863_v21  ;;  %v1745_v20 = vld [vmem:[%s18182_s23] sm:$0xff]  ;;  %v18215_v61 = vmul.f32 %v3638_v44, %v1748_v54 }
 0x946   : > { %4709 = vmatprep.mubr.f32.mxu0 %v21871_v18  ;;  %v21869_v25 = vmax.f32 %v18170_v40, 0.0  ;;  %v18198_v21 = vmul.f32 %v3623_v63, %v1745_v20  ;;  %v5150_v20 = vld [vmem:[%s22292_s24 + $0x8] sm:$0xff] }
 0x947   : > { %v21862_v60 = vmax.f32 %v18164_v43, 0.0  ;;  %v18291_v27 = vmul.f32 %v5152_v37, %v18215_v61 }
 0x948   : > { %v18231_v54 = vmul.f32 %v5173_v32, %v18198_v21 }
 0x949   : > { %12375 = vmatmul.mubr.msk.f32.gmra.mrb[86].mxu0 %vm4584_vm4, %v21862_v60  ;;  %v18196_v60 = vmul.f32 %v3628_v15, %v1746_v7  ;;  %v18208_v15 = vmul.f32 %v5165_v33, %v18198_v21  ;;  %v5149_v7 = vld [vmem:[%s22292_s24] sm:$0xff]  ;;  %22306 = vst [vmem:[#allocation113_spill] sm:$0xff] %v18291_v27 }
 0x94a   : > { %4715 = vmatprep.mubr.f32.mxu0 %v21871_v18  ;;  %v5157_v33 = vld [vmem:[%s22292_s24 + $0x40] sm:$0xff]  ;;  %22295 = vst [vmem:[#allocation102_spill] sm:$0xff] %v18231_v54 }
 0x94b   : > { %v18211_v63 = vmul.f32 %v5166_v57, %v18196_v60  ;;  %v14037_v57 = vpop.f32.mrb[52].mxu0  ;;  %v18234_v44 = vmul.f32 %v5174_v14, %v18196_v60  ;;  %v18244_v23 = vmul.f32 %v5157_v33, %v18198_v21  ;;  %v5181_v14 = vld [vmem:[%s22292_s24 + $0x100] sm:$0xff]  ;;  %v18259_v33 = vmul.f32 %v5198_v28, %v18196_v60 }
 0x94c   : > { %v3648_v47 = vadd.f32 %v14037_v57, %v18174_v10  ;;  %v18269_v13 = vmul.f32 %v5181_v14, %v18198_v21  ;;  %v5175_v14 = vld [vmem:[%s22292_s24 + $0xd0] sm:$0xff] }
 0x94d   : > { %12376 = vmatmul.mubr.msk.f32.gmra.mrb[88].mxu0 %vm4584_vm4, %v21869_v25  ;;  %v3633_v25 = vadd.f32 %v18174_v10, %v3632_v22  ;;  %v18221_v22 = vmul.f32 %v5150_v20, %v18196_v60  ;;  %22296 = vst [vmem:[#allocation103_spill] sm:$0xff] %v18234_v44  ;;  %v5197_v20 = vld [vmem:[%s22292_s24 + $0x180] sm:$0xff]  ;;  %22297 = vst [vmem:[#allocation104_spill] sm:$0xff] %v18244_v23  ;;  %v18320_v23 = vmul.f32 %v5160_v6, %v18215_v61 }
 0x94e   : > { %4955 = vmatprep.mubr.f32.mxu0 %v21871_v18  ;;  %v18218_v18 = vmul.f32 %v5149_v7, %v18198_v21  ;;  %v5158_v7 = vld [vmem:[%s22292_s24 + $0x48] sm:$0xff]  ;;  %v18256_v52 = vmul.f32 %v5197_v20, %v18198_v21  ;;  %22300 = vst [vmem:[#allocation107_spill] sm:$0xff] %v18259_v33  ;;  %v18261_v29 = vmul.f32 %v3648_v47, %v1750_v50  ;;  %22301 = vst [vmem:[#allocation108_spill] sm:$0xff] %v18269_v13  ;;  %v5177_v33 = vld [vmem:[%s22292_s24 + $0xe0] sm:$0xff] }
 0x94f   : > { %22294 = vst [vmem:[#allocation101_spill] sm:$0xff] %v18221_v22  ;;  %v18226_v4 = vmul.f32 %v3633_v25, %v1747_v51  ;;  %v1749_v51 = vld [vmem:[%s18182_s23 + $0x20] sm:$0xff]  ;;  %v3642_v25 = vpop.f32.mrb[53].mxu0  ;;  %v18247_v32 = vmul.f32 %v5158_v7, %v18196_v60  ;;  %v5167_v7 = vld [vmem:[%s22292_s24 + $0x90] sm:$0xff]  ;;  %v18272_v20 = vmul.f32 %v5182_v36, %v18196_v60  ;;  %v18280_v50 = vmul.f32 %v5168_v12, %v18215_v61  ;;  %v5935_v13 = vld [vmem:[%s22316_s14 + $0x18] sm:$0xff] }
 0x950   : > { %22293 = vst [vmem:[#allocation100_spill] sm:$0xff] %v18218_v18  ;;  %v3643_v46 = vadd.f32 %v18174_v10, %v3642_v25  ;;  %22299 = vst [vmem:[#allocation106_spill] sm:$0xff] %v18256_v52  ;;  %v14040_v28 = vpop.f32.mrb[54].mxu0  ;;  %v18297_v12 = vmul.f32 %v5176_v41, %v18215_v61  ;;  %v5154_v41 = vld [vmem:[%s22292_s24 + $0x28] sm:$0xff]  ;;  %v5947_v18 = vld [vmem:[%s22316_s14 + $0x78] sm:$0xff] }
 0x951   : > { %22298 = vst [vmem:[#allocation105_spill] sm:$0xff] %v18247_v32  ;;  %22302 = vst [vmem:[#allocation109_spill] sm:$0xff] %v18272_v20  ;;  %v18277_v47 = vmul.f32 %v5167_v7, %v18226_v4  ;;  %v18284_v25 = vmul.f32 %v5151_v19, %v18226_v4  ;;  %v3658_v36 = vadd.f32 %v14040_v28, %v18174_v10  ;;  %v5159_v19 = vld [vmem:[%s22292_s24 + $0x50] sm:$0xff]  ;;  %v5178_v28 = vld [vmem:[%s22292_s24 + $0xe8] sm:$0xff] }
 0x952   : > { %v18274_v57 = vmul.f32 %v3643_v46, %v1749_v51  ;;  %22304 = vst [vmem:[#allocation111_spill] sm:$0xff] %v18280_v50  ;;  %v1751_v46 = vld [vmem:[%s18182_s23 + $0x30] sm:$0xff]  ;;  %v3652_v51 = vpop.f32.mrb[55].mxu0  ;;  %v18294_v7 = vmul.f32 %v5175_v14, %v18226_v4  ;;  %22308 = vst [vmem:[#allocation115_spill] sm:$0xff] %v18297_v12  ;;  %v18308_v14 = vmul.f32 %v5159_v19, %v18226_v4  ;;  %v5162_v12 = vld [vmem:[%s22292_s24 + $0x68] sm:$0xff] }
 0x953   : > { %22303 = vst [vmem:[#allocation110_spill] sm:$0xff] %v18277_v47  ;;  %22305 = vst [vmem:[#allocation112_spill] sm:$0xff] %v18284_v25  ;;  %v3653_v1 = vadd.f32 %v18174_v10, %v3652_v51  ;;  %v18310_v58 = vmul.f32 %v3658_v36, %v1752_v5  ;;  %v5169_v51 = vld [vmem:[%s22292_s24 + $0xa0] sm:$0xff]  ;;  %v14043_v19 = vpop.f32.mrb[56].mxu0  ;;  %v18328_v36 = vmul.f32 %v5170_v55, %v18261_v29 }
 0x954   : > { %22307 = vst [vmem:[#allocation114_spill] sm:$0xff] %v18294_v7  ;;  %22309 = vst [vmem:[#allocation116_spill] sm:$0xff] %v18308_v14  ;;  %v18325_v5 = vmul.f32 %v5169_v51, %v18274_v57  ;;  %v18332_v52 = vmul.f32 %v5153_v24, %v18274_v57  ;;  %v3668_v6 = vadd.f32 %v14043_v19, %v18174_v10  ;;  %v5161_v24 = vld [vmem:[%s22292_s24 + $0x60] sm:$0xff]  ;;  %v5171_v14 = vld [vmem:[%s22292_s24 + $0xb0] sm:$0xff] }
 0x955   : > { %22310 = vst [vmem:[#allocation117_spill] sm:$0xff] %v18320_v23  ;;  %v18322_v37 = vmul.f32 %v3653_v1, %v1751_v46  ;;  %22312 = vst [vmem:[#allocation119_spill] sm:$0xff] %v18328_v36  ;;  %v1753_v1 = vld [vmem:[%s18182_s23 + $0x40] sm:$0xff]  ;;  %v3662_v46 = vpop.f32.mrb[57].mxu0  ;;  %v18339_v7 = vmul.f32 %v5154_v41, %v18261_v29  ;;  %v18344_v51 = vmul.f32 %v5177_v33, %v18274_v57  ;;  %v5172_v23 = vld [vmem:[%s22292_s24 + $0xb8] sm:$0xff] }
 0x956   : > { %22311 = vst [vmem:[#allocation118_spill] sm:$0xff] %v18325_v5  ;;  %22313 = vst [vmem:[#allocation120_spill] sm:$0xff] %v18332_v52  ;;  %v3663_v32 = vadd.f32 %v18174_v10, %v3662_v46  ;;  %v18352_v54 = vmul.f32 %v5178_v28, %v18261_v29  ;;  %v18355_v41 = vmul.f32 %v5161_v24, %v18274_v57  ;;  %v5155_v10 = vld [vmem:[%s22292_s24 + $0x30] sm:$0xff]  ;;  %v5932_v55 = vld [vmem:[%s22316_s14] sm:$0xff] }
 0x957   : > { %22314 = vst [vmem:[#allocation121_spill] sm:$0xff] %v18339_v7  ;;  %22315 = vst [vmem:[#allocation122_spill] sm:$0xff] %v18344_v51  ;;  %v3680_v33 = vmul.f32 %v3668_v6, %v1754_v16  ;;  %v18363_v46 = vmul.f32 %v5162_v12, %v18261_v29  ;;  %v18368_v44 = vmul.f32 %v5171_v14, %v18322_v37  ;;  %v5156_v6 = vld [vmem:[%s22292_s24 + $0x38] sm:$0xff]  ;;  %v5179_v12 = vld [vmem:[%s22292_s24 + $0xf0] sm:$0xff] }
 0x958   : > { %22317 = vst [vmem:[#allocation123_spill] sm:$0xff] %v18352_v54  ;;  %22318 = vst [vmem:[#allocation124_spill] sm:$0xff] %v18355_v41  ;;  %v3679_v28 = vmul.f32 %v3663_v32, %v1753_v1  ;;  %v18371_v16 = vmul.f32 %v5172_v23, %v18310_v58  ;;  %v18375_v24 = vmul.f32 %v5155_v10, %v18322_v37  ;;  %v5933_v52 = vld [vmem:[%s22316_s14 + $0x8] sm:$0xff]  ;;  %v5934_v7 = vld [vmem:[%s22316_s14 + $0x10] sm:$0xff] }
 0x959   : > { %22319 = vst [vmem:[#allocation125_spill] sm:$0xff] %v18363_v46  ;;  %22320 = vst [vmem:[#allocation126_spill] sm:$0xff] %v18368_v44  ;;  %v18382_v32 = vmul.f32 %v5156_v6, %v18310_v58  ;;  %v18389_v1 = vmul.f32 %v5179_v12, %v18322_v37  ;;  %v5949_v19 = vmul.f32 %v5933_v52, %v3680_v33  ;;  %v5936_v5 = vld [vmem:[%s22316_s14 + $0x20] sm:$0xff]  ;;  %v5937_v6 = vld [vmem:[%s22316_s14 + $0x28] sm:$0xff] }
 0x95a   : > { %22321 = vst [vmem:[#allocation127_spill] sm:$0xff] %v18371_v16  ;;  %22322 = vst [vmem:[#allocation128_spill] sm:$0xff] %v18375_v24  ;;  %v5948_v10 = vmul.f32 %v5932_v55, %v3679_v28  ;;  %v5950_v20 = vmul.f32 %v5934_v7, %v3679_v28  ;;  %v5180_v14 = vld [vmem:[%s22292_s24 + $0xf8] sm:$0xff]  ;;  %v5951_v51 = vmul.f32 %v5935_v13, %v3680_v33  ;;  %v5938_v12 = vld [vmem:[%s22316_s14 + $0x30] sm:$0xff] }
 0x95b   : > { %22323 = vst [vmem:[#allocation129_spill] sm:$0xff] %v18382_v32  ;;  %22324 = vst [vmem:[#allocation130_spill] sm:$0xff] %v18389_v1  ;;  %v5952_v23 = vmul.f32 %v5936_v5, %v3679_v28  ;;  %v5953_v41 = vmul.f32 %v5937_v6, %v3680_v33  ;;  %v5939_v46 = vld [vmem:[%s22316_s14 + $0x38] sm:$0xff]  ;;  %v5940_v52 = vld [vmem:[%s22316_s14 + $0x40] sm:$0xff]  ;;  %v5954_v54 = vmul.f32 %v5938_v12, %v3679_v28 }
 0x95c   : > { %v18402_v55 = vpack.c.bf16 %v5949_v19, %v5948_v10  ;;  %v5955_v25 = vmul.f32 %v5939_v46, %v3680_v33  ;;  %v5941_v36 = vld [vmem:[%s22316_s14 + $0x48] sm:$0xff]  ;;  %v5956_v44 = vmul.f32 %v5940_v52, %v3679_v28  ;;  %v5942_v16 = vld [vmem:[%s22316_s14 + $0x50] sm:$0xff]  ;;  %v5943_v13 = vld [vmem:[%s22316_s14 + $0x58] sm:$0xff]  ;;  %v18409_v27 = vpack.c.bf16 %v5951_v51, %v5950_v20 }
 0x95d   : > { %v5199_v5 = vld [vmem:[%s22292_s24 + $0x190] sm:$0xff]  ;;  %v5200_v6 = vld [vmem:[%s22292_s24 + $0x198] sm:$0xff]  ;;  %v18411_v47 = vpack.c.bf16 %v5953_v41, %v5952_v23  ;;  %v5957_v50 = vmul.f32 %v5941_v36, %v3680_v33  ;;  %v5958_v7 = vmul.f32 %v5942_v16, %v3679_v28  ;;  %v5944_v19 = vld [vmem:[%s22316_s14 + $0x60] sm:$0xff]  ;;  %v5959_v52 = vmul.f32 %v5943_v13, %v3680_v33 }
 0x95e   : > { %22325 = vst [vmem:[#allocation131_spill] sm:$0xff] %v18409_v27  ;;  %v5945_v46 = vld [vmem:[%s22316_s14 + $0x68] sm:$0xff]  ;;  %v5946_v10 = vld [vmem:[%s22316_s14 + $0x70] sm:$0xff]  ;;  %v18416_v12 = vpack.c.bf16 %v5955_v25, %v5954_v54  ;;  %v5960_v24 = vmul.f32 %v5944_v19, %v3679_v28  ;;  %v5164_v51 = vld [vmem:[%s22292_s24 + $0x78] sm:$0xff]  ;;  %v5963_v16 = vmul.f32 %v5947_v18, %v3680_v33  ;;  %v18424_v23 = vmul.f32 %v5180_v14, %v18310_v58 }
 0x95f   : > { %22326 = vst [vmem:[#allocation132_spill] sm:$0xff] %v18411_v47  ;;  %v5961_v32 = vmul.f32 %v5945_v46, %v3680_v33  ;;  %v5163_v20 = vld [vmem:[%s22292_s24 + $0x70] sm:$0xff]  ;;  %v18421_v41 = vpack.c.bf16 %v5957_v50, %v5956_v44  ;;  %v5962_v36 = vmul.f32 %v5946_v10, %v3679_v28  ;;  %v5184_v25 = vld [vmem:[%s22292_s24 + $0x118] sm:$0xff]  ;;  %v5201_v13 = vld [vmem:[%s22292_s24 + $0x1a0] sm:$0xff]  ;;  %v18429_v19 = vpack.c.bf16 %v5959_v52, %v5958_v7 }
 0x960   : > { %22327 = vst [vmem:[#allocation133_spill] sm:$0xff] %v18416_v12  ;;  %22329 = vst [vmem:[#allocation135_spill] sm:$0xff] %v18424_v23  ;;  %v5183_v54 = vld [vmem:[%s22292_s24 + $0x110] sm:$0xff]  ;;  %v18434_v22 = vmul.f32 %v5163_v20, %v18322_v37  ;;  %v18437_v44 = vmul.f32 %v5164_v51, %v18310_v58  ;;  %v5202_v18 = vld [vmem:[%s22292_s24 + $0x1a8] sm:$0xff] }
 0x961   : > { %22328 = vst [vmem:[#allocation134_spill] sm:$0xff] %v18421_v41  ;;  %22330 = vst [vmem:[#allocation136_spill] sm:$0xff] %v18429_v19  ;;  %v18431_v46 = vpack.c.bf16 %v5961_v32, %v5960_v24  ;;  %v5185_v50 = vld [vmem:[%s22292_s24 + $0x120] sm:$0xff]  ;;  %v5186_v33 = vld [vmem:[%s22292_s24 + $0x128] sm:$0xff]  ;;  %v18442_v28 = vpack.c.bf16 %v5963_v16, %v5962_v36  ;;  %v18447_v24 = vmul.f32 %v5199_v5, %v18226_v4 }
 0x962   : > { %22332 = vst [vmem:[#allocation138_spill] sm:$0xff] %v18434_v22  ;;  %22333 = vst [vmem:[#allocation139_spill] sm:$0xff] %v18437_v44  ;;  %v18450_v32 = vmul.f32 %v5200_v6, %v18215_v61  ;;  %v5203_v7 = vld [vmem:[%s22292_s24 + $0x1b0] sm:$0xff]  ;;  %v5204_v10 = vld [vmem:[%s22292_s24 + $0x1b8] sm:$0xff]  ;;  %v18458_v51 = vmul.f32 %v5183_v54, %v18226_v4  ;;  %v18461_v36 = vmul.f32 %v5184_v25, %v18215_v61 }
 0x963   : > { %22331 = vst [vmem:[#allocation137_spill] sm:$0xff] %v18431_v46  ;;  %22334 = vst [vmem:[#allocation140_spill] sm:$0xff] %v18442_v28  ;;  %v5187_v52 = vld [vmem:[%s22292_s24 + $0x130] sm:$0xff]  ;;  %v18464_v5 = vmul.f32 %v5201_v13, %v18274_v57  ;;  %v5188_v6 = vld [vmem:[%s22292_s24 + $0x138] sm:$0xff]  ;;  %v18471_v1 = vmul.f32 %v5202_v18, %v18261_v29  ;;  %v18474_v54 = vmul.f32 %v5185_v50, %v18274_v57 }
 0x964   : > { %22335 = vst [vmem:[#allocation141_spill] sm:$0xff] %v18447_v24  ;;  %22336 = vst [vmem:[#allocation142_spill] sm:$0xff] %v18450_v32  ;;  %v5205_v16 = vld [vmem:[%s22292_s24 + $0x1c0] sm:$0xff]  ;;  %v18477_v25 = vmul.f32 %v5186_v33, %v18261_v29  ;;  %v5206_v20 = vld [vmem:[%s22292_s24 + $0x1c8] sm:$0xff]  ;;  %v18485_v18 = vmul.f32 %v5203_v7, %v18322_v37  ;;  %v18488_v50 = vmul.f32 %v5204_v10, %v18310_v58 }
 0x965   : > { %22337 = vst [vmem:[#allocation143_spill] sm:$0xff] %v18458_v51  ;;  %22338 = vst [vmem:[#allocation144_spill] sm:$0xff] %v18461_v36  ;;  %v5189_v13 = vld [vmem:[%s22292_s24 + $0x140] sm:$0xff]  ;;  %v5190_v22 = vld [vmem:[%s22292_s24 + $0x148] sm:$0xff]  ;;  %v18491_v24 = vmul.f32 %v5187_v52, %v18322_v37  ;;  %v18501_v14 = vmul.f32 %v5188_v6, %v18310_v58  ;;  %v18504_v7 = vmul.f32 %v5205_v16, %v18198_v21 }
 0x966   : > { %22339 = vst [vmem:[#allocation145_spill] sm:$0xff] %v18464_v5  ;;  %22340 = vst [vmem:[#allocation146_spill] sm:$0xff] %v18471_v1  ;;  %v5207_v33 = vld [vmem:[%s22292_s24 + $0x1d0] sm:$0xff]  ;;  %v5208_v32 = vld [vmem:[%s22292_s24 + $0x1d8] sm:$0xff]  ;;  %v18514_v28 = vmul.f32 %v5206_v20, %v18196_v60  ;;  %v18517_v6 = vmul.f32 %v5189_v13, %v18198_v21  ;;  %v18520_v16 = vmul.f32 %v5190_v22, %v18196_v60 }
 0x967   : > { %22341 = vst [vmem:[#allocation147_spill] sm:$0xff] %v18474_v54  ;;  %22342 = vst [vmem:[#allocation148_spill] sm:$0xff] %v18477_v25  ;;  %v5191_v44 = vld [vmem:[%s22292_s24 + $0x150] sm:$0xff]  ;;  %v5192_v10 = vld [vmem:[%s22292_s24 + $0x158] sm:$0xff]  ;;  %v18528_v1 = vmul.f32 %v5207_v33, %v18226_v4  ;;  %v18531_v23 = vmul.f32 %v5208_v32, %v18215_v61 }
 0x968   : > { %22343 = vst [vmem:[#allocation149_spill] sm:$0xff] %v18485_v18  ;;  %22344 = vst [vmem:[#allocation150_spill] sm:$0xff] %v18488_v50  ;;  %v5209_v52 = vld [vmem:[%s22292_s24 + $0x1e0] sm:$0xff]  ;;  %v5210_v51 = vld [vmem:[%s22292_s24 + $0x1e8] sm:$0xff]  ;;  %v18548_v32 = vmul.f32 %v5192_v10, %v18215_v61 }
 0x969   : > { %22345 = vst [vmem:[#allocation151_spill] sm:$0xff] %v18491_v24  ;;  %22346 = vst [vmem:[#allocation152_spill] sm:$0xff] %v18501_v14  ;;  %v4555_v36 = vld [vmem:[%s22278_s12 + $0x18] sm:$0xff]  ;;  %v5193_v54 = vld [vmem:[%s22292_s24 + $0x160] sm:$0xff]  ;;  %v18551_v33 = vmul.f32 %v5209_v52, %v18274_v57  ;;  %v18554_v22 = vmul.f32 %v5210_v51, %v18261_v29 }
 0x96a   : > { %22347 = vst [vmem:[#allocation153_spill] sm:$0xff] %v18504_v7  ;;  %v4559_v46 = vld [vmem:[%s22278_s12 + $0x38] sm:$0xff]  ;;  %22348 = vst [vmem:[#allocation154_spill] sm:$0xff] %v18514_v28  ;;  %v5194_v20 = vld [vmem:[%s22292_s24 + $0x168] sm:$0xff] }
 0x96b   : > { %22349 = vst [vmem:[#allocation155_spill] sm:$0xff] %v18517_v6  ;;  %22350 = vst [vmem:[#allocation156_spill] sm:$0xff] %v18520_v16  ;;  %v18523_v25 = vpack.c.bf16 %v4559_v46, %v4555_v36  ;;  %v5211_v18 = vld [vmem:[%s22292_s24 + $0x1f0] sm:$0xff]  ;;  %v5212_v21 = vld [vmem:[%s22292_s24 + $0x1f8] sm:$0xff]  ;;  %v18541_v46 = vmul.f32 %v5191_v44, %v18226_v4  ;;  %v18558_v44 = vmul.f32 %v5193_v54, %v18274_v57 }
 0x96c   : > { %22352 = vst [vmem:[#allocation158_spill] sm:$0xff] %v18528_v1  ;;  %22353 = vst [vmem:[#allocation159_spill] sm:$0xff] %v18531_v23  ;;  %v5195_v36 = vld [vmem:[%s22292_s24 + $0x170] sm:$0xff]  ;;  %v5196_v4 = vld [vmem:[%s22292_s24 + $0x178] sm:$0xff]  ;;  %v18561_v13 = vmul.f32 %v5194_v20, %v18261_v29  ;;  %v18564_v61 = vmul.f32 %v5211_v18, %v18322_v37  ;;  %v18567_v10 = vmul.f32 %v5212_v21, %v18310_v58 }
 0x96d   : > { %22351 = vst [vmem:[#allocation157_spill] sm:$0xff] %v18523_v25  ;;  %22354 = vst [vmem:[#allocation160_spill] sm:$0xff] %v18541_v46  ;;  %15032 = vmatprep.subr.bf16.mxu1 %v18523_v25  ;;  %v18574_v57 = vmul.f32 %v5195_v36, %v18322_v37  ;;  %v18581_v18 = vmul.f32 %v5196_v4, %v18310_v58  ;;  %v4836_v21 = vld [vmem:[%s22355_s19 + $0x8] sm:$0xff]  ;;  %v4835_v51 = vld [vmem:[%s22355_s19] sm:$0xff]  ;;  %v22384_v46 = vmax.f32 %v18120_v35, 0.0  ;;  %v22387_v35 = vmax.f32 %v18124_v9, 0.0 }
 0x96e   : > { %22356 = vst [vmem:[#allocation161_spill] sm:$0xff] %v18548_v32  ;;  %22357 = vst [vmem:[#allocation162_spill] sm:$0xff] %v18551_v33  ;;  %v4840_v52 = vld [vmem:[%s22355_s19 + $0x28] sm:$0xff]  ;;  %v4839_v36 = vld [vmem:[%s22355_s19 + $0x20] sm:$0xff] }
 0x96f   : > { %22358 = vst [vmem:[#allocation163_spill] sm:$0xff] %v18554_v22  ;;  %22359 = vst [vmem:[#allocation164_spill] sm:$0xff] %v18558_v44  ;;  %v18588_v37 = vpack.c.bf16 %v4840_v52, %v4836_v21  ;;  %v4844_v29 = vld [vmem:[%s22355_s19 + $0x48] sm:$0xff]  ;;  %v18593_v60 = vpack.c.bf16 %v4839_v36, %v4835_v51  ;;  %v4843_v4 = vld [vmem:[%s22355_s19 + $0x40] sm:$0xff] }
 0x970   : > { %22360 = vst [vmem:[#allocation165_spill] sm:$0xff] %v18561_v13  ;;  %22361 = vst [vmem:[#allocation166_spill] sm:$0xff] %v18564_v61  ;;  %v4848_v54 = vld [vmem:[%s22355_s19 + $0x68] sm:$0xff]  ;;  %v4847_v20 = vld [vmem:[%s22355_s19 + $0x60] sm:$0xff] }
 0x971   : > { %22362 = vst [vmem:[#allocation167_spill] sm:$0xff] %v18567_v10  ;;  %22363 = vst [vmem:[#allocation168_spill] sm:$0xff] %v18574_v57  ;;  %v18595_v58 = vpack.c.bf16 %v4848_v54, %v4844_v29  ;;  %15048 = vmatprep.subr.bf16.mxu0 %v18588_v37  ;;  %v18601_v52 = vpack.c.bf16 %v4847_v20, %v4843_v4  ;;  %v4852_v21 = vld [vmem:[%s22355_s19 + $0x88] sm:$0xff]  ;;  %v4851_v51 = vld [vmem:[%s22355_s19 + $0x80] sm:$0xff] }
 0x972   : > { %22364 = vst [vmem:[#allocation169_spill] sm:$0xff] %v18581_v18  ;;  %22365 = vst [vmem:[#allocation170_spill] sm:$0xff] %v18588_v37  ;;  %15050 = vmatpush1.bf16.msra.mxu0 %v18593_v60  ;;  %v4856_v5 = vld [vmem:[%s22355_s19 + $0xa8] sm:$0xff]  ;;  %v4855_v36 = vld [vmem:[%s22355_s19 + $0xa0] sm:$0xff] }
 0x973   : > { %22366 = vst [vmem:[#allocation171_spill] sm:$0xff] %v18593_v60  ;;  %22367 = vst [vmem:[#allocation172_spill] sm:$0xff] %v18595_v58  ;;  %15052 = vmatprep.subr.bf16.mxu0 %v18595_v58  ;;  %v18606_v25 = vpack.c.bf16 %v4856_v5, %v4852_v21  ;;  %v4860_v29 = vld [vmem:[%s22355_s19 + $0xc8] sm:$0xff]  ;;  %v18613_v37 = vpack.c.bf16 %v4855_v36, %v4851_v51  ;;  %v4859_v20 = vld [vmem:[%s22355_s19 + $0xc0] sm:$0xff] }
 0x974   : > { %22368 = vst [vmem:[#allocation173_spill] sm:$0xff] %v18601_v52  ;;  %v4864_v54 = vld [vmem:[%s22355_s19 + $0xe8] sm:$0xff]  ;;  %v4863_v4 = vld [vmem:[%s22355_s19 + $0xe0] sm:$0xff]  ;;  %v4566_v60 = vld [vmem:[%s22278_s12 + $0x70] sm:$0xff] }
 0x975   : > { %22369 = vst [vmem:[#allocation174_spill] sm:$0xff] %v18606_v25  ;;  %22370 = vst [vmem:[#allocation175_spill] sm:$0xff] %v18613_v37  ;;  %v18616_v57 = vpack.c.bf16 %v4864_v54, %v4860_v29  ;;  %v18621_v58 = vpack.c.bf16 %v4863_v4, %v4859_v20  ;;  %v4554_v20 = vld [vmem:[%s22278_s12 + $0x10] sm:$0xff]  ;;  %v4858_v22 = vld [vmem:[%s22355_s19 + $0xb8] sm:$0xff] }
 0x976   : > { %15054 = vmatpush1.bf16.msra.mxu0 %v18601_v52  ;;  %v4558_v4 = vld [vmem:[%s22278_s12 + $0x30] sm:$0xff]  ;;  %v1775_v14 = vld [vmem:[%s18833_s15 + $0x20] sm:$0xff] }
 0x977   : > { %15056 = vmatprep.subr.bf16.mxu0 %v18606_v25  ;;  %22371 = vst [vmem:[#allocation176_spill] sm:$0xff] %v18616_v57  ;;  %22372 = vst [vmem:[#allocation177_spill] sm:$0xff] %v18621_v58  ;;  %v4562_v52 = vld [vmem:[%s22278_s12 + $0x50] sm:$0xff] }
 0x978   : > { %v4574_v61 = vld [vmem:[%s22278_s12 + $0xb0] sm:$0xff] }
 0x979   : > { %v4582_v44 = vld [vmem:[%s22278_s12 + $0xf0] sm:$0xff] }
 0x97a   : > { %15058 = vmatpush1.bf16.msra.mxu0 %v18613_v37  ;;  %v4567_v37 = vld [vmem:[%s22278_s12 + $0x78] sm:$0xff]  ;;  %v4841_v33 = vld [vmem:[%s22355_s19 + $0x30] sm:$0xff] }
 0x97b   : > { %15060 = vmatprep.subr.bf16.mxu0 %v18616_v57  ;;  %v4861_v32 = vld [vmem:[%s22355_s19 + $0xd0] sm:$0xff] }
 0x97c   : > { %v4865_v1 = vld [vmem:[%s22355_s19 + $0xf0] sm:$0xff] }
 0x97d   : > { %v18817_v23 = vpack.c.bf16 %v4865_v1, %v4861_v32  ;;  %v1772_v1 = vld [vmem:[%s18833_s15 + $0x8] sm:$0xff]  ;;  %v1771_v32 = vld [vmem:[%s18833_s15] sm:$0xff] }
 0x97e   : > { %15062 = vmatpush1.bf16.msra.mxu0 %v18621_v58  ;;  %v4563_v58 = vld [vmem:[%s22278_s12 + $0x58] sm:$0xff] }
 0x97f   : > { %22400 = vst [vmem:[#allocation193_spill] sm:$0xff] %v18817_v23 }
 0x9e1   : > { %v14090_v5 = vpop.f32.mrb[58].mxu0 }
 0x9e2   : > { %15870 = vrcp.f32 %v14090_v5  ;;  %v4068_v21 = vpop.f32.mrb[59].mxu0 }
 0x9e3   : > { %15872 = vrcp.f32 %v4068_v21 }
 0x9e5   : > { %v14093_v51 = vpop.f32.mrb[60].mxu0 }
 0x9e6   : > { %15874 = vrcp.f32 %v14093_v51  ;;  %v4078_v36 = vpop.f32.mrb[61].mxu0 }
 0x9e7   : > { %15876 = vrcp.f32 %v4078_v36  ;;  %v18632_v36 = vpack.c.bf16 %v4558_v4, %v4554_v20 }
 0x9e9   : > { %v14096_v29 = vpop.f32.mrb[62].mxu0  ;;  %22373 = vst [vmem:[#allocation178_spill] sm:$0xff] %v18632_v36 }
 0x9ea   : > { %15878 = vrcp.f32 %v14096_v29  ;;  %v4088_v54 = vpop.f32.mrb[63].mxu0 }
 0x9eb   : > { %15880 = vrcp.f32 %v4088_v54  ;;  %v18637_v54 = vpack.c.bf16 %v4567_v37, %v4563_v58  ;;  %v18655_v37 = vpack.c.bf16 %v4566_v60, %v4562_v52 }
 0x9ec   : > { %v15871_v57 = vpop.eup %15870 }
 0x9ed   : > { %v15873_v5 = vpop.eup %15872  ;;  %v14099_v25 = vpop.f32.mrb[64].mxu0  ;;  %v18635_v29 = vmul.f32 %v15871_v57, %v18024_v39  ;;  %22374 = vst [vmem:[#allocation179_spill] sm:$0xff] %v18637_v54  ;;  %22375 = vst [vmem:[#allocation180_spill] sm:$0xff] %v18655_v37 }
 0x9ee   : > { %15882 = vrcp.f32 %v14099_v25  ;;  %v4098_v21 = vpop.f32.mrb[65].mxu0  ;;  %v18630_v51 = vmul.f32 %v15873_v5, %v18020_v17  ;;  %v4571_v25 = vld [vmem:[%s22278_s12 + $0x98] sm:$0xff] }
 0x9ef   : > { %15884 = vrcp.f32 %v4098_v21  ;;  %v4575_v17 = vld [vmem:[%s22278_s12 + $0xb8] sm:$0xff]  ;;  %v4570_v21 = vld [vmem:[%s22278_s12 + $0x90] sm:$0xff] }
 0x9f0   : > { %v15875_v18 = vpop.eup %15874  ;;  %14144 = vmatprep.mubr.msk.f32.mxu1 %vm3927_vm3, %v18630_v51  ;;  %v18661_v5 = vpack.c.bf16 %v4575_v17, %v4571_v25  ;;  %v18679_v25 = vpack.c.bf16 %v4574_v61, %v4570_v21  ;;  %v4842_v61 = vld [vmem:[%s22355_s19 + $0x38] sm:$0xff] }
 0x9f1   : > { %v15877_v20 = vpop.eup %15876  ;;  %v18645_v4 = vpop.f32.mrb[66].mxu0  ;;  %14145 = vmatmul.mubr.msk.f32.vlgmr.msra.gmra.mrb[96].mxu1 %vm3927_vm3, %v18635_v29  ;;  %v18658_v58 = vmul.f32 %v15875_v18, %v18038_v62 }
 0x9f2   : > { %v18649_v39 = vpop.f32.mrb[67].mxu0  ;;  %15034 = vmatpush1.bf16.msra.mxu1 %v18632_v36  ;;  %v18653_v57 = vmul.f32 %v15877_v20, %v18033_v2  ;;  %22376 = vst [vmem:[#allocation181_spill] sm:$0xff] %v18661_v5  ;;  %v4579_v36 = vld [vmem:[%s22278_s12 + $0xd8] sm:$0xff]  ;;  %22377 = vst [vmem:[#allocation182_spill] sm:$0xff] %v18679_v25 }
 0x9f3   : > { %15036 = vmatprep.subr.bf16.mxu1 %v18637_v54  ;;  %v4583_v2 = vld [vmem:[%s22278_s12 + $0xf8] sm:$0xff]  ;;  %v4578_v54 = vld [vmem:[%s22278_s12 + $0xd0] sm:$0xff]  ;;  %s22396_s12 = sld [smem:[#allocation31_spill]] }
 0x9f4   : > { %v15879_v10 = vpop.eup %15878  ;;  %14147 = vmatprep.mubr.msk.f32.mxu1 %vm3927_vm3, %v18653_v57  ;;  %v18685_v20 = vpack.c.bf16 %v4583_v2, %v4579_v36  ;;  %v18703_v36 = vpack.c.bf16 %v4582_v44, %v4578_v54 }
 0x9f5   : > { %v15881_v60 = vpop.eup %15880  ;;  %v18669_v52 = vpop.f32.mrb[68].mxu0  ;;  %14148 = vmatmul.mubr.msk.f32.gmra.mrb[98].mxu1 %vm3927_vm3, %v18658_v58  ;;  %v18682_v17 = vmul.f32 %v15879_v10, %v18048_v42 }
 0x9f6   : > { %v18673_v62 = vpop.f32.mrb[69].mxu0  ;;  %15038 = vmatpush1.bf16.msra.mxu1 %v18655_v37  ;;  %v18677_v18 = vmul.f32 %v15881_v60, %v18045_v56  ;;  %22378 = vst [vmem:[#allocation183_spill] sm:$0xff] %v18685_v20  ;;  %v4838_v56 = vld [vmem:[%s22355_s19 + $0x18] sm:$0xff]  ;;  %22379 = vst [vmem:[#allocation184_spill] sm:$0xff] %v18703_v36  ;;  %v4837_v37 = vld [vmem:[%s22355_s19 + $0x10] sm:$0xff] }
 0x9f7   : > { %15040 = vmatprep.subr.bf16.mxu1 %v18661_v5  ;;  %v18709_v5 = vpack.c.bf16 %v4842_v61, %v4838_v56  ;;  %v18725_v54 = vpack.c.bf16 %v4841_v33, %v4837_v37  ;;  %v4845_v61 = vld [vmem:[%s22355_s19 + $0x50] sm:$0xff] }
 0x9f8   : > { %v15883_v13 = vpop.eup %15882  ;;  %14150 = vmatprep.mubr.msk.f32.mxu1 %vm3927_vm3, %v18677_v18  ;;  %v4853_v37 = vld [vmem:[%s22355_s19 + $0x90] sm:$0xff] }
 0x9f9   : > { %v15885_v21 = vpop.eup %15884  ;;  %v18693_v60 = vpop.f32.mrb[70].mxu0  ;;  %14151 = vmatmul.mubr.msk.f32.gmra.mrb[100].mxu1 %vm3927_vm3, %v18682_v17  ;;  %v18706_v2 = vmul.f32 %v15883_v13, %v18058_v34  ;;  %22380 = vst [vmem:[#allocation185_spill] sm:$0xff] %v18709_v5  ;;  %v22381_v13 = vmov 0.0   ;;  %22382 = vst [vmem:[#allocation186_spill] sm:$0xff] %v18725_v54  ;;  %v5386_v16 = vld [vmem:[%s22396_s12] sm:$0xff]  ;;  %v5387_v7 = vld [vmem:[%s22396_s12 + $0x8] sm:$0xff] }
 0x9fa   : > { %v18697_v42 = vpop.f32.mrb[71].mxu0  ;;  %15042 = vmatpush1.bf16.msra.mxu1 %v18679_v25  ;;  %v18701_v10 = vmul.f32 %v15885_v21, %v18054_v0  ;;  %v4846_v0 = vld [vmem:[%s22355_s19 + $0x58] sm:$0xff]  ;;  %v18828_v28 = vpack.c.bf16 %v5387_v7, %v5386_v16  ;;  %v4327_v7 = vadd.f32 %v18649_v39, %v1771_v32  ;;  %v5388_v47 = vld [vmem:[%s22396_s12 + $0x10] sm:$0xff] }
 0x9fb   : > { %15044 = vmatprep.subr.bf16.mxu1 %v18685_v20  ;;  %v4850_v21 = vld [vmem:[%s22355_s19 + $0x78] sm:$0xff]  ;;  %v4849_v20 = vld [vmem:[%s22355_s19 + $0x70] sm:$0xff] }
 0x9fc   : > { %14153 = vmatprep.mubr.msk.f32.mxu1 %vm3927_vm3, %v18701_v10  ;;  %v18728_v56 = vpack.c.bf16 %v4850_v21, %v4846_v0  ;;  %v4854_v25 = vld [vmem:[%s22355_s19 + $0x98] sm:$0xff]  ;;  %v4857_v0 = vld [vmem:[%s22355_s19 + $0xb0] sm:$0xff]  ;;  %22402 = vst [vmem:[#allocation195_spill] sm:$0xff] %v18828_v28  ;;  %v4389_v24 = vand.u32 2147483647, %v4327_v7 }
 0x9fd   : > { %v18717_v44 = vpop.f32.mrb[72].mxu0  ;;  %14154 = vmatmul.mubr.msk.f32.gmra.mrb[102].mxu1 %vm3927_vm3, %v18706_v2  ;;  %v18742_v33 = vpack.c.bf16 %v4858_v22, %v4854_v25  ;;  %v1778_v32 = vld [vmem:[%s18833_s15 + $0x38] sm:$0xff] }
 0x9fe   : > { %v18721_v34 = vpop.f32.mrb[73].mxu0  ;;  %15046 = vmatpush1.bf16.msra.mxu1 %v18703_v36  ;;  %4786 = vmatprep.mubr.f32.mxu1 %v22381_v13  ;;  %22383 = vst [vmem:[#allocation187_spill] sm:$0xff] %v18728_v56  ;;  %v18739_v36 = vpack.c.bf16 %v4849_v20, %v4845_v61  ;;  %v22389_v20 = vmax.f32 %v18132_v53, 0.0  ;;  %v22391_v53 = vmax.f32 %v18148_v11, 0.0  ;;  %v4397_v39 = vsub.f32 1.0, %v4389_v24 }
 0x9ff   : > { %15064 = vmatprep.subr.bf16.mxu1 %v18709_v5  ;;  %22386 = vst [vmem:[#allocation189_spill] sm:$0xff] %v18742_v33  ;;  %v4362_v12 = vadd.f32 %v18717_v44, %v1778_v32 }
 0xa00   : > { %22385 = vst [vmem:[#allocation188_spill] sm:$0xff] %v18739_v36 }
 0xa01   : > { %12377 = vmatmul.mubr.msk.f32.vlgmr.msra.gmra.mrb[104].mxu1 %vm4584_vm4, %v22384_v46  ;;  %v18755_v46 = vpack.c.bf16 %v4857_v0, %v4853_v37  ;;  %v22390_v37 = vmax.f32 %v18140_v49, 0.0  ;;  %v22392_v49 = vmax.f32 %v18156_v48, 0.0  ;;  %v4396_v44 = vand.u32 2147483647, %v4362_v12 }
 0xa02   : > { %4792 = vmatprep.mubr.f32.mxu1 %v22381_v13  ;;  %15066 = vmatpush1.bf16.msra.mxu1 %v18725_v54 }
 0xa03   : > { %15068 = vmatprep.subr.bf16.mxu1 %v18728_v56  ;;  %22388 = vst [vmem:[#allocation190_spill] sm:$0xff] %v18755_v46  ;;  %v4866_v56 = vld [vmem:[%s22355_s19 + $0xf8] sm:$0xff] }
 0xa04   : > { %v18746_v21 = vpop.f32.mrb[74].mxu0 }
 0xa05   : > { %v18748_v5 = vpop.f32.mrb[75].mxu0  ;;  %12378 = vmatmul.mubr.msk.f32.gmra.mrb[106].mxu1 %vm4584_vm4, %v22387_v35 }
 0xa06   : > { %4798 = vmatprep.mubr.f32.mxu1 %v22381_v13  ;;  %15070 = vmatpush1.bf16.msra.mxu1 %v18739_v36 }
 0xa07   : > { %15072 = vmatprep.subr.bf16.mxu1 %v18742_v33 }
 0xa08   : > { %v18758_v22 = vpop.f32.mrb[76].mxu0 }
 0xa09   : > { %v18760_v25 = vpop.f32.mrb[77].mxu0  ;;  %12379 = vmatmul.mubr.msk.f32.gmra.mrb[108].mxu1 %vm4584_vm4, %v22389_v20 }
 0xa0a   : > { %4804 = vmatprep.mubr.f32.mxu1 %v22381_v13  ;;  %15074 = vmatpush1.bf16.msra.mxu1 %v18755_v46 }
 0xa0c   : > { %v18767_v9 = vpop.f32.mrb[78].mxu0 }
 0xa0d   : > { %v18769_v61 = vpop.f32.mrb[79].mxu0  ;;  %12380 = vmatmul.mubr.msk.f32.gmra.mrb[110].mxu1 %vm4584_vm4, %v22390_v37 }
 0xa0e   : > { %4810 = vmatprep.mubr.f32.mxu1 %v22381_v13 }
 0xa10   : > { %v18775_v0 = vpop.f32.mrb[80].mxu0 }
 0xa11   : > { %v18777_v35 = vpop.f32.mrb[81].mxu0  ;;  %12381 = vmatmul.mubr.msk.f32.gmra.mrb[112].mxu1 %vm4584_vm4, %v22391_v53  ;;  %v22393_v53 = vmax.f32 %v18164_v43, 0.0 }
 0xa12   : > { %4816 = vmatprep.mubr.f32.mxu1 %v22381_v13 }
 0xa14   : > { %v18783_v20 = vpop.f32.mrb[82].mxu0 }
 0xa15   : > { %v18785_v46 = vpop.f32.mrb[83].mxu0  ;;  %12382 = vmatmul.mubr.msk.f32.gmra.mrb[114].mxu1 %vm4584_vm4, %v22392_v49  ;;  %v22395_v49 = vmax.f32 %v18170_v40, 0.0  ;;  %v5277_v40 = vld [vmem:[%s22394_s16] sm:$0xff] }
 0xa16   : > { %4822 = vmatprep.mubr.f32.mxu1 %v22381_v13 }
 0xa18   : > { %v18791_v37 = vpop.f32.mrb[84].mxu0 }
 0xa19   : > { %v18793_v11 = vpop.f32.mrb[85].mxu0  ;;  %12383 = vmatmul.mubr.msk.f32.gmra.mrb[116].mxu1 %vm4584_vm4, %v22393_v53  ;;  %v4862_v53 = vld [vmem:[%s22355_s19 + $0xd8] sm:$0xff]  ;;  %s22404_s19 = sld [smem:[#allocation35_spill]] }
 0xa1a   : > { %4828 = vmatprep.mubr.f32.mxu1 %v22381_v13  ;;  %v18813_v54 = vpack.c.bf16 %v4866_v56, %v4862_v53  ;;  %v4332_v56 = vadd.f32 %v18645_v4, %v1772_v1  ;;  %v1774_v53 = vld [vmem:[%s18833_s15 + $0x18] sm:$0xff]  ;;  %v4347_v1 = vadd.f32 %v18697_v42, %v1775_v14 }
 0xa1b   : > { %v4342_v16 = vadd.f32 %v18669_v52, %v1774_v53  ;;  %v1777_v52 = vld [vmem:[%s18833_s15 + $0x30] sm:$0xff]  ;;  %v5389_v14 = vld [vmem:[%s22396_s12 + $0x18] sm:$0xff]  ;;  %s22409_s12 = sld [smem:[#allocation36_spill]] }
 0xa1c   : > { %v18799_v33 = vpop.f32.mrb[86].mxu0  ;;  %22399 = vst [vmem:[#allocation192_spill] sm:$0xff] %v18813_v54  ;;  %15076 = vmatprep.subr.bf16.mxu1 %v18813_v54  ;;  %v1776_v54 = vld [vmem:[%s18833_s15 + $0x28] sm:$0xff]  ;;  %v4393_v7 = vand.u32 2147483647, %v4347_v1 }
 0xa1d   : > { %v18801_v48 = vpop.f32.mrb[87].mxu0  ;;  %12384 = vmatmul.mubr.msk.f32.gmra.mrb[118].mxu1 %vm4584_vm4, %v22395_v49  ;;  %v5278_v49 = vld [vmem:[%s22394_s16 + $0x8] sm:$0xff]  ;;  %v4392_v50 = vand.u32 2147483647, %v4342_v16  ;;  %v4352_v41 = vadd.f32 %v18693_v60, %v1776_v54  ;;  %v5279_v16 = vld [vmem:[%s22394_s16 + $0x10] sm:$0xff]  ;;  %v4357_v60 = vadd.f32 %v18721_v34, %v1777_v52  ;;  %v5280_v54 = vld [vmem:[%s22394_s16 + $0x18] sm:$0xff] }
 0xa1e   : > { %5068 = vmatprep.mubr.f32.mxu1 %v22381_v13  ;;  %15078 = vmatpush1.bf16.msra.mxu1 %v18817_v23  ;;  %v18823_v6 = vpack.c.bf16 %v5278_v49, %v5277_v40  ;;  %v1773_v40 = vld [vmem:[%s18833_s15 + $0x10] sm:$0xff]  ;;  %v4390_v23 = vand.u32 2147483647, %v4332_v56  ;;  %v4401_v1 = vsub.f32 1.0, %v4393_v7  ;;  %v18855_v32 = vpack.c.bf16 %v5280_v54, %v5279_v16  ;;  %v5543_v34 = vld [vmem:[%s22403_s28] sm:$0xff]  ;;  %s22415_s16 = sld [smem:[#allocation23_spill]] }
 0xa1f   : > { %15088 = vmatprep.subr.bf16.mxu1 %v18828_v28  ;;  %v4337_v49 = vadd.f32 %v18673_v62, %v1773_v40  ;;  %v4400_v53 = vsub.f32 1.0, %v4392_v50  ;;  %v4394_v56 = vand.u32 2147483647, %v4352_v41  ;;  %v4395_v52 = vand.u32 2147483647, %v4357_v60 }
 0xa20   : > { %v18807_v36 = vpop.f32.mrb[88].mxu0  ;;  %22401 = vst [vmem:[#allocation194_spill] sm:$0xff] %v18823_v6  ;;  %15080 = vmatprep.subr.bf16.mxu0 %v18823_v6  ;;  %v4398_v4 = vsub.f32 1.0, %v4390_v23  ;;  %22405 = vst [vmem:[#allocation196_spill] sm:$0xff] %v18855_v32 }
 0xa21   : > { %v18809_v43 = vpop.f32.mrb[89].mxu0  ;;  %v4391_v19 = vand.u32 2147483647, %v4337_v49  ;;  %v4405_v49 = vmax.f32 %v4397_v39, 0.0  ;;  %v4402_v50 = vsub.f32 1.0, %v4394_v56  ;;  %v18857_v39 = vpack.c.bf16 %v5389_v14, %v5388_v47 }
 0xa22   : > { %22397 = vst [vmem:[#allocation191_spill] sm:$0xff] %v18809_v43  ;;  %v4406_v40 = vmax.f32 %v4398_v4, 0.0  ;;  %v5659_v43 = vld [vmem:[%s22404_s19 + $0x8] sm:$0xff]  ;;  %v4404_v56 = vsub.f32 1.0, %v4396_v44 }
 0xa23   : > { %v4399_v62 = vsub.f32 1.0, %v4391_v19  ;;  %v4408_v19 = vmax.f32 %v4400_v53, 0.0  ;;  %22406 = vst [vmem:[#allocation197_spill] sm:$0xff] %v18857_v39  ;;  %v4410_v47 = vmax.f32 %v4402_v50, 0.0 }
 0xa25   : > { %v4407_v41 = vmax.f32 %v4399_v62, 0.0 }
 0xac4   : > { %v14146_v23 = vpop.f32.mrb[96].mxu1 }
 0xac5   : > { %v4545_v24 = vmul.f32 %v14146_v23, %v4406_v40  ;;  %v4505_v42 = vpop.f32.mrb[97].mxu1  ;;  %v5544_v40 = vld [vmem:[%s22403_s28 + $0x8] sm:$0xff]  ;;  %v5658_v23 = vld [vmem:[%s22404_s19] sm:$0xff]  ;;  %s22518_s28 = sld [smem:[#allocation49_spill]] }
 0xac6   : > { %v4544_v4 = vmul.f32 %v4505_v42, %v4405_v49  ;;  %v18871_v7 = vpack.c.bf16 %v5544_v40, %v5543_v34  ;;  %v18873_v16 = vpack.c.bf16 %v5659_v43, %v5658_v23  ;;  %v4403_v49 = vsub.f32 1.0, %v4395_v52 }
 0xac7   : > { %v4412_v43 = vmax.f32 %v4404_v56, 0.0  ;;  %v5661_v56 = vld [vmem:[%s22404_s19 + $0x18] sm:$0xff] }
 0xac8   : > { %v14149_v27 = vpop.f32.mrb[98].mxu1  ;;  %12385 = vmatmul.mubr.msk.f32.vlgmr.msra.gmra.mrb[90].mxu0 %vm4584_vm4, %v4544_v4  ;;  %12393 = vmatmul.mubr.msk.f32.vlgmr.msra.gmra.mrb[120].mxu1 %vm4584_vm4, %v4544_v4  ;;  %22407 = vst [vmem:[#allocation198_spill] sm:$0xff] %v18871_v7  ;;  %22408 = vst [vmem:[#allocation199_spill] sm:$0xff] %v18873_v16 }
 0xac9   : > { %v4547_v53 = vmul.f32 %v14149_v27, %v4408_v19  ;;  %15082 = vmatpush3.bf16.msra.mxu0 %v18823_v6  ;;  %v4515_v62 = vpop.f32.mrb[99].mxu1  ;;  %4961 = vmatprep.mubr.f32.mxu0 %v22381_v13  ;;  %v4409_v27 = vmax.f32 %v4401_v1, 0.0  ;;  %v4411_v19 = vmax.f32 %v4403_v49, 0.0  ;;  %v5792_v49 = vld [vmem:[%s22409_s12 + $0x8] sm:$0xff] }
 0xaca   : > { %v4546_v12 = vmul.f32 %v4515_v62, %v4407_v41  ;;  %5074 = vmatprep.mubr.f32.mxu1 %v22381_v13  ;;  %15090 = vmatpush3.bf16.msra.mxu1 %v18828_v28 }
 0xacb   : > { %15084 = vmatprep.subr.bf16.mxu0 %v18855_v32  ;;  %15092 = vmatprep.subr.bf16.mxu1 %v18857_v39 }
 0xacc   : > { %v14152_v60 = vpop.f32.mrb[100].mxu1  ;;  %12386 = vmatmul.mubr.msk.f32.gmra.mrb[92].mxu0 %vm4584_vm4, %v4545_v24  ;;  %12394 = vmatmul.mubr.msk.f32.gmra.mrb[122].mxu1 %vm4584_vm4, %v4545_v24 }
 0xacd   : > { %v4549_v54 = vmul.f32 %v14152_v60, %v4410_v47  ;;  %v4525_v14 = vpop.f32.mrb[101].mxu1  ;;  %4967 = vmatprep.mubr.f32.mxu0 %v22381_v13  ;;  %5080 = vmatprep.mubr.f32.mxu1 %v22381_v13 }
 0xace   : > { %v4548_v42 = vmul.f32 %v4525_v14, %v4409_v27  ;;  %15086 = vmatpush3.bf16.msra.mxu0 %v18855_v32  ;;  %15094 = vmatpush3.bf16.msra.mxu1 %v18857_v39  ;;  %v5791_v27 = vld [vmem:[%s22409_s12] sm:$0xff] }
 0xacf   : > { %15096 = vmatprep.subr.bf16.mxu0 %v18871_v7  ;;  %15100 = vmatprep.subr.bf16.mxu1 %v18873_v16  ;;  %v18935_v14 = vpack.c.bf16 %v5792_v49, %v5791_v27 }
 0xad0   : > { %v14155_v41 = vpop.f32.mrb[102].mxu1  ;;  %12387 = vmatmul.mubr.msk.f32.gmra.mrb[94].mxu0 %vm4584_vm4, %v4546_v12  ;;  %12395 = vmatmul.mubr.msk.f32.gmra.mrb[124].mxu1 %vm4584_vm4, %v4546_v12  ;;  %v5660_v12 = vld [vmem:[%s22404_s19 + $0x10] sm:$0xff] }
 0xad1   : > { %v4551_v24 = vmul.f32 %v14155_v41, %v4412_v43  ;;  %v4535_v50 = vpop.f32.mrb[103].mxu1  ;;  %4973 = vmatprep.mubr.f32.mxu0 %v22381_v13  ;;  %5086 = vmatprep.mubr.f32.mxu1 %v22381_v13  ;;  %22411 = vst [vmem:[#allocation201_spill] sm:$0xff] %v18935_v14 }
 0xad2   : > { %v4550_v4 = vmul.f32 %v4535_v50, %v4411_v19  ;;  %v5793_v19 = vld [vmem:[%s22409_s12 + $0x10] sm:$0xff] }
 0xad4   : > { %v18887_v1 = vpop.f32.mrb[104].mxu1  ;;  %12388 = vmatmul.mubr.msk.f32.gmra.mrb[96].mxu0 %vm4584_vm4, %v4547_v53  ;;  %12396 = vmatmul.mubr.msk.f32.gmra.mrb[126].mxu1 %vm4584_vm4, %v4547_v53 }
 0xad5   : > { %v18891_v44 = vpop.f32.mrb[105].mxu1  ;;  %4979 = vmatprep.mubr.f32.mxu0 %v22381_v13  ;;  %5092 = vmatprep.mubr.f32.mxu1 %v22381_v13 }
 0xad8   : > { %v18895_v34 = vpop.f32.mrb[106].mxu1  ;;  %12389 = vmatmul.mubr.msk.f32.gmra.mrb[98].mxu0 %vm4584_vm4, %v4548_v42  ;;  %12397 = vmatmul.mubr.msk.f32.gmra.mrb[128].mxu1 %vm4584_vm4, %v4548_v42 }
 0xad9   : > { %v18899_v52 = vpop.f32.mrb[107].mxu1  ;;  %4985 = vmatprep.mubr.f32.mxu0 %v22381_v13  ;;  %5098 = vmatprep.mubr.f32.mxu1 %v22381_v13 }
 0xadc   : > { %v18903_v40 = vpop.f32.mrb[108].mxu1  ;;  %12390 = vmatmul.mubr.msk.f32.gmra.mrb[100].mxu0 %vm4584_vm4, %v4549_v54  ;;  %12398 = vmatmul.mubr.msk.f32.gmra.mrb[130].mxu1 %vm4584_vm4, %v4549_v54  ;;  %v18933_v54 = vpack.c.bf16 %v5661_v56, %v5660_v12 }
 0xadd   : > { %v18907_v23 = vpop.f32.mrb[109].mxu1  ;;  %4991 = vmatprep.mubr.f32.mxu0 %v22381_v13  ;;  %5104 = vmatprep.mubr.f32.mxu1 %v22381_v13 }
 0xade   : > { %22410 = vst [vmem:[#allocation200_spill] sm:$0xff] %v18933_v54 }
 0xae0   : > { %v18911_v53 = vpop.f32.mrb[110].mxu1  ;;  %12391 = vmatmul.mubr.msk.f32.gmra.mrb[102].mxu0 %vm4584_vm4, %v4550_v4  ;;  %12399 = vmatmul.mubr.msk.f32.gmra.mrb[132].mxu1 %vm4584_vm4, %v4550_v4 }
 0xae1   : > { %v18915_v62 = vpop.f32.mrb[111].mxu1  ;;  %4997 = vmatprep.mubr.f32.mxu0 %v22381_v13  ;;  %5110 = vmatprep.mubr.f32.mxu1 %v22381_v13 }
 0xae4   : > { %v18920_v47 = vpop.f32.mrb[112].mxu1  ;;  %12392 = vmatmul.mubr.msk.f32.gmra.mrb[104].mxu0 %vm4584_vm4, %v4551_v24  ;;  %12400 = vmatmul.mubr.msk.f32.gmra.mrb[134].mxu1 %vm4584_vm4, %v4551_v24 }
 0xae5   : > { %v18927_v60 = vpop.f32.mrb[113].mxu1  ;;  %14164 = vmatprep.mubr.msk.f32.mxu0 %vm1893_vm0, %v17948_v31  ;;  %14184 = vmatprep.mubr.msk.f32.mxu1 %vm1893_vm0, %v17948_v31 }
 0xae8   : > { %v18937_v42 = vpop.f32.mrb[114].mxu1  ;;  %14165 = vmatmul.mubr.msk.f32.vlgmr.msra.gmra.mrb[106].mxu0 %vm1893_vm0, %v17950_v38  ;;  %14185 = vmatmul.mubr.msk.f32.vlgmr.msra.gmra.mrb[136].mxu1 %vm1893_vm0, %v17950_v38 }
 0xae9   : > { %15098 = vmatpush3.bf16.msra.mxu0 %v18871_v7  ;;  %15102 = vmatpush3.bf16.msra.mxu1 %v18873_v16  ;;  %v18945_v43 = vpop.f32.mrb[115].mxu1 }
 0xaea   : > { %14167 = vmatprep.mubr.msk.f32.mxu0 %vm1893_vm0, %v17956_v26  ;;  %14187 = vmatprep.mubr.msk.f32.mxu1 %vm1893_vm0, %v17956_v26 }
 0xaeb   : > { %15104 = vmatprep.subr.bf16.mxu1 %v18933_v54  ;;  %15108 = vmatprep.subr.bf16.mxu0 %v18935_v14 }
 0xaec   : > { %v18953_v31 = vpop.f32.mrb[116].mxu1  ;;  %14168 = vmatmul.mubr.msk.f32.gmra.mrb[108].mxu0 %vm1893_vm0, %v17958_v3  ;;  %14188 = vmatmul.mubr.msk.f32.gmra.mrb[138].mxu1 %vm1893_vm0, %v17958_v3 }
 0xaed   : > { %15106 = vmatpush3.bf16.msra.mxu1 %v18933_v54  ;;  %v18960_v38 = vpop.f32.mrb[117].mxu1  ;;  %14170 = vmatprep.mubr.msk.f32.mxu0 %vm1893_vm0, %v17964_v8 }
 0xaee   : > { %14190 = vmatprep.mubr.msk.f32.mxu1 %vm1893_vm0, %v17964_v8  ;;  %15116 = vmatprep.subr.bf16.mxu1 %v18402_v55  ;;  %v5794_v8 = vld [vmem:[%s22409_s12 + $0x18] sm:$0xff]  ;;  %s22414_s12 = sld [smem:[#allocation22_spill]] }
 0xaf0   : > { %v18967_v26 = vpop.f32.mrb[118].mxu1  ;;  %14171 = vmatmul.mubr.msk.f32.gmra.mrb[110].mxu0 %vm1893_vm0, %v17966_v59  ;;  %14191 = vmatmul.mubr.msk.f32.gmra.mrb[140].mxu1 %vm1893_vm0, %v17966_v59  ;;  %v18987_v59 = vpack.c.bf16 %v5794_v8, %v5793_v19 }
 0xaf1   : > { %v18973_v3 = vpop.f32.mrb[119].mxu1  ;;  %14173 = vmatprep.mubr.msk.f32.mxu0 %vm1893_vm0, %v17972_v30  ;;  %14193 = vmatprep.mubr.msk.f32.mxu1 %vm1893_vm0, %v17972_v30  ;;  %v22413_v30 = vpack.c.bf16 %v18211_v63, %v18208_v15 }
 0xaf2   : > { %22412 = vst [vmem:[#allocation202_spill] sm:$0xff] %v18987_v59 }
 0xaf4   : > { %14174 = vmatmul.mubr.msk.f32.gmra.mrb[112].mxu0 %vm1893_vm0, %v17975_v45  ;;  %14194 = vmatmul.mubr.msk.f32.gmra.mrb[142].mxu1 %vm1893_vm0, %v17975_v45  ;;  %s19095_s19 = scalar_lea.vmem %s22414_s12, %s16909_s0  ;;  %s19112_s12 = scalar_lea.vmem %s22415_s16, %s16909_s0 }
 0xaf5   : > { %14200 = vmatprep.mubr.msk.f32.mxu0 %vm3927_vm3, %v18630_v51  ;;  %v1768_v54 = vld [vmem:[%s19095_s19 + $0x28] sm:$0xff]  ;;  %v1767_v7 = vld [vmem:[%s19095_s19 + $0x20] sm:$0xff]  ;;  %s22517_s16 = sld [smem:[#allocation48_spill]]  ;;  %s22528_s0 = sld [smem:[#allocation54_spill]] }
 0xaf6   : > { %v1784_v16 = vld [vmem:[%s19112_s12 + $0x28] sm:$0xff]  ;;  %v1783_v32 = vld [vmem:[%s19112_s12 + $0x20] sm:$0xff] }
 0xaf8   : > { %14201 = vmatmul.mubr.msk.f32.vlgmr.msra.gmra.mrb[114].mxu0 %vm3927_vm3, %v18635_v29 }
 0xaf9   : > { %15110 = vmatpush3.bf16.msra.mxu0 %v18935_v14  ;;  %14203 = vmatprep.mubr.msk.f32.mxu0 %vm3927_vm3, %v18653_v57 }
 0xafa   : > { %15112 = vmatprep.subr.bf16.mxu0 %v18987_v59 }
 0xafc   : > { %14204 = vmatmul.mubr.msk.f32.gmra.mrb[116].mxu0 %vm3927_vm3, %v18658_v58 }
 0xafd   : > { %15114 = vmatpush3.bf16.msra.mxu0 %v18987_v59  ;;  %14206 = vmatprep.mubr.msk.f32.mxu0 %vm3927_vm3, %v18677_v18  ;;  %v1781_v59 = vld [vmem:[%s19112_s12 + $0x10] sm:$0xff] }
 0xafe   : > { %15148 = vmatprep.subr.bf16.mxu0 %v22413_v30 }
 0xb00   : > { %14207 = vmatmul.mubr.msk.f32.gmra.mrb[118].mxu0 %vm3927_vm3, %v18682_v17 }
 0xb01   : > { %14209 = vmatprep.mubr.msk.f32.mxu0 %vm3927_vm3, %v18701_v10 }
 0xb04   : > { %14210 = vmatmul.mubr.msk.f32.gmra.mrb[120].mxu0 %vm3927_vm3, %v18706_v2 }
 0xb9b   : > { %v4957_v45 = vpop.f32.mrb[90].mxu0  ;;  %v5070_v51 = vpop.f32.mrb[120].mxu1 }
 0xb9c   : > { %v19010_v29 = vmul.f32 %v4957_v45, %v18746_v21  ;;  %v19013_v57 = vmul.f32 %v5070_v51, %v18887_v1  ;;  %v4959_v58 = vpop.f32.mrb[91].mxu0  ;;  %v5072_v15 = vpop.f32.mrb[121].mxu1 }
 0xb9d   : > { %v19016_v63 = vmul.f32 %v4959_v58, %v18748_v5  ;;  %v19019_v18 = vmul.f32 %v5072_v15, %v18891_v44 }
 0xb9f   : > { %v4963_v17 = vpop.f32.mrb[92].mxu0  ;;  %v5076_v10 = vpop.f32.mrb[122].mxu1 }
 0xba0   : > { %v19022_v2 = vmul.f32 %v4963_v17, %v18758_v22  ;;  %v19025_v41 = vmul.f32 %v5076_v10, %v18895_v34  ;;  %v4965_v21 = vpop.f32.mrb[93].mxu0  ;;  %v5078_v24 = vpop.f32.mrb[123].mxu1 }
 0xba1   : > { %v19028_v50 = vmul.f32 %v4965_v21, %v18760_v25  ;;  %v19031_v4 = vmul.f32 %v5078_v24, %v18899_v52 }
 0xba3   : > { %v4969_v5 = vpop.f32.mrb[94].mxu0  ;;  %v5082_v1 = vpop.f32.mrb[124].mxu1 }
 0xba4   : > { %v19034_v44 = vmul.f32 %v4969_v5, %v18767_v9  ;;  %v19037_v12 = vmul.f32 %v5082_v1, %v18903_v40  ;;  %v4971_v22 = vpop.f32.mrb[95].mxu0  ;;  %v5084_v56 = vpop.f32.mrb[125].mxu1 }
 0xba5   : > { %v19040_v34 = vmul.f32 %v4971_v22, %v18769_v61  ;;  %v19043_v27 = vmul.f32 %v5084_v56, %v18907_v23 }
 0xba7   : > { %v4975_v25 = vpop.f32.mrb[96].mxu0  ;;  %v5088_v49 = vpop.f32.mrb[126].mxu1 }
 0xba8   : > { %v19046_v52 = vmul.f32 %v4975_v25, %v18775_v0  ;;  %v19049_v19 = vmul.f32 %v5088_v49, %v18911_v53  ;;  %v4977_v9 = vpop.f32.mrb[97].mxu0  ;;  %v5090_v8 = vpop.f32.mrb[127].mxu1 }
 0xba9   : > { %v19052_v40 = vmul.f32 %v4977_v9, %v18777_v35  ;;  %v19055_v30 = vmul.f32 %v5090_v8, %v18915_v62  ;;  %v1764_v8 = vld [vmem:[%s19095_s19 + $0x8] sm:$0xff] }
 0xbab   : > { %v4981_v61 = vpop.f32.mrb[98].mxu0  ;;  %v5094_v45 = vpop.f32.mrb[128].mxu1 }
 0xbac   : > { %v19058_v23 = vmul.f32 %v4981_v61, %v18783_v20  ;;  %v19061_v51 = vmul.f32 %v5094_v45, %v18920_v47  ;;  %v4983_v0 = vpop.f32.mrb[99].mxu0  ;;  %v5096_v58 = vpop.f32.mrb[129].mxu1 }
 0xbad   : > { %v19064_v53 = vmul.f32 %v4983_v0, %v18785_v46  ;;  %v19067_v15 = vmul.f32 %v5096_v58, %v18927_v60  ;;  %v1780_v0 = vld [vmem:[%s19112_s12 + $0x8] sm:$0xff] }
 0xbaf   : > { %v4987_v35 = vpop.f32.mrb[100].mxu0  ;;  %v5100_v62 = vpop.f32.mrb[130].mxu1 }
 0xbb0   : > { %v19070_v17 = vmul.f32 %v4987_v35, %v18791_v37  ;;  %v19073_v20 = vmul.f32 %v5100_v62, %v18937_v42  ;;  %v4989_v47 = vpop.f32.mrb[101].mxu0  ;;  %v5102_v10 = vpop.f32.mrb[131].mxu1 }
 0xbb1   : > { %v19076_v21 = vmul.f32 %v4989_v47, %v18793_v11  ;;  %v19079_v46 = vmul.f32 %v5102_v10, %v18945_v43  ;;  %v1779_v47 = vld [vmem:[%s19112_s12] sm:$0xff]  ;;  %v1766_v10 = vld [vmem:[%s19095_s19 + $0x18] sm:$0xff] }
 0xbb3   : > { %v4993_v60 = vpop.f32.mrb[102].mxu0  ;;  %v5106_v24 = vpop.f32.mrb[132].mxu1 }
 0xbb4   : > { %v19082_v5 = vmul.f32 %v4993_v60, %v18799_v33  ;;  %v19085_v37 = vmul.f32 %v5106_v24, %v18953_v31  ;;  %v4995_v42 = vpop.f32.mrb[103].mxu0  ;;  %v5108_v1 = vpop.f32.mrb[133].mxu1  ;;  %v1765_v24 = vld [vmem:[%s19095_s19 + $0x10] sm:$0xff] }
 0xbb5   : > { %v19088_v22 = vmul.f32 %v4995_v42, %v18801_v48  ;;  %v19091_v11 = vmul.f32 %v5108_v1, %v18960_v38  ;;  %v22416_v48 = vld [vmem:[#allocation191_spill] sm:$0xff] }
 0xbb7   : > { %v4999_v43 = vpop.f32.mrb[104].mxu0  ;;  %v5112_v33 = vpop.f32.mrb[134].mxu1 }
 0xbb8   : > { %v19098_v56 = vmul.f32 %v4999_v43, %v18807_v36  ;;  %v19101_v31 = vmul.f32 %v5112_v33, %v18967_v26  ;;  %v5001_v25 = vpop.f32.mrb[105].mxu0  ;;  %v5114_v49 = vpop.f32.mrb[135].mxu1  ;;  %v1763_v36 = vld [vmem:[%s19095_s19] sm:$0xff] }
 0xbb9   : > { %v19104_v9 = vmul.f32 %v5001_v25, %v22416_v48  ;;  %v19107_v38 = vmul.f32 %v5114_v49, %v18973_v3  ;;  %v1782_v3 = vld [vmem:[%s19112_s12 + $0x18] sm:$0xff] }
 0xbbb   : > { %v14166_v61 = vpop.f32.mrb[106].mxu0  ;;  %v14186_v26 = vpop.f32.mrb[136].mxu1 }
 0xbbc   : > { %v5353_v45 = vadd.f32 %v14166_v61, %v1764_v8  ;;  %v5347_v58 = vpop.f32.mrb[107].mxu0  ;;  %v5456_v35 = vpop.f32.mrb[137].mxu1  ;;  %v5462_v42 = vadd.f32 %v14186_v26, %v1780_v0 }
 0xbbd   : > { %v5348_v62 = vadd.f32 %v5347_v58, %v1763_v36  ;;  %v5457_v49 = vadd.f32 %v5456_v35, %v1779_v47 }
 0xbbe   : > { %v5496_v60 = vand.u32 2147483647, %v5353_v45  ;;  %v5520_v39 = vand.u32 2147483647, %v5462_v42 }
 0xbbf   : > { %v5495_v1 = vand.u32 2147483647, %v5348_v62  ;;  %v14169_v43 = vpop.f32.mrb[108].mxu0  ;;  %v14189_v33 = vpop.f32.mrb[138].mxu1  ;;  %v5519_v47 = vand.u32 2147483647, %v5457_v49 }
 0xbc0   : > { %v5504_v25 = vsub.f32 1.0, %v5496_v60  ;;  %v5363_v48 = vadd.f32 %v14169_v43, %v1766_v10  ;;  %v5357_v8 = vpop.f32.mrb[109].mxu0  ;;  %v5466_v61 = vpop.f32.mrb[139].mxu1  ;;  %v5472_v58 = vadd.f32 %v14189_v33, %v1782_v3 }
 0xbc1   : > { %v5503_v36 = vsub.f32 1.0, %v5495_v1  ;;  %v5358_v14 = vadd.f32 %v5357_v8, %v1765_v24  ;;  %v5467_v62 = vadd.f32 %v5466_v61, %v1781_v59  ;;  %v1770_v59 = vld [vmem:[%s19095_s19 + $0x38] sm:$0xff] }
 0xbc2   : > { %v5498_v45 = vand.u32 2147483647, %v5363_v48  ;;  %v5512_v35 = vmax.f32 %v5504_v25, 0.0  ;;  %v5522_v1 = vand.u32 2147483647, %v5472_v58  ;;  %v1786_v8 = vld [vmem:[%s19112_s12 + $0x38] sm:$0xff] }
 0xbc3   : > { %v5511_v26 = vmax.f32 %v5503_v36, 0.0  ;;  %v5497_v0 = vand.u32 2147483647, %v5358_v14  ;;  %v14172_v60 = vpop.f32.mrb[110].mxu0  ;;  %v14192_v43 = vpop.f32.mrb[140].mxu1  ;;  %v1769_v25 = vld [vmem:[%s19095_s19 + $0x30] sm:$0xff] }
 0xbc4   : > { %v5506_v10 = vsub.f32 1.0, %v5498_v45  ;;  %v5373_v24 = vadd.f32 %v14172_v60, %v1768_v54  ;;  %v5367_v33 = vpop.f32.mrb[111].mxu0  ;;  %v5476_v48 = vpop.f32.mrb[141].mxu1  ;;  %v5482_v42 = vadd.f32 %v14192_v43, %v1784_v16  ;;  %v5521_v49 = vand.u32 2147483647, %v5467_v62  ;;  %v1785_v58 = vld [vmem:[%s19112_s12 + $0x30] sm:$0xff] }
 0xbc5   : > { %v5505_v3 = vsub.f32 1.0, %v5497_v0  ;;  %14220 = vmatprep.mubr.msk.f32.mxu1 %vm1893_vm0, %v5511_v26  ;;  %v5368_v14 = vadd.f32 %v5367_v33, %v1767_v7  ;;  %v5477_v45 = vadd.f32 %v5476_v48, %v1783_v32  ;;  %v5528_v0 = vsub.f32 1.0, %v5520_v39  ;;  %v22417_v26 = vld [vmem:[#allocation131_spill] sm:$0xff] }
 0xbc6   : > { %14221 = vmatmul.mubr.msk.f32.vlgmr.msra.gmra.mrb[144].mxu1 %vm1893_vm0, %v5512_v35  ;;  %v5500_v36 = vand.u32 2147483647, %v5373_v24  ;;  %v5514_v54 = vmax.f32 %v5506_v10, 0.0  ;;  %v5527_v7 = vsub.f32 1.0, %v5519_v47  ;;  %v5530_v16 = vsub.f32 1.0, %v5522_v1 }
 0xbc7   : > { %v5513_v61 = vmax.f32 %v5505_v3, 0.0  ;;  %15118 = vmatpush3.bf16.msra.mxu1 %v18402_v55  ;;  %v5499_v60 = vand.u32 2147483647, %v5368_v14  ;;  %v14175_v28 = vpop.f32.mrb[112].mxu0  ;;  %v14195_v6 = vpop.f32.mrb[142].mxu1  ;;  %v5529_v39 = vsub.f32 1.0, %v5521_v49 }
 0xbc8   : > { %15120 = vmatprep.subr.bf16.mxu1 %v22417_v26  ;;  %v5508_v35 = vsub.f32 1.0, %v5500_v36  ;;  %v5383_v43 = vadd.f32 %v14175_v28, %v1770_v59  ;;  %v5377_v33 = vpop.f32.mrb[113].mxu0  ;;  %v5486_v13 = vpop.f32.mrb[143].mxu1  ;;  %v5524_v62 = vand.u32 2147483647, %v5482_v42  ;;  %v5492_v3 = vadd.f32 %v14195_v6, %v1786_v8  ;;  %v22418_v28 = vld [vmem:[#allocation132_spill] sm:$0xff] }
 0xbc9   : > { %14223 = vmatprep.mubr.msk.f32.mxu1 %vm1893_vm0, %v5513_v61  ;;  %v5507_v32 = vsub.f32 1.0, %v5499_v60  ;;  %v5378_v55 = vadd.f32 %v5377_v33, %v1769_v25  ;;  %v5523_v10 = vand.u32 2147483647, %v5477_v45  ;;  %v5487_v48 = vadd.f32 %v5486_v13, %v1785_v58  ;;  %v22419_v33 = vld [vmem:[#allocation133_spill] sm:$0xff] }
 0xbca   : > { %14224 = vmatmul.mubr.msk.f32.gmra.mrb[146].mxu1 %vm1893_vm0, %v5514_v54  ;;  %v5502_v24 = vand.u32 2147483647, %v5383_v43  ;;  %v5536_v47 = vmax.f32 %v5528_v0, 0.0  ;;  %v5535_v59 = vmax.f32 %v5527_v7, 0.0  ;;  %v5538_v36 = vmax.f32 %v5530_v16, 0.0 }
 0xbcb   : > { %15122 = vmatpush3.bf16.msra.mxu1 %v22417_v26  ;;  %v5515_v1 = vmax.f32 %v5507_v32, 0.0  ;;  %v5501_v14 = vand.u32 2147483647, %v5378_v55  ;;  %v5516_v61 = vmax.f32 %v5508_v35, 0.0  ;;  %v14202_v60 = vpop.f32.mrb[114].mxu0  ;;  %v5532_v6 = vsub.f32 1.0, %v5524_v62 }
 0xbcc   : > { %15124 = vmatprep.subr.bf16.mxu1 %v22418_v28  ;;  %v5510_v42 = vsub.f32 1.0, %v5502_v24  ;;  %v5526_v8 = vand.u32 2147483647, %v5492_v3  ;;  %v5651_v54 = vmul.f32 %v14202_v60, %v5536_v47  ;;  %v5611_v49 = vpop.f32.mrb[115].mxu0  ;;  %v5537_v13 = vmax.f32 %v5529_v39, 0.0  ;;  %v22421_v24 = vld [vmem:[#allocation100_spill] sm:$0xff] }
 0xbcd   : > { %v5509_v25 = vsub.f32 1.0, %v5501_v14  ;;  %14226 = vmatprep.mubr.msk.f32.mxu1 %vm1893_vm0, %v5515_v1  ;;  %v5531_v45 = vsub.f32 1.0, %v5523_v10  ;;  %v5525_v58 = vand.u32 2147483647, %v5487_v48  ;;  %v5650_v0 = vmul.f32 %v5611_v49, %v5535_v59  ;;  %v22420_v10 = vld [vmem:[#allocation101_spill] sm:$0xff]  ;;  %v22423_v1 = vld [vmem:[#allocation111_spill] sm:$0xff] }
 0xbce   : > { %14227 = vmatmul.mubr.msk.f32.gmra.mrb[148].mxu1 %vm1893_vm0, %v5516_v61  ;;  %v5518_v35 = vmax.f32 %v5510_v42, 0.0  ;;  %v5540_v32 = vmax.f32 %v5532_v6, 0.0  ;;  %v5534_v3 = vsub.f32 1.0, %v5526_v8  ;;  %v22422_v48 = vpack.c.bf16 %v22420_v10, %v22421_v24  ;;  %v22424_v14 = vld [vmem:[#allocation110_spill] sm:$0xff]  ;;  %v22427_v8 = vld [vmem:[#allocation113_spill] sm:$0xff]  ;;  %v22442_v10 = vld [vmem:[#allocation128_spill] sm:$0xff] }
 0xbcf   : > { %v14205_v26 = vpop.f32.mrb[116].mxu0  ;;  %v5517_v43 = vmax.f32 %v5509_v25, 0.0  ;;  %15126 = vmatpush3.bf16.msra.mxu1 %v22418_v28  ;;  %14240 = vmatprep.mubr.msk.f32.mxu0 %vm1893_vm0, %v5650_v0  ;;  %v5539_v55 = vmax.f32 %v5531_v45, 0.0  ;;  %v5533_v39 = vsub.f32 1.0, %v5525_v58  ;;  %v22425_v28 = vpack.c.bf16 %v22423_v1, %v22424_v14  ;;  %v22426_v61 = vld [vmem:[#allocation134_spill] sm:$0xff]  ;;  %v22428_v25 = vld [vmem:[#allocation112_spill] sm:$0xff] }
 0xbd0   : > { %v5653_v7 = vmul.f32 %v14205_v26, %v5538_v36  ;;  %v5621_v16 = vpop.f32.mrb[117].mxu0  ;;  %15128 = vmatprep.subr.bf16.mxu1 %v22419_v33  ;;  %14241 = vmatmul.mubr.msk.f32.vlgmr.msra.gmra.mrb[122].mxu0 %vm1893_vm0, %v5651_v54  ;;  %v5542_v60 = vmax.f32 %v5534_v3, 0.0  ;;  %v22429_v54 = vpack.c.bf16 %v22427_v8, %v22428_v25  ;;  %v22431_v45 = vld [vmem:[#allocation118_spill] sm:$0xff]  ;;  %v22447_v14 = vld [vmem:[#allocation140_spill] sm:$0xff]  ;;  %v22457_v25 = vld [vmem:[#allocation117_spill] sm:$0xff] }
 0xbd1   : > { %v5652_v62 = vmul.f32 %v5621_v16, %v5537_v13  ;;  %14229 = vmatprep.mubr.msk.f32.mxu1 %vm1893_vm0, %v5517_v43  ;;  %15150 = vmatpush3.bf16.msra.mxu0 %v22422_v48  ;;  %v5541_v6 = vmax.f32 %v5533_v39, 0.0  ;;  %v22430_v13 = vld [vmem:[#allocation119_spill] sm:$0xff]  ;;  %v22433_v43 = vld [vmem:[#allocation136_spill] sm:$0xff]  ;;  %v22441_v39 = vld [vmem:[#allocation129_spill] sm:$0xff] }
 0xbd2   : > { %14230 = vmatmul.mubr.msk.f32.gmra.mrb[150].mxu1 %vm1893_vm0, %v5518_v35  ;;  %15152 = vmatprep.subr.bf16.mxu0 %v22425_v28  ;;  %v22432_v58 = vpack.c.bf16 %v22430_v13, %v22431_v45  ;;  %v22435_v35 = vld [vmem:[#allocation120_spill] sm:$0xff]  ;;  %v22443_v24 = vpack.c.bf16 %v22441_v39, %v22442_v10  ;;  %v22444_v48 = vld [vmem:[#allocation103_spill] sm:$0xff]  ;;  %v22448_v28 = vld [vmem:[#allocation105_spill] sm:$0xff] }
 0xbd3   : > { %v14208_v47 = vpop.f32.mrb[118].mxu0  ;;  %15130 = vmatpush3.bf16.msra.mxu1 %v22419_v33  ;;  %14243 = vmatprep.mubr.msk.f32.mxu0 %vm1893_vm0, %v5652_v62  ;;  %v22437_v62 = vld [vmem:[#allocation127_spill] sm:$0xff]  ;;  %v22461_v45 = vld [vmem:[#allocation122_spill] sm:$0xff]  ;;  %v22472_v39 = vld [vmem:[#allocation109_spill] sm:$0xff] }
 0xbd4   : > { %v5655_v59 = vmul.f32 %v14208_v47, %v5540_v32  ;;  %v5631_v36 = vpop.f32.mrb[119].mxu0  ;;  %15132 = vmatprep.subr.bf16.mxu1 %v22426_v61  ;;  %14244 = vmatmul.mubr.msk.f32.gmra.mrb[124].mxu0 %vm1893_vm0, %v5653_v7  ;;  %v22434_v7 = vld [vmem:[#allocation121_spill] sm:$0xff]  ;;  %v22438_v32 = vld [vmem:[#allocation126_spill] sm:$0xff]  ;;  %v22460_v13 = vld [vmem:[#allocation123_spill] sm:$0xff] }
 0xbd5   : > { %v5654_v42 = vmul.f32 %v5631_v36, %v5539_v55  ;;  %15154 = vmatpush3.bf16.msra.mxu0 %v22429_v54  ;;  %v22436_v33 = vpack.c.bf16 %v22434_v7, %v22435_v35  ;;  %v22439_v3 = vpack.c.bf16 %v22437_v62, %v22438_v32  ;;  %v22440_v55 = vld [vmem:[#allocation137_spill] sm:$0xff]  ;;  %v22445_v47 = vld [vmem:[#allocation102_spill] sm:$0xff]  ;;  %v22458_v54 = vld [vmem:[#allocation116_spill] sm:$0xff] }
 0xbd6   : > { %15156 = vmatprep.subr.bf16.mxu0 %v22432_v58  ;;  %v22446_v1 = vpack.c.bf16 %v22444_v48, %v22445_v47  ;;  %v22462_v58 = vpack.c.bf16 %v22460_v13, %v22461_v45  ;;  %v22467_v7 = vld [vmem:[#allocation130_spill] sm:$0xff]  ;;  %v22476_v48 = vld [vmem:[#allocation141_spill] sm:$0xff]  ;;  %v22484_v13 = vld [vmem:[#allocation148_spill] sm:$0xff] }
 0xbd7   : > { %v14211_v49 = vpop.f32.mrb[120].mxu0  ;;  %14246 = vmatprep.mubr.msk.f32.mxu0 %vm1893_vm0, %v5654_v42  ;;  %15134 = vmatpush3.bf16.msra.mxu1 %v22426_v61  ;;  %v22451_v61 = vld [vmem:[#allocation115_spill] sm:$0xff]  ;;  %v22452_v42 = vld [vmem:[#allocation114_spill] sm:$0xff] }
 0xbd8   : > { %v5657_v0 = vmul.f32 %v14211_v49, %v5542_v60  ;;  %v5641_v26 = vpop.f32.mrb[121].mxu0  ;;  %15136 = vmatprep.subr.bf16.mxu1 %v22433_v43  ;;  %14247 = vmatmul.mubr.msk.f32.gmra.mrb[126].mxu0 %vm1893_vm0, %v5655_v59  ;;  %v22449_v59 = vld [vmem:[#allocation104_spill] sm:$0xff]  ;;  %v22453_v60 = vpack.c.bf16 %v22451_v61, %v22452_v42  ;;  %v22459_v49 = vpack.c.bf16 %v22457_v25, %v22458_v54  ;;  %v22470_v62 = vld [vmem:[#allocation138_spill] sm:$0xff]  ;;  %v22479_v61 = vld [vmem:[#allocation143_spill] sm:$0xff] }
 0xbd9   : > { %v5656_v16 = vmul.f32 %v5641_v26, %v5541_v6  ;;  %15158 = vmatpush3.bf16.msra.mxu0 %v22436_v33  ;;  %v22450_v36 = vpack.c.bf16 %v22448_v28, %v22449_v59  ;;  %v22454_v6 = vld [vmem:[#allocation107_spill] sm:$0xff]  ;;  %v22464_v26 = vld [vmem:[#allocation124_spill] sm:$0xff] }
 0xbda   : > { %15160 = vmatprep.subr.bf16.mxu0 %v22439_v3  ;;  %v22469_v33 = vld [vmem:[#allocation139_spill] sm:$0xff] }
 0xbdb   : > { %14249 = vmatprep.mubr.msk.f32.mxu0 %vm1893_vm0, %v5656_v16  ;;  %15138 = vmatpush3.bf16.msra.mxu1 %v22433_v43  ;;  %v22466_v16 = vld [vmem:[#allocation135_spill] sm:$0xff]  ;;  %v22471_v32 = vpack.c.bf16 %v22469_v33, %v22470_v62  ;;  %v22493_v33 = vld [vmem:[#allocation154_spill] sm:$0xff]  ;;  %v22494_v62 = vld [vmem:[#allocation153_spill] sm:$0xff] }
 0xbdc   : > { %15140 = vmatprep.subr.bf16.mxu1 %v22440_v55  ;;  %14250 = vmatmul.mubr.msk.f32.gmra.mrb[128].mxu0 %vm1893_vm0, %v5657_v0  ;;  %v22463_v0 = vld [vmem:[#allocation125_spill] sm:$0xff]  ;;  %v22468_v35 = vpack.c.bf16 %v22466_v16, %v22467_v7  ;;  %v22485_v45 = vld [vmem:[#allocation147_spill] sm:$0xff]  ;;  %v22490_v16 = vld [vmem:[#allocation152_spill] sm:$0xff] }
 0xbdd   : > { %15162 = vmatpush3.bf16.msra.mxu0 %v22443_v24  ;;  %6133 = vmatprep.mubr.f32.mxu0 %v19016_v63  ;;  %v22455_v63 = vld [vmem:[#allocation106_spill] sm:$0xff]  ;;  %v22465_v43 = vpack.c.bf16 %v22463_v0, %v22464_v26  ;;  %v22488_v26 = vld [vmem:[#allocation149_spill] sm:$0xff]  ;;  %v22491_v7 = vld [vmem:[#allocation151_spill] sm:$0xff] }
 0xbde   : > { %15164 = vmatprep.subr.bf16.mxu0 %v22446_v1  ;;  %v22456_v8 = vpack.c.bf16 %v22454_v6, %v22455_v63  ;;  %v22475_v24 = vld [vmem:[#allocation142_spill] sm:$0xff]  ;;  %v22482_v6 = vld [vmem:[#allocation145_spill] sm:$0xff] }
 0xbdf   : > { %15142 = vmatpush3.bf16.msra.mxu1 %v22440_v55  ;;  %v22477_v47 = vpack.c.bf16 %v22475_v24, %v22476_v48  ;;  %v22487_v0 = vld [vmem:[#allocation150_spill] sm:$0xff]  ;;  %v22514_v48 = vld [vmem:[#allocation169_spill] sm:$0xff] }
 0xbe0   : > { %15144 = vmatprep.subr.bf16.mxu1 %v22447_v14 }
 0xbe1   : > { %15166 = vmatpush3.bf16.msra.mxu0 %v22450_v36  ;;  %v22478_v36 = vld [vmem:[#allocation144_spill] sm:$0xff] }
 0xbe2   : > { %15168 = vmatprep.subr.bf16.mxu0 %v22453_v60  ;;  %v22480_v42 = vpack.c.bf16 %v22478_v36, %v22479_v61  ;;  %v22481_v60 = vld [vmem:[#allocation146_spill] sm:$0xff] }
 0xbe3   : > { %15146 = vmatpush3.bf16.msra.mxu1 %v22447_v14  ;;  %v22483_v63 = vpack.c.bf16 %v22481_v60, %v22482_v6 }
 0xbe4   : > { %15180 = vmatprep.subr.bf16.mxu1 %v22456_v8 }
 0xbe5   : > { %15170 = vmatpush3.bf16.msra.mxu0 %v22459_v49 }
 0xbe6   : > { %15172 = vmatprep.subr.bf16.mxu0 %v22462_v58  ;;  %v22486_v58 = vpack.c.bf16 %v22484_v13, %v22485_v45  ;;  %v1858_v45 = vld [vmem:[%s22517_s16 + $0x10] sm:$0xff] }
 0xbe9   : > { %15174 = vmatpush3.bf16.msra.mxu0 %v22465_v43  ;;  %v22489_v43 = vpack.c.bf16 %v22487_v0, %v22488_v26 }
 0xbea   : > { %15176 = vmatprep.subr.bf16.mxu0 %v22468_v35  ;;  %v22492_v35 = vpack.c.bf16 %v22490_v16, %v22491_v7 }
 0xbed   : > { %15178 = vmatpush3.bf16.msra.mxu0 %v22471_v32  ;;  %v22495_v32 = vpack.c.bf16 %v22493_v33, %v22494_v62 }
 0xbf0   : > { %6134 = vmatmul.mubr.f32.vlgmr.msra.gmra.mrb[130].mxu0 %v19010_v29 }
 0xbf1   : > { %6138 = vmatprep.mubr.f32.mxu0 %v19028_v50 }
 0xbf4   : > { %6139 = vmatmul.mubr.f32.gmra.mrb[132].mxu0 %v19022_v2 }
 0xbf5   : > { %6143 = vmatprep.mubr.f32.mxu0 %v19040_v34 }
 0xbf8   : > { %6144 = vmatmul.mubr.f32.gmra.mrb[134].mxu0 %v19034_v44 }
 0xbf9   : > { %6148 = vmatprep.mubr.f32.mxu0 %v19052_v40 }
 0xbfc   : > { %6149 = vmatmul.mubr.f32.gmra.mrb[136].mxu0 %v19046_v52 }
 0xbfd   : > { %6153 = vmatprep.mubr.f32.mxu0 %v19064_v53 }
 0xc00   : > { %6154 = vmatmul.mubr.f32.gmra.mrb[138].mxu0 %v19058_v23 }
 0xc01   : > { %6158 = vmatprep.mubr.f32.mxu0 %v19076_v21 }
 0xc04   : > { %6159 = vmatmul.mubr.f32.gmra.mrb[140].mxu0 %v19070_v17 }
 0xc05   : > { %6163 = vmatprep.mubr.f32.mxu0 %v19088_v22 }
 0xc08   : > { %6164 = vmatmul.mubr.f32.gmra.mrb[142].mxu0 %v19082_v5 }
 0xc09   : > { %6168 = vmatprep.mubr.f32.mxu0 %v19104_v9 }
 0xc0c   : > { %6169 = vmatmul.mubr.f32.gmra.mrb[144].mxu0 %v19098_v56  ;;  %v22473_v56 = vld [vmem:[#allocation108_spill] sm:$0xff] }
 0xc0d   : > { %v22474_v10 = vpack.c.bf16 %v22472_v39, %v22473_v56 }
 0xc99   : > { %v14222_v29 = vpop.f32.mrb[144].mxu1 }
 0xc9a   : > { %v5752_v2 = vpop.f32.mrb[145].mxu1 }
 0xc9d   : > { %v14225_v50 = vpop.f32.mrb[146].mxu1 }
 0xc9e   : > { %v5762_v44 = vpop.f32.mrb[147].mxu1 }
 0xca1   : > { %v14228_v34 = vpop.f32.mrb[148].mxu1 }
 0xca2   : > { %v5772_v52 = vpop.f32.mrb[149].mxu1 }
 0xca3   : > { %v14242_v40 = vpop.f32.mrb[122].mxu0 }
 0xca4   : > { %v5925_v23 = vmul.f32 %v14242_v40, %v14222_v29  ;;  %v5885_v53 = vpop.f32.mrb[123].mxu0  ;;  %v22496_v29 = vld [vmem:[#allocation156_spill] sm:$0xff]  ;;  %v22502_v40 = vld [vmem:[#allocation161_spill] sm:$0xff] }
 0xca5   : > { %v14231_v21 = vpop.f32.mrb[150].mxu1  ;;  %v5924_v3 = vmul.f32 %v5885_v53, %v5752_v2  ;;  %v22497_v2 = vld [vmem:[#allocation155_spill] sm:$0xff] }
 0xca6   : > { %v5782_v17 = vpop.f32.mrb[151].mxu1 }
 0xca7   : > { %v14245_v55 = vpop.f32.mrb[124].mxu0  ;;  %14284 = vmatprep.mubr.f32.mxu1 %v5924_v3  ;;  %v22506_v3 = vld [vmem:[#allocation162_spill] sm:$0xff] }
 0xca8   : > { %v5927_v22 = vmul.f32 %v14245_v55, %v14225_v50  ;;  %v5895_v5 = vpop.f32.mrb[125].mxu0  ;;  %14285 = vmatmul.mubr.f32.vlgmr.msra.gmra.mrb[152].mxu1 %v5925_v23  ;;  %v22498_v50 = vpack.c.bf16 %v22496_v29, %v22497_v2  ;;  %v22503_v23 = vld [vmem:[#allocation160_spill] sm:$0xff] }
 0xca9   : > { %v5926_v9 = vmul.f32 %v5895_v5, %v5762_v44  ;;  %15182 = vmatpush3.bf16.msra.mxu1 %v22474_v10  ;;  %v22499_v44 = vld [vmem:[#allocation159_spill] sm:$0xff]  ;;  %v22504_v53 = vpack.c.bf16 %v22502_v40, %v22503_v23  ;;  %v22509_v55 = vld [vmem:[#allocation164_spill] sm:$0xff] }
 0xcaa   : > { %15184 = vmatprep.subr.bf16.mxu1 %v22477_v47  ;;  %v22511_v5 = vld [vmem:[#allocation167_spill] sm:$0xff]  ;;  %v22515_v47 = vld [vmem:[#allocation168_spill] sm:$0xff] }
 0xcab   : > { %v14248_v1 = vpop.f32.mrb[126].mxu0  ;;  %14287 = vmatprep.mubr.f32.mxu1 %v5926_v9  ;;  %v22512_v9 = vld [vmem:[#allocation166_spill] sm:$0xff] }
 0xcac   : > { %v5929_v14 = vmul.f32 %v14248_v1, %v14228_v34  ;;  %v5905_v28 = vpop.f32.mrb[127].mxu0  ;;  %14288 = vmatmul.mubr.f32.gmra.mrb[154].mxu1 %v5927_v22  ;;  %v22500_v34 = vld [vmem:[#allocation158_spill] sm:$0xff]  ;;  %v22513_v39 = vpack.c.bf16 %v22511_v5, %v22512_v9  ;;  %v22516_v1 = vpack.c.bf16 %v22514_v48, %v22515_v47 }
 0xcad   : > { %v5928_v59 = vmul.f32 %v5905_v28, %v5772_v52  ;;  %15186 = vmatpush3.bf16.msra.mxu1 %v22480_v42  ;;  %v22501_v52 = vpack.c.bf16 %v22499_v44, %v22500_v34 }
 0xcae   : > { %15188 = vmatprep.subr.bf16.mxu1 %v22483_v63 }
 0xcaf   : > { %v14251_v8 = vpop.f32.mrb[128].mxu0  ;;  %14290 = vmatprep.mubr.f32.mxu1 %v5928_v59 }
 0xcb0   : > { %v5931_v25 = vmul.f32 %v14251_v8, %v14231_v21  ;;  %v5915_v54 = vpop.f32.mrb[129].mxu0  ;;  %14291 = vmatmul.mubr.f32.gmra.mrb[156].mxu1 %v5929_v14  ;;  %v22505_v21 = vld [vmem:[#allocation163_spill] sm:$0xff] }
 0xcb1   : > { %v5930_v49 = vmul.f32 %v5915_v54, %v5782_v17  ;;  %15190 = vmatpush3.bf16.msra.mxu1 %v22486_v58  ;;  %v22507_v17 = vpack.c.bf16 %v22505_v21, %v22506_v3  ;;  %v1859_v58 = vld [vmem:[%s22517_s16 + $0x18] sm:$0xff] }
 0xcb2   : > { %15192 = vmatprep.subr.bf16.mxu1 %v22489_v43 }
 0xcb3   : > { %14293 = vmatprep.mubr.f32.mxu1 %v5930_v49 }
 0xcb4   : > { %14294 = vmatmul.mubr.f32.gmra.mrb[158].mxu1 %v5931_v25 }
 0xcb5   : > { %15194 = vmatpush3.bf16.msra.mxu1 %v22492_v35  ;;  %6238 = vmatprep.mubr.f32.mxu1 %v19019_v18  ;;  %v22508_v18 = vld [vmem:[#allocation165_spill] sm:$0xff] }
 0xcb6   : > { %15196 = vmatprep.subr.bf16.mxu1 %v22495_v32  ;;  %v22510_v22 = vpack.c.bf16 %v22508_v18, %v22509_v55 }
 0xcb9   : > { %15198 = vmatpush3.bf16.msra.mxu1 %v22498_v50 }
 0xcba   : > { %15200 = vmatprep.subr.bf16.mxu1 %v22501_v52 }
 0xcbd   : > { %15202 = vmatpush3.bf16.msra.mxu1 %v22504_v53 }
 0xcbe   : > { %15204 = vmatprep.subr.bf16.mxu1 %v22507_v17 }
 0xcc1   : > { %15206 = vmatpush3.bf16.msra.mxu1 %v22510_v22 }
 0xcc2   : > { %15208 = vmatprep.subr.bf16.mxu1 %v22513_v39 }
 0xcc3   : > { %v13237_v56 = vpop.f32.mrb[130].mxu0 }
 0xcc4   : > { %v13238_v10 = vpop.f32.mrb[131].mxu0 }
 0xcc5   : > { %v13239_v24 = vadd.f32 %v13238_v10, %v13237_v56  ;;  %15210 = vmatpush3.bf16.msra.mxu1 %v22516_v1 }
 0xcc7   : > { %v13240_v14 = vpop.f32.mrb[132].mxu0 }
 0xcc8   : > { %v13241_v28 = vpop.f32.mrb[133].mxu0  ;;  %6239 = vmatmul.mubr.f32.vlgmr.msra.gmra.mrb[160].mxu1 %v19013_v57 }
 0xcc9   : > { %v13242_v59 = vadd.f32 %v13241_v28, %v13240_v14  ;;  %6243 = vmatprep.mubr.f32.mxu1 %v19031_v4 }
 0xccb   : > { %v13243_v36 = vpop.f32.mrb[134].mxu0 }
 0xccc   : > { %v13244_v61 = vpop.f32.mrb[135].mxu0  ;;  %6244 = vmatmul.mubr.f32.gmra.mrb[162].mxu1 %v19025_v41 }
 0xccd   : > { %v13245_v42 = vadd.f32 %v13244_v61, %v13243_v36  ;;  %6248 = vmatprep.mubr.f32.mxu1 %v19043_v27 }
 0xccf   : > { %v13246_v60 = vpop.f32.mrb[136].mxu0 }
 0xcd0   : > { %v13247_v6 = vpop.f32.mrb[137].mxu0  ;;  %6249 = vmatmul.mubr.f32.gmra.mrb[164].mxu1 %v19037_v12 }
 0xcd1   : > { %v13248_v63 = vadd.f32 %v13247_v6, %v13246_v60  ;;  %6253 = vmatprep.mubr.f32.mxu1 %v19055_v30 }
 0xcd3   : > { %v13249_v8 = vpop.f32.mrb[138].mxu0 }
 0xcd4   : > { %v13250_v25 = vpop.f32.mrb[139].mxu0  ;;  %6254 = vmatmul.mubr.f32.gmra.mrb[166].mxu1 %v19049_v19 }
 0xcd5   : > { %v13251_v57 = vadd.f32 %v13250_v25, %v13249_v8  ;;  %6258 = vmatprep.mubr.f32.mxu1 %v19067_v15 }
 0xcd7   : > { %v13252_v4 = vpop.f32.mrb[140].mxu0 }
 0xcd8   : > { %v13253_v41 = vpop.f32.mrb[141].mxu0  ;;  %6259 = vmatmul.mubr.f32.gmra.mrb[168].mxu1 %v19061_v51  ;;  %v1856_v51 = vld [vmem:[%s22517_s16] sm:$0xff] }
 0xcd9   : > { %v13254_v27 = vadd.f32 %v13253_v41, %v13252_v4  ;;  %6263 = vmatprep.mubr.f32.mxu1 %v19079_v46  ;;  %v1857_v46 = vld [vmem:[%s22517_s16 + $0x8] sm:$0xff] }
 0xcda   : > { %v15211_v13 = vpack.c.bf16 %v1857_v46, %v1856_v51 }
 0xcdb   : > { %v13255_v12 = vpop.f32.mrb[142].mxu0 }
 0xcdc   : > { %v13256_v54 = vpop.f32.mrb[143].mxu0  ;;  %6264 = vmatmul.mubr.f32.gmra.mrb[170].mxu1 %v19073_v20  ;;  %15212 = vmatprep.subr.bf16.mxu0 %v15211_v13  ;;  %v15215_v20 = vpack.c.bf16 %v1859_v58, %v1858_v45 }
 0xcdd   : > { %v13257_v30 = vadd.f32 %v13256_v54, %v13255_v12  ;;  %6268 = vmatprep.mubr.f32.mxu1 %v19091_v11  ;;  %15214 = vmatpush3.bf16.msra.mxu0 %v15211_v13  ;;  %v22519_v54 = vld [vmem:[#allocation79_spill] sm:$0xff] }
 0xcde   : > { %15216 = vmatprep.subr.bf16.mxu0 %v15215_v20 }
 0xcdf   : > { %v13258_v19 = vpop.f32.mrb[144].mxu0 }
 0xce0   : > { %v13259_v15 = vpop.f32.mrb[145].mxu0  ;;  %6269 = vmatmul.mubr.f32.gmra.mrb[172].mxu1 %v19085_v37 }
 0xce1   : > { %v13260_v49 = vadd.f32 %v13259_v15, %v13258_v19  ;;  %6273 = vmatprep.mubr.f32.mxu1 %v19107_v38  ;;  %15218 = vmatpush3.bf16.msra.mxu0 %v15215_v20  ;;  %v22520_v19 = vld [vmem:[#allocation78_spill] sm:$0xff] }
 0xce2   : > { %v22521_v20 = vld [vmem:[#allocation82_spill] sm:$0xff] }
 0xce4   : > { %6274 = vmatmul.mubr.f32.gmra.mrb[174].mxu1 %v19101_v31 }
 0xd7b   : > { %v14286_v11 = vpop.f32.mrb[152].mxu1 }
 0xd7c   : > { %v6141_v0 = vadd.f32 %v14286_v11, %v13242_v59  ;;  %v6030_v26 = vpop.f32.mrb[153].mxu1 }
 0xd7d   : > { %v6136_v43 = vadd.f32 %v13239_v24, %v6030_v26 }
 0xd7f   : > { %v14289_v37 = vpop.f32.mrb[154].mxu1 }
 0xd80   : > { %v6151_v16 = vadd.f32 %v14289_v37, %v13248_v63  ;;  %v6040_v7 = vpop.f32.mrb[155].mxu1 }
 0xd81   : > { %v6146_v38 = vadd.f32 %v13245_v42, %v6040_v7 }
 0xd83   : > { %v14292_v35 = vpop.f32.mrb[156].mxu1 }
 0xd84   : > { %v6161_v31 = vadd.f32 %v14292_v35, %v13254_v27  ;;  %v6050_v33 = vpop.f32.mrb[157].mxu1 }
 0xd85   : > { %v6156_v62 = vadd.f32 %v13251_v57, %v6050_v33  ;;  %v12441_v57 = vld [vmem:[%s22518_s28] ss:$0 sm:$0xff] }
 0xd87   : > { %v14295_v32 = vpop.f32.mrb[158].mxu1 }
 0xd88   : > { %v6171_v29 = vadd.f32 %v14295_v32, %v13260_v49  ;;  %v6060_v2 = vpop.f32.mrb[159].mxu1 }
 0xd89   : > { %v6166_v50 = vadd.f32 %v13257_v30, %v6060_v2 }
 0xd9b   : > { %v13293_v44 = vpop.f32.mrb[160].mxu1 }
 0xd9c   : > { %v13294_v34 = vpop.f32.mrb[161].mxu1 }
 0xd9d   : > { %v13295_v52 = vadd.f32 %v13294_v34, %v13293_v44 }
 0xd9f   : > { %v6241_v40 = vadd.f32 %v13295_v52, %v6136_v43  ;;  %v13296_v23 = vpop.f32.mrb[162].mxu1 }
 0xda0   : > { %v13297_v53 = vpop.f32.mrb[163].mxu1 }
 0xda1   : > { %v13298_v21 = vadd.f32 %v13297_v53, %v13296_v23  ;;  %14304 = vmatprep.mubr.msk.f32.mxu0 %vm1893_vm0, %v6241_v40  ;;  %v22525_v40 = vld [vmem:[#allocation86_spill] sm:$0xff]  ;;  %v22526_v53 = vld [vmem:[#allocation85_spill] sm:$0xff] }
 0xda3   : > { %v6246_v3 = vadd.f32 %v13298_v21, %v6141_v0  ;;  %v13299_v17 = vpop.f32.mrb[164].mxu1  ;;  %v22522_v0 = vld [vmem:[#allocation80_spill] sm:$0xff] }
 0xda4   : > { %v13300_v18 = vpop.f32.mrb[165].mxu1 }
 0xda5   : > { %v13301_v55 = vadd.f32 %v13300_v18, %v13299_v17  ;;  %14305 = vmatmul.mubr.msk.f32.vlgmr.msra.gmra.mrb[146].mxu0 %vm1893_vm0, %v6246_v3 }
 0xda7   : > { %v6251_v22 = vadd.f32 %v13301_v55, %v6146_v38  ;;  %v13302_v5 = vpop.f32.mrb[166].mxu1 }
 0xda8   : > { %v13303_v9 = vpop.f32.mrb[167].mxu1 }
 0xda9   : > { %v13304_v39 = vadd.f32 %v13303_v9, %v13302_v5  ;;  %14307 = vmatprep.mubr.msk.f32.mxu0 %vm1893_vm0, %v6251_v22 }
 0xdab   : > { %v6256_v56 = vadd.f32 %v13304_v39, %v6151_v16  ;;  %v13305_v10 = vpop.f32.mrb[168].mxu1 }
 0xdac   : > { %v13306_v24 = vpop.f32.mrb[169].mxu1 }
 0xdad   : > { %v13307_v48 = vadd.f32 %v13306_v24, %v13305_v10  ;;  %14308 = vmatmul.mubr.msk.f32.gmra.mrb[148].mxu0 %vm1893_vm0, %v6256_v56 }
 0xdaf   : > { %v6261_v47 = vadd.f32 %v13307_v48, %v6156_v62  ;;  %v13308_v1 = vpop.f32.mrb[170].mxu1  ;;  %v22524_v62 = vld [vmem:[#allocation83_spill] sm:$0xff] }
 0xdb0   : > { %v13309_v14 = vpop.f32.mrb[171].mxu1 }
 0xdb1   : > { %v13310_v28 = vadd.f32 %v13309_v14, %v13308_v1  ;;  %14310 = vmatprep.mubr.msk.f32.mxu0 %vm1893_vm0, %v6261_v47 }
 0xdb3   : > { %v6266_v59 = vadd.f32 %v13310_v28, %v6161_v31  ;;  %v13311_v36 = vpop.f32.mrb[172].mxu1  ;;  %v22523_v31 = vld [vmem:[#allocation84_spill] sm:$0xff] }
 0xdb4   : > { %v13312_v61 = vpop.f32.mrb[173].mxu1 }
 0xdb5   : > { %v13313_v42 = vadd.f32 %v13312_v61, %v13311_v36  ;;  %14311 = vmatmul.mubr.msk.f32.gmra.mrb[150].mxu0 %vm1893_vm0, %v6266_v59 }
 0xdb7   : > { %v6271_v60 = vadd.f32 %v13313_v42, %v6166_v50  ;;  %v13314_v6 = vpop.f32.mrb[174].mxu1 }
 0xdb8   : > { %v13315_v63 = vpop.f32.mrb[175].mxu1 }
 0xdb9   : > { %v13316_v8 = vadd.f32 %v13315_v63, %v13314_v6  ;;  %14313 = vmatprep.mubr.msk.f32.mxu0 %vm1893_vm0, %v6271_v60 }
 0xdbb   : > { %v6276_v25 = vadd.f32 %v13316_v8, %v6171_v29 }
 0xdbd   : > { %14314 = vmatmul.mubr.msk.f32.gmra.mrb[152].mxu0 %vm1893_vm0, %v6276_v25 }
 0xe78   : > { %v14306_v4 = vpop.f32.mrb[146].mxu0 }
 0xe79   : > { %v6381_v41 = vadd.f32 %v14306_v4, %v12441_v57  ;;  %v6375_v27 = vpop.f32.mrb[147].mxu0 }
 0xe7a   : > { %v6376_v12 = vadd.f32 %v12441_v57, %v6375_v27 }
 0xe7b   : > { %v6415_v30 = vadd.f32 %v6381_v41, %v22519_v54 }
 0xe7c   : > { %v6414_v15 = vadd.f32 %v6376_v12, %v22520_v19 }
 0xe7d   : > { %v6425_v49 = vsel %vm1893_vm0, %v6415_v30, 0.0 }
 0xe7e   : > { %6426 = vadd.xlane.f32.xlu1 %v6425_v49  ;;  %v6422_v51 = vsel %vm1893_vm0, %v6414_v15, 0.0 }
 0xe7f   : > { %6423 = vadd.xlane.f32.xlu0 %v6422_v51 }
 0xe80   : > { %v14309_v46 = vpop.f32.mrb[148].mxu0 }
 0xe81   : > { %v6391_v13 = vadd.f32 %v14309_v46, %v12441_v57  ;;  %v6385_v45 = vpop.f32.mrb[149].mxu0 }
 0xe82   : > { %v6386_v58 = vadd.f32 %v12441_v57, %v6385_v45 }
 0xe83   : > { %v6417_v11 = vadd.f32 %v6391_v13, %v22521_v20 }
 0xe84   : > { %v6416_v26 = vadd.f32 %v6386_v58, %v22522_v0  ;;  %v1863_v0 = vld [vmem:[%s22527_s30] sm:$0xff] }
 0xe85   : > { %v6431_v43 = vsel %vm1893_vm0, %v6417_v11, 0.0 }
 0xe86   : > { %6432 = vadd.xlane.f32.xlu1 %v6431_v43  ;;  %v6428_v37 = vsel %vm1893_vm0, %v6416_v26, 0.0 }
 0xe87   : > { %6429 = vadd.xlane.f32.xlu0 %v6428_v37  ;;  %v1865_v37 = vld [vmem:[%s22527_s30 + $0x10] sm:$0xff] }
 0xe88   : > { %v14312_v16 = vpop.f32.mrb[150].mxu0 }
 0xe89   : > { %v6401_v7 = vadd.f32 %v14312_v16, %v12441_v57  ;;  %v6395_v38 = vpop.f32.mrb[151].mxu0  ;;  %v1866_v16 = vld [vmem:[%s22527_s30 + $0x18] sm:$0xff] }
 0xe8a   : > { %v6396_v35 = vadd.f32 %v12441_v57, %v6395_v38  ;;  %v1868_v38 = vld [vmem:[%s22528_s0] sm:$0xff] }
 0xe8b   : > { %v6419_v33 = vadd.f32 %v6401_v7, %v22523_v31  ;;  %v15223_v7 = vpack.c.bf16 %v1866_v16, %v1865_v37  ;;  %v1870_v31 = vld [vmem:[%s22528_s0 + $0x10] sm:$0xff] }
 0xe8c   : > { %v6418_v32 = vadd.f32 %v6396_v35, %v22524_v62  ;;  %v1869_v35 = vld [vmem:[%s22528_s0 + $0x8] sm:$0xff]  ;;  %v1871_v62 = vld [vmem:[%s22528_s0 + $0x18] sm:$0xff] }
 0xe8d   : > { %v6437_v29 = vsel %vm1893_vm0, %v6419_v33, 0.0 }
 0xe8e   : > { %6438 = vadd.xlane.f32.xlu1 %v6437_v29  ;;  %v6434_v2 = vsel %vm1893_vm0, %v6418_v32, 0.0  ;;  %v1872_v29 = vld [vmem:[%s22528_s0 + $0x20] sm:$0xff] }
 0xe8f   : > { %6435 = vadd.xlane.f32.xlu0 %v6434_v2  ;;  %v1873_v2 = vld [vmem:[%s22528_s0 + $0x28] sm:$0xff] }
 0xe90   : > { %v14315_v50 = vpop.f32.mrb[152].mxu0 }
 0xe91   : > { %v6411_v44 = vadd.f32 %v14315_v50, %v12441_v57  ;;  %v6405_v34 = vpop.f32.mrb[153].mxu0  ;;  %v15235_v50 = vpack.c.bf16 %v1873_v2, %v1872_v29 }
 0xe92   : > { %v6406_v52 = vadd.f32 %v12441_v57, %v6405_v34  ;;  %v1875_v34 = vld [vmem:[%s22528_s0 + $0x38] sm:$0xff] }
 0xe93   : > { %v6421_v23 = vadd.f32 %v6411_v44, %v22525_v40  ;;  %v1874_v44 = vld [vmem:[%s22528_s0 + $0x30] sm:$0xff] }
 0xe94   : > { %v6420_v21 = vadd.f32 %v6406_v52, %v22526_v53  ;;  %v15239_v52 = vpack.c.bf16 %v1875_v34, %v1874_v44 }
 0xe95   : > { %v6443_v3 = vsel %vm1893_vm0, %v6421_v23, 0.0 }
 0xe96   : > { %6444 = vadd.xlane.f32.xlu1 %v6443_v3  ;;  %v6440_v17 = vsel %vm1893_vm0, %v6420_v21, 0.0 }
 0xe97   : > { %6441 = vadd.xlane.f32.xlu0 %v6440_v17 }
 0xf0b   : > { %v6427_v18 = vpop.xlane.xlu1 %6426 }
 0xf0c   : > { %v6447_v55 = vmul.f32 0.03125, %v6427_v18  ;;  %v6424_v22 = vpop.xlane.xlu0 %6423 }
 0xf0d   : > { %v6446_v5 = vmul.f32 0.03125, %v6424_v22 }
 0xf0e   : > { %v19314_v9 = vsub.f32 %v6415_v30, %v6447_v55 }
 0xf0f   : > { %v19316_v39 = vsub.f32 %v6414_v15, %v6446_v5 }
 0xf10   : > { %v6463_v56 = vmul.f32 %v19314_v9, %v19314_v9 }
 0xf11   : > { %v6462_v10 = vmul.f32 %v19316_v39, %v19316_v39 }
 0xf12   : > { %v6473_v24 = vsel %vm1893_vm0, %v6463_v56, 0.0 }
 0xf13   : > { %v6433_v48 = vpop.xlane.xlu1 %6432  ;;  %6474 = vadd.xlane.f32.xlu1 %v6473_v24  ;;  %v6470_v47 = vsel %vm1893_vm0, %v6462_v10, 0.0 }
 0xf14   : > { %v6449_v1 = vmul.f32 0.03125, %v6433_v48  ;;  %v6430_v14 = vpop.xlane.xlu0 %6429  ;;  %6471 = vadd.xlane.f32.xlu0 %v6470_v47  ;;  %v12450_v48 = vld [vmem:[#allocation2] ss:$0 sm:$0xff] }
 0xf15   : > { %v6448_v28 = vmul.f32 0.03125, %v6430_v14 }
 0xf16   : > { %v19324_v59 = vsub.f32 %v6417_v11, %v6449_v1 }
 0xf17   : > { %v19326_v36 = vsub.f32 %v6416_v26, %v6448_v28  ;;  %v1864_v26 = vld [vmem:[%s22527_s30 + $0x8] sm:$0xff] }
 0xf18   : > { %v6465_v61 = vmul.f32 %v19324_v59, %v19324_v59  ;;  %v15219_v43 = vpack.c.bf16 %v1864_v26, %v1863_v0 }
 0xf19   : > { %v6464_v42 = vmul.f32 %v19326_v36, %v19326_v36 }
 0xf1a   : > { %v6479_v60 = vsel %vm1893_vm0, %v6465_v61, 0.0  ;;  %15220 = vmatprep.subr.bf16.mxu0 %v15219_v43 }
 0xf1b   : > { %v6439_v6 = vpop.xlane.xlu1 %6438  ;;  %6480 = vadd.xlane.f32.xlu1 %v6479_v60  ;;  %v6476_v63 = vsel %vm1893_vm0, %v6464_v42, 0.0  ;;  %15222 = vmatpush3.bf16.msra.mxu0 %v15219_v43  ;;  %v12451_v60 = vld [vmem:[#allocation4] ss:$0 sm:$0xff] }
 0xf1c   : > { %v6451_v8 = vmul.f32 0.03125, %v6439_v6  ;;  %v6436_v25 = vpop.xlane.xlu0 %6435  ;;  %6477 = vadd.xlane.f32.xlu0 %v6476_v63  ;;  %15224 = vmatprep.subr.bf16.mxu0 %v15223_v7 }
 0xf1d   : > { %v6450_v57 = vmul.f32 0.03125, %v6436_v25 }
 0xf1e   : > { %v19334_v4 = vsub.f32 %v6419_v33, %v6451_v8  ;;  %v15227_v33 = vpack.c.bf16 %v1869_v35, %v1868_v38 }
 0xf1f   : > { %v19336_v41 = vsub.f32 %v6418_v32, %v6450_v57  ;;  %15226 = vmatpush3.bf16.msra.mxu0 %v15223_v7  ;;  %v15231_v32 = vpack.c.bf16 %v1871_v62, %v1870_v31 }
 0xf20   : > { %v6467_v27 = vmul.f32 %v19334_v4, %v19334_v4  ;;  %15228 = vmatprep.subr.bf16.mxu1 %v15227_v33 }
 0xf21   : > { %v6466_v12 = vmul.f32 %v19336_v41, %v19336_v41  ;;  %15230 = vmatpush3.bf16.msra.mxu1 %v15227_v33 }
 0xf22   : > { %v6485_v54 = vsel %vm1893_vm0, %v6467_v27, 0.0  ;;  %15232 = vmatprep.subr.bf16.mxu1 %v15231_v32 }
 0xf23   : > { %6486 = vadd.xlane.f32.xlu1 %v6485_v54  ;;  %v6445_v30 = vpop.xlane.xlu1 %6444  ;;  %v6482_v19 = vsel %vm1893_vm0, %v6466_v12, 0.0 }
 0xf24   : > { %v6453_v15 = vmul.f32 0.03125, %v6445_v30  ;;  %6483 = vadd.xlane.f32.xlu0 %v6482_v19  ;;  %v6442_v49 = vpop.xlane.xlu0 %6441 }
 0xf25   : > { %v6452_v51 = vmul.f32 0.03125, %v6442_v49  ;;  %15234 = vmatpush3.bf16.msra.mxu1 %v15231_v32 }
 0xf26   : > { %v19344_v46 = vsub.f32 %v6421_v23, %v6453_v15  ;;  %15236 = vmatprep.subr.bf16.mxu1 %v15235_v50 }
 0xf27   : > { %v19346_v13 = vsub.f32 %v6420_v21, %v6452_v51 }
 0xf28   : > { %v6469_v45 = vmul.f32 %v19344_v46, %v19344_v46 }
 0xf29   : > { %v6468_v58 = vmul.f32 %v19346_v13, %v19346_v13  ;;  %15238 = vmatpush3.bf16.msra.mxu1 %v15235_v50  ;;  %v12452_v50 = vld [vmem:[#allocation6] ss:$0 sm:$0xff] }
 0xf2a   : > { %v6491_v20 = vsel %vm1893_vm0, %v6469_v45, 0.0  ;;  %15240 = vmatprep.subr.bf16.mxu1 %v15239_v52 }
 0xf2b   : > { %6492 = vadd.xlane.f32.xlu1 %v6491_v20  ;;  %v6488_v11 = vsel %vm1893_vm0, %v6468_v58, 0.0 }
 0xf2c   : > { %6489 = vadd.xlane.f32.xlu0 %v6488_v11 }
 0xf2d   : > { %15242 = vmatpush3.bf16.msra.mxu1 %v15239_v52 }
 0xfa0   : > { %v6475_v40 = vpop.xlane.xlu1 %6474 }
 0xfa1   : > { %v6495_v23 = vmul.f32 0.03125, %v6475_v40  ;;  %v6472_v53 = vpop.xlane.xlu0 %6471 }
 0xfa2   : > { %v6494_v21 = vmul.f32 0.03125, %v6472_v53 }
 0xfa3   : > { %v6503_v3 = vadd.f32 1e-05, %v6495_v23 }
 0xfa4   : > { %v6502_v17 = vadd.f32 1e-05, %v6494_v21 }
 0xfa5   : > { %15886 = vrsqrt.f32 %v6503_v3 }
 0xfa6   : > { %15888 = vrsqrt.f32 %v6502_v17 }
 0xfa8   : > { %v6481_v18 = vpop.xlane.xlu1 %6480 }
 0xfa9   : > { %v6497_v55 = vmul.f32 0.03125, %v6481_v18  ;;  %v6478_v22 = vpop.xlane.xlu0 %6477 }
 0xfaa   : > { %v6496_v5 = vmul.f32 0.03125, %v6478_v22 }
 0xfab   : > { %v6505_v56 = vadd.f32 1e-05, %v6497_v55 }
 0xfac   : > { %v6504_v10 = vadd.f32 1e-05, %v6496_v5 }
 0xfad   : > { %15890 = vrsqrt.f32 %v6505_v56 }
 0xfae   : > { %15892 = vrsqrt.f32 %v6504_v10 }
 0xfaf   : > { %v15887_v24 = vpop.eup %15886 }
 0xfb0   : > { %v15889_v47 = vpop.eup %15888  ;;  %v6519_v1 = vmul.f32 %v15887_v24, %v19314_v9  ;;  %v6487_v14 = vpop.xlane.xlu1 %6486 }
 0xfb1   : > { %v6499_v28 = vmul.f32 0.03125, %v6487_v14  ;;  %v6484_v61 = vpop.xlane.xlu0 %6483  ;;  %v6518_v42 = vmul.f32 %v15889_v47, %v19316_v39 }
 0xfb2   : > { %v6533_v6 = vmul.f32 %v12450_v48, %v6519_v1  ;;  %v6498_v63 = vmul.f32 0.03125, %v6484_v61 }
 0xfb3   : > { %v6507_v8 = vadd.f32 1e-05, %v6499_v28  ;;  %v6532_v25 = vmul.f32 %v12450_v48, %v6518_v42  ;;  %v12461_v42 = vld [vmem:[#allocation7] ss:$0 sm:$0xff] }
 0xfb4   : > { %v6506_v57 = vadd.f32 1e-05, %v6498_v63  ;;  %v19370_v12 = vadd.f32 %v12451_v60, %v6533_v6 }
 0xfb5   : > { %15894 = vrsqrt.f32 %v6507_v8  ;;  %v19368_v27 = vadd.f32 %v12451_v60, %v6532_v25 }
 0xfb6   : > { %15896 = vrsqrt.f32 %v6506_v57 }
 0xfb7   : > { %v15891_v54 = vpop.eup %15890  ;;  %14324 = vmatprep.mubr.msk.f32.mxu0 %vm1893_vm0, %v19368_v27 }
 0xfb8   : > { %v15893_v9 = vpop.eup %15892  ;;  %v6493_v30 = vpop.xlane.xlu1 %6492  ;;  %14325 = vmatmul.mubr.msk.f32.vlgmr.msra.gmra.mrb[154].mxu0 %vm1893_vm0, %v19370_v12  ;;  %v6521_v39 = vmul.f32 %v15891_v54, %v19324_v59 }
 0xfb9   : > { %v6501_v19 = vmul.f32 0.03125, %v6493_v30  ;;  %v6490_v15 = vpop.xlane.xlu0 %6489  ;;  %v6520_v49 = vmul.f32 %v15893_v9, %v19326_v36 }
 0xfba   : > { %v6500_v51 = vmul.f32 0.03125, %v6490_v15  ;;  %v6535_v45 = vmul.f32 %v12450_v48, %v6521_v39 }
 0xfbb   : > { %v6509_v58 = vadd.f32 1e-05, %v6501_v19  ;;  %v6534_v20 = vmul.f32 %v12450_v48, %v6520_v49 }
 0xfbc   : > { %v6508_v11 = vadd.f32 1e-05, %v6500_v51  ;;  %v19380_v26 = vadd.f32 %v12451_v60, %v6535_v45 }
 0xfbd   : > { %15898 = vrsqrt.f32 %v6509_v58  ;;  %v19378_v0 = vadd.f32 %v12451_v60, %v6534_v20 }
 0xfbe   : > { %15900 = vrsqrt.f32 %v6508_v11 }
 0xfbf   : > { %v15895_v43 = vpop.eup %15894  ;;  %14327 = vmatprep.mubr.msk.f32.mxu0 %vm1893_vm0, %v19378_v0 }
 0xfc0   : > { %v15897_v59 = vpop.eup %15896  ;;  %14328 = vmatmul.mubr.msk.f32.gmra.mrb[156].mxu0 %vm1893_vm0, %v19380_v26  ;;  %v6523_v36 = vmul.f32 %v15895_v43, %v19334_v4 }
 0xfc1   : > { %v6522_v37 = vmul.f32 %v15897_v59, %v19336_v41 }
 0xfc2   : > { %v6537_v16 = vmul.f32 %v12450_v48, %v6523_v36 }
 0xfc3   : > { %v6536_v7 = vmul.f32 %v12450_v48, %v6522_v37 }
 0xfc4   : > { %v19390_v35 = vadd.f32 %v12451_v60, %v6537_v16 }
 0xfc5   : > { %v19388_v38 = vadd.f32 %v12451_v60, %v6536_v7 }
 0xfc7   : > { %v15899_v31 = vpop.eup %15898  ;;  %14330 = vmatprep.mubr.msk.f32.mxu0 %vm1893_vm0, %v19388_v38 }
 0xfc8   : > { %v15901_v33 = vpop.eup %15900  ;;  %14331 = vmatmul.mubr.msk.f32.gmra.mrb[158].mxu0 %vm1893_vm0, %v19390_v35  ;;  %v6525_v62 = vmul.f32 %v15899_v31, %v19344_v46 }
 0xfc9   : > { %v6524_v4 = vmul.f32 %v15901_v33, %v19346_v13 }
 0xfca   : > { %v6539_v32 = vmul.f32 %v12450_v48, %v6525_v62 }
 0xfcb   : > { %v6538_v41 = vmul.f32 %v12450_v48, %v6524_v4 }
 0xfcc   : > { %v19400_v2 = vadd.f32 %v12451_v60, %v6539_v32 }
 0xfcd   : > { %v19398_v29 = vadd.f32 %v12451_v60, %v6538_v41 }
 0xfcf   : > { %14333 = vmatprep.mubr.msk.f32.mxu0 %vm1893_vm0, %v19398_v29 }
 0xfd0   : > { %14334 = vmatmul.mubr.msk.f32.gmra.mrb[160].mxu0 %vm1893_vm0, %v19400_v2 }
0x108b   : > { %v14326_v44 = vpop.f32.mrb[154].mxu0 }
0x108c   : > { %v6656_v34 = vadd.f32 %v14326_v44, %v12452_v50  ;;  %v6650_v52 = vpop.f32.mrb[155].mxu0 }
0x108d   : > { %v6651_v40 = vadd.f32 %v12452_v50, %v6650_v52 }
0x108e   : > { %v6690_v23 = vmax.f32 %v6656_v34, 0.0 }
0x108f   : > { %v6689_v46 = vmax.f32 %v6651_v40, 0.0 }
0x1091   : > { %14352 = vmatprep.mubr.msk.f32.mxu1 %vm4584_vm4, %v6689_v46 }
0x1092   : > { %14353 = vmatmul.mubr.msk.f32.vlgmr.msra.gmra.mrb[176].mxu1 %vm4584_vm4, %v6690_v23 }
0x1093   : > { %v14329_v13 = vpop.f32.mrb[156].mxu0 }
0x1094   : > { %v6666_v53 = vadd.f32 %v14329_v13, %v12452_v50  ;;  %v6660_v21 = vpop.f32.mrb[157].mxu0 }
0x1095   : > { %v6661_v3 = vadd.f32 %v12452_v50, %v6660_v21 }
0x1096   : > { %v6692_v18 = vmax.f32 %v6666_v53, 0.0 }
0x1097   : > { %v6691_v17 = vmax.f32 %v6661_v3, 0.0 }
0x1099   : > { %14355 = vmatprep.mubr.msk.f32.mxu1 %vm4584_vm4, %v6691_v17 }
0x109a   : > { %14356 = vmatmul.mubr.msk.f32.gmra.mrb[178].mxu1 %vm4584_vm4, %v6692_v18 }
0x109b   : > { %v14332_v55 = vpop.f32.mrb[158].mxu0 }
0x109c   : > { %v6676_v22 = vadd.f32 %v14332_v55, %v12452_v50  ;;  %v6670_v5 = vpop.f32.mrb[159].mxu0 }
0x109d   : > { %v6671_v56 = vadd.f32 %v12452_v50, %v6670_v5 }
0x109e   : > { %v6694_v24 = vmax.f32 %v6676_v22, 0.0 }
0x109f   : > { %v6693_v10 = vmax.f32 %v6671_v56, 0.0 }
0x10a1   : > { %14358 = vmatprep.mubr.msk.f32.mxu1 %vm4584_vm4, %v6693_v10 }
0x10a2   : > { %14359 = vmatmul.mubr.msk.f32.gmra.mrb[180].mxu1 %vm4584_vm4, %v6694_v24 }
0x10a3   : > { %v14335_v48 = vpop.f32.mrb[160].mxu0 }
0x10a4   : > { %v6686_v47 = vadd.f32 %v14335_v48, %v12452_v50  ;;  %v6680_v1 = vpop.f32.mrb[161].mxu0 }
0x10a5   : > { %v6681_v14 = vadd.f32 %v12452_v50, %v6680_v1 }
0x10a6   : > { %v6696_v61 = vmax.f32 %v6686_v47, 0.0 }
0x10a7   : > { %v6695_v28 = vmax.f32 %v6681_v14, 0.0 }
0x10a9   : > { %14361 = vmatprep.mubr.msk.f32.mxu1 %vm4584_vm4, %v6695_v28 }
0x10aa   : > { %14362 = vmatmul.mubr.msk.f32.gmra.mrb[182].mxu1 %vm4584_vm4, %v6696_v61 }
0x1165   : > { %v14354_v60 = vpop.f32.mrb[176].mxu1 }
0x1166   : > { %v6799_v6 = vadd.f32 %v14354_v60, %v12461_v42  ;;  %v6793_v63 = vpop.f32.mrb[177].mxu1 }
0x1167   : > { %v6794_v8 = vadd.f32 %v12461_v42, %v6793_v63 }
0x1168   : > { %v6833_v25 = vadd.f32 %v6799_v6, %v19370_v12 }
0x1169   : > { %v6832_v57 = vadd.f32 %v6794_v8, %v19368_v27 }
0x116a   : > { %v6843_v54 = vsel %vm1893_vm0, %v6833_v25, 0.0 }
0x116b   : > { %6844 = vadd.xlane.f32.xlu1 %v6843_v54  ;;  %v6840_v9 = vsel %vm1893_vm0, %v6832_v57, 0.0 }
0x116c   : > { %6841 = vadd.xlane.f32.xlu0 %v6840_v9 }
0x116d   : > { %v14357_v30 = vpop.f32.mrb[178].mxu1 }
0x116e   : > { %v6809_v39 = vadd.f32 %v14357_v30, %v12461_v42  ;;  %v6803_v19 = vpop.f32.mrb[179].mxu1  ;;  %v12477_v30 = vld [vmem:[%s16633_s29 + $0x20] sm:$0xff] }
0x116f   : > { %v6804_v15 = vadd.f32 %v12461_v42, %v6803_v19  ;;  %v12472_v19 = vld [vmem:[%s16623_s25 + $0x20] sm:$0xff] }
0x1170   : > { %v6835_v49 = vadd.f32 %v6809_v39, %v19380_v26  ;;  %v12478_v39 = vld [vmem:[%s16633_s29 + $0x28] sm:$0xff] }
0x1171   : > { %v6834_v51 = vadd.f32 %v6804_v15, %v19378_v0  ;;  %v15251_v15 = vpack.c.bf16 %v12478_v39, %v12477_v30 }
0x1172   : > { %v6849_v45 = vsel %vm1893_vm0, %v6835_v49, 0.0 }
0x1173   : > { %6850 = vadd.xlane.f32.xlu1 %v6849_v45  ;;  %v6846_v12 = vsel %vm1893_vm0, %v6834_v51, 0.0  ;;  %15252 = vmatprep.subr.bf16.mxu1 %v15251_v15  ;;  %v12479_v45 = vld [vmem:[%s16633_s29 + $0x30] sm:$0xff] }
0x1174   : > { %6847 = vadd.xlane.f32.xlu0 %v6846_v12  ;;  %15254 = vmatpush3.bf16.msra.mxu1 %v15251_v15  ;;  %v12480_v12 = vld [vmem:[%s16633_s29 + $0x38] sm:$0xff] }
0x1175   : > { %v14360_v27 = vpop.f32.mrb[180].mxu1 }
0x1176   : > { %v6819_v58 = vadd.f32 %v14360_v27, %v12461_v42  ;;  %v6813_v20 = vpop.f32.mrb[181].mxu1  ;;  %v12474_v27 = vld [vmem:[%s16623_s25 + $0x30] sm:$0xff] }
0x1177   : > { %v6814_v11 = vadd.f32 %v12461_v42, %v6813_v20  ;;  %v12475_v20 = vld [vmem:[%s16623_s25 + $0x38] sm:$0xff] }
0x1178   : > { %v6837_v43 = vadd.f32 %v6819_v58, %v19390_v35  ;;  %v15255_v58 = vpack.c.bf16 %v12480_v12, %v12479_v45 }
0x1179   : > { %v6836_v59 = vadd.f32 %v6814_v11, %v19388_v38  ;;  %v15247_v11 = vpack.c.bf16 %v12475_v20, %v12474_v27 }
0x117a   : > { %v6855_v36 = vsel %vm1893_vm0, %v6837_v43, 0.0  ;;  %15256 = vmatprep.subr.bf16.mxu1 %v15255_v58 }
0x117b   : > { %6856 = vadd.xlane.f32.xlu1 %v6855_v36  ;;  %v6852_v26 = vsel %vm1893_vm0, %v6836_v59, 0.0  ;;  %15258 = vmatpush3.bf16.msra.mxu1 %v15255_v58  ;;  %v16065_v58 = vld [vmem:[%s16917_s18 + $0x18] sm:$0xff] }
0x117c   : > { %6853 = vadd.xlane.f32.xlu0 %v6852_v26 }
0x117d   : > { %v14363_v0 = vpop.f32.mrb[182].mxu1 }
0x117e   : > { %v6829_v37 = vadd.f32 %v14363_v0, %v12461_v42  ;;  %v6823_v16 = vpop.f32.mrb[183].mxu1 }
0x117f   : > { %v6824_v7 = vadd.f32 %v12461_v42, %v6823_v16 }
0x1180   : > { %v6839_v31 = vadd.f32 %v6829_v37, %v19400_v2 }
0x1181   : > { %v6838_v33 = vadd.f32 %v6824_v7, %v19398_v29 }
0x1182   : > { %v6861_v62 = vsel %vm1893_vm0, %v6839_v31, 0.0 }
0x1183   : > { %6862 = vadd.xlane.f32.xlu1 %v6861_v62  ;;  %v6858_v35 = vsel %vm1893_vm0, %v6838_v33, 0.0 }
0x1184   : > { %6859 = vadd.xlane.f32.xlu0 %v6858_v35 }
0x11f8   : > { %v6845_v38 = vpop.xlane.xlu1 %6844 }
0x11f9   : > { %v6865_v4 = vmul.f32 0.03125, %v6845_v38  ;;  %v6842_v32 = vpop.xlane.xlu0 %6841 }
0x11fa   : > { %v6864_v41 = vmul.f32 0.03125, %v6842_v32 }
0x11fb   : > { %v19430_v50 = vsub.f32 %v6833_v25, %v6865_v4 }
0x11fc   : > { %v19432_v44 = vsub.f32 %v6832_v57, %v6864_v41 }
0x11fd   : > { %v6881_v34 = vmul.f32 %v19430_v50, %v19430_v50 }
0x11fe   : > { %v6880_v29 = vmul.f32 %v19432_v44, %v19432_v44 }
0x11ff   : > { %v6891_v2 = vsel %vm1893_vm0, %v6881_v34, 0.0  ;;  %v19480_v34 = vld [vmem:[#allocation9] ss:$0 sm:$0xff] }
0x1200   : > { %v6851_v52 = vpop.xlane.xlu1 %6850  ;;  %6892 = vadd.xlane.f32.xlu1 %v6891_v2  ;;  %v6888_v40 = vsel %vm1893_vm0, %v6880_v29, 0.0 }
0x1201   : > { %v6867_v46 = vmul.f32 0.03125, %v6851_v52  ;;  %6889 = vadd.xlane.f32.xlu0 %v6888_v40  ;;  %v6848_v23 = vpop.xlane.xlu0 %6847  ;;  %v19483_v40 = vld [vmem:[#allocation10] ss:$0 sm:$0xff] }
0x1202   : > { %v6866_v13 = vmul.f32 0.03125, %v6848_v23 }
0x1203   : > { %v19440_v53 = vsub.f32 %v6835_v49, %v6867_v46  ;;  %v12473_v49 = vld [vmem:[%s16623_s25 + $0x28] sm:$0xff] }
0x1204   : > { %v19442_v21 = vsub.f32 %v6834_v51, %v6866_v13  ;;  %v15243_v51 = vpack.c.bf16 %v12473_v49, %v12472_v19 }
0x1205   : > { %v6883_v3 = vmul.f32 %v19440_v53, %v19440_v53 }
0x1206   : > { %v6882_v17 = vmul.f32 %v19442_v21, %v19442_v21  ;;  %15244 = vmatprep.subr.bf16.mxu0 %v15243_v51 }
0x1207   : > { %v6897_v18 = vsel %vm1893_vm0, %v6883_v3, 0.0  ;;  %15246 = vmatpush3.bf16.msra.mxu0 %v15243_v51  ;;  %v16064_v51 = vld [vmem:[%s16917_s18 + $0x10] sm:$0xff] }
0x1208   : > { %v6857_v55 = vpop.xlane.xlu1 %6856  ;;  %6898 = vadd.xlane.f32.xlu1 %v6897_v18  ;;  %v6894_v22 = vsel %vm1893_vm0, %v6882_v17, 0.0  ;;  %15248 = vmatprep.subr.bf16.mxu0 %v15247_v11 }
0x1209   : > { %v6869_v5 = vmul.f32 0.03125, %v6857_v55  ;;  %6895 = vadd.xlane.f32.xlu0 %v6894_v22  ;;  %v6854_v56 = vpop.xlane.xlu0 %6853 }
0x120a   : > { %v6868_v10 = vmul.f32 0.03125, %v6854_v56  ;;  %v12484_v56 = vld [vmem:[%s16643_s27 + $0x30] sm:$0xff] }
0x120b   : > { %v19450_v24 = vsub.f32 %v6837_v43, %v6869_v5  ;;  %15250 = vmatpush3.bf16.msra.mxu0 %v15247_v11  ;;  %v12482_v43 = vld [vmem:[%s16643_s27 + $0x20] sm:$0xff] }
0x120c   : > { %v19452_v48 = vsub.f32 %v6836_v59, %v6868_v10  ;;  %v12483_v59 = vld [vmem:[%s16643_s27 + $0x28] sm:$0xff]  ;;  %v12485_v10 = vld [vmem:[%s16643_s27 + $0x38] sm:$0xff] }
0x120d   : > { %v6885_v47 = vmul.f32 %v19450_v24, %v19450_v24  ;;  %v15259_v36 = vpack.c.bf16 %v12483_v59, %v12482_v43 }
0x120e   : > { %v6884_v1 = vmul.f32 %v19452_v48, %v19452_v48 }
0x120f   : > { %v6903_v14 = vsel %vm1893_vm0, %v6885_v47, 0.0  ;;  %15260 = vmatprep.subr.bf16.mxu0 %v15259_v36  ;;  %v16062_v47 = vld [vmem:[%s16917_s18] sm:$0xff] }
0x1210   : > { %6904 = vadd.xlane.f32.xlu1 %v6903_v14  ;;  %v6863_v28 = vpop.xlane.xlu1 %6862  ;;  %v6900_v61 = vsel %vm1893_vm0, %v6884_v1, 0.0 }
0x1211   : > { %v6871_v42 = vmul.f32 0.03125, %v6863_v28  ;;  %6901 = vadd.xlane.f32.xlu0 %v6900_v61  ;;  %v6860_v60 = vpop.xlane.xlu0 %6859 }
0x1212   : > { %v6870_v6 = vmul.f32 0.03125, %v6860_v60 }
0x1213   : > { %v19460_v63 = vsub.f32 %v6839_v31, %v6871_v42  ;;  %v16063_v42 = vld [vmem:[%s16917_s18 + $0x8] sm:$0xff] }
0x1214   : > { %v19462_v8 = vsub.f32 %v6838_v33, %v6870_v6  ;;  %v15263_v6 = vpack.c.bf16 %v12485_v10, %v12484_v56 }
0x1215   : > { %v6887_v25 = vmul.f32 %v19460_v63, %v19460_v63 }
0x1216   : > { %v6886_v57 = vmul.f32 %v19462_v8, %v19462_v8 }
0x1217   : > { %v6909_v54 = vsel %vm1893_vm0, %v6887_v25, 0.0 }
0x1218   : > { %6910 = vadd.xlane.f32.xlu1 %v6909_v54  ;;  %v6906_v9 = vsel %vm1893_vm0, %v6886_v57, 0.0 }
0x1219   : > { %6907 = vadd.xlane.f32.xlu0 %v6906_v9 }
0x128d   : > { %v6893_v26 = vpop.xlane.xlu1 %6892 }
0x128e   : > { %v6913_v0 = vmul.f32 0.03125, %v6893_v26  ;;  %v6890_v37 = vpop.xlane.xlu0 %6889 }
0x128f   : > { %v6912_v16 = vmul.f32 0.03125, %v6890_v37 }
0x1290   : > { %v6921_v7 = vadd.f32 1e-05, %v6913_v0 }
0x1291   : > { %v6920_v31 = vadd.f32 1e-05, %v6912_v16 }
0x1292   : > { %15902 = vrsqrt.f32 %v6921_v7  ;;  %v16067_v7 = vld [vmem:[%s16917_s18 + $0x28] sm:$0xff] }
0x1293   : > { %15904 = vrsqrt.f32 %v6920_v31 }
0x1295   : > { %v6899_v33 = vpop.xlane.xlu1 %6898 }
0x1296   : > { %v6915_v62 = vmul.f32 0.03125, %v6899_v33  ;;  %v6896_v35 = vpop.xlane.xlu0 %6895 }
0x1297   : > { %v6914_v38 = vmul.f32 0.03125, %v6896_v35 }
0x1298   : > { %v6923_v4 = vadd.f32 1e-05, %v6915_v62 }
0x1299   : > { %v6922_v32 = vadd.f32 1e-05, %v6914_v38 }
0x129a   : > { %15906 = vrsqrt.f32 %v6923_v4  ;;  %v16068_v4 = vld [vmem:[%s16917_s18 + $0x30] sm:$0xff] }
0x129b   : > { %15908 = vrsqrt.f32 %v6922_v32  ;;  %v16069_v32 = vld [vmem:[%s16917_s18 + $0x38] sm:$0xff] }
0x129c   : > { %v15903_v41 = vpop.eup %15902 }
0x129d   : > { %v15905_v29 = vpop.eup %15904  ;;  %v6937_v2 = vmul.f32 %v15903_v41, %v19430_v50  ;;  %v6905_v52 = vpop.xlane.xlu1 %6904 }
0x129e   : > { %v6936_v46 = vmul.f32 %v15905_v29, %v19432_v44  ;;  %v6917_v23 = vmul.f32 0.03125, %v6905_v52  ;;  %v6902_v13 = vpop.xlane.xlu0 %6901  ;;  %v12488_v29 = vld [vmem:[%s16653_s21 + $0x28] sm:$0xff]  ;;  %v12489_v52 = vld [vmem:[%s16653_s21 + $0x30] sm:$0xff] }
0x129f   : > { %v6951_v3 = vmul.f32 %v19480_v34, %v6937_v2  ;;  %v6916_v17 = vmul.f32 0.03125, %v6902_v13  ;;  %v19580_v13 = vld [vmem:[%s16628_s4 + $0x1] ss:$0 sm:$0xff] }
0x12a0   : > { %v6925_v18 = vadd.f32 1e-05, %v6917_v23  ;;  %v6950_v55 = vmul.f32 %v19480_v34, %v6936_v46  ;;  %v22537_v23 = vld [vmem:[#allocation67_spill] sm:$0xff] }
0x12a1   : > { %v19489_v22 = vadd.f32 %v19483_v40, %v6951_v3  ;;  %v6924_v5 = vadd.f32 1e-05, %v6916_v17  ;;  %v19583_v3 = vld [vmem:[%s16638_s20 + $0x1] ss:$0 sm:$0xff] }
0x12a2   : > { %15910 = vrsqrt.f32 %v6925_v18  ;;  %v19492_v50 = vadd.f32 %v19483_v40, %v6950_v55 }
0x12a3   : > { %22529 = vst [vmem:[#allocation191_spill] sm:$0xff] %v19489_v22  ;;  %15912 = vrsqrt.f32 %v6924_v5  ;;  %v7059_v60 = vadd.f32 %v16063_v42, %v19489_v22  ;;  %v19604_v42 = vld [vmem:[%s16543_s8 + $0x88] sm:$0xff] }
0x12a4   : > { %22530 = vst [vmem:[#allocation131_spill] sm:$0xff] %v19492_v50  ;;  %v15907_v44 = vpop.eup %15906  ;;  %v7058_v1 = vadd.f32 %v16062_v47, %v19492_v50 }
0x12a5   : > { %v15909_v14 = vpop.eup %15908  ;;  %v6939_v28 = vmul.f32 %v15907_v44, %v19440_v53  ;;  %v6911_v61 = vpop.xlane.xlu1 %6910 }
0x12a6   : > { %v6938_v25 = vmul.f32 %v15909_v14, %v19442_v21  ;;  %v6919_v57 = vmul.f32 0.03125, %v6911_v61  ;;  %14372 = vmatprep.mubr.msk.f32.mxu0 %vm1893_vm0, %v7058_v1  ;;  %14392 = vmatprep.mubr.msk.f32.mxu1 %vm1893_vm0, %v7058_v1  ;;  %v6908_v54 = vpop.xlane.xlu0 %6907  ;;  %v19594_v1 = vld [vmem:[%s16543_s8 + $0x8] sm:$0xff] }
0x12a7   : > { %v6918_v9 = vmul.f32 0.03125, %v6908_v54  ;;  %14373 = vmatmul.mubr.msk.f32.vlgmr.msra.gmra.mrb[162].mxu0 %vm1893_vm0, %v7059_v60  ;;  %14393 = vmatmul.mubr.msk.f32.vlgmr.msra.gmra.mrb[184].mxu1 %vm1893_vm0, %v7059_v60  ;;  %v6953_v53 = vmul.f32 %v19480_v34, %v6939_v28  ;;  %v19598_v28 = vld [vmem:[%s16543_s8 + $0x48] sm:$0xff] }
0x12a8   : > { %v6927_v30 = vadd.f32 1e-05, %v6919_v57  ;;  %v6952_v39 = vmul.f32 %v19480_v34, %v6938_v25  ;;  %15262 = vmatpush3.bf16.msra.mxu0 %v15259_v36  ;;  %v19614_v57 = vld [vmem:[%s16543_s8] sm:$0xff] }
0x12a9   : > { %v6926_v21 = vadd.f32 1e-05, %v6918_v9  ;;  %v19509_v19 = vadd.f32 %v19483_v40, %v6953_v53  ;;  %15264 = vmatprep.subr.bf16.mxu0 %v15263_v6  ;;  %v19618_v9 = vld [vmem:[%s16543_s8 + $0x40] sm:$0xff] }
0x12aa   : > { %15914 = vrsqrt.f32 %v6927_v30  ;;  %v19512_v15 = vadd.f32 %v19483_v40, %v6952_v39  ;;  %v19624_v30 = vld [vmem:[%s16543_s8 + $0x80] sm:$0xff] }
0x12ab   : > { %22531 = vst [vmem:[#allocation132_spill] sm:$0xff] %v19509_v19  ;;  %15916 = vrsqrt.f32 %v6926_v21  ;;  %v7061_v20 = vadd.f32 %v16065_v58, %v19509_v19  ;;  %v19628_v21 = vld [vmem:[%s16543_s8 + $0xc0] sm:$0xff] }
0x12ac   : > { %22532 = vst [vmem:[#allocation133_spill] sm:$0xff] %v19512_v15  ;;  %v15911_v49 = vpop.eup %15910  ;;  %v7060_v45 = vadd.f32 %v16064_v51, %v19512_v15  ;;  %15266 = vmatpush3.bf16.msra.mxu0 %v15263_v6  ;;  %v19608_v6 = vld [vmem:[%s16543_s8 + $0xc8] sm:$0xff] }
0x12ad   : > { %v15913_v12 = vpop.eup %15912  ;;  %v6941_v27 = vmul.f32 %v15911_v49, %v19450_v24 }
0x12ae   : > { %v6940_v11 = vmul.f32 %v15913_v12, %v19452_v48  ;;  %14375 = vmatprep.mubr.msk.f32.mxu0 %vm1893_vm0, %v7060_v45  ;;  %14395 = vmatprep.mubr.msk.f32.mxu1 %vm1893_vm0, %v7060_v45  ;;  %v16066_v48 = vld [vmem:[%s16917_s18 + $0x20] sm:$0xff] }
0x12af   : > { %14376 = vmatmul.mubr.msk.f32.gmra.mrb[164].mxu0 %vm1893_vm0, %v7061_v20  ;;  %14396 = vmatmul.mubr.msk.f32.gmra.mrb[186].mxu1 %vm1893_vm0, %v7061_v20  ;;  %v6955_v43 = vmul.f32 %v19480_v34, %v6941_v27 }
0x12b0   : > { %v6954_v59 = vmul.f32 %v19480_v34, %v6940_v11  ;;  %v16103_v11 = vld [vmem:[%s22235_s1] sm:$0xff] }
0x12b1   : > { %v19527_v24 = vadd.f32 %v19483_v40, %v6955_v43 }
0x12b2   : > { %v19530_v36 = vadd.f32 %v19483_v40, %v6954_v59 }
0x12b3   : > { %22533 = vst [vmem:[#allocation101_spill] sm:$0xff] %v19527_v24  ;;  %v7063_v31 = vadd.f32 %v16067_v7, %v19527_v24 }
0x12b4   : > { %22534 = vst [vmem:[#allocation100_spill] sm:$0xff] %v19530_v36  ;;  %v15915_v26 = vpop.eup %15914  ;;  %v7062_v0 = vadd.f32 %v16066_v48, %v19530_v36 }
0x12b5   : > { %v15917_v37 = vpop.eup %15916  ;;  %v6943_v16 = vmul.f32 %v15915_v26, %v19460_v63 }
0x12b6   : > { %v6942_v33 = vmul.f32 %v15917_v37, %v19462_v8  ;;  %14378 = vmatprep.mubr.msk.f32.mxu0 %vm1893_vm0, %v7062_v0  ;;  %14398 = vmatprep.mubr.msk.f32.mxu1 %vm1893_vm0, %v7062_v0 }
0x12b7   : > { %14379 = vmatmul.mubr.msk.f32.gmra.mrb[166].mxu0 %vm1893_vm0, %v7063_v31  ;;  %14399 = vmatmul.mubr.msk.f32.gmra.mrb[188].mxu1 %vm1893_vm0, %v7063_v31  ;;  %v6957_v62 = vmul.f32 %v19480_v34, %v6943_v16  ;;  %v19652_v16 = vld [vmem:[%s16543_s8 + $0x18] sm:$0xff] }
0x12b8   : > { %v6956_v35 = vmul.f32 %v19480_v34, %v6942_v33  ;;  %v12487_v34 = vld [vmem:[%s16653_s21 + $0x20] sm:$0xff]  ;;  %v19656_v31 = vld [vmem:[%s16543_s8 + $0x58] sm:$0xff] }
0x12b9   : > { %v19545_v38 = vadd.f32 %v19483_v40, %v6957_v62  ;;  %v15267_v2 = vpack.c.bf16 %v12488_v29, %v12487_v34  ;;  %v19662_v62 = vld [vmem:[%s16543_s8 + $0x98] sm:$0xff]  ;;  %v19676_v34 = vld [vmem:[%s16543_s8 + $0x50] sm:$0xff] }
0x12ba   : > { %v19548_v63 = vadd.f32 %v19483_v40, %v6956_v35  ;;  %v12490_v40 = vld [vmem:[%s16653_s21 + $0x38] sm:$0xff] }
0x12bb   : > { %22535 = vst [vmem:[#allocation111_spill] sm:$0xff] %v19545_v38  ;;  %v7065_v41 = vadd.f32 %v16069_v32, %v19545_v38  ;;  %15268 = vmatprep.subr.bf16.mxu1 %v15267_v2  ;;  %v15271_v46 = vpack.c.bf16 %v12490_v40, %v12489_v52  ;;  %v19672_v32 = vld [vmem:[%s16543_s8 + $0x10] sm:$0xff] }
0x12bc   : > { %22536 = vst [vmem:[#allocation110_spill] sm:$0xff] %v19548_v63  ;;  %v7064_v8 = vadd.f32 %v16068_v4, %v19548_v63  ;;  %15270 = vmatpush3.bf16.msra.mxu1 %v15267_v2  ;;  %v19666_v4 = vld [vmem:[%s16543_s8 + $0xd8] sm:$0xff]  ;;  %v19682_v2 = vld [vmem:[%s16543_s8 + $0x90] sm:$0xff] }
0x12bd   : > { %15272 = vmatprep.subr.bf16.mxu1 %v15271_v46  ;;  %22539 = vst [vmem:[#allocation134_spill] sm:$0xff] %v19666_v4  ;;  %v19686_v40 = vld [vmem:[%s16543_s8 + $0xd0] sm:$0xff] }
0x12be   : > { %14381 = vmatprep.mubr.msk.f32.mxu0 %vm1893_vm0, %v7064_v8  ;;  %14401 = vmatprep.mubr.msk.f32.mxu1 %vm1893_vm0, %v7064_v8 }
0x12bf   : > { %14382 = vmatmul.mubr.msk.f32.gmra.mrb[168].mxu0 %vm1893_vm0, %v7065_v41  ;;  %14402 = vmatmul.mubr.msk.f32.gmra.mrb[190].mxu1 %vm1893_vm0, %v7065_v41 }
0x12c0   : > { %14412 = vmatprep.mubr.msk.f32.mxu0 %vm1893_vm0, %v19492_v50  ;;  %15274 = vmatpush3.bf16.msra.mxu1 %v15271_v46 }
0x12c1   : > { %15324 = vmatprep.subr.bf16.mxu1 %v22537_v23 }
0x12c3   : > { %14413 = vmatmul.mubr.msk.f32.vlgmr.msra.gmra.mrb[170].mxu0 %vm1893_vm0, %v19489_v22  ;;  %v19793_v22 = vld [vmem:[%s16543_s8 + $0xf0] sm:$0xff] }
0x12c4   : > { %14415 = vmatprep.mubr.msk.f32.mxu0 %vm1893_vm0, %v19512_v15 }
0x12c7   : > { %14416 = vmatmul.mubr.msk.f32.gmra.mrb[172].mxu0 %vm1893_vm0, %v19509_v19  ;;  %v19789_v19 = vld [vmem:[%s16543_s8 + $0xb0] sm:$0xff] }
0x12c8   : > { %14418 = vmatprep.mubr.msk.f32.mxu0 %vm1893_vm0, %v19530_v36 }
0x12cb   : > { %14419 = vmatmul.mubr.msk.f32.gmra.mrb[174].mxu0 %vm1893_vm0, %v19527_v24 }
0x12cc   : > { %14421 = vmatprep.mubr.msk.f32.mxu0 %vm1893_vm0, %v19548_v63  ;;  %v19772_v63 = vld [vmem:[%s16543_s8 + $0xb8] sm:$0xff] }
0x12cf   : > { %14422 = vmatmul.mubr.msk.f32.gmra.mrb[176].mxu0 %vm1893_vm0, %v19545_v38  ;;  %v19766_v38 = vld [vmem:[%s16543_s8 + $0x78] sm:$0xff] }
0x137a   : > { %v14374_v17 = vpop.f32.mrb[162].mxu0  ;;  %v14394_v18 = vpop.f32.mrb[184].mxu1 }
0x137b   : > { %v19586_v55 = vadd.f32 %v14374_v17, %v19580_v13  ;;  %v7279_v5 = vadd.f32 %v14394_v18, %v19583_v3  ;;  %v7162_v56 = vpop.f32.mrb[163].mxu0  ;;  %v7273_v10 = vpop.f32.mrb[185].mxu1 }
0x137c   : > { %v19590_v44 = vadd.f32 %v19580_v13, %v7162_v56  ;;  %v7274_v47 = vadd.f32 %v19583_v3, %v7273_v10 }
0x137d   : > { %v7448_v14 = vmul.f32 %v19594_v1, %v7279_v5  ;;  %v19601_v61 = vmul.f32 %v19598_v28, %v7279_v5  ;;  %v7464_v60 = vmul.f32 %v19604_v42, %v7279_v5  ;;  %v19611_v25 = vmul.f32 %v19608_v6, %v7279_v5  ;;  %v16094_v5 = vld [vmem:[%s16543_s8 + $0x38] sm:$0xff] }
0x137e   : > { %v7447_v54 = vmul.f32 %v19614_v57, %v7274_v47  ;;  %v19621_v53 = vmul.f32 %v19618_v9, %v7274_v47  ;;  %v7463_v39 = vmul.f32 %v19624_v30, %v7274_v47  ;;  %v19631_v49 = vmul.f32 %v19628_v21, %v7274_v47  ;;  %13461 = vmatprep.mubr.msk.f32.mxu0 %vm1893_vm0, %v19590_v44 }
0x1380   : > { %v15278_v51 = vpack.c.bf16 %v7448_v14, %v7447_v54  ;;  %v15275_v12 = vpack.c.bf16 %v7464_v60, %v7463_v39 }
0x1382   : > { %v14377_v58 = vpop.f32.mrb[164].mxu0  ;;  %v14397_v20 = vpop.f32.mrb[186].mxu1  ;;  %15277 = vmatprep.subr.msk.bf16.mxu0 %vm17042_vm1, %v15275_v12  ;;  %v19708_v12 = vld [vmem:[%s16543_s8 + $0x28] sm:$0xff] }
0x1383   : > { %v19642_v43 = vadd.f32 %v14377_v58, %v19580_v13  ;;  %v7289_v59 = vadd.f32 %v14397_v20, %v19583_v3  ;;  %v7172_v26 = vpop.f32.mrb[165].mxu0  ;;  %v7283_v48 = vpop.f32.mrb[187].mxu1  ;;  %15280 = vmatpush3.bf16.xpose.msk.msra.mxu0 %vm17042_vm1, %v15278_v51  ;;  %v19712_v20 = vld [vmem:[%s16543_s8 + $0x68] sm:$0xff] }
0x1384   : > { %v19648_v0 = vadd.f32 %v19580_v13, %v7172_v26  ;;  %v7284_v37 = vadd.f32 %v19583_v3, %v7283_v48  ;;  %v19718_v26 = vld [vmem:[%s16543_s8 + $0xa8] sm:$0xff] }
0x1385   : > { %v7450_v7 = vmul.f32 %v19652_v16, %v7289_v59  ;;  %v19659_v33 = vmul.f32 %v19656_v31, %v7289_v59  ;;  %v7466_v35 = vmul.f32 %v19662_v62, %v7289_v59  ;;  %v19669_v8 = vmul.f32 %v19666_v4, %v7289_v59 }
0x1386   : > { %v7449_v41 = vmul.f32 %v19672_v32, %v7284_v37  ;;  %v19679_v29 = vmul.f32 %v19676_v34, %v7284_v37  ;;  %v7465_v52 = vmul.f32 %v19682_v2, %v7284_v37  ;;  %v19689_v46 = vmul.f32 %v19686_v40, %v7284_v37  ;;  %v19722_v37 = vld [vmem:[%s16543_s8 + $0xe8] sm:$0xff] }
0x1387   : > { %22542 = vst [vmem:[#allocation119_spill] sm:$0xff] %v19722_v37 }
0x1388   : > { %v15284_v23 = vpack.c.bf16 %v7450_v7, %v7449_v41  ;;  %v15281_v18 = vpack.c.bf16 %v7466_v35, %v7465_v52  ;;  %v19728_v35 = vld [vmem:[%s16543_s8 + $0x20] sm:$0xff] }
0x1389   : > { %v19732_v52 = vld [vmem:[%s16543_s8 + $0x60] sm:$0xff] }
0x138a   : > { %v14380_v56 = vpop.f32.mrb[166].mxu0  ;;  %v14400_v10 = vpop.f32.mrb[188].mxu1  ;;  %15283 = vmatprep.subr.msk.bf16.mxu0 %vm17042_vm1, %v15281_v18  ;;  %v19738_v18 = vld [vmem:[%s16543_s8 + $0xa0] sm:$0xff] }
0x138b   : > { %v19698_v47 = vadd.f32 %v14380_v56, %v19580_v13  ;;  %v7299_v14 = vadd.f32 %v14400_v10, %v19583_v3  ;;  %v7182_v60 = vpop.f32.mrb[167].mxu0  ;;  %v7293_v54 = vpop.f32.mrb[189].mxu1  ;;  %15286 = vmatpush3.bf16.xpose.msk.msra.mxu0 %vm17042_vm1, %v15284_v23  ;;  %v19742_v10 = vld [vmem:[%s16543_s8 + $0xe0] sm:$0xff] }
0x138c   : > { %v19704_v39 = vadd.f32 %v19580_v13, %v7182_v60  ;;  %v7294_v51 = vadd.f32 %v19583_v3, %v7293_v54  ;;  %22543 = vst [vmem:[#allocation118_spill] sm:$0xff] %v19742_v10 }
0x138d   : > { %22540 = vst [vmem:[#allocation113_spill] sm:$0xff] %v19698_v47  ;;  %v7452_v58 = vmul.f32 %v19708_v12, %v7299_v14  ;;  %v19715_v59 = vmul.f32 %v19712_v20, %v7299_v14  ;;  %v7468_v48 = vmul.f32 %v19718_v26, %v7299_v14  ;;  %v19725_v7 = vmul.f32 %v19722_v37, %v7299_v14 }
0x138e   : > { %22541 = vst [vmem:[#allocation112_spill] sm:$0xff] %v19704_v39  ;;  %v7451_v41 = vmul.f32 %v19728_v35, %v7294_v51  ;;  %v19735_v23 = vmul.f32 %v19732_v52, %v7294_v51  ;;  %v7467_v56 = vmul.f32 %v19738_v18, %v7294_v51  ;;  %v19745_v60 = vmul.f32 %v19742_v10, %v7294_v51 }
0x1390   : > { %v15290_v14 = vpack.c.bf16 %v7452_v58, %v7451_v41  ;;  %v15287_v17 = vpack.c.bf16 %v7468_v48, %v7467_v56 }
0x1392   : > { %v14383_v45 = vpop.f32.mrb[168].mxu0  ;;  %v14403_v27 = vpop.f32.mrb[190].mxu1  ;;  %15289 = vmatprep.subr.msk.bf16.mxu0 %vm17042_vm1, %v15287_v17  ;;  %v12544_v17 = vld [vmem:[%s16648_s17 + $0x1] ss:$0 sm:$0xff] }
0x1393   : > { %v19754_v51 = vadd.f32 %v14383_v45, %v19580_v13  ;;  %v7309_v58 = vadd.f32 %v14403_v27, %v19583_v3  ;;  %v7192_v41 = vpop.f32.mrb[169].mxu0  ;;  %v7303_v54 = vpop.f32.mrb[191].mxu1  ;;  %15292 = vmatpush3.bf16.xpose.msk.msra.mxu0 %vm17042_vm1, %v15290_v14  ;;  %v19776_v14 = vld [vmem:[%s16543_s8 + $0xf8] sm:$0xff] }
0x1394   : > { %v19760_v48 = vadd.f32 %v19580_v13, %v7192_v41  ;;  %v7304_v56 = vadd.f32 %v19583_v3, %v7303_v54  ;;  %22546 = vst [vmem:[#allocation120_spill] sm:$0xff] %v19776_v14  ;;  %v16098_v41 = vld [vmem:[%s16543_s8 + $0x30] sm:$0xff] }
0x1395   : > { %22544 = vst [vmem:[#allocation136_spill] sm:$0xff] %v19754_v51  ;;  %v7454_v45 = vmul.f32 %v16094_v5, %v7309_v58  ;;  %v19769_v27 = vmul.f32 %v19766_v38, %v7309_v58  ;;  %v7470_v24 = vmul.f32 %v19772_v63, %v7309_v58  ;;  %v19779_v13 = vmul.f32 %v19776_v14, %v7309_v58  ;;  %v19783_v54 = vld [vmem:[%s16543_s8 + $0x70] sm:$0xff] }
0x1396   : > { %22545 = vst [vmem:[#allocation121_spill] sm:$0xff] %v19760_v48  ;;  %v7453_v3 = vmul.f32 %v16098_v41, %v7304_v56  ;;  %v19786_v36 = vmul.f32 %v19783_v54, %v7304_v56  ;;  %v7469_v15 = vmul.f32 %v19789_v19, %v7304_v56  ;;  %v19796_v50 = vmul.f32 %v19793_v22, %v7304_v56  ;;  %v14414_v51 = vpop.f32.mrb[170].mxu0 }
0x1397   : > { %v19798_v48 = vadd.f32 %v14414_v51, %v12544_v17  ;;  %v7408_v58 = vpop.f32.mrb[171].mxu0 }
0x1398   : > { %v15296_v14 = vpack.c.bf16 %v7454_v45, %v7453_v3  ;;  %v15320_v37 = vpack.c.bf16 %v19769_v27, %v19786_v36  ;;  %v19802_v47 = vadd.f32 %v12544_v17, %v7408_v58  ;;  %v15293_v10 = vpack.c.bf16 %v7470_v24, %v7469_v15  ;;  %v22550_v58 = vld [vmem:[#allocation66_spill] sm:$0xff] }
0x1399   : > { %v15317_v4 = vpack.c.bf16 %v19779_v13, %v19796_v50  ;;  %v7480_v51 = vmul.f32 %v19594_v1, %v19798_v48  ;;  %v22547_v50 = vpack.c.bf16 %v19611_v25, %v19631_v49  ;;  %v22549_v13 = vld [vmem:[#allocation63_spill] sm:$0xff] }
0x139a   : > { %v14417_v39 = vpop.f32.mrb[172].mxu0  ;;  %15295 = vmatprep.subr.msk.bf16.mxu0 %vm17042_vm1, %v15293_v10  ;;  %v7479_v56 = vmul.f32 %v19614_v57, %v19802_v47  ;;  %v22548_v57 = vld [vmem:[#allocation62_spill] sm:$0xff] }
0x139b   : > { %v19812_v45 = vadd.f32 %v14417_v39, %v12544_v17  ;;  %v7418_v3 = vpop.f32.mrb[173].mxu0  ;;  %15298 = vmatpush3.bf16.xpose.msk.msra.mxu0 %vm17042_vm1, %v15296_v14 }
0x139c   : > { %v19816_v15 = vadd.f32 %v12544_v17, %v7418_v3  ;;  %14432 = vmatprep.mubr.msk.f32.mxu1 %vm1893_vm0, %v7479_v56  ;;  %15301 = vmatprep.subr.msk.bf16.mxu0 %vm17042_vm1, %v22547_v50  ;;  %v22552_v50 = vld [vmem:[#allocation64_spill] sm:$0xff] }
0x139d   : > { %14433 = vmatmul.mubr.msk.f32.vlgmr.msra.gmra.mrb[192].mxu1 %vm1893_vm0, %v7480_v51  ;;  %v7482_v14 = vmul.f32 %v19652_v16, %v19812_v45  ;;  %v22551_v16 = vpack.c.bf16 %v19601_v61, %v19621_v53  ;;  %v22554_v53 = vld [vmem:[#allocation65_spill] sm:$0xff] }
0x139e   : > { %v14420_v24 = vpop.f32.mrb[174].mxu0  ;;  %v7481_v1 = vmul.f32 %v19672_v32, %v19816_v15  ;;  %15326 = vmatpush3.bf16.msra.mxu1 %v22548_v57  ;;  %v7489_v57 = vmul.f32 %v19676_v34, %v19816_v15  ;;  %v22563_v34 = vpack.c.bf16 %v19715_v59, %v19735_v23  ;;  %v22565_v59 = vld [vmem:[#allocation75_spill] sm:$0xff] }
0x139f   : > { %v19828_v39 = vadd.f32 %v14420_v24, %v12544_v17  ;;  %v7428_v10 = vpop.f32.mrb[175].mxu0  ;;  %15328 = vmatprep.subr.bf16.mxu1 %v22549_v13  ;;  %v7498_v13 = vmul.f32 %v19662_v62, %v19812_v45 }
0x13a0   : > { %v19833_v25 = vadd.f32 %v12544_v17, %v7428_v10  ;;  %14435 = vmatprep.mubr.msk.f32.mxu1 %vm1893_vm0, %v7481_v1  ;;  %v22555_v1 = vld [vmem:[#allocation70_spill] sm:$0xff] }
0x13a1   : > { %14436 = vmatmul.mubr.msk.f32.gmra.mrb[194].mxu1 %vm1893_vm0, %v7482_v14  ;;  %v7484_v3 = vmul.f32 %v19708_v12, %v19828_v39  ;;  %v22564_v10 = vld [vmem:[#allocation74_spill] sm:$0xff]  ;;  %v22566_v14 = vld [vmem:[#allocation76_spill] sm:$0xff] }
0x13a2   : > { %v14423_v49 = vpop.f32.mrb[176].mxu0  ;;  %v7483_v32 = vmul.f32 %v19728_v35, %v19833_v25  ;;  %15330 = vmatpush3.bf16.msra.mxu1 %v22550_v58  ;;  %v22553_v35 = vpack.c.bf16 %v19669_v8, %v19689_v46  ;;  %v22556_v8 = vld [vmem:[#allocation68_spill] sm:$0xff]  ;;  %v22557_v46 = vpack.c.bf16 %v19659_v33, %v19679_v29  ;;  %v22560_v33 = vld [vmem:[#allocation71_spill] sm:$0xff]  ;;  %v7499_v36 = vmul.f32 %v19738_v18, %v19833_v25  ;;  %v22573_v18 = vld [vmem:[#allocation121_spill] sm:$0xff] }
0x13a3   : > { %v19840_v56 = vadd.f32 %v14423_v49, %v12544_v17  ;;  %v7438_v51 = vpop.f32.mrb[177].mxu0  ;;  %15304 = vmatpush3.bf16.xpose.msk.msra.mxu0 %vm17042_vm1, %v22551_v16  ;;  %15332 = vmatprep.subr.bf16.mxu1 %v22552_v50  ;;  %v22561_v29 = vld [vmem:[#allocation72_spill] sm:$0xff] }
0x13a4   : > { %v19850_v24 = vadd.f32 %v12544_v17, %v7438_v51  ;;  %14438 = vmatprep.mubr.msk.f32.mxu1 %vm1893_vm0, %v7483_v32  ;;  %15307 = vmatprep.subr.msk.bf16.mxu0 %vm17042_vm1, %v22553_v35  ;;  %v7487_v17 = vmul.f32 %v19618_v9, %v19802_v47  ;;  %v22559_v9 = vpack.c.bf16 %v19725_v7, %v19745_v60  ;;  %v22562_v60 = vld [vmem:[#allocation73_spill] sm:$0xff] }
0x13a5   : > { %14439 = vmatmul.mubr.msk.f32.gmra.mrb[196].mxu1 %vm1893_vm0, %v7484_v3  ;;  %v7486_v12 = vmul.f32 %v16094_v5, %v19840_v56  ;;  %v7488_v5 = vmul.f32 %v19598_v28, %v19798_v48  ;;  %v7490_v28 = vmul.f32 %v19656_v31, %v19812_v45  ;;  %v7491_v7 = vmul.f32 %v19732_v52, %v19833_v25 }
0x13a6   : > { %v7485_v61 = vmul.f32 %v16098_v41, %v19850_v24  ;;  %15334 = vmatpush3.bf16.msra.mxu1 %v22554_v53  ;;  %v22558_v41 = vld [vmem:[#allocation69_spill] sm:$0xff]  ;;  %v7492_v31 = vmul.f32 %v19712_v20, %v19828_v39  ;;  %v7493_v52 = vmul.f32 %v19783_v54, %v19850_v24  ;;  %v7494_v23 = vmul.f32 %v19766_v38, %v19840_v56 }
0x13a7   : > { %15336 = vmatprep.subr.bf16.mxu1 %v22555_v1  ;;  %v7495_v20 = vmul.f32 %v19624_v30, %v19802_v47  ;;  %v7496_v38 = vmul.f32 %v19604_v42, %v19798_v48  ;;  %v7497_v54 = vmul.f32 %v19682_v2, %v19816_v15  ;;  %v16102_v30 = vld [vmem:[%s22235_s1 + $0x8] sm:$0xff]  ;;  %v7500_v42 = vmul.f32 %v19718_v26, %v19828_v39 }
0x13a8   : > { %14441 = vmatprep.mubr.msk.f32.mxu1 %vm1893_vm0, %v7485_v61  ;;  %v7501_v62 = vmul.f32 %v19789_v19, %v19850_v24  ;;  %v7503_v2 = vmul.f32 %v19628_v21, %v19802_v47  ;;  %v7504_v19 = vmul.f32 %v19608_v6, %v19798_v48  ;;  %v22569_v21 = vld [vmem:[#allocation134_spill] sm:$0xff]  ;;  %v22571_v6 = vld [vmem:[#allocation113_spill] sm:$0xff]  ;;  %v22574_v48 = vld [vmem:[#allocation120_spill] sm:$0xff] }
0x13a9   : > { %14442 = vmatmul.mubr.msk.f32.gmra.mrb[198].mxu1 %vm1893_vm0, %v7486_v12  ;;  %v22570_v47 = vld [vmem:[#allocation118_spill] sm:$0xff]  ;;  %v7510_v27 = vmul.f32 %v22574_v48, %v19840_v56 }
0x13aa   : > { %14444 = vmatprep.mubr.msk.f32.mxu1 %vm1893_vm0, %v7487_v17  ;;  %15338 = vmatpush3.bf16.msra.mxu1 %v22556_v8  ;;  %v7507_v26 = vmul.f32 %v22570_v47, %v19833_v25 }
0x13ab   : > { %15310 = vmatpush3.bf16.xpose.msk.msra.mxu0 %vm17042_vm1, %v22557_v46  ;;  %15340 = vmatprep.subr.bf16.mxu1 %v22558_v41 }
0x13ac   : > { %15313 = vmatprep.subr.msk.bf16.mxu0 %vm17042_vm1, %v22559_v9 }
0x13ad   : > { %14445 = vmatmul.mubr.msk.f32.gmra.mrb[200].mxu1 %vm1893_vm0, %v7488_v5 }
0x13ae   : > { %14447 = vmatprep.mubr.msk.f32.mxu1 %vm1893_vm0, %v7489_v57  ;;  %15342 = vmatpush3.bf16.msra.mxu1 %v22560_v33 }
0x13af   : > { %15344 = vmatprep.subr.bf16.mxu1 %v22561_v29 }
0x13b1   : > { %14448 = vmatmul.mubr.msk.f32.gmra.mrb[202].mxu1 %vm1893_vm0, %v7490_v28 }
0x13b2   : > { %14450 = vmatprep.mubr.msk.f32.mxu1 %vm1893_vm0, %v7491_v7  ;;  %15346 = vmatpush3.bf16.msra.mxu1 %v22562_v60 }
0x13b3   : > { %15316 = vmatpush3.bf16.xpose.msk.msra.mxu0 %vm17042_vm1, %v22563_v34  ;;  %15348 = vmatprep.subr.bf16.mxu1 %v22564_v10 }
0x13b4   : > { %15319 = vmatprep.subr.msk.bf16.mxu0 %vm17042_vm1, %v15317_v4  ;;  %v22567_v4 = vld [vmem:[#allocation77_spill] sm:$0xff] }
0x13b5   : > { %14451 = vmatmul.mubr.msk.f32.gmra.mrb[204].mxu1 %vm1893_vm0, %v7492_v31 }
0x13b6   : > { %14453 = vmatprep.mubr.msk.f32.mxu1 %vm1893_vm0, %v7493_v52  ;;  %15350 = vmatpush3.bf16.msra.mxu1 %v22565_v59 }
0x13b7   : > { %15352 = vmatprep.subr.bf16.mxu1 %v22566_v14 }
0x13b9   : > { %14454 = vmatmul.mubr.msk.f32.gmra.mrb[206].mxu1 %vm1893_vm0, %v7494_v23 }
0x13ba   : > { %14456 = vmatprep.mubr.msk.f32.mxu1 %vm1893_vm0, %v7495_v20  ;;  %15354 = vmatpush3.bf16.msra.mxu1 %v22567_v4 }
0x13bb   : > { %15322 = vmatpush3.bf16.xpose.msk.msra.mxu0 %vm17042_vm1, %v15320_v37  ;;  %v7509_v37 = vmul.f32 %v19793_v22, %v19850_v24  ;;  %v22576_v22 = vmov 0.0  }
0x13bc   : > { %8274 = vmatprep.subr.mxu0 %v16102_v30 }
0x13bd   : > { %14457 = vmatmul.mubr.msk.f32.gmra.mrb[208].mxu1 %vm1893_vm0, %v7496_v38 }
0x13be   : > { %14459 = vmatprep.mubr.msk.f32.mxu1 %vm1893_vm0, %v7497_v54 }
0x13c1   : > { %14460 = vmatmul.mubr.msk.f32.gmra.mrb[210].mxu1 %vm1893_vm0, %v7498_v13 }
0x13c2   : > { %14462 = vmatprep.mubr.msk.f32.mxu1 %vm1893_vm0, %v7499_v36  ;;  %13462 = vmatmul.mubr.msk.f32.vlgmr.msra.gmra.mrb[178].mxu0 %vm1893_vm0, %v19590_v44  ;;  %v7502_v44 = vmul.f32 %v19772_v63, %v19840_v56  ;;  %v22568_v63 = vld [vmem:[#allocation112_spill] sm:$0xff] }
0x13c3   : > { %13463 = vmatprep.mubr.msk.f32.mxu0 %vm1893_vm0, %v19586_v55  ;;  %8275 = vmatpush1.msra.mxu0 %v16103_v11 }
0x13c5   : > { %14463 = vmatmul.mubr.msk.f32.gmra.mrb[212].mxu1 %vm1893_vm0, %v7500_v42 }
0x13c6   : > { %14465 = vmatprep.mubr.msk.f32.mxu1 %vm1893_vm0, %v7501_v62  ;;  %13464 = vmatmul.mubr.msk.f32.gmra.mrb[180].mxu0 %vm1893_vm0, %v19586_v55  ;;  %v7505_v55 = vmul.f32 %v19686_v40, %v19816_v15 }
0x13c7   : > { %13465 = vmatprep.mubr.msk.f32.mxu0 %vm1893_vm0, %v19648_v0 }
0x13c9   : > { %14466 = vmatmul.mubr.msk.f32.gmra.mrb[214].mxu1 %vm1893_vm0, %v7502_v44 }
0x13ca   : > { %14468 = vmatprep.mubr.msk.f32.mxu1 %vm1893_vm0, %v7503_v2  ;;  %13466 = vmatmul.mubr.msk.f32.gmra.mrb[182].mxu0 %vm1893_vm0, %v19648_v0  ;;  %v7506_v0 = vmul.f32 %v22569_v21, %v19812_v45  ;;  %v22575_v45 = vld [vmem:[#allocation136_spill] sm:$0xff] }
0x13cb   : > { %13467 = vmatprep.mubr.msk.f32.mxu0 %vm1893_vm0, %v19642_v43 }
0x13cd   : > { %14469 = vmatmul.mubr.msk.f32.gmra.mrb[216].mxu1 %vm1893_vm0, %v7504_v19 }
0x13ce   : > { %14471 = vmatprep.mubr.msk.f32.mxu1 %vm1893_vm0, %v7505_v55  ;;  %13468 = vmatmul.mubr.msk.f32.gmra.mrb[184].mxu0 %vm1893_vm0, %v19642_v43  ;;  %v22572_v43 = vld [vmem:[#allocation119_spill] sm:$0xff] }
0x13cf   : > { %13469 = vmatprep.mubr.msk.f32.mxu0 %vm1893_vm0, %v22568_v63  ;;  %v7508_v40 = vmul.f32 %v22572_v43, %v19828_v39 }
0x13d1   : > { %14472 = vmatmul.mubr.msk.f32.gmra.mrb[218].mxu1 %vm1893_vm0, %v7506_v0 }
0x13d2   : > { %14474 = vmatprep.mubr.msk.f32.mxu1 %vm1893_vm0, %v7507_v26  ;;  %13470 = vmatmul.mubr.msk.f32.gmra.mrb[186].mxu0 %vm1893_vm0, %v22568_v63 }
0x13d3   : > { %13471 = vmatprep.mubr.msk.f32.mxu0 %vm1893_vm0, %v22571_v6 }
0x13d5   : > { %14475 = vmatmul.mubr.msk.f32.gmra.mrb[220].mxu1 %vm1893_vm0, %v7508_v40 }
0x13d6   : > { %14477 = vmatprep.mubr.msk.f32.mxu1 %vm1893_vm0, %v7509_v37  ;;  %13472 = vmatmul.mubr.msk.f32.gmra.mrb[188].mxu0 %vm1893_vm0, %v22571_v6 }
0x13d7   : > { %13473 = vmatprep.mubr.msk.f32.mxu0 %vm1893_vm0, %v22573_v18 }
0x13d9   : > { %14478 = vmatmul.mubr.msk.f32.gmra.mrb[222].mxu1 %vm1893_vm0, %v7510_v27 }
0x13da   : > { %13474 = vmatmul.mubr.msk.f32.gmra.mrb[190].mxu0 %vm1893_vm0, %v22573_v18 }
0x13db   : > { %13475 = vmatprep.mubr.msk.f32.mxu0 %vm1893_vm0, %v22575_v45 }
0x13de   : > { %13476 = vmatmul.mubr.msk.f32.gmra.mrb[192].mxu0 %vm1893_vm0, %v22575_v45 }
0x13df   : > { %8338 = vmatprep.mubr.f32.mxu0 %v22576_v22 }
0x1470   : > { %v20001_v15 = vpop.f32.mrb[192].mxu1 }
0x1471   : > { %v20003_v39 = vpop.f32.mrb[193].mxu1 }
0x1472   : > { %v15357_v25 = vpack.c.bf16 %v20001_v15, %v20003_v39 }
0x1474   : > { %v20007_v49 = vpop.f32.mrb[194].mxu1 }
0x1475   : > { %v20009_v32 = vpop.f32.mrb[195].mxu1 }
0x1478   : > { %v20013_v56 = vpop.f32.mrb[196].mxu1 }
0x1479   : > { %v20015_v51 = vpop.f32.mrb[197].mxu1 }
0x147c   : > { %v20019_v3 = vpop.f32.mrb[198].mxu1 }
0x147d   : > { %v20021_v50 = vpop.f32.mrb[199].mxu1 }
0x1480   : > { %v20025_v35 = vpop.f32.mrb[200].mxu1 }
0x1481   : > { %v20027_v61 = vpop.f32.mrb[201].mxu1 }
0x1484   : > { %v20031_v12 = vpop.f32.mrb[202].mxu1 }
0x1485   : > { %v20033_v1 = vpop.f32.mrb[203].mxu1 }
0x1488   : > { %v20037_v8 = vpop.f32.mrb[204].mxu1 }
0x1489   : > { %v20039_v46 = vpop.f32.mrb[205].mxu1 }
0x148c   : > { %v20043_v41 = vpop.f32.mrb[206].mxu1 }
0x148d   : > { %v20045_v9 = vpop.f32.mrb[207].mxu1 }
0x1490   : > { %v14458_v33 = vpop.f32.mrb[208].mxu1 }
0x1491   : > { %v7753_v28 = vpop.f32.mrb[209].mxu1 }
0x1492   : > { %v15355_v29 = vpack.c.bf16 %v14458_v33, %v7753_v28 }
0x1494   : > { %v20049_v7 = vpop.f32.mrb[210].mxu1  ;;  %15356 = vmatprep.subr.bf16.mxu1 %v15355_v29 }
0x1495   : > { %v20051_v60 = vpop.f32.mrb[211].mxu1  ;;  %v8018_v34 = vpop.f32.mrb[178].mxu0 }
0x1496   : > { %v8020_v10 = vpop.f32.mrb[179].mxu0 }
0x1497   : > { %v8065_v52 = vmax.f32 %v8018_v34, %v8020_v10 }
0x1498   : > { %v20055_v59 = vpop.f32.mrb[212].mxu1 }
0x1499   : > { %8066 = vmax.xlane.f32.xlu0 %v8065_v52  ;;  %v20057_v23 = vpop.f32.mrb[213].mxu1  ;;  %v8024_v14 = vpop.f32.mrb[180].mxu0 }
0x149a   : > { %v8026_v4 = vpop.f32.mrb[181].mxu0 }
0x149b   : > { %v8068_v38 = vmax.f32 %v8024_v14, %v8026_v4 }
0x149c   : > { %v20061_v54 = vpop.f32.mrb[214].mxu1 }
0x149d   : > { %8069 = vmax.xlane.f32.xlu1 %v8068_v38  ;;  %v20063_v30 = vpop.f32.mrb[215].mxu1  ;;  %v8030_v13 = vpop.f32.mrb[182].mxu0 }
0x149e   : > { %v8032_v42 = vpop.f32.mrb[183].mxu0 }
0x149f   : > { %v8071_v11 = vmax.f32 %v8030_v13, %v8032_v42 }
0x14a0   : > { %v20067_v62 = vpop.f32.mrb[216].mxu1 }
0x14a1   : > { %8072 = vmax.xlane.f32.xlu0 %v8071_v11  ;;  %v20069_v44 = vpop.f32.mrb[217].mxu1  ;;  %v8036_v2 = vpop.f32.mrb[184].mxu0 }
0x14a2   : > { %v8038_v55 = vpop.f32.mrb[185].mxu0 }
0x14a3   : > { %v8074_v63 = vmax.f32 %v8036_v2, %v8038_v55 }
0x14a4   : > { %v20073_v21 = vpop.f32.mrb[218].mxu1 }
0x14a5   : > { %8075 = vmax.xlane.f32.xlu1 %v8074_v63  ;;  %v20075_v0 = vpop.f32.mrb[219].mxu1  ;;  %v8042_v47 = vpop.f32.mrb[186].mxu0 }
0x14a6   : > { %v8044_v6 = vpop.f32.mrb[187].mxu0 }
0x14a7   : > { %v8077_v43 = vmax.f32 %v8042_v47, %v8044_v6 }
0x14a8   : > { %v20079_v40 = vpop.f32.mrb[220].mxu1 }
0x14a9   : > { %8078 = vmax.xlane.f32.xlu0 %v8077_v43  ;;  %v20081_v37 = vpop.f32.mrb[221].mxu1  ;;  %v20083_v18 = vpop.f32.mrb[188].mxu0 }
0x14aa   : > { %v20087_v27 = vpop.f32.mrb[189].mxu0 }
0x14ab   : > { %v8080_v45 = vmax.f32 %v20083_v18, %v20087_v27 }
0x14ac   : > { %v20091_v33 = vpop.f32.mrb[222].mxu1 }
0x14ad   : > { %8081 = vmax.xlane.f32.xlu1 %v8080_v45  ;;  %v20093_v28 = vpop.f32.mrb[223].mxu1  ;;  %v20095_v29 = vpop.f32.mrb[190].mxu0 }
0x14ae   : > { %v20099_v38 = vpop.f32.mrb[191].mxu0 }
0x14af   : > { %v8083_v11 = vmax.f32 %v20095_v29, %v20099_v38 }
0x14b1   : > { %8084 = vmax.xlane.f32.xlu0 %v8083_v11  ;;  %v20103_v63 = vpop.f32.mrb[192].mxu0 }
0x14b2   : > { %v20105_v43 = vpop.f32.mrb[193].mxu0 }
0x14b3   : > { %v8086_v45 = vmax.f32 %v20103_v63, %v20105_v43 }
0x14b5   : > { %8087 = vmax.xlane.f32.xlu1 %v8086_v45 }
0x1526   : > { %v8067_v57 = vpop.xlane.xlu0 %8066 }
0x1527   : > { %v8089_v5 = vsub.f32 %v8018_v34, %v8067_v57  ;;  %v8090_v48 = vsub.f32 %v8020_v10, %v8067_v57 }
0x1529   : > { %v8105_v17 = vmul.f32 1.442695, %v8089_v5  ;;  %v8107_v26 = vmul.f32 1.442695, %v8090_v48 }
0x152a   : > { %v8070_v52 = vpop.xlane.xlu1 %8069 }
0x152b   : > { %15918 = vpow2.f32 %v8105_v17  ;;  %v8091_v53 = vsub.f32 %v8024_v14, %v8070_v52  ;;  %v8092_v19 = vsub.f32 %v8026_v4, %v8070_v52 }
0x152c   : > { %15920 = vpow2.f32 %v8107_v26 }
0x152d   : > { %v8109_v24 = vmul.f32 1.442695, %v8091_v53  ;;  %v8111_v11 = vmul.f32 1.442695, %v8092_v19 }
0x152e   : > { %v8073_v36 = vpop.xlane.xlu0 %8072 }
0x152f   : > { %15922 = vpow2.f32 %v8109_v24  ;;  %v8093_v16 = vsub.f32 %v8030_v13, %v8073_v36  ;;  %v8094_v20 = vsub.f32 %v8032_v42, %v8073_v36  ;;  %v22577_v13 = vpack.c.bf16 %v20049_v7, %v20051_v60 }
0x1530   : > { %15924 = vpow2.f32 %v8111_v11  ;;  %v22579_v60 = vpack.c.bf16 %v20055_v59, %v20057_v23  ;;  %v22581_v23 = vpack.c.bf16 %v20061_v54, %v20063_v30  ;;  %v22583_v30 = vpack.c.bf16 %v20067_v62, %v20069_v44 }
0x1531   : > { %v8113_v58 = vmul.f32 1.442695, %v8093_v16  ;;  %v8115_v31 = vmul.f32 1.442695, %v8094_v20  ;;  %v22586_v44 = vpack.c.bf16 %v20031_v12, %v20033_v1  ;;  %v22589_v12 = vpack.c.bf16 %v20091_v33, %v20093_v28 }
0x1532   : > { %v8076_v45 = vpop.xlane.xlu1 %8075  ;;  %v22590_v1 = vpack.c.bf16 %v20043_v41, %v20045_v9 }
0x1533   : > { %15926 = vpow2.f32 %v8113_v58  ;;  %v8095_v34 = vsub.f32 %v8036_v2, %v8076_v45  ;;  %v8096_v57 = vsub.f32 %v8038_v55, %v8076_v45 }
0x1534   : > { %15928 = vpow2.f32 %v8115_v31 }
0x1535   : > { %v20109_v5 = vpop.eup %15918  ;;  %v8117_v17 = vmul.f32 1.442695, %v8095_v34  ;;  %v8119_v10 = vmul.f32 1.442695, %v8096_v57 }
0x1536   : > { %v20111_v14 = vpop.eup %15920  ;;  %v8079_v53 = vpop.xlane.xlu0 %8078 }
0x1537   : > { %15930 = vpow2.f32 %v8117_v17  ;;  %v8097_v4 = vsub.f32 %v8042_v47, %v8079_v53  ;;  %v8098_v24 = vsub.f32 %v8044_v6, %v8079_v53  ;;  %8201 = vmatprep.mubr.f32.mxu1 %v20111_v14 }
0x1538   : > { %15932 = vpow2.f32 %v8119_v10  ;;  %8202 = vmatmul.mubr.f32.vlgmr.msra.gmra.mrb[224].mxu1 %v20109_v5 }
0x1539   : > { %v20115_v16 = vpop.eup %15922  ;;  %v8121_v58 = vmul.f32 1.442695, %v8097_v4  ;;  %v8123_v20 = vmul.f32 1.442695, %v8098_v24  ;;  %15358 = vmatpush3.bf16.msra.mxu1 %v15357_v25  ;;  %v22578_v25 = vpack.c.bf16 %v20007_v49, %v20009_v32 }
0x153a   : > { %v20120_v31 = vpop.eup %15924  ;;  %15360 = vmatprep.subr.bf16.mxu1 %v22577_v13  ;;  %v8082_v36 = vpop.xlane.xlu1 %8081 }
0x153b   : > { %15934 = vpow2.f32 %v8121_v58  ;;  %v8099_v42 = vsub.f32 %v20083_v18, %v8082_v36  ;;  %v8100_v2 = vsub.f32 %v20087_v27, %v8082_v36  ;;  %8206 = vmatprep.mubr.f32.mxu1 %v20120_v31  ;;  %v22580_v18 = vpack.c.bf16 %v20013_v56, %v20015_v51 }
0x153c   : > { %15936 = vpow2.f32 %v8123_v20  ;;  %8207 = vmatmul.mubr.f32.gmra.mrb[226].mxu1 %v20115_v16 }
0x153d   : > { %v20129_v19 = vpop.eup %15926  ;;  %v8125_v15 = vmul.f32 1.442695, %v8099_v42  ;;  %v8127_v39 = vmul.f32 1.442695, %v8100_v2  ;;  %15362 = vmatpush3.bf16.msra.mxu1 %v22578_v25 }
0x153e   : > { %v20134_v7 = vpop.eup %15928  ;;  %15364 = vmatprep.subr.bf16.mxu1 %v22579_v60  ;;  %v8085_v55 = vpop.xlane.xlu0 %8084 }
0x153f   : > { %15938 = vpow2.f32 %v8125_v15  ;;  %8211 = vmatprep.mubr.f32.mxu1 %v20134_v7  ;;  %v8101_v47 = vsub.f32 %v20095_v29, %v8085_v55  ;;  %v8102_v26 = vsub.f32 %v20099_v38, %v8085_v55  ;;  %v22582_v38 = vpack.c.bf16 %v20019_v3, %v20021_v50 }
0x1540   : > { %15940 = vpow2.f32 %v8127_v39  ;;  %8212 = vmatmul.mubr.f32.gmra.mrb[228].mxu1 %v20129_v19  ;;  %v22585_v50 = vpack.c.bf16 %v20073_v21, %v20075_v0  ;;  %v22588_v21 = vpack.c.bf16 %v20037_v8, %v20039_v46 }
0x1541   : > { %v20143_v6 = vpop.eup %15930  ;;  %v8129_v49 = vmul.f32 1.442695, %v8101_v47  ;;  %v8131_v32 = vmul.f32 1.442695, %v8102_v26  ;;  %15366 = vmatpush3.bf16.msra.mxu1 %v22580_v18 }
0x1542   : > { %v20148_v59 = vpop.eup %15932  ;;  %15368 = vmatprep.subr.bf16.mxu1 %v22581_v23  ;;  %v8088_v48 = vpop.xlane.xlu1 %8087  ;;  %v16104_v23 = vld [vmem:[%s17933_s6] sm:$0xff] }
0x1543   : > { %15942 = vpow2.f32 %v8129_v49  ;;  %8216 = vmatprep.mubr.f32.mxu1 %v20148_v59  ;;  %v8103_v27 = vsub.f32 %v20103_v63, %v8088_v48  ;;  %v8104_v29 = vsub.f32 %v20105_v43, %v8088_v48  ;;  %v22584_v43 = vpack.c.bf16 %v20025_v35, %v20027_v61 }
0x1544   : > { %15944 = vpow2.f32 %v8131_v32  ;;  %8217 = vmatmul.mubr.f32.gmra.mrb[230].mxu1 %v20143_v6  ;;  %v22587_v35 = vpack.c.bf16 %v20079_v40, %v20081_v37 }
0x1545   : > { %v20157_v52 = vpop.eup %15934  ;;  %v8133_v56 = vmul.f32 1.442695, %v8103_v27  ;;  %v8135_v51 = vmul.f32 1.442695, %v8104_v29  ;;  %15370 = vmatpush3.bf16.msra.mxu1 %v22582_v38 }
0x1546   : > { %v20162_v54 = vpop.eup %15936  ;;  %15372 = vmatprep.subr.bf16.mxu1 %v22583_v30 }
0x1547   : > { %15946 = vpow2.f32 %v8133_v56  ;;  %8221 = vmatprep.mubr.f32.mxu1 %v20162_v54 }
0x1548   : > { %15948 = vpow2.f32 %v8135_v51  ;;  %8222 = vmatmul.mubr.f32.gmra.mrb[232].mxu1 %v20157_v52 }
0x1549   : > { %v20169_v63 = vpop.eup %15938  ;;  %15374 = vmatpush3.bf16.msra.mxu1 %v22584_v43 }
0x154a   : > { %v20174_v3 = vpop.eup %15940  ;;  %15376 = vmatprep.subr.bf16.mxu1 %v22585_v50 }
0x154b   : > { %8226 = vmatprep.mubr.f32.mxu1 %v20174_v3 }
0x154c   : > { %8227 = vmatmul.mubr.f32.gmra.mrb[234].mxu1 %v20169_v63 }
0x154d   : > { %v20181_v62 = vpop.eup %15942  ;;  %15378 = vmatpush3.bf16.msra.mxu1 %v22586_v44 }
0x154e   : > { %v20186_v11 = vpop.eup %15944  ;;  %15380 = vmatprep.subr.bf16.mxu1 %v22587_v35 }
0x154f   : > { %8231 = vmatprep.mubr.f32.mxu1 %v20186_v11 }
0x1550   : > { %8232 = vmatmul.mubr.f32.gmra.mrb[236].mxu1 %v20181_v62 }
0x1551   : > { %v20193_v61 = vpop.eup %15946  ;;  %15382 = vmatpush3.bf16.msra.mxu1 %v22588_v21 }
0x1552   : > { %v20198_v0 = vpop.eup %15948  ;;  %15384 = vmatprep.subr.bf16.mxu1 %v22589_v12 }
0x1553   : > { %8236 = vmatprep.mubr.f32.mxu1 %v20198_v0 }
0x1554   : > { %8237 = vmatmul.mubr.f32.gmra.mrb[238].mxu1 %v20193_v61 }
0x1555   : > { %15386 = vmatpush3.bf16.msra.mxu1 %v22590_v1 }
0x160b   : > { %v13509_v40 = vpop.f32.mrb[224].mxu1 }
0x160c   : > { %v13510_v37 = vpop.f32.mrb[225].mxu1 }
0x160d   : > { %v13511_v45 = vadd.f32 %v13510_v37, %v13509_v40 }
0x160f   : > { %15950 = vrcp.f32 %v13511_v45  ;;  %v13512_v8 = vpop.f32.mrb[226].mxu1 }
0x1610   : > { %v13513_v46 = vpop.f32.mrb[227].mxu1 }
0x1611   : > { %v13514_v34 = vadd.f32 %v13513_v46, %v13512_v8 }
0x1613   : > { %15952 = vrcp.f32 %v13514_v34  ;;  %v13515_v57 = vpop.f32.mrb[228].mxu1 }
0x1614   : > { %v13516_v17 = vpop.f32.mrb[229].mxu1 }
0x1615   : > { %v13517_v33 = vadd.f32 %v13516_v17, %v13515_v57 }
0x1617   : > { %15954 = vrcp.f32 %v13517_v33  ;;  %v13518_v28 = vpop.f32.mrb[230].mxu1 }
0x1618   : > { %v13519_v10 = vpop.f32.mrb[231].mxu1 }
0x1619   : > { %v15951_v53 = vpop.eup %15950  ;;  %v13520_v4 = vadd.f32 %v13519_v10, %v13518_v28 }
0x161a   : > { %12625 = vmatmul.mubr.msk.f32.vlgmr.msra.gmra.mrb[194].mxu0 %vm3106_vm2, %v15951_v53 }
0x161b   : > { %15956 = vrcp.f32 %v13520_v4  ;;  %v13521_v41 = vpop.f32.mrb[232].mxu1  ;;  %8344 = vmatprep.mubr.f32.mxu0 %v22576_v22 }
0x161c   : > { %v13522_v9 = vpop.f32.mrb[233].mxu1 }
0x161d   : > { %v15953_v24 = vpop.eup %15952  ;;  %v13523_v58 = vadd.f32 %v13522_v9, %v13521_v41  ;;  %v22591_v41 = vld [vmem:[#allocation131_spill] sm:$0xff] }
0x161e   : > { %12626 = vmatmul.mubr.msk.f32.gmra.mrb[196].mxu0 %vm3106_vm2, %v15953_v24 }
0x161f   : > { %15958 = vrcp.f32 %v13523_v58  ;;  %v13524_v20 = vpop.f32.mrb[234].mxu1  ;;  %8350 = vmatprep.mubr.f32.mxu0 %v22576_v22 }
0x1620   : > { %v13525_v13 = vpop.f32.mrb[235].mxu1 }
0x1621   : > { %v15955_v36 = vpop.eup %15954  ;;  %v13526_v42 = vadd.f32 %v13525_v13, %v13524_v20  ;;  %v22592_v20 = vld [vmem:[#allocation191_spill] sm:$0xff] }
0x1622   : > { %12627 = vmatmul.mubr.msk.f32.gmra.mrb[198].mxu0 %vm3106_vm2, %v15955_v36 }
0x1623   : > { %15960 = vrcp.f32 %v13526_v42  ;;  %v13527_v2 = vpop.f32.mrb[236].mxu1  ;;  %8356 = vmatprep.mubr.f32.mxu0 %v22576_v22 }
0x1624   : > { %v13528_v15 = vpop.f32.mrb[237].mxu1 }
0x1625   : > { %v15957_v39 = vpop.eup %15956  ;;  %v13529_v25 = vadd.f32 %v13528_v15, %v13527_v2 }
0x1626   : > { %12628 = vmatmul.mubr.msk.f32.gmra.mrb[200].mxu0 %vm3106_vm2, %v15957_v39 }
0x1627   : > { %15962 = vrcp.f32 %v13529_v25  ;;  %v13530_v60 = vpop.f32.mrb[238].mxu1  ;;  %8362 = vmatprep.mubr.f32.mxu0 %v22576_v22  ;;  %v22593_v25 = vld [vmem:[#allocation133_spill] sm:$0xff] }
0x1628   : > { %v13531_v55 = vpop.f32.mrb[239].mxu1 }
0x1629   : > { %v15959_v47 = vpop.eup %15958  ;;  %v13532_v26 = vadd.f32 %v13531_v55, %v13530_v60 }
0x162a   : > { %12629 = vmatmul.mubr.msk.f32.gmra.mrb[202].mxu0 %vm3106_vm2, %v15959_v47 }
0x162b   : > { %15964 = vrcp.f32 %v13532_v26  ;;  %8368 = vmatprep.mubr.f32.mxu0 %v22576_v22 }
0x162d   : > { %v15961_v49 = vpop.eup %15960 }
0x162e   : > { %12630 = vmatmul.mubr.msk.f32.gmra.mrb[204].mxu0 %vm3106_vm2, %v15961_v49 }
0x162f   : > { %8374 = vmatprep.mubr.f32.mxu0 %v22576_v22 }
0x1631   : > { %v15963_v32 = vpop.eup %15962 }
0x1632   : > { %12631 = vmatmul.mubr.msk.f32.gmra.mrb[206].mxu0 %vm3106_vm2, %v15963_v32 }
0x1633   : > { %8380 = vmatprep.mubr.f32.mxu0 %v22576_v22 }
0x1635   : > { %v15965_v18 = vpop.eup %15964 }
0x1636   : > { %12632 = vmatmul.mubr.msk.f32.gmra.mrb[208].mxu0 %vm3106_vm2, %v15965_v18  ;;  %v22594_v18 = vld [vmem:[#allocation132_spill] sm:$0xff] }
0x1637   : > { %14488 = vmatprep.mubr.msk.f32.mxu0 %vm1893_vm0, %v16104_v23 }
0x16ed   : > { %v8340_v48 = vpop.f32.mrb[194].mxu0 }
0x16ee   : > { %v8342_v27 = vpop.f32.mrb[195].mxu0  ;;  %v8387_v56 = vmul.f32 %v20109_v5, %v8340_v48 }
0x16ef   : > { %v8388_v29 = vmul.f32 %v20111_v14, %v8342_v27 }
0x16f1   : > { %v8346_v51 = vpop.f32.mrb[196].mxu0  ;;  %8473 = vmatprep.mubr.f32.mxu1 %v8388_v29 }
0x16f2   : > { %v8348_v38 = vpop.f32.mrb[197].mxu0  ;;  %8474 = vmatmul.mubr.f32.vlgmr.msra.gmra.mrb[240].mxu1 %v8387_v56  ;;  %v8389_v43 = vmul.f32 %v20115_v16, %v8346_v51 }
0x16f3   : > { %v8390_v30 = vmul.f32 %v20120_v31, %v8348_v38  ;;  %v22595_v38 = vld [vmem:[#allocation100_spill] sm:$0xff] }
0x16f5   : > { %v8352_v50 = vpop.f32.mrb[198].mxu0  ;;  %8478 = vmatprep.mubr.f32.mxu1 %v8390_v30 }
0x16f6   : > { %v8354_v44 = vpop.f32.mrb[199].mxu0  ;;  %8479 = vmatmul.mubr.f32.gmra.mrb[242].mxu1 %v8389_v43  ;;  %v8391_v21 = vmul.f32 %v20129_v19, %v8352_v50 }
0x16f7   : > { %v8392_v35 = vmul.f32 %v20134_v7, %v8354_v44 }
0x16f9   : > { %v8358_v12 = vpop.f32.mrb[200].mxu0  ;;  %8483 = vmatprep.mubr.f32.mxu1 %v8392_v35 }
0x16fa   : > { %v8360_v14 = vpop.f32.mrb[201].mxu0  ;;  %8484 = vmatmul.mubr.f32.gmra.mrb[244].mxu1 %v8391_v21  ;;  %v8393_v1 = vmul.f32 %v20143_v6, %v8358_v12  ;;  %v22596_v12 = vld [vmem:[#allocation101_spill] sm:$0xff] }
0x16fb   : > { %v8394_v5 = vmul.f32 %v20148_v59, %v8360_v14 }
0x16fd   : > { %v8364_v40 = vpop.f32.mrb[202].mxu0  ;;  %8488 = vmatprep.mubr.f32.mxu1 %v8394_v5 }
0x16fe   : > { %v8366_v31 = vpop.f32.mrb[203].mxu0  ;;  %8489 = vmatmul.mubr.f32.gmra.mrb[246].mxu1 %v8393_v1  ;;  %v8395_v37 = vmul.f32 %v20157_v52, %v8364_v40 }
0x16ff   : > { %v8396_v16 = vmul.f32 %v20162_v54, %v8366_v31 }
0x1701   : > { %v8370_v45 = vpop.f32.mrb[204].mxu0  ;;  %8493 = vmatprep.mubr.f32.mxu1 %v8396_v16 }
0x1702   : > { %v8372_v7 = vpop.f32.mrb[205].mxu0  ;;  %8494 = vmatmul.mubr.f32.gmra.mrb[248].mxu1 %v8395_v37  ;;  %v8397_v8 = vmul.f32 %v20169_v63, %v8370_v45  ;;  %v22597_v37 = vld [vmem:[#allocation110_spill] sm:$0xff] }
0x1703   : > { %v8398_v19 = vmul.f32 %v20174_v3, %v8372_v7  ;;  %v12633_v3 = vld [vmem:[%s22252_s7 + $0x1] ss:$0 sm:$0xff] }
0x1705   : > { %v8376_v59 = vpop.f32.mrb[206].mxu0  ;;  %8498 = vmatprep.mubr.f32.mxu1 %v8398_v19 }
0x1706   : > { %v8378_v6 = vpop.f32.mrb[207].mxu0  ;;  %8499 = vmatmul.mubr.f32.gmra.mrb[250].mxu1 %v8397_v8  ;;  %v8399_v34 = vmul.f32 %v20181_v62, %v8376_v59  ;;  %v22598_v8 = vld [vmem:[#allocation111_spill] sm:$0xff] }
0x1707   : > { %v8400_v46 = vmul.f32 %v20186_v11, %v8378_v6 }
0x1709   : > { %v8382_v54 = vpop.f32.mrb[208].mxu0  ;;  %8503 = vmatprep.mubr.f32.mxu1 %v8400_v46  ;;  %v12494_v46 = vld [vmem:[%s22267_s10 + $0x20] sm:$0xff] }
0x170a   : > { %v8384_v52 = vpop.f32.mrb[209].mxu0  ;;  %8504 = vmatmul.mubr.f32.gmra.mrb[252].mxu1 %v8399_v34  ;;  %v8401_v17 = vmul.f32 %v20193_v61, %v8382_v54  ;;  %v12495_v34 = vld [vmem:[%s22267_s10 + $0x28] sm:$0xff]  ;;  %v12496_v54 = vld [vmem:[%s22267_s10 + $0x30] sm:$0xff] }
0x170b   : > { %v8402_v57 = vmul.f32 %v20198_v0, %v8384_v52  ;;  %v15387_v52 = vpack.c.bf16 %v12495_v34, %v12494_v46  ;;  %v12501_v46 = vld [vmem:[%s22253_s2 + $0x30] sm:$0xff] }
0x170d   : > { %8508 = vmatprep.mubr.f32.mxu1 %v8402_v57  ;;  %v12497_v57 = vld [vmem:[%s22267_s10 + $0x38] sm:$0xff]  ;;  %15388 = vmatprep.subr.bf16.mxu0 %v15387_v52 }
0x170e   : > { %8509 = vmatmul.mubr.f32.gmra.mrb[254].mxu1 %v8401_v17  ;;  %v15391_v17 = vpack.c.bf16 %v12497_v57, %v12496_v54  ;;  %15390 = vmatpush3.bf16.msra.mxu0 %v15387_v52  ;;  %v12502_v54 = vld [vmem:[%s22253_s2 + $0x38] sm:$0xff]  ;;  %v22599_v57 = vld [vmem:[#allocation81_spill] sm:$0xff] }
0x170f   : > { %v15399_v52 = vpack.c.bf16 %v12502_v54, %v12501_v46  ;;  %v16115_v46 = vld [vmem:[%s16917_s18 + $0x8] sm:$0xff] }
0x1710   : > { %15392 = vmatprep.subr.bf16.mxu0 %v15391_v17 }
0x1712   : > { %15394 = vmatpush3.bf16.msra.mxu0 %v15391_v17 }
0x17c5   : > { %v13565_v63 = vpop.f32.mrb[240].mxu1 }
0x17c6   : > { %v13566_v33 = vpop.f32.mrb[241].mxu1 }
0x17c7   : > { %v13567_v28 = vadd.f32 %v13566_v33, %v13565_v63  ;;  %v16105_v63 = vld [vmem:[%s17933_s6 + $0x8] sm:$0xff]  ;;  %v16107_v33 = vld [vmem:[%s17933_s6 + $0x18] sm:$0xff] }
0x17c8   : > { %14489 = vmatmul.mubr.msk.f32.vlgmr.msra.gmra.mrb[210].mxu0 %vm1893_vm0, %v16105_v63 }
0x17c9   : > { %v8476_v10 = vadd.f32 %v13567_v28, %v12633_v3  ;;  %v13568_v53 = vpop.f32.mrb[242].mxu1  ;;  %v16108_v28 = vld [vmem:[%s17933_s6 + $0x20] sm:$0xff] }
0x17ca   : > { %v13569_v4 = vpop.f32.mrb[243].mxu1 }
0x17cb   : > { %v13570_v11 = vadd.f32 %v13569_v4, %v13568_v53  ;;  %v20243_v62 = vadd.f32 %v8476_v10, %v22591_v41  ;;  %v16109_v10 = vld [vmem:[%s17933_s6 + $0x28] sm:$0xff]  ;;  %v16110_v53 = vld [vmem:[%s17933_s6 + $0x30] sm:$0xff]  ;;  %v16111_v4 = vld [vmem:[%s17933_s6 + $0x38] sm:$0xff] }
0x17cc   : > { %v16113_v41 = vld [vmem:[%s17933_s6 + $0x48] sm:$0xff] }
0x17cd   : > { %v8481_v9 = vadd.f32 %v13570_v11, %v12633_v3  ;;  %v13571_v24 = vpop.f32.mrb[244].mxu1  ;;  %v8522_v0 = vsel %vm1893_vm0, %v20243_v62, 0.0  ;;  %v16112_v11 = vld [vmem:[%s17933_s6 + $0x40] sm:$0xff] }
0x17ce   : > { %v13572_v58 = vpop.f32.mrb[245].mxu1  ;;  %8523 = vadd.xlane.f32.xlu0 %v8522_v0 }
0x17cf   : > { %v13573_v61 = vadd.f32 %v13572_v58, %v13571_v24  ;;  %v20248_v13 = vadd.f32 %v8481_v9, %v22592_v20 }
0x17d1   : > { %v8486_v36 = vadd.f32 %v13573_v61, %v12633_v3  ;;  %v13574_v42 = vpop.f32.mrb[246].mxu1  ;;  %v8525_v2 = vsel %vm1893_vm0, %v20248_v13, 0.0 }
0x17d2   : > { %v13575_v15 = vpop.f32.mrb[247].mxu1  ;;  %8526 = vadd.xlane.f32.xlu1 %v8525_v2 }
0x17d3   : > { %v13576_v39 = vadd.f32 %v13575_v15, %v13574_v42  ;;  %v20253_v60 = vadd.f32 %v8486_v36, %v22593_v25 }
0x17d5   : > { %v8491_v55 = vadd.f32 %v13576_v39, %v12633_v3  ;;  %v13577_v47 = vpop.f32.mrb[248].mxu1  ;;  %v8528_v26 = vsel %vm1893_vm0, %v20253_v60, 0.0 }
0x17d6   : > { %v13578_v49 = vpop.f32.mrb[249].mxu1  ;;  %8529 = vadd.xlane.f32.xlu0 %v8528_v26 }
0x17d7   : > { %v13579_v32 = vadd.f32 %v13578_v49, %v13577_v47  ;;  %v20258_v23 = vadd.f32 %v8491_v55, %v22594_v18 }
0x17d9   : > { %v8496_v48 = vadd.f32 %v13579_v32, %v12633_v3  ;;  %v13580_v27 = vpop.f32.mrb[250].mxu1  ;;  %v8531_v29 = vsel %vm1893_vm0, %v20258_v23, 0.0 }
0x17da   : > { %v13581_v56 = vpop.f32.mrb[251].mxu1  ;;  %8532 = vadd.xlane.f32.xlu1 %v8531_v29 }
0x17db   : > { %v13582_v51 = vadd.f32 %v13581_v56, %v13580_v27  ;;  %v20263_v30 = vadd.f32 %v8496_v48, %v22595_v38 }
0x17dd   : > { %v8501_v43 = vadd.f32 %v13582_v51, %v12633_v3  ;;  %v13583_v50 = vpop.f32.mrb[252].mxu1  ;;  %v8534_v44 = vsel %vm1893_vm0, %v20263_v30, 0.0 }
0x17de   : > { %v13584_v35 = vpop.f32.mrb[253].mxu1  ;;  %8535 = vadd.xlane.f32.xlu0 %v8534_v44 }
0x17df   : > { %v13585_v21 = vadd.f32 %v13584_v35, %v13583_v50  ;;  %v20268_v14 = vadd.f32 %v8501_v43, %v22596_v12 }
0x17e1   : > { %v8506_v5 = vadd.f32 %v13585_v21, %v12633_v3  ;;  %v13586_v1 = vpop.f32.mrb[254].mxu1  ;;  %v8537_v40 = vsel %vm1893_vm0, %v20268_v14, 0.0 }
0x17e2   : > { %8538 = vadd.xlane.f32.xlu1 %v8537_v40  ;;  %v13587_v31 = vpop.f32.mrb[255].mxu1 }
0x17e3   : > { %v13588_v16 = vadd.f32 %v13587_v31, %v13586_v1  ;;  %v20273_v45 = vadd.f32 %v8506_v5, %v22597_v37  ;;  %v12500_v37 = vld [vmem:[%s22253_s2 + $0x28] sm:$0xff] }
0x17e5   : > { %v8511_v7 = vadd.f32 %v13588_v16, %v12633_v3  ;;  %v8540_v19 = vsel %vm1893_vm0, %v20273_v45, 0.0  ;;  %v16106_v3 = vld [vmem:[%s17933_s6 + $0x10] sm:$0xff]  ;;  %v12499_v16 = vld [vmem:[%s22253_s2 + $0x20] sm:$0xff]  ;;  %s22841_s6 = sld [smem:[#allocation58_spill]] }
0x17e6   : > { %8541 = vadd.xlane.f32.xlu0 %v8540_v19  ;;  %14491 = vmatprep.mubr.msk.f32.mxu0 %vm1893_vm0, %v16106_v3  ;;  %v12505_v19 = vld [vmem:[%s22254_s22 + $0x28] sm:$0xff]  ;;  %v20375_v3 = vld [vmem:[%s22289_s5 + $0x1] ss:$0 sm:$0xff] }
0x17e7   : > { %v20278_v59 = vadd.f32 %v8511_v7, %v22598_v8  ;;  %14492 = vmatmul.mubr.msk.f32.gmra.mrb[212].mxu0 %vm1893_vm0, %v16107_v33  ;;  %v15395_v7 = vpack.c.bf16 %v12500_v37, %v12499_v16  ;;  %v16114_v16 = vld [vmem:[%s16917_s18] sm:$0xff] }
0x17e8   : > { %14494 = vmatprep.mubr.msk.f32.mxu0 %vm1893_vm0, %v16108_v28 }
0x17e9   : > { %v8543_v6 = vsel %vm1893_vm0, %v20278_v59, 0.0  ;;  %15396 = vmatprep.subr.bf16.mxu1 %v15395_v7 }
0x17ea   : > { %8544 = vadd.xlane.f32.xlu1 %v8543_v6  ;;  %15398 = vmatpush3.bf16.msra.mxu1 %v15395_v7  ;;  %v12507_v6 = vld [vmem:[%s22254_s22 + $0x38] sm:$0xff] }
0x17eb   : > { %14495 = vmatmul.mubr.msk.f32.gmra.mrb[214].mxu0 %vm1893_vm0, %v16109_v10  ;;  %15400 = vmatprep.subr.bf16.mxu1 %v15399_v52 }
0x17ec   : > { %14497 = vmatprep.mubr.msk.f32.mxu0 %vm1893_vm0, %v16110_v53 }
0x17ee   : > { %15402 = vmatpush3.bf16.msra.mxu1 %v15399_v52 }
0x17ef   : > { %14498 = vmatmul.mubr.msk.f32.gmra.mrb[216].mxu0 %vm1893_vm0, %v16111_v4 }
0x17f0   : > { %14500 = vmatprep.mubr.msk.f32.mxu0 %vm1893_vm0, %v16112_v11 }
0x17f3   : > { %14501 = vmatmul.mubr.msk.f32.gmra.mrb[218].mxu0 %vm1893_vm0, %v16113_v41 }
0x185b   : > { %v8524_v9 = vpop.xlane.xlu0 %8523 }
0x185c   : > { %v8546_v24 = vmul.f32 0.03125, %v8524_v9 }
0x185e   : > { %v20305_v0 = vsub.f32 %v20243_v62, %v8546_v24 }
0x185f   : > { %v8527_v58 = vpop.xlane.xlu1 %8526 }
0x1860   : > { %v8547_v61 = vmul.f32 0.03125, %v8527_v58  ;;  %v8562_v20 = vmul.f32 %v20305_v0, %v20305_v0 }
0x1862   : > { %v20310_v36 = vsub.f32 %v20248_v13, %v8547_v61  ;;  %v8570_v42 = vsel %vm1893_vm0, %v8562_v20, 0.0 }
0x1863   : > { %8571 = vadd.xlane.f32.xlu0 %v8570_v42  ;;  %v8530_v2 = vpop.xlane.xlu0 %8529 }
0x1864   : > { %v8548_v15 = vmul.f32 0.03125, %v8530_v2  ;;  %v8563_v39 = vmul.f32 %v20310_v36, %v20310_v36 }
0x1866   : > { %v20316_v25 = vsub.f32 %v20253_v60, %v8548_v15  ;;  %v8573_v62 = vsel %vm1893_vm0, %v8563_v39, 0.0 }
0x1867   : > { %v8533_v55 = vpop.xlane.xlu1 %8532  ;;  %8574 = vadd.xlane.f32.xlu1 %v8573_v62 }
0x1868   : > { %v8549_v47 = vmul.f32 0.03125, %v8533_v55  ;;  %v8564_v13 = vmul.f32 %v20316_v25, %v20316_v25 }
0x186a   : > { %v20322_v26 = vsub.f32 %v20258_v23, %v8549_v47  ;;  %v8576_v49 = vsel %vm1893_vm0, %v8564_v13, 0.0 }
0x186b   : > { %8577 = vadd.xlane.f32.xlu0 %v8576_v49  ;;  %v8536_v32 = vpop.xlane.xlu0 %8535 }
0x186c   : > { %v8550_v18 = vmul.f32 0.03125, %v8536_v32  ;;  %v8565_v60 = vmul.f32 %v20322_v26, %v20322_v26 }
0x186e   : > { %v20328_v48 = vsub.f32 %v20263_v30, %v8550_v18  ;;  %v8579_v27 = vsel %vm1893_vm0, %v8565_v60, 0.0 }
0x186f   : > { %v8539_v29 = vpop.xlane.xlu1 %8538  ;;  %8580 = vadd.xlane.f32.xlu1 %v8579_v27 }
0x1870   : > { %v8551_v56 = vmul.f32 0.03125, %v8539_v29  ;;  %v8566_v23 = vmul.f32 %v20328_v48, %v20328_v48 }
0x1872   : > { %v20334_v51 = vsub.f32 %v20268_v14, %v8551_v56  ;;  %v8582_v38 = vsel %vm1893_vm0, %v8566_v23, 0.0  ;;  %v20400_v56 = vld [vmem:[%s22255_s11 + $0x1] ss:$0 sm:$0xff] }
0x1873   : > { %8583 = vadd.xlane.f32.xlu0 %v8582_v38  ;;  %v8542_v43 = vpop.xlane.xlu0 %8541 }
0x1874   : > { %v8552_v50 = vmul.f32 0.03125, %v8542_v43  ;;  %v8567_v30 = vmul.f32 %v20334_v51, %v20334_v51 }
0x1876   : > { %v20340_v44 = vsub.f32 %v20273_v45, %v8552_v50  ;;  %v8585_v35 = vsel %vm1893_vm0, %v8567_v30, 0.0  ;;  %v12504_v45 = vld [vmem:[%s22254_s22 + $0x20] sm:$0xff] }
0x1877   : > { %8586 = vadd.xlane.f32.xlu1 %v8585_v35  ;;  %v8545_v21 = vpop.xlane.xlu1 %8544  ;;  %v20356_v8 = vpack.c.bf16 %v12505_v19, %v12504_v45  ;;  %v20404_v50 = vld [vmem:[%s22256_s26 + $0x1] ss:$0 sm:$0xff] }
0x1878   : > { %v8553_v12 = vmul.f32 0.03125, %v8545_v21  ;;  %v8568_v14 = vmul.f32 %v20340_v44, %v20340_v44 }
0x1879   : > { %15404 = vmatprep.subr.bf16.mxu0 %v20356_v8  ;;  %15663 = vmatprep.subr.bf16.mxu1 %v20356_v8 }
0x187a   : > { %v20346_v5 = vsub.f32 %v20278_v59, %v8553_v12  ;;  %v8588_v1 = vsel %vm1893_vm0, %v8568_v14, 0.0  ;;  %v12506_v59 = vld [vmem:[%s22254_s22 + $0x30] sm:$0xff]  ;;  %15406 = vmatpush3.bf16.msra.mxu0 %v20356_v8 }
0x187b   : > { %8589 = vadd.xlane.f32.xlu0 %v8588_v1  ;;  %v20363_v34 = vpack.c.bf16 %v12507_v6, %v12506_v59 }
0x187c   : > { %v8569_v40 = vmul.f32 %v20346_v5, %v20346_v5 }
0x187d   : > { %15408 = vmatprep.subr.bf16.mxu0 %v20363_v34 }
0x187e   : > { %v8591_v31 = vsel %vm1893_vm0, %v8569_v40, 0.0  ;;  %15410 = vmatpush3.bf16.msra.mxu0 %v20363_v34 }
0x187f   : > { %8592 = vadd.xlane.f32.xlu1 %v8591_v31  ;;  %15416 = vmatprep.subr.bf16.mxu0 %v22599_v57 }
0x189b   : > { %v20370_v17 = vpop.f32.mrb[210].mxu0 }
0x189c   : > { %v20372_v63 = vpop.f32.mrb[211].mxu0 }
0x18ba   : > { %v14493_v33 = vpop.f32.mrb[212].mxu0 }
0x18bb   : > { %v20378_v28 = vadd.f32 %v14493_v33, %v20375_v3  ;;  %v8744_v10 = vpop.f32.mrb[213].mxu0 }
0x18bc   : > { %v20381_v53 = vadd.f32 %v20375_v3, %v8744_v10 }
0x18be   : > { %v14496_v4 = vpop.f32.mrb[214].mxu0 }
0x18bf   : > { %v20384_v11 = vadd.f32 %v14496_v4, %v20375_v3  ;;  %v8754_v41 = vpop.f32.mrb[215].mxu0 }
0x18c0   : > { %v20387_v9 = vadd.f32 %v20375_v3, %v8754_v41 }
0x18c2   : > { %v14499_v24 = vpop.f32.mrb[216].mxu0 }
0x18c3   : > { %v20390_v58 = vadd.f32 %v14499_v24, %v20375_v3  ;;  %v8764_v61 = vpop.f32.mrb[217].mxu0 }
0x18c4   : > { %v20393_v20 = vadd.f32 %v20375_v3, %v8764_v61 }
0x18c6   : > { %v20395_v42 = vpop.f32.mrb[218].mxu0 }
0x18c7   : > { %v20397_v2 = vpop.f32.mrb[219].mxu0 }
0x18f0   : > { %v8572_v15 = vpop.xlane.xlu0 %8571 }
0x18f1   : > { %v8594_v39 = vmul.f32 0.03125, %v8572_v15  ;;  %v16116_v15 = vld [vmem:[%s16917_s18 + $0x10] sm:$0xff] }
0x18f3   : > { %v8602_v62 = vadd.f32 1e-05, %v8594_v39  ;;  %v22603_v39 = vld [vmem:[#allocation87_spill] sm:$0xff] }
0x18f4   : > { %v8575_v55 = vpop.xlane.xlu1 %8574 }
0x18f5   : > { %15966 = vrsqrt.f32 %v8602_v62  ;;  %v8595_v47 = vmul.f32 0.03125, %v8575_v55 }
0x18f7   : > { %v8603_v13 = vadd.f32 1e-05, %v8595_v47 }
0x18f8   : > { %v8578_v49 = vpop.xlane.xlu0 %8577 }
0x18f9   : > { %15968 = vrsqrt.f32 %v8603_v13  ;;  %v8596_v32 = vmul.f32 0.03125, %v8578_v49 }
0x18fb   : > { %v8604_v18 = vadd.f32 1e-05, %v8596_v32  ;;  %v22605_v32 = vld [vmem:[#allocation88_spill] sm:$0xff] }
0x18fc   : > { %v8581_v60 = vpop.xlane.xlu1 %8580 }
0x18fd   : > { %15970 = vrsqrt.f32 %v8604_v18  ;;  %v8597_v27 = vmul.f32 0.03125, %v8581_v60  ;;  %v22606_v18 = vld [vmem:[#allocation90_spill] sm:$0xff] }
0x18ff   : > { %v15967_v29 = vpop.eup %15966  ;;  %v8605_v23 = vadd.f32 1e-05, %v8597_v27 }
0x1900   : > { %v8618_v38 = vmul.f32 %v15967_v29, %v20305_v0  ;;  %v8584_v43 = vpop.xlane.xlu0 %8583  ;;  %v16118_v29 = vld [vmem:[%s16917_s18 + $0x20] sm:$0xff] }
0x1901   : > { %15972 = vrsqrt.f32 %v8605_v23  ;;  %v8598_v30 = vmul.f32 0.03125, %v8584_v43 }
0x1902   : > { %v8632_v35 = vmul.f32 %v20400_v56, %v8618_v38 }
0x1903   : > { %v15969_v21 = vpop.eup %15968  ;;  %v8606_v12 = vadd.f32 1e-05, %v8598_v30 }
0x1904   : > { %v8619_v14 = vmul.f32 %v15969_v21, %v20310_v36  ;;  %v8587_v1 = vpop.xlane.xlu1 %8586  ;;  %v20409_v40 = vadd.f32 %v20404_v50, %v8632_v35 }
0x1905   : > { %15974 = vrsqrt.f32 %v8606_v12  ;;  %v8599_v31 = vmul.f32 0.03125, %v8587_v1 }
0x1906   : > { %22600 = vst [vmem:[#allocation127_spill] sm:$0xff] %v20409_v40  ;;  %v8633_v0 = vmul.f32 %v20400_v56, %v8619_v14  ;;  %v8654_v37 = vadd.f32 %v16114_v16, %v20409_v40 }
0x1907   : > { %v15971_v45 = vpop.eup %15970  ;;  %v8607_v7 = vadd.f32 1e-05, %v8599_v31  ;;  %v16120_v31 = vld [vmem:[%s16917_s18 + $0x30] sm:$0xff] }
0x1908   : > { %v20415_v19 = vadd.f32 %v20404_v50, %v8633_v0  ;;  %v8620_v59 = vmul.f32 %v15971_v45, %v20316_v25  ;;  %v8590_v36 = vpop.xlane.xlu0 %8589  ;;  %14511 = vmatprep.mubr.msk.f32.mxu1 %vm1893_vm0, %v8654_v37  ;;  %14531 = vmatprep.mubr.msk.f32.mxu0 %vm1893_vm0, %v8654_v37  ;;  %v8735_v45 = vadd.f32 %v20375_v3, %v20372_v63  ;;  %v16125_v63 = vld [vmem:[%s18182_s23 + $0x10] sm:$0xff] }
0x1909   : > { %15976 = vrsqrt.f32 %v8607_v7  ;;  %v8600_v6 = vmul.f32 0.03125, %v8590_v36  ;;  %v16122_v7 = vld [vmem:[%s18182_s23 + $0x8] sm:$0xff]  ;;  %v16123_v36 = vld [vmem:[%s18182_s23] sm:$0xff] }
0x190a   : > { %22601 = vst [vmem:[#allocation126_spill] sm:$0xff] %v20415_v19  ;;  %v8655_v54 = vadd.f32 %v16115_v46, %v20415_v19  ;;  %v8634_v52 = vmul.f32 %v20400_v56, %v8620_v59  ;;  %v8780_v46 = vadd.f32 %v20395_v42, %v20375_v3  ;;  %v16127_v42 = vld [vmem:[%s18182_s23 + $0x20] sm:$0xff] }
0x190b   : > { %v15973_v33 = vpop.eup %15972  ;;  %v8608_v10 = vadd.f32 1e-05, %v8600_v6  ;;  %v8783_v6 = vmul.f32 %v16123_v36, %v8735_v45 }
0x190c   : > { %v8621_v4 = vmul.f32 %v15973_v33, %v20322_v26  ;;  %14512 = vmatmul.mubr.msk.f32.vlgmr.msra.gmra.mrb[0].mxu1 %vm1893_vm0, %v8655_v54  ;;  %14532 = vmatmul.mubr.msk.f32.vlgmr.msra.gmra.mrb[220].mxu0 %vm1893_vm0, %v8655_v54  ;;  %v8593_v25 = vpop.xlane.xlu1 %8592  ;;  %v20427_v41 = vadd.f32 %v20404_v50, %v8634_v52  ;;  %v8775_v54 = vadd.f32 %v20375_v3, %v20397_v2  ;;  %v16124_v52 = vld [vmem:[%s18182_s23 + $0x18] sm:$0xff] }
0x190d   : > { %15978 = vrsqrt.f32 %v8608_v10  ;;  %v8601_v24 = vmul.f32 0.03125, %v8593_v25  ;;  %15665 = vmatpush3.bf16.msra.mxu1 %v20356_v8  ;;  %15418 = vmatpush3.bf16.msra.mxu0 %v22599_v57  ;;  %v16117_v8 = vld [vmem:[%s16917_s18 + $0x18] sm:$0xff]  ;;  %v20505_v33 = vmul.f32 %v16125_v63, %v20381_v53  ;;  %v16126_v10 = vld [vmem:[%s18182_s23 + $0x28] sm:$0xff]  ;;  %v20513_v25 = vmul.f32 %v16127_v42, %v20387_v9  ;;  %v16130_v53 = vld [vmem:[%s22292_s24 + $0x80] sm:$0xff] }
0x190e   : > { %22602 = vst [vmem:[#allocation137_spill] sm:$0xff] %v20427_v41  ;;  %v8635_v61 = vmul.f32 %v20400_v56, %v8621_v4  ;;  %v8656_v26 = vadd.f32 %v16116_v15, %v20427_v41  ;;  %15664 = vmatprep.subr.bf16.mxu1 %v20363_v34  ;;  %15420 = vmatprep.subr.bf16.mxu0 %v22603_v39  ;;  %v16132_v9 = vld [vmem:[%s18182_s23 + $0x48] sm:$0xff]  ;;  %v16176_v41 = vld [vmem:[%s22292_s24 + $0x78] sm:$0xff] }
0x190f   : > { %v15975_v62 = vpop.eup %15974  ;;  %v8609_v55 = vadd.f32 1e-05, %v8601_v24  ;;  %v20509_v4 = vmul.f32 %v16126_v10, %v20384_v11  ;;  %v16131_v11 = vld [vmem:[%s22292_s24 + $0x88] sm:$0xff]  ;;  %v16148_v10 = vld [vmem:[%s22292_s24 + $0x98] sm:$0xff] }
0x1910   : > { %v20437_v47 = vadd.f32 %v20404_v50, %v8635_v61  ;;  %v8622_v13 = vmul.f32 %v15975_v62, %v20328_v48  ;;  %14514 = vmatprep.mubr.msk.f32.mxu1 %vm1893_vm0, %v8656_v26  ;;  %14534 = vmatprep.mubr.msk.f32.mxu0 %vm1893_vm0, %v8656_v26  ;;  %v20524_v61 = vmul.f32 %v16130_v53, %v8783_v6  ;;  %v16134_v62 = vld [vmem:[%s22292_s24] sm:$0xff]  ;;  %v16150_v53 = vld [vmem:[%s22292_s24 + $0x18] sm:$0xff] }
0x1911   : > { %15980 = vrsqrt.f32 %v8609_v55  ;;  %15666 = vmatpush3.bf16.msra.mxu1 %v20363_v34  ;;  %15422 = vmatpush3.bf16.msra.mxu0 %v22603_v39  ;;  %v20531_v26 = vmul.f32 %v16132_v9, %v8780_v46  ;;  %v16135_v55 = vld [vmem:[%s22292_s24 + $0x8] sm:$0xff]  ;;  %v16146_v46 = vld [vmem:[%s22292_s24 + $0x140] sm:$0xff] }
0x1912   : > { %22604 = vst [vmem:[#allocation129_spill] sm:$0xff] %v20437_v47  ;;  %v8657_v57 = vadd.f32 %v16117_v8, %v20437_v47  ;;  %v8636_v49 = vmul.f32 %v20400_v56, %v8622_v13  ;;  %15412 = vmatprep.subr.bf16.mxu1 %v22605_v32  ;;  %15432 = vmatprep.subr.bf16.mxu0 %v22606_v18  ;;  %v16177_v47 = vld [vmem:[%s22316_s14] sm:$0xff] }
0x1913   : > { %v15977_v48 = vpop.eup %15976 }
0x1914   : > { %v8623_v60 = vmul.f32 %v15977_v48, %v20334_v51  ;;  %14515 = vmatmul.mubr.msk.f32.gmra.mrb[2].mxu1 %vm1893_vm0, %v8657_v57  ;;  %14535 = vmatmul.mubr.msk.f32.gmra.mrb[222].mxu0 %vm1893_vm0, %v8657_v57  ;;  %v20453_v34 = vadd.f32 %v20404_v50, %v8636_v49  ;;  %v16119_v51 = vld [vmem:[%s16917_s18 + $0x28] sm:$0xff]  ;;  %v16136_v57 = vld [vmem:[%s22292_s24 + $0xc0] sm:$0xff] }
0x1915   : > { %v20546_v49 = vmul.f32 %v16136_v57, %v8783_v6 }
0x1916   : > { %22607 = vst [vmem:[#allocation128_spill] sm:$0xff] %v20453_v34  ;;  %v8637_v27 = vmul.f32 %v20400_v56, %v8623_v60  ;;  %v8658_v23 = vadd.f32 %v16118_v29, %v20453_v34  ;;  %v16138_v60 = vld [vmem:[%s22292_s24 + $0x40] sm:$0xff]  ;;  %v16169_v29 = vld [vmem:[%s22292_s24 + $0xb0] sm:$0xff]  ;;  %v16174_v34 = vld [vmem:[%s22292_s24 + $0xf8] sm:$0xff] }
0x1917   : > { %v15979_v38 = vpop.eup %15978  ;;  %22614 = vst [vmem:[#allocation115_spill] sm:$0xff] %v20546_v49  ;;  %v22713_v49 = vld [vmem:[#allocation189_spill] sm:$0xff] }
0x1918   : > { %v20459_v43 = vadd.f32 %v20404_v50, %v8637_v27  ;;  %v8624_v30 = vmul.f32 %v15979_v38, %v20340_v44  ;;  %14517 = vmatprep.mubr.msk.f32.mxu1 %vm1893_vm0, %v8658_v23  ;;  %14537 = vmatprep.mubr.msk.f32.mxu0 %vm1893_vm0, %v8658_v23  ;;  %v20553_v27 = vmul.f32 %v16138_v60, %v8783_v6  ;;  %v16139_v23 = vld [vmem:[%s22292_s24 + $0x48] sm:$0xff] }
0x191a   : > { %22608 = vst [vmem:[#allocation103_spill] sm:$0xff] %v20459_v43  ;;  %v8659_v35 = vadd.f32 %v16119_v51, %v20459_v43  ;;  %v8638_v21 = vmul.f32 %v20400_v56, %v8624_v30  ;;  %22616 = vst [vmem:[#allocation107_spill] sm:$0xff] %v20553_v27  ;;  %v16140_v30 = vld [vmem:[%s22292_s24 + $0x180] sm:$0xff]  ;;  %v16175_v43 = vld [vmem:[%s22292_s24 + $0x70] sm:$0xff] }
0x191b   : > { %v15981_v12 = vpop.eup %15980  ;;  %v20562_v51 = vmul.f32 %v16140_v30, %v8783_v6  ;;  %v16171_v30 = vld [vmem:[%s22292_s24 + $0x30] sm:$0xff] }
0x191c   : > { %v8625_v14 = vmul.f32 %v15981_v12, %v20346_v5  ;;  %14518 = vmatmul.mubr.msk.f32.gmra.mrb[4].mxu1 %vm1893_vm0, %v8659_v35  ;;  %14538 = vmatmul.mubr.msk.f32.gmra.mrb[224].mxu0 %vm1893_vm0, %v8659_v35  ;;  %v20471_v44 = vadd.f32 %v20404_v50, %v8638_v21  ;;  %v16121_v5 = vld [vmem:[%s16917_s18 + $0x38] sm:$0xff]  ;;  %v16141_v35 = vld [vmem:[%s22292_s24 + $0x188] sm:$0xff] }
0x191d   : > { %22618 = vst [vmem:[#allocation117_spill] sm:$0xff] %v20562_v51  ;;  %v16166_v12 = vld [vmem:[%s22292_s24 + $0x118] sm:$0xff]  ;;  %v16187_v51 = vld [vmem:[%s22316_s14 + $0x50] sm:$0xff] }
0x191e   : > { %22609 = vst [vmem:[#allocation102_spill] sm:$0xff] %v20471_v44  ;;  %v8639_v1 = vmul.f32 %v20400_v56, %v8625_v14  ;;  %v8660_v0 = vadd.f32 %v16120_v31, %v20471_v44  ;;  %v22611_v56 = vld [vmem:[#allocation89_spill] sm:$0xff]  ;;  %v16142_v14 = vld [vmem:[%s22292_s24 + $0x100] sm:$0xff]  ;;  %v16172_v44 = vld [vmem:[%s22292_s24 + $0x38] sm:$0xff] }
0x191f   : > { %v16143_v31 = vld [vmem:[%s22292_s24 + $0x108] sm:$0xff] }
0x1920   : > { %v20477_v16 = vadd.f32 %v20404_v50, %v8639_v1  ;;  %14520 = vmatprep.mubr.msk.f32.mxu1 %vm1893_vm0, %v8660_v0  ;;  %v8740_v50 = vadd.f32 %v20370_v17, %v20375_v3  ;;  %v20501_v17 = vmul.f32 %v16124_v52, %v20378_v28  ;;  %v16128_v3 = vld [vmem:[%s18182_s23 + $0x38] sm:$0xff]  ;;  %v16129_v28 = vld [vmem:[%s18182_s23 + $0x30] sm:$0xff]  ;;  %v20571_v1 = vmul.f32 %v16142_v14, %v8783_v6 }
0x1921   : > { %v20517_v2 = vmul.f32 %v16128_v3, %v20390_v58  ;;  %v20521_v24 = vmul.f32 %v16129_v28, %v20393_v20  ;;  %v16133_v58 = vld [vmem:[%s18182_s23 + $0x40] sm:$0xff]  ;;  %v20537_v20 = vmul.f32 %v16134_v62, %v8783_v6  ;;  %v16147_v52 = vld [vmem:[%s22292_s24 + $0x90] sm:$0xff] }
0x1922   : > { %22610 = vst [vmem:[#allocation140_spill] sm:$0xff] %v20477_v16  ;;  %v8661_v37 = vadd.f32 %v16121_v5, %v20477_v16  ;;  %v20492_v59 = vmul.f32 %v16122_v7, %v8740_v50  ;;  %v20534_v39 = vmul.f32 %v16133_v58, %v8775_v54  ;;  %22620 = vst [vmem:[#allocation123_spill] sm:$0xff] %v20571_v1  ;;  %v16144_v5 = vld [vmem:[%s22292_s24 + $0x1c0] sm:$0xff]  ;;  %v16145_v7 = vld [vmem:[%s22292_s24 + $0x1c8] sm:$0xff] }
0x1923   : > { %22612 = vst [vmem:[#allocation105_spill] sm:$0xff] %v20537_v20  ;;  %v20589_v54 = vmul.f32 %v16146_v46, %v8783_v6  ;;  %v20593_v63 = vmul.f32 %v16147_v52, %v20505_v33  ;;  %v20597_v42 = vmul.f32 %v16148_v10, %v20501_v17  ;;  %v16149_v3 = vld [vmem:[%s22292_s24 + $0x10] sm:$0xff]  ;;  %v16152_v58 = vld [vmem:[%s22292_s24 + $0xd8] sm:$0xff]  ;;  %v16181_v1 = vld [vmem:[%s22316_s14 + $0x20] sm:$0xff] }
0x1924   : > { %14521 = vmatmul.mubr.msk.f32.gmra.mrb[6].mxu1 %vm1893_vm0, %v8661_v37  ;;  %v20528_v15 = vmul.f32 %v16131_v11, %v20492_v59  ;;  %v20541_v13 = vmul.f32 %v16135_v55, %v20492_v59  ;;  %v20559_v38 = vmul.f32 %v16139_v23, %v20492_v59  ;;  %v20566_v21 = vmul.f32 %v16141_v35, %v20492_v59  ;;  %v16153_v55 = vld [vmem:[%s22292_s24 + $0x50] sm:$0xff]  ;;  %v16156_v46 = vld [vmem:[%s22292_s24 + $0x198] sm:$0xff]  ;;  %v16168_v23 = vld [vmem:[%s22292_s24 + $0x1a8] sm:$0xff] }
0x1925   : > { %14540 = vmatprep.mubr.msk.f32.mxu1 %vm1893_vm0, %v8660_v0  ;;  %v20575_v0 = vmul.f32 %v16143_v31, %v20492_v59  ;;  %v20586_v36 = vmul.f32 %v16145_v7, %v20492_v59  ;;  %22624 = vst [vmem:[#allocation135_spill] sm:$0xff] %v20589_v54  ;;  %22625 = vst [vmem:[#allocation130_spill] sm:$0xff] %v20593_v63  ;;  %v20601_v28 = vmul.f32 %v16149_v3, %v20505_v33  ;;  %v16155_v14 = vld [vmem:[%s22292_s24 + $0x190] sm:$0xff] }
0x1926   : > { %22613 = vst [vmem:[#allocation104_spill] sm:$0xff] %v20541_v13  ;;  %22617 = vst [vmem:[#allocation106_spill] sm:$0xff] %v20559_v38  ;;  %v20605_v11 = vmul.f32 %v16150_v53, %v20501_v17  ;;  %v20613_v62 = vmul.f32 %v16152_v58, %v20501_v17  ;;  %v20617_v57 = vmul.f32 %v16153_v55, %v20505_v33  ;;  %v16157_v10 = vld [vmem:[%s22292_s24 + $0x110] sm:$0xff]  ;;  %v16158_v53 = vld [vmem:[%s22292_s24 + $0xa0] sm:$0xff] }
0x1927   : > { %22619 = vst [vmem:[#allocation116_spill] sm:$0xff] %v20566_v21  ;;  %22621 = vst [vmem:[#allocation122_spill] sm:$0xff] %v20575_v0  ;;  %v20631_v31 = vmul.f32 %v16155_v14, %v20505_v33  ;;  %v20639_v52 = vmul.f32 %v16156_v46, %v20501_v17  ;;  %v20643_v3 = vmul.f32 %v16157_v10, %v20505_v33  ;;  %v16159_v58 = vld [vmem:[%s22292_s24 + $0xa8] sm:$0xff]  ;;  %v16162_v10 = vld [vmem:[%s22292_s24 + $0xe0] sm:$0xff] }
0x1928   : > { %14541 = vmatmul.mubr.msk.f32.vlgmr.msra.gmra.mrb[8].mxu1 %vm1893_vm0, %v8661_v37  ;;  %v20578_v37 = vmul.f32 %v16144_v5, %v8783_v6  ;;  %22623 = vst [vmem:[#allocation124_spill] sm:$0xff] %v20586_v36  ;;  %22626 = vst [vmem:[#allocation139_spill] sm:$0xff] %v20597_v42  ;;  %v16151_v6 = vld [vmem:[%s22292_s24 + $0xd0] sm:$0xff]  ;;  %v20651_v55 = vmul.f32 %v16159_v58, %v20509_v4  ;;  %v16161_v46 = vld [vmem:[%s22292_s24 + $0x28] sm:$0xff]  ;;  %v20663_v7 = vmul.f32 %v16162_v10, %v20513_v25 }
0x1929   : > { %15414 = vmatpush3.bf16.msra.mxu1 %v22605_v32  ;;  %v16137_v32 = vld [vmem:[%s22292_s24 + $0xc8] sm:$0xff]  ;;  %22627 = vst [vmem:[#allocation138_spill] sm:$0xff] %v20601_v28  ;;  %22628 = vst [vmem:[#allocation109_spill] sm:$0xff] %v20605_v11  ;;  %v20609_v9 = vmul.f32 %v16151_v6, %v20505_v33  ;;  %v20647_v6 = vmul.f32 %v16158_v53, %v20513_v25  ;;  %v20659_v35 = vmul.f32 %v16161_v46, %v20509_v4  ;;  %v16164_v58 = vld [vmem:[%s22292_s24 + $0x60] sm:$0xff] }
0x192a   : > { %15424 = vmatprep.subr.bf16.mxu1 %v22611_v56  ;;  %v20550_v48 = vmul.f32 %v16137_v32, %v20492_v59  ;;  %22622 = vst [vmem:[#allocation125_spill] sm:$0xff] %v20578_v37  ;;  %22630 = vst [vmem:[#allocation142_spill] sm:$0xff] %v20613_v62  ;;  %v16154_v32 = vld [vmem:[%s22292_s24 + $0x58] sm:$0xff]  ;;  %v16163_v53 = vld [vmem:[%s22292_s24 + $0xe8] sm:$0xff]  ;;  %v20671_v5 = vmul.f32 %v16164_v58, %v20513_v25  ;;  %v20685_v58 = vmul.f32 %v16166_v12, %v20501_v17 }
0x192b   : > { %22629 = vst [vmem:[#allocation108_spill] sm:$0xff] %v20609_v9  ;;  %22631 = vst [vmem:[#allocation141_spill] sm:$0xff] %v20617_v57  ;;  %v20621_v60 = vmul.f32 %v16154_v32, %v20501_v17  ;;  %v16160_v32 = vld [vmem:[%s22292_s24 + $0x20] sm:$0xff]  ;;  %v20667_v45 = vmul.f32 %v16163_v53, %v20509_v4  ;;  %v20697_v53 = vmul.f32 %v16168_v23, %v20509_v4  ;;  %v16173_v16 = vld [vmem:[%s22292_s24 + $0xf0] sm:$0xff] }
0x192c   : > { %22615 = vst [vmem:[#allocation114_spill] sm:$0xff] %v20550_v48  ;;  %22633 = vst [vmem:[#allocation143_spill] sm:$0xff] %v20631_v31  ;;  %v20655_v14 = vmul.f32 %v16160_v32, %v20513_v25  ;;  %v16165_v32 = vld [vmem:[%s22292_s24 + $0x68] sm:$0xff]  ;;  %v16167_v10 = vld [vmem:[%s22292_s24 + $0x1a0] sm:$0xff]  ;;  %v20701_v12 = vmul.f32 %v16169_v29, %v20521_v24  ;;  %v20713_v23 = vmul.f32 %v16172_v44, %v20517_v2 }
0x192d   : > { %22632 = vst [vmem:[#allocation144_spill] sm:$0xff] %v20621_v60  ;;  %22634 = vst [vmem:[#allocation146_spill] sm:$0xff] %v20639_v52  ;;  %v20675_v46 = vmul.f32 %v16165_v32, %v20509_v4  ;;  %v20693_v50 = vmul.f32 %v16167_v10, %v20513_v25  ;;  %v16170_v32 = vld [vmem:[%s22292_s24 + $0xb8] sm:$0xff]  ;;  %v20709_v10 = vmul.f32 %v16171_v30, %v20521_v24  ;;  %v16179_v31 = vld [vmem:[%s22316_s14 + $0x10] sm:$0xff] }
0x192e   : > { %22635 = vst [vmem:[#allocation145_spill] sm:$0xff] %v20643_v3  ;;  %22636 = vst [vmem:[#allocation148_spill] sm:$0xff] %v20647_v6  ;;  %v20705_v8 = vmul.f32 %v16170_v32, %v20517_v2  ;;  %v20717_v29 = vmul.f32 %v16173_v16, %v20521_v24  ;;  %v20721_v32 = vmul.f32 %v16174_v34, %v20517_v2  ;;  %v16178_v16 = vld [vmem:[%s22316_s14 + $0x8] sm:$0xff]  ;;  %v16180_v52 = vld [vmem:[%s22316_s14 + $0x18] sm:$0xff] }
0x192f   : > { %22637 = vst [vmem:[#allocation147_spill] sm:$0xff] %v20651_v55  ;;  %22638 = vst [vmem:[#allocation150_spill] sm:$0xff] %v20655_v14  ;;  %v20725_v30 = vmul.f32 %v16175_v43, %v20521_v24  ;;  %v20729_v44 = vmul.f32 %v16176_v41, %v20517_v2  ;;  %v10884_v40 = vmul.f32 %v16177_v47, %v20534_v39  ;;  %v16182_v41 = vld [vmem:[%s22316_s14 + $0x28] sm:$0xff]  ;;  %v16183_v47 = vld [vmem:[%s22316_s14 + $0x30] sm:$0xff] }
0x1930   : > { %22639 = vst [vmem:[#allocation149_spill] sm:$0xff] %v20659_v35  ;;  %22640 = vst [vmem:[#allocation152_spill] sm:$0xff] %v20663_v7  ;;  %v10885_v19 = vmul.f32 %v16178_v16, %v20531_v26  ;;  %v10886_v34 = vmul.f32 %v16179_v31, %v20534_v39  ;;  %v10887_v43 = vmul.f32 %v16180_v52, %v20531_v26  ;;  %v16184_v7 = vld [vmem:[%s22316_s14 + $0x38] sm:$0xff]  ;;  %v16185_v52 = vld [vmem:[%s22316_s14 + $0x40] sm:$0xff] }
0x1931   : > { %22641 = vst [vmem:[#allocation151_spill] sm:$0xff] %v20667_v45  ;;  %22642 = vst [vmem:[#allocation154_spill] sm:$0xff] %v20671_v5  ;;  %v10888_v0 = vmul.f32 %v16181_v1, %v20534_v39  ;;  %v10889_v5 = vmul.f32 %v16182_v41, %v20531_v26  ;;  %v10891_v16 = vmul.f32 %v16184_v7, %v20531_v26  ;;  %v16186_v1 = vld [vmem:[%s22316_s14 + $0x48] sm:$0xff]  ;;  %v16202_v37 = vld [vmem:[%s22292_s24 + $0x150] sm:$0xff] }
0x1932   : > { %22643 = vst [vmem:[#allocation153_spill] sm:$0xff] %v20675_v46  ;;  %22644 = vst [vmem:[#allocation156_spill] sm:$0xff] %v20685_v58  ;;  %v10890_v46 = vmul.f32 %v16183_v47, %v20534_v39  ;;  %v20747_v45 = vpack.c.bf16 %v10885_v19, %v10884_v40  ;;  %v20749_v31 = vpack.c.bf16 %v10887_v43, %v10886_v34  ;;  %v16188_v40 = vld [vmem:[%s22316_s14 + $0x58] sm:$0xff]  ;;  %v16204_v36 = vld [vmem:[%s22292_s24 + $0x1e0] sm:$0xff] }
0x1933   : > { %22645 = vst [vmem:[#allocation155_spill] sm:$0xff] %v20693_v50  ;;  %22646 = vst [vmem:[#allocation159_spill] sm:$0xff] %v20697_v53  ;;  %v10892_v57 = vmul.f32 %v16185_v52, %v20534_v39  ;;  %v10893_v60 = vmul.f32 %v16186_v1, %v20531_v26  ;;  %v20755_v41 = vpack.c.bf16 %v10889_v5, %v10888_v0  ;;  %v16189_v52 = vld [vmem:[%s22316_s14 + $0x60] sm:$0xff]  ;;  %v16190_v0 = vld [vmem:[%s22316_s14 + $0x68] sm:$0xff] }
0x1934   : > { %22647 = vst [vmem:[#allocation158_spill] sm:$0xff] %v20701_v12  ;;  %22648 = vst [vmem:[#allocation161_spill] sm:$0xff] %v20705_v8  ;;  %v20757_v47 = vpack.c.bf16 %v10891_v16, %v10890_v46  ;;  %v10894_v7 = vmul.f32 %v16187_v51, %v20534_v39  ;;  %v10895_v19 = vmul.f32 %v16188_v40, %v20531_v26  ;;  %v16191_v16 = vld [vmem:[%s22316_s14 + $0x70] sm:$0xff]  ;;  %v16199_v51 = vld [vmem:[%s22292_s24 + $0x148] sm:$0xff] }
0x1935   : > { %22649 = vst [vmem:[#allocation160_spill] sm:$0xff] %v20709_v10  ;;  %22650 = vst [vmem:[#allocation163_spill] sm:$0xff] %v20713_v23  ;;  %v20763_v34 = vpack.c.bf16 %v10893_v60, %v10892_v57  ;;  %v10896_v1 = vmul.f32 %v16189_v52, %v20534_v39  ;;  %v10897_v5 = vmul.f32 %v16190_v0, %v20531_v26  ;;  %v16192_v60 = vld [vmem:[%s22316_s14 + $0x78] sm:$0xff]  ;;  %v16200_v50 = vld [vmem:[%s22292_s24 + $0x1d0] sm:$0xff] }
0x1936   : > { %22651 = vst [vmem:[#allocation162_spill] sm:$0xff] %v20717_v29  ;;  %22652 = vst [vmem:[#allocation165_spill] sm:$0xff] %v20721_v32  ;;  %v20771_v46 = vpack.c.bf16 %v10895_v19, %v10894_v7  ;;  %v10898_v57 = vmul.f32 %v16191_v16, %v20534_v39  ;;  %v10899_v40 = vmul.f32 %v16192_v60, %v20531_v26  ;;  %v16193_v16 = vld [vmem:[%s22292_s24 + $0x120] sm:$0xff]  ;;  %v16195_v60 = vld [vmem:[%s22292_s24 + $0x1b0] sm:$0xff] }
0x1937   : > { %22653 = vst [vmem:[#allocation164_spill] sm:$0xff] %v20725_v30  ;;  %22654 = vst [vmem:[#allocation167_spill] sm:$0xff] %v20729_v44  ;;  %v20779_v43 = vpack.c.bf16 %v10897_v5, %v10896_v1  ;;  %v20793_v26 = vmul.f32 %v16193_v16, %v20513_v25  ;;  %v16194_v1 = vld [vmem:[%s22292_s24 + $0x128] sm:$0xff]  ;;  %v20801_v7 = vmul.f32 %v16195_v60, %v20521_v24  ;;  %v16197_v39 = vld [vmem:[%s22292_s24 + $0x130] sm:$0xff] }
0x1938   : > { %22655 = vst [vmem:[#allocation166_spill] sm:$0xff] %v20749_v31  ;;  %22656 = vst [vmem:[#allocation169_spill] sm:$0xff] %v20755_v41  ;;  %v20787_v0 = vpack.c.bf16 %v10899_v40, %v10898_v57  ;;  %v20797_v5 = vmul.f32 %v16194_v1, %v20509_v4  ;;  %v16196_v57 = vld [vmem:[%s22292_s24 + $0x1b8] sm:$0xff]  ;;  %v20809_v19 = vmul.f32 %v16197_v39, %v20521_v24  ;;  %v22703_v62 = vld [vmem:[#allocation181_spill] sm:$0xff] }
0x1939   : > { %22657 = vst [vmem:[#allocation168_spill] sm:$0xff] %v20757_v47  ;;  %22658 = vst [vmem:[#allocation79_spill] sm:$0xff] %v20763_v34  ;;  %v20805_v40 = vmul.f32 %v16196_v57, %v20517_v2  ;;  %v16198_v16 = vld [vmem:[%s22292_s24 + $0x138] sm:$0xff]  ;;  %v20821_v57 = vmul.f32 %v16199_v51, %v20492_v59  ;;  %v20825_v39 = vmul.f32 %v16200_v50, %v20505_v33  ;;  %v16221_v8 = vld [vmem:[%s18833_s15] sm:$0xff] }
0x193a   : > { %22659 = vst [vmem:[#allocation78_spill] sm:$0xff] %v20771_v46  ;;  %22660 = vst [vmem:[#allocation82_spill] sm:$0xff] %v20779_v43  ;;  %v20813_v52 = vmul.f32 %v16198_v16, %v20517_v2  ;;  %v20837_v59 = vmul.f32 %v16202_v37, %v20505_v33  ;;  %v16203_v51 = vld [vmem:[%s22292_s24 + $0x158] sm:$0xff]  ;;  %v20847_v1 = vmul.f32 %v16204_v36, %v20513_v25  ;;  %v16206_v37 = vld [vmem:[%s22292_s24 + $0x160] sm:$0xff] }
0x193b   : > { %22661 = vst [vmem:[#allocation80_spill] sm:$0xff] %v20787_v0  ;;  %22662 = vst [vmem:[#allocation84_spill] sm:$0xff] %v20793_v26  ;;  %v16201_v26 = vld [vmem:[%s22292_s24 + $0x1d8] sm:$0xff]  ;;  %v20843_v16 = vmul.f32 %v16203_v51, %v20501_v17  ;;  %v20857_v50 = vmul.f32 %v16206_v37, %v20513_v25  ;;  %v16208_v36 = vld [vmem:[%s22292_s24 + $0x1f0] sm:$0xff] }
0x193c   : > { %22663 = vst [vmem:[#allocation83_spill] sm:$0xff] %v20797_v5  ;;  %22664 = vst [vmem:[#allocation86_spill] sm:$0xff] %v20801_v7  ;;  %v20833_v60 = vmul.f32 %v16201_v26, %v20501_v17  ;;  %v16207_v17 = vld [vmem:[%s22292_s24 + $0x168] sm:$0xff]  ;;  %v20865_v54 = vmul.f32 %v16208_v36, %v20521_v24  ;;  %v16210_v37 = vld [vmem:[%s22292_s24 + $0x170] sm:$0xff] }
0x193d   : > { %22665 = vst [vmem:[#allocation85_spill] sm:$0xff] %v20805_v40  ;;  %22666 = vst [vmem:[#allocation67_spill] sm:$0xff] %v20809_v19  ;;  %v16205_v19 = vld [vmem:[%s22292_s24 + $0x1e8] sm:$0xff]  ;;  %v20861_v51 = vmul.f32 %v16207_v17, %v20509_v4  ;;  %v16211_v17 = vld [vmem:[%s22292_s24 + $0x178] sm:$0xff] }
0x193e   : > { %22667 = vst [vmem:[#allocation61_spill] sm:$0xff] %v20813_v52  ;;  %22668 = vst [vmem:[#allocation62_spill] sm:$0xff] %v20821_v57  ;;  %v20851_v26 = vmul.f32 %v16205_v19, %v20509_v4  ;;  %v20883_v36 = vmul.f32 %v16211_v17, %v20517_v2  ;;  %v16222_v55 = vld [vmem:[%s18833_s15 + $0x18] sm:$0xff]  ;;  %v16223_v34 = vld [vmem:[%s18833_s15 + $0x10] sm:$0xff] }
0x193f   : > { %22669 = vst [vmem:[#allocation63_spill] sm:$0xff] %v20825_v39  ;;  %22670 = vst [vmem:[#allocation66_spill] sm:$0xff] %v20833_v60  ;;  %v16209_v39 = vld [vmem:[%s22292_s24 + $0x1f8] sm:$0xff]  ;;  %v20877_v60 = vmul.f32 %v16210_v37, %v20521_v24 }
0x1940   : > { %22671 = vst [vmem:[#allocation64_spill] sm:$0xff] %v20837_v59  ;;  %22672 = vst [vmem:[#allocation65_spill] sm:$0xff] %v20843_v16  ;;  %v20873_v25 = vmul.f32 %v16209_v39, %v20517_v2  ;;  %v12647_v39 = vld [vmem:[%s22271_s9 + $0x1] ss:$0 sm:$0xff] }
0x1941   : > { %22673 = vst [vmem:[#allocation70_spill] sm:$0xff] %v20847_v1  ;;  %22674 = vst [vmem:[#allocation68_spill] sm:$0xff] %v20851_v26  ;;  %v12656_v1 = vld [vmem:[%s22273_s3 + $0x1] ss:$0 sm:$0xff] }
0x1942   : > { %22675 = vst [vmem:[#allocation69_spill] sm:$0xff] %v20857_v50  ;;  %22676 = vst [vmem:[#allocation71_spill] sm:$0xff] %v20861_v51 }
0x1943   : > { %22677 = vst [vmem:[#allocation72_spill] sm:$0xff] %v20865_v54  ;;  %22678 = vst [vmem:[#allocation73_spill] sm:$0xff] %v20873_v25 }
0x1944   : > { %22679 = vst [vmem:[#allocation74_spill] sm:$0xff] %v20877_v60  ;;  %22680 = vst [vmem:[#allocation75_spill] sm:$0xff] %v20883_v36 }
0x19df   : > { %v14513_v26 = vpop.f32.mrb[0].mxu1  ;;  %v14533_v59 = vpop.f32.mrb[220].mxu0 }
0x19e0   : > { %v9006_v16 = vadd.f32 %v14533_v59, %v12656_v1  ;;  %v8889_v24 = vpop.f32.mrb[1].mxu1  ;;  %v9000_v37 = vpop.f32.mrb[221].mxu0  ;;  %v20893_v50 = vadd.f32 %v14513_v26, %v12647_v39  ;;  %v22681_v59 = vld [vmem:[#allocation157_spill] sm:$0xff] }
0x19e1   : > { %v20891_v57 = vadd.f32 %v12647_v39, %v8889_v24  ;;  %v9001_v4 = vadd.f32 %v12656_v1, %v9000_v37 }
0x19e2   : > { %v9042_v2 = vsel %vm3927_vm3, %v9006_v16, -inf }
0x19e3   : > { %9043 = vmax.xlane.f32.xlu1 %v9042_v2  ;;  %14567 = vmatprep.mubr.msk.f32.mxu0 %vm1893_vm0, %v20891_v57  ;;  %v9039_v17 = vsel %vm3927_vm3, %v9001_v4, -inf }
0x19e4   : > { %9040 = vmax.xlane.f32.xlu0 %v9039_v17  ;;  %14568 = vmatmul.mubr.msk.f32.vlgmr.msra.gmra.mrb[226].mxu0 %vm1893_vm0, %v20893_v50 }
0x19e5   : > { %15434 = vmatpush3.bf16.msra.mxu0 %v22606_v18 }
0x19e6   : > { %15452 = vmatprep.subr.bf16.mxu0 %v22681_v59 }
0x19e7   : > { %v14516_v24 = vpop.f32.mrb[2].mxu1  ;;  %v14536_v37 = vpop.f32.mrb[222].mxu0 }
0x19e8   : > { %v9016_v26 = vadd.f32 %v14536_v37, %v12656_v1  ;;  %v8899_v33 = vpop.f32.mrb[3].mxu1  ;;  %v9010_v19 = vpop.f32.mrb[223].mxu0  ;;  %v20905_v36 = vadd.f32 %v14516_v24, %v12647_v39 }
0x19e9   : > { %v20903_v60 = vadd.f32 %v12647_v39, %v8899_v33  ;;  %v9011_v2 = vadd.f32 %v12656_v1, %v9010_v19 }
0x19ea   : > { %v9048_v54 = vsel %vm3927_vm3, %v9016_v26, -inf }
0x19eb   : > { %9049 = vmax.xlane.f32.xlu1 %v9048_v54  ;;  %14570 = vmatprep.mubr.msk.f32.mxu0 %vm1893_vm0, %v20903_v60  ;;  %v9045_v18 = vsel %vm3927_vm3, %v9011_v2, -inf }
0x19ec   : > { %9046 = vmax.xlane.f32.xlu0 %v9045_v18  ;;  %14571 = vmatmul.mubr.msk.f32.gmra.mrb[228].mxu0 %vm1893_vm0, %v20905_v36 }
0x19ef   : > { %v14519_v17 = vpop.f32.mrb[4].mxu1  ;;  %v14539_v59 = vpop.f32.mrb[224].mxu0 }
0x19f0   : > { %v9026_v37 = vadd.f32 %v14539_v59, %v12656_v1  ;;  %v8909_v33 = vpop.f32.mrb[5].mxu1  ;;  %v9020_v25 = vpop.f32.mrb[225].mxu0  ;;  %v20915_v51 = vadd.f32 %v14519_v17, %v12647_v39 }
0x19f1   : > { %v20913_v19 = vadd.f32 %v12647_v39, %v8909_v33  ;;  %v9021_v24 = vadd.f32 %v12656_v1, %v9020_v25 }
0x19f2   : > { %v9054_v54 = vsel %vm3927_vm3, %v9026_v37, -inf }
0x19f3   : > { %9055 = vmax.xlane.f32.xlu1 %v9054_v54  ;;  %14573 = vmatprep.mubr.msk.f32.mxu0 %vm1893_vm0, %v20913_v19  ;;  %v9051_v18 = vsel %vm3927_vm3, %v9021_v24, -inf }
0x19f4   : > { %9052 = vmax.xlane.f32.xlu0 %v9051_v18  ;;  %14574 = vmatmul.mubr.msk.f32.gmra.mrb[230].mxu0 %vm1893_vm0, %v20915_v51 }
0x19f7   : > { %v14522_v59 = vpop.f32.mrb[6].mxu1 }
0x19f8   : > { %v8919_v52 = vpop.f32.mrb[7].mxu1  ;;  %v20925_v33 = vadd.f32 %v14522_v59, %v12647_v39 }
0x19f9   : > { %v20923_v7 = vadd.f32 %v12647_v39, %v8919_v52 }
0x19fb   : > { %v14542_v25 = vpop.f32.mrb[8].mxu1  ;;  %14576 = vmatprep.mubr.msk.f32.mxu0 %vm1893_vm0, %v20923_v7 }
0x19fc   : > { %v9036_v17 = vadd.f32 %v14542_v25, %v12656_v1  ;;  %v9030_v54 = vpop.f32.mrb[9].mxu1  ;;  %14577 = vmatmul.mubr.msk.f32.gmra.mrb[232].mxu0 %vm1893_vm0, %v20925_v33 }
0x19fd   : > { %v9031_v40 = vadd.f32 %v12656_v1, %v9030_v54 }
0x19fe   : > { %v9060_v18 = vsel %vm3927_vm3, %v9036_v17, -inf }
0x19ff   : > { %9061 = vmax.xlane.f32.xlu1 %v9060_v18  ;;  %v9057_v5 = vsel %vm3927_vm3, %v9031_v40, -inf }
0x1a00   : > { %9058 = vmax.xlane.f32.xlu0 %v9057_v5 }
0x1a70   : > { %v9044_v52 = vpop.xlane.xlu1 %9043 }
0x1a71   : > { %v9064_v53 = vsub.f32 %v9006_v16, %v9044_v52  ;;  %v9041_v39 = vpop.xlane.xlu0 %9040 }
0x1a72   : > { %v9063_v59 = vsub.f32 %v9001_v4, %v9041_v39 }
0x1a73   : > { %v9073_v3 = vmul.f32 1.442695, %v9064_v53 }
0x1a74   : > { %v9071_v58 = vmul.f32 1.442695, %v9063_v59 }
0x1a76   : > { %15982 = vpow2.f32 %v9071_v58 }
0x1a77   : > { %15984 = vpow2.f32 %v9073_v3 }
0x1a78   : > { %v9050_v25 = vpop.xlane.xlu1 %9049 }
0x1a79   : > { %v9066_v30 = vsub.f32 %v9016_v26, %v9050_v25  ;;  %v9047_v44 = vpop.xlane.xlu0 %9046 }
0x1a7a   : > { %v9065_v29 = vsub.f32 %v9011_v2, %v9047_v44 }
0x1a7b   : > { %v9077_v32 = vmul.f32 1.442695, %v9066_v30  ;;  %v22683_v30 = vld [vmem:[#allocation92_spill] sm:$0xff] }
0x1a7c   : > { %v9075_v1 = vmul.f32 1.442695, %v9065_v29  ;;  %v22682_v29 = vld [vmem:[#allocation91_spill] sm:$0xff] }
0x1a7e   : > { %15986 = vpow2.f32 %v9075_v1 }
0x1a7f   : > { %15988 = vpow2.f32 %v9077_v32 }
0x1a80   : > { %v20933_v54 = vpop.eup %15982  ;;  %v9056_v18 = vpop.xlane.xlu1 %9055 }
0x1a81   : > { %v20935_v5 = vpop.eup %15984  ;;  %v9068_v16 = vsub.f32 %v9026_v37, %v9056_v18  ;;  %v9053_v52 = vpop.xlane.xlu0 %9052  ;;  %14547 = vmatprep.mubr.msk.f32.mxu1 %vm3927_vm3, %v20933_v54  ;;  %v22686_v18 = vld [vmem:[#allocation95_spill] sm:$0xff] }
0x1a82   : > { %v9067_v53 = vsub.f32 %v9021_v24, %v9053_v52  ;;  %14548 = vmatmul.mubr.msk.f32.vlgmr.msra.gmra.mrb[10].mxu1 %vm3927_vm3, %v20935_v5  ;;  %v22688_v52 = vld [vmem:[#allocation97_spill] sm:$0xff] }
0x1a83   : > { %v9081_v3 = vmul.f32 1.442695, %v9068_v16  ;;  %15426 = vmatpush3.bf16.msra.mxu1 %v22611_v56  ;;  %v22687_v16 = vld [vmem:[#allocation96_spill] sm:$0xff] }
0x1a84   : > { %v9079_v58 = vmul.f32 1.442695, %v9067_v53  ;;  %15428 = vmatprep.subr.bf16.mxu1 %v22682_v29  ;;  %v22689_v53 = vld [vmem:[#allocation98_spill] sm:$0xff] }
0x1a86   : > { %15990 = vpow2.f32 %v9079_v58  ;;  %v22691_v58 = vld [vmem:[#allocation170_spill] sm:$0xff] }
0x1a87   : > { %15992 = vpow2.f32 %v9081_v3  ;;  %15430 = vmatpush3.bf16.msra.mxu1 %v22682_v29  ;;  %v22690_v3 = vld [vmem:[#allocation99_spill] sm:$0xff] }
0x1a88   : > { %v20944_v32 = vpop.eup %15986  ;;  %15436 = vmatprep.subr.bf16.mxu1 %v22683_v30  ;;  %v16212_v30 = vld [vmem:[%s18094_s13 + $0x8] sm:$0xff] }
0x1a89   : > { %v20947_v44 = vpop.eup %15988  ;;  %14550 = vmatprep.mubr.msk.f32.mxu1 %vm3927_vm3, %v20944_v32 }
0x1a8a   : > { %14551 = vmatmul.mubr.msk.f32.gmra.mrb[12].mxu1 %vm3927_vm3, %v20947_v44 }
0x1a8c   : > { %v9062_v56 = vpop.xlane.xlu1 %9061 }
0x1a8d   : > { %v9070_v4 = vsub.f32 %v9036_v17, %v9062_v56  ;;  %v9059_v26 = vpop.xlane.xlu0 %9058  ;;  %v22685_v17 = vld [vmem:[#allocation94_spill] sm:$0xff] }
0x1a8e   : > { %v9069_v2 = vsub.f32 %v9031_v40, %v9059_v26  ;;  %v22684_v40 = vld [vmem:[#allocation93_spill] sm:$0xff]  ;;  %v16213_v26 = vld [vmem:[%s18094_s13] sm:$0xff] }
0x1a8f   : > { %v9085_v37 = vmul.f32 1.442695, %v9070_v4 }
0x1a90   : > { %v20953_v24 = vpop.eup %15990  ;;  %v9083_v39 = vmul.f32 1.442695, %v9069_v2 }
0x1a91   : > { %v20955_v59 = vpop.eup %15992  ;;  %14553 = vmatprep.mubr.msk.f32.mxu1 %vm3927_vm3, %v20953_v24 }
0x1a92   : > { %15994 = vpow2.f32 %v9083_v39  ;;  %14554 = vmatmul.mubr.msk.f32.gmra.mrb[14].mxu1 %vm3927_vm3, %v20955_v59 }
0x1a93   : > { %15996 = vpow2.f32 %v9085_v37 }
0x1a9c   : > { %v20961_v25 = vpop.eup %15994 }
0x1a9d   : > { %v20963_v1 = vpop.eup %15996  ;;  %14556 = vmatprep.mubr.msk.f32.mxu1 %vm3927_vm3, %v20961_v25 }
0x1a9e   : > { %14557 = vmatmul.mubr.msk.f32.gmra.mrb[16].mxu1 %vm3927_vm3, %v20963_v1 }
0x1a9f   : > { %14587 = vmatprep.mubr.msk.f32.mxu1 %vm1893_vm0, %v20891_v57 }
0x1aa2   : > { %14588 = vmatmul.mubr.msk.f32.vlgmr.msra.gmra.mrb[18].mxu1 %vm1893_vm0, %v20893_v50 }
0x1aa3   : > { %14590 = vmatprep.mubr.msk.f32.mxu1 %vm1893_vm0, %v20903_v60  ;;  %15438 = vmatpush1.bf16.msra.mxu1 %v22684_v40 }
0x1aa4   : > { %15440 = vmatprep.subr.bf16.mxu1 %v22685_v17 }
0x1aa6   : > { %14591 = vmatmul.mubr.msk.f32.gmra.mrb[20].mxu1 %vm1893_vm0, %v20905_v36 }
0x1aa7   : > { %14593 = vmatprep.mubr.msk.f32.mxu1 %vm1893_vm0, %v20913_v19  ;;  %15442 = vmatpush1.bf16.msra.mxu1 %v22686_v18 }
0x1aa8   : > { %15444 = vmatprep.subr.bf16.mxu1 %v22687_v16 }
0x1aaa   : > { %14594 = vmatmul.mubr.msk.f32.gmra.mrb[22].mxu1 %vm1893_vm0, %v20915_v51 }
0x1aab   : > { %14596 = vmatprep.mubr.msk.f32.mxu1 %vm1893_vm0, %v20923_v7  ;;  %15446 = vmatpush1.bf16.msra.mxu1 %v22688_v52  ;;  %v16214_v52 = vld [vmem:[%s18094_s13 + $0x18] sm:$0xff] }
0x1aac   : > { %15448 = vmatprep.subr.bf16.mxu1 %v22689_v53 }
0x1aae   : > { %14597 = vmatmul.mubr.msk.f32.gmra.mrb[24].mxu1 %vm1893_vm0, %v20925_v33 }
0x1aaf   : > { %15450 = vmatpush1.bf16.msra.mxu1 %v22690_v3  ;;  %9739 = vmatprep.mubr.f32.mxu1 %v22576_v22 }
0x1ab0   : > { %15468 = vmatprep.subr.bf16.mxu1 %v22691_v58  ;;  %v16215_v58 = vld [vmem:[%s18094_s13 + $0x10] sm:$0xff] }
0x1ab7   : > { %v14569_v29 = vpop.f32.mrb[226].mxu0 }
0x1ab8   : > { %v9328_v56 = vadd.f32 %v16212_v30, %v14569_v29  ;;  %v9322_v4 = vpop.f32.mrb[227].mxu0  ;;  %v22692_v29 = vld [vmem:[#allocation171_spill] sm:$0xff] }
0x1ab9   : > { %v9323_v2 = vadd.f32 %v16213_v26, %v9322_v4  ;;  %v22693_v26 = vld [vmem:[#allocation172_spill] sm:$0xff] }
0x1aba   : > { %v9467_v37 = vand.u32 2147483647, %v9328_v56 }
0x1abb   : > { %v9466_v39 = vand.u32 2147483647, %v9323_v2 }
0x1abc   : > { %v20998_v17 = vsub.f32 1.0, %v9467_v37  ;;  %v22694_v37 = vld [vmem:[#allocation173_spill] sm:$0xff] }
0x1abd   : > { %v20996_v40 = vsub.f32 1.0, %v9466_v39 }
0x1abe   : > { %v22091_v30 = vmax.f32 %v20998_v17, 0.0 }
0x1abf   : > { %v22093_v18 = vmax.f32 %v20996_v40, 0.0  ;;  %v14572_v16 = vpop.f32.mrb[228].mxu0  ;;  %v22708_v0 = vmax.f32 %v20996_v40, 0.0 }
0x1ac0   : > { %v9338_v53 = vadd.f32 %v16214_v52, %v14572_v16  ;;  %v9332_v3 = vpop.f32.mrb[229].mxu0 }
0x1ac1   : > { %v9333_v21 = vadd.f32 %v16215_v58, %v9332_v3  ;;  %12697 = vmatmul.mubr.msk.f32.vlgmr.msra.gmra.mrb[26].mxu1 %vm4584_vm4, %v22093_v18  ;;  %v22695_v3 = vld [vmem:[#allocation174_spill] sm:$0xff] }
0x1ac2   : > { %9745 = vmatprep.mubr.f32.mxu1 %v22576_v22  ;;  %15470 = vmatpush1.bf16.msra.mxu1 %v22692_v29  ;;  %v9469_v56 = vand.u32 2147483647, %v9338_v53  ;;  %v16217_v29 = vld [vmem:[%s18094_s13 + $0x20] sm:$0xff] }
0x1ac3   : > { %v9468_v4 = vand.u32 2147483647, %v9333_v21  ;;  %15472 = vmatprep.subr.bf16.mxu1 %v22693_v26  ;;  %v16216_v21 = vld [vmem:[%s18094_s13 + $0x28] sm:$0xff]  ;;  %v22696_v26 = vld [vmem:[#allocation175_spill] sm:$0xff] }
0x1ac4   : > { %v21017_v39 = vsub.f32 1.0, %v9469_v56 }
0x1ac5   : > { %v21010_v2 = vsub.f32 1.0, %v9468_v4  ;;  %12698 = vmatmul.mubr.msk.f32.gmra.mrb[28].mxu1 %vm4584_vm4, %v22091_v30 }
0x1ac6   : > { %9751 = vmatprep.mubr.f32.mxu1 %v22576_v22  ;;  %15474 = vmatpush1.bf16.msra.mxu1 %v22694_v37  ;;  %v22094_v56 = vmax.f32 %v21017_v39, 0.0 }
0x1ac7   : > { %v22092_v16 = vmax.f32 %v21010_v2, 0.0  ;;  %v14575_v52 = vpop.f32.mrb[230].mxu0  ;;  %15476 = vmatprep.subr.bf16.mxu1 %v22695_v3  ;;  %v22697_v3 = vld [vmem:[#allocation176_spill] sm:$0xff]  ;;  %v22714_v40 = vmax.f32 %v21010_v2, 0.0 }
0x1ac8   : > { %v9348_v53 = vadd.f32 %v16216_v21, %v14575_v52  ;;  %v9342_v58 = vpop.f32.mrb[231].mxu0  ;;  %v22698_v21 = vld [vmem:[#allocation177_spill] sm:$0xff] }
0x1ac9   : > { %v9343_v4 = vadd.f32 %v16217_v29, %v9342_v58  ;;  %12699 = vmatmul.mubr.msk.f32.gmra.mrb[30].mxu1 %vm4584_vm4, %v22092_v16  ;;  %v22699_v16 = vld [vmem:[#allocation194_spill] sm:$0xff] }
0x1aca   : > { %9757 = vmatprep.mubr.f32.mxu1 %v22576_v22  ;;  %15478 = vmatpush1.bf16.msra.mxu1 %v22696_v26  ;;  %v9471_v37 = vand.u32 2147483647, %v9348_v53  ;;  %v16218_v53 = vld [vmem:[%s18094_s13 + $0x38] sm:$0xff] }
0x1acb   : > { %v9470_v30 = vand.u32 2147483647, %v9343_v4  ;;  %15480 = vmatprep.subr.bf16.mxu1 %v22697_v3 }
0x1acc   : > { %v21037_v58 = vsub.f32 1.0, %v9471_v37 }
0x1acd   : > { %v21030_v52 = vsub.f32 1.0, %v9470_v30  ;;  %12700 = vmatmul.mubr.msk.f32.gmra.mrb[32].mxu1 %vm4584_vm4, %v22094_v56  ;;  %v16219_v30 = vld [vmem:[%s18094_s13 + $0x30] sm:$0xff]  ;;  %s22840_s13 = sld [smem:[#allocation60_spill]] }
0x1ace   : > { %9763 = vmatprep.mubr.f32.mxu1 %v22576_v22  ;;  %15482 = vmatpush1.bf16.msra.mxu1 %v22698_v21  ;;  %v22097_v21 = vmax.f32 %v21037_v58, 0.0 }
0x1acf   : > { %v22098_v29 = vmax.f32 %v21030_v52, 0.0  ;;  %v14578_v26 = vpop.f32.mrb[232].mxu0  ;;  %15500 = vmatprep.subr.bf16.mxu1 %v22699_v16 }
0x1ad0   : > { %v9358_v4 = vadd.f32 %v16218_v53, %v14578_v26  ;;  %v9352_v3 = vpop.f32.mrb[233].mxu0 }
0x1ad1   : > { %v9353_v18 = vadd.f32 %v16219_v30, %v9352_v3  ;;  %12701 = vmatmul.mubr.msk.f32.gmra.mrb[34].mxu1 %vm4584_vm4, %v22098_v29 }
0x1ad2   : > { %9769 = vmatprep.mubr.f32.mxu1 %v22576_v22  ;;  %v9473_v37 = vand.u32 2147483647, %v9358_v4 }
0x1ad3   : > { %v9472_v56 = vand.u32 2147483647, %v9353_v18 }
0x1ad4   : > { %v21054_v26 = vsub.f32 1.0, %v9473_v37 }
0x1ad5   : > { %v21048_v9 = vsub.f32 1.0, %v9472_v56  ;;  %12702 = vmatmul.mubr.msk.f32.gmra.mrb[36].mxu1 %vm4584_vm4, %v22097_v21 }
0x1ad6   : > { %9775 = vmatprep.mubr.f32.mxu1 %v22576_v22  ;;  %v22099_v18 = vmax.f32 %v21054_v26, 0.0 }
0x1ad7   : > { %v22096_v53 = vmax.f32 %v21048_v9, 0.0 }
0x1ad9   : > { %12703 = vmatmul.mubr.msk.f32.gmra.mrb[38].mxu1 %vm4584_vm4, %v22096_v53 }
0x1ada   : > { %9781 = vmatprep.mubr.f32.mxu1 %v22576_v22 }
0x1add   : > { %12704 = vmatmul.mubr.msk.f32.gmra.mrb[40].mxu1 %vm4584_vm4, %v22099_v18 }
0x1ade   : > { %9989 = vmatprep.mubr.f32.mxu1 %v22576_v22 }
0x1b55   : > { %v14549_v56 = vpop.f32.mrb[10].mxu1 }
0x1b56   : > { %15998 = vrcp.f32 %v14549_v56  ;;  %v9177_v4 = vpop.f32.mrb[11].mxu1 }
0x1b57   : > { %16000 = vrcp.f32 %v9177_v4  ;;  %v22700_v4 = vld [vmem:[#allocation178_spill] sm:$0xff] }
0x1b5d   : > { %v14552_v3 = vpop.f32.mrb[12].mxu1 }
0x1b5e   : > { %16002 = vrcp.f32 %v14552_v3  ;;  %v9187_v30 = vpop.f32.mrb[13].mxu1  ;;  %v22701_v3 = vld [vmem:[#allocation179_spill] sm:$0xff] }
0x1b5f   : > { %16004 = vrcp.f32 %v9187_v30 }
0x1b60   : > { %v15999_v37 = vpop.eup %15998 }
0x1b61   : > { %v16001_v53 = vpop.eup %16000  ;;  %v21070_v29 = vmul.f32 %v15999_v37, %v20935_v5  ;;  %v22702_v5 = vld [vmem:[#allocation180_spill] sm:$0xff] }
0x1b62   : > { %v21067_v21 = vmul.f32 %v16001_v53, %v20933_v54 }
0x1b64   : > { %14603 = vmatprep.mubr.msk.f32.mxu0 %vm3927_vm3, %v21067_v21 }
0x1b65   : > { %v14555_v18 = vpop.f32.mrb[14].mxu1  ;;  %14604 = vmatmul.mubr.msk.f32.vlgmr.msra.gmra.mrb[234].mxu0 %vm3927_vm3, %v21070_v29 }
0x1b66   : > { %16006 = vrcp.f32 %v14555_v18  ;;  %v9197_v56 = vpop.f32.mrb[15].mxu1  ;;  %15454 = vmatpush1.bf16.msra.mxu0 %v22700_v4  ;;  %v22704_v18 = vld [vmem:[#allocation182_spill] sm:$0xff] }
0x1b67   : > { %16008 = vrcp.f32 %v9197_v56  ;;  %15456 = vmatprep.subr.bf16.mxu0 %v22701_v3  ;;  %v22705_v56 = vld [vmem:[#allocation183_spill] sm:$0xff] }
0x1b68   : > { %v16003_v30 = vpop.eup %16002 }
0x1b69   : > { %v16005_v54 = vpop.eup %16004  ;;  %v21083_v37 = vmul.f32 %v16003_v30, %v20947_v44  ;;  %v22706_v30 = vld [vmem:[#allocation184_spill] sm:$0xff] }
0x1b6a   : > { %v21079_v53 = vmul.f32 %v16005_v54, %v20944_v32  ;;  %15458 = vmatpush1.bf16.msra.mxu0 %v22702_v5  ;;  %v22707_v5 = vld [vmem:[#allocation185_spill] sm:$0xff] }
0x1b6b   : > { %15460 = vmatprep.subr.bf16.mxu0 %v22703_v62 }
0x1b6c   : > { %14606 = vmatprep.mubr.msk.f32.mxu0 %vm3927_vm3, %v21079_v53 }
0x1b6d   : > { %14607 = vmatmul.mubr.msk.f32.gmra.mrb[236].mxu0 %vm3927_vm3, %v21083_v37 }
0x1b6e   : > { %15462 = vmatpush1.bf16.msra.mxu0 %v22704_v18 }
0x1b6f   : > { %15464 = vmatprep.subr.bf16.mxu0 %v22705_v56 }
0x1b70   : > { %v16007_v4 = vpop.eup %16006 }
0x1b71   : > { %v16009_v32 = vpop.eup %16008  ;;  %v14558_v3 = vpop.f32.mrb[16].mxu1  ;;  %v21097_v62 = vmul.f32 %v16007_v4, %v20955_v59 }
0x1b72   : > { %16010 = vrcp.f32 %v14558_v3  ;;  %v9207_v54 = vpop.f32.mrb[17].mxu1  ;;  %v21093_v44 = vmul.f32 %v16009_v32, %v20953_v24  ;;  %15466 = vmatpush1.bf16.msra.mxu0 %v22706_v30 }
0x1b73   : > { %16012 = vrcp.f32 %v9207_v54  ;;  %15484 = vmatprep.subr.bf16.mxu0 %v22707_v5 }
0x1b74   : > { %14609 = vmatprep.mubr.msk.f32.mxu0 %vm3927_vm3, %v21093_v44 }
0x1b75   : > { %v14589_v18 = vpop.f32.mrb[18].mxu1  ;;  %14610 = vmatmul.mubr.msk.f32.gmra.mrb[238].mxu0 %vm3927_vm3, %v21097_v62 }
0x1b76   : > { %v9427_v56 = vpop.f32.mrb[19].mxu1 }
0x1b77   : > { %v9428_v14 = vadd.f32 %v16221_v8, %v9427_v56  ;;  %v16225_v56 = vld [vmem:[%s18833_s15 + $0x20] sm:$0xff] }
0x1b79   : > { %v14592_v3 = vpop.f32.mrb[20].mxu1  ;;  %v9490_v46 = vand.u32 2147483647, %v9428_v14 }
0x1b7a   : > { %v21104_v27 = vpop.f32.mrb[21].mxu1  ;;  %v9443_v28 = vadd.f32 %v16222_v55, %v14592_v3 }
0x1b7b   : > { %v9498_v11 = vsub.f32 1.0, %v9490_v46  ;;  %v9438_v63 = vadd.f32 %v16223_v34, %v21104_v27  ;;  %v22724_v27 = vld [vmem:[#allocation196_spill] sm:$0xff]  ;;  %v22726_v46 = vld [vmem:[#allocation198_spill] sm:$0xff] }
0x1b7c   : > { %v16011_v24 = vpop.eup %16010  ;;  %v9493_v20 = vand.u32 2147483647, %v9443_v28 }
0x1b7d   : > { %v16013_v32 = vpop.eup %16012  ;;  %v21106_v30 = vpop.f32.mrb[22].mxu1  ;;  %v21114_v4 = vmul.f32 %v16011_v24, %v20963_v1  ;;  %v22710_v1 = vld [vmem:[#allocation187_spill] sm:$0xff]  ;;  %v22711_v24 = vmax.f32 %v20998_v17, 0.0  ;;  %v22717_v17 = vmax.f32 %v21017_v39, 0.0  ;;  %v9506_v13 = vmax.f32 %v9498_v11, 0.0 }
0x1b7e   : > { %v21108_v54 = vpop.f32.mrb[23].mxu1  ;;  %v21111_v59 = vmul.f32 %v16013_v32, %v20961_v25  ;;  %v22709_v25 = vld [vmem:[#allocation186_spill] sm:$0xff]  ;;  %v22712_v32 = vld [vmem:[#allocation188_spill] sm:$0xff]  ;;  %v9492_v47 = vand.u32 2147483647, %v9438_v63  ;;  %v9501_v8 = vsub.f32 1.0, %v9493_v20 }
0x1b7f   : > { %v9448_v55 = vadd.f32 %v16225_v56, %v21108_v54  ;;  %v22725_v63 = vld [vmem:[#allocation197_spill] sm:$0xff] }
0x1b80   : > { %14612 = vmatprep.mubr.msk.f32.mxu0 %vm3927_vm3, %v21111_v59  ;;  %v9509_v20 = vmax.f32 %v9501_v8, 0.0 }
0x1b81   : > { %v21118_v5 = vpop.f32.mrb[24].mxu1  ;;  %14613 = vmatmul.mubr.msk.f32.gmra.mrb[240].mxu0 %vm3927_vm3, %v21114_v4  ;;  %v9494_v28 = vand.u32 2147483647, %v9448_v55 }
0x1b82   : > { %v21122_v38 = vpop.f32.mrb[25].mxu1  ;;  %9852 = vmatprep.mubr.f32.mxu0 %v22576_v22 }
0x1b83   : > { %v9502_v3 = vsub.f32 1.0, %v9494_v28 }
0x1b85   : > { %12705 = vmatmul.mubr.msk.f32.vlgmr.msra.gmra.mrb[242].mxu0 %vm4584_vm4, %v22708_v0  ;;  %v22715_v0 = vld [vmem:[#allocation190_spill] sm:$0xff] }
0x1b86   : > { %9858 = vmatprep.mubr.f32.mxu0 %v22576_v22  ;;  %15486 = vmatpush1.bf16.msra.mxu0 %v22709_v25  ;;  %v22716_v25 = vld [vmem:[#allocation192_spill] sm:$0xff] }
0x1b87   : > { %15488 = vmatprep.subr.bf16.mxu0 %v22710_v1  ;;  %v22718_v1 = vld [vmem:[#allocation193_spill] sm:$0xff] }
0x1b89   : > { %12706 = vmatmul.mubr.msk.f32.gmra.mrb[244].mxu0 %vm4584_vm4, %v22711_v24  ;;  %v22719_v24 = vld [vmem:[#allocation195_spill] sm:$0xff] }
0x1b8a   : > { %9864 = vmatprep.mubr.f32.mxu0 %v22576_v22  ;;  %15490 = vmatpush1.bf16.msra.mxu0 %v22712_v32  ;;  %v22720_v32 = vmax.f32 %v21030_v52, 0.0  ;;  %v22722_v52 = vmax.f32 %v21048_v9, 0.0 }
0x1b8b   : > { %15492 = vmatprep.subr.bf16.mxu0 %v22713_v49 }
0x1b8d   : > { %12707 = vmatmul.mubr.msk.f32.gmra.mrb[246].mxu0 %vm4584_vm4, %v22714_v40 }
0x1b8e   : > { %9870 = vmatprep.mubr.f32.mxu0 %v22576_v22  ;;  %15494 = vmatpush1.bf16.msra.mxu0 %v22715_v0  ;;  %v22721_v0 = vmax.f32 %v21037_v58, 0.0  ;;  %v22723_v58 = vmax.f32 %v21054_v26, 0.0 }
0x1b8f   : > { %15496 = vmatprep.subr.bf16.mxu0 %v22716_v25 }
0x1b91   : > { %12708 = vmatmul.mubr.msk.f32.gmra.mrb[248].mxu0 %vm4584_vm4, %v22717_v17 }
0x1b92   : > { %9876 = vmatprep.mubr.f32.mxu0 %v22576_v22  ;;  %15498 = vmatpush1.bf16.msra.mxu0 %v22718_v1 }
0x1b93   : > { %15508 = vmatprep.subr.bf16.mxu0 %v22719_v24 }
0x1b94   : > { %v21149_v49 = vpop.f32.mrb[26].mxu1 }
0x1b95   : > { %v21151_v2 = vpop.f32.mrb[27].mxu1  ;;  %12709 = vmatmul.mubr.msk.f32.gmra.mrb[250].mxu0 %vm4584_vm4, %v22720_v32 }
0x1b96   : > { %9882 = vmatprep.mubr.f32.mxu0 %v22576_v22 }
0x1b98   : > { %v21157_v40 = vpop.f32.mrb[28].mxu1 }
0x1b99   : > { %v21159_v39 = vpop.f32.mrb[29].mxu1  ;;  %12710 = vmatmul.mubr.msk.f32.gmra.mrb[252].mxu0 %vm4584_vm4, %v22721_v0 }
0x1b9a   : > { %9888 = vmatprep.mubr.f32.mxu0 %v22576_v22 }
0x1b9c   : > { %v21165_v25 = vpop.f32.mrb[30].mxu1 }
0x1b9d   : > { %v21167_v17 = vpop.f32.mrb[31].mxu1  ;;  %12711 = vmatmul.mubr.msk.f32.gmra.mrb[254].mxu0 %vm4584_vm4, %v22722_v52 }
0x1b9e   : > { %9894 = vmatprep.mubr.f32.mxu0 %v22576_v22 }
0x1ba0   : > { %v21173_v1 = vpop.f32.mrb[32].mxu1 }
0x1ba1   : > { %v21175_v32 = vpop.f32.mrb[33].mxu1  ;;  %12712 = vmatmul.mubr.msk.f32.gmra.mrb[0].mxu0 %vm4584_vm4, %v22723_v58  ;;  %v16220_v58 = vld [vmem:[%s18833_s15 + $0x8] sm:$0xff] }
0x1ba2   : > { %10102 = vmatprep.mubr.f32.mxu0 %v22576_v22  ;;  %v9433_v12 = vadd.f32 %v16220_v58, %v14589_v18 }
0x1ba4   : > { %v21181_v0 = vpop.f32.mrb[34].mxu1  ;;  %v9491_v35 = vand.u32 2147483647, %v9433_v12  ;;  %v16224_v12 = vld [vmem:[%s18833_s15 + $0x28] sm:$0xff] }
0x1ba5   : > { %v21183_v48 = vpop.f32.mrb[35].mxu1  ;;  %v9453_v14 = vadd.f32 %v16224_v12, %v21106_v30  ;;  %v16226_v30 = vld [vmem:[%s18833_s15 + $0x38] sm:$0xff] }
0x1ba6   : > { %v9499_v6 = vsub.f32 1.0, %v9491_v35  ;;  %v9500_v35 = vsub.f32 1.0, %v9492_v47  ;;  %v9463_v54 = vadd.f32 %v16226_v30, %v21118_v5 }
0x1ba8   : > { %v21185_v9 = vpop.f32.mrb[36].mxu1  ;;  %v9507_v42 = vmax.f32 %v9499_v6, 0.0  ;;  %v9497_v56 = vand.u32 2147483647, %v9463_v54 }
0x1ba9   : > { %v21187_v52 = vpop.f32.mrb[37].mxu1 }
0x1bac   : > { %v21189_v10 = vpop.f32.mrb[38].mxu1 }
0x1bad   : > { %v21191_v23 = vpop.f32.mrb[39].mxu1 }
0x1bb0   : > { %v21193_v43 = vpop.f32.mrb[40].mxu1 }
0x1bb1   : > { %v21195_v26 = vpop.f32.mrb[41].mxu1 }
0x1c38   : > { %v14605_v41 = vpop.f32.mrb[234].mxu0 }
0x1c39   : > { %v9644_v31 = vmul.f32 %v14605_v41, %v9507_v42  ;;  %v9604_v18 = vpop.f32.mrb[235].mxu0  ;;  %v9508_v42 = vmax.f32 %v9500_v35, 0.0 }
0x1c3a   : > { %v9643_v58 = vmul.f32 %v9604_v18, %v9506_v13  ;;  %v9495_v13 = vand.u32 2147483647, %v9453_v14  ;;  %v16227_v18 = vld [vmem:[%s18833_s15 + $0x30] sm:$0xff]  ;;  %s21770_s15 = scalar_lea.vmem %s22841_s6, %s22840_s13 }
0x1c3c   : > { %12713 = vmatmul.mubr.msk.f32.vlgmr.msra.gmra.mrb[42].mxu1 %vm4584_vm4, %v9643_v58  ;;  %12721 = vmatmul.mubr.msk.f32.vlgmr.msra.gmra.mrb[2].mxu0 %vm4584_vm4, %v9643_v58  ;;  %v9503_v34 = vsub.f32 1.0, %v9495_v13  ;;  %v9458_v58 = vadd.f32 %v16227_v18, %v21122_v38  ;;  %v9505_v38 = vsub.f32 1.0, %v9497_v56 }
0x1c3d   : > { %9995 = vmatprep.mubr.f32.mxu1 %v22576_v22  ;;  %10108 = vmatprep.mubr.f32.mxu0 %v22576_v22 }
0x1c3e   : > { %15502 = vmatpush3.bf16.msra.mxu1 %v22699_v16  ;;  %15510 = vmatpush3.bf16.msra.mxu0 %v22719_v24  ;;  %v22727_v16 = vld [vmem:[#allocation199_spill] sm:$0xff]  ;;  %v9510_v24 = vmax.f32 %v9502_v3, 0.0  ;;  %v9496_v55 = vand.u32 2147483647, %v9458_v58  ;;  %v22729_v3 = vld [vmem:[#allocation201_spill] sm:$0xff] }
0x1c3f   : > { %15504 = vmatprep.subr.bf16.mxu1 %v22724_v27  ;;  %15512 = vmatprep.subr.bf16.mxu0 %v22725_v63 }
0x1c40   : > { %v14608_v11 = vpop.f32.mrb[236].mxu0  ;;  %12714 = vmatmul.mubr.msk.f32.gmra.mrb[44].mxu1 %vm4584_vm4, %v9644_v31  ;;  %12722 = vmatmul.mubr.msk.f32.gmra.mrb[4].mxu0 %vm4584_vm4, %v9644_v31  ;;  %v9511_v31 = vmax.f32 %v9503_v34, 0.0  ;;  %v9504_v5 = vsub.f32 1.0, %v9496_v55 }
0x1c41   : > { %v9646_v6 = vmul.f32 %v14608_v11, %v9509_v20  ;;  %v9614_v41 = vpop.f32.mrb[237].mxu0  ;;  %10001 = vmatprep.mubr.f32.mxu1 %v22576_v22  ;;  %10114 = vmatprep.mubr.f32.mxu0 %v22576_v22  ;;  %v9513_v20 = vmax.f32 %v9505_v38, 0.0 }
0x1c42   : > { %v9645_v47 = vmul.f32 %v9614_v41, %v9508_v42  ;;  %15506 = vmatpush3.bf16.msra.mxu1 %v22724_v27  ;;  %15514 = vmatpush3.bf16.msra.mxu0 %v22725_v63  ;;  %v9512_v13 = vmax.f32 %v9504_v5, 0.0 }
0x1c43   : > { %15516 = vmatprep.subr.bf16.mxu1 %v22726_v46  ;;  %15520 = vmatprep.subr.bf16.mxu0 %v22727_v16 }
0x1c44   : > { %12715 = vmatmul.mubr.msk.f32.gmra.mrb[46].mxu1 %vm4584_vm4, %v9645_v47  ;;  %12723 = vmatmul.mubr.msk.f32.gmra.mrb[6].mxu0 %vm4584_vm4, %v9645_v47 }
0x1c45   : > { %10007 = vmatprep.mubr.f32.mxu1 %v22576_v22  ;;  %10120 = vmatprep.mubr.f32.mxu0 %v22576_v22 }
0x1c48   : > { %v14611_v8 = vpop.f32.mrb[238].mxu0  ;;  %12716 = vmatmul.mubr.msk.f32.gmra.mrb[48].mxu1 %vm4584_vm4, %v9646_v6  ;;  %12724 = vmatmul.mubr.msk.f32.gmra.mrb[8].mxu0 %vm4584_vm4, %v9646_v6 }
0x1c49   : > { %v9648_v12 = vmul.f32 %v14611_v8, %v9511_v31  ;;  %v9624_v14 = vpop.f32.mrb[239].mxu0  ;;  %10013 = vmatprep.mubr.f32.mxu1 %v22576_v22  ;;  %10126 = vmatprep.mubr.f32.mxu0 %v22576_v22 }
0x1c4a   : > { %v9647_v35 = vmul.f32 %v9624_v14, %v9510_v24 }
0x1c4c   : > { %12717 = vmatmul.mubr.msk.f32.gmra.mrb[50].mxu1 %vm4584_vm4, %v9647_v35  ;;  %12725 = vmatmul.mubr.msk.f32.gmra.mrb[10].mxu0 %vm4584_vm4, %v9647_v35 }
0x1c4d   : > { %10019 = vmatprep.mubr.f32.mxu1 %v22576_v22  ;;  %10132 = vmatprep.mubr.f32.mxu0 %v22576_v22 }
0x1c50   : > { %12718 = vmatmul.mubr.msk.f32.gmra.mrb[52].mxu1 %vm4584_vm4, %v9648_v12  ;;  %12726 = vmatmul.mubr.msk.f32.gmra.mrb[12].mxu0 %vm4584_vm4, %v9648_v12 }
0x1c51   : > { %10025 = vmatprep.mubr.f32.mxu1 %v22576_v22  ;;  %10138 = vmatprep.mubr.f32.mxu0 %v22576_v22 }
0x1c54   : > { %v14614_v27 = vpop.f32.mrb[240].mxu0 }
0x1c55   : > { %v9650_v63 = vmul.f32 %v14614_v27, %v9513_v20  ;;  %v9634_v42 = vpop.f32.mrb[241].mxu0 }
0x1c56   : > { %v9649_v28 = vmul.f32 %v9634_v42, %v9512_v13 }
0x1c58   : > { %v9854_v11 = vpop.f32.mrb[242].mxu0  ;;  %12719 = vmatmul.mubr.msk.f32.gmra.mrb[54].mxu1 %vm4584_vm4, %v9649_v28  ;;  %12727 = vmatmul.mubr.msk.f32.gmra.mrb[14].mxu0 %vm4584_vm4, %v9649_v28 }
0x1c59   : > { %v9856_v6 = vpop.f32.mrb[243].mxu0  ;;  %10031 = vmatprep.mubr.f32.mxu1 %v22576_v22  ;;  %10144 = vmatprep.mubr.f32.mxu0 %v22576_v22 }
0x1c5c   : > { %v9860_v41 = vpop.f32.mrb[244].mxu0  ;;  %12720 = vmatmul.mubr.msk.f32.gmra.mrb[56].mxu1 %vm4584_vm4, %v9650_v63  ;;  %12728 = vmatmul.mubr.msk.f32.gmra.mrb[16].mxu0 %vm4584_vm4, %v9650_v63 }
0x1c5d   : > { %v9862_v47 = vpop.f32.mrb[245].mxu0  ;;  %14623 = vmatprep.mubr.msk.f32.mxu1 %vm1893_vm0, %v20891_v57  ;;  %14643 = vmatprep.mubr.msk.f32.mxu0 %vm1893_vm0, %v20891_v57  ;;  %v22728_v57 = vld [vmem:[#allocation200_spill] sm:$0xff] }
0x1c60   : > { %v21252_v34 = vpop.f32.mrb[246].mxu0  ;;  %14624 = vmatmul.mubr.msk.f32.vlgmr.msra.gmra.mrb[58].mxu1 %vm1893_vm0, %v20893_v50  ;;  %14644 = vmatmul.mubr.msk.f32.vlgmr.msra.gmra.mrb[18].mxu0 %vm1893_vm0, %v20893_v50 }
0x1c61   : > { %15518 = vmatpush3.bf16.msra.mxu1 %v22726_v46  ;;  %15522 = vmatpush3.bf16.msra.mxu0 %v22727_v16  ;;  %v9868_v22 = vpop.f32.mrb[247].mxu0  ;;  %v22730_v16 = vld [vmem:[#allocation202_spill] sm:$0xff] }
0x1c62   : > { %14626 = vmatprep.mubr.msk.f32.mxu1 %vm1893_vm0, %v20903_v60  ;;  %14646 = vmatprep.mubr.msk.f32.mxu0 %vm1893_vm0, %v20903_v60 }
0x1c63   : > { %15524 = vmatprep.subr.bf16.mxu0 %v22728_v57  ;;  %15528 = vmatprep.subr.bf16.mxu1 %v22729_v3 }
0x1c64   : > { %v9872_v31 = vpop.f32.mrb[248].mxu0  ;;  %14627 = vmatmul.mubr.msk.f32.gmra.mrb[60].mxu1 %vm1893_vm0, %v20905_v36  ;;  %14647 = vmatmul.mubr.msk.f32.gmra.mrb[20].mxu0 %vm1893_vm0, %v20905_v36 }
0x1c65   : > { %15526 = vmatpush3.bf16.msra.mxu0 %v22728_v57  ;;  %v9874_v50 = vpop.f32.mrb[249].mxu0  ;;  %14629 = vmatprep.mubr.msk.f32.mxu1 %vm1893_vm0, %v20913_v19 }
0x1c66   : > { %14649 = vmatprep.mubr.msk.f32.mxu0 %vm1893_vm0, %v20913_v19  ;;  %15536 = vmatprep.subr.bf16.mxu0 %v20747_v45 }
0x1c68   : > { %v9878_v60 = vpop.f32.mrb[250].mxu0  ;;  %14630 = vmatmul.mubr.msk.f32.gmra.mrb[62].mxu1 %vm1893_vm0, %v20915_v51  ;;  %14650 = vmatmul.mubr.msk.f32.gmra.mrb[22].mxu0 %vm1893_vm0, %v20915_v51 }
0x1c69   : > { %v9880_v46 = vpop.f32.mrb[251].mxu0  ;;  %14632 = vmatprep.mubr.msk.f32.mxu1 %vm1893_vm0, %v20923_v7  ;;  %14652 = vmatprep.mubr.msk.f32.mxu0 %vm1893_vm0, %v20923_v7 }
0x1c6c   : > { %v21284_v36 = vpop.f32.mrb[252].mxu0  ;;  %14633 = vmatmul.mubr.msk.f32.gmra.mrb[64].mxu1 %vm1893_vm0, %v20925_v33  ;;  %14653 = vmatmul.mubr.msk.f32.gmra.mrb[24].mxu0 %vm1893_vm0, %v20925_v33 }
0x1c6d   : > { %v21290_v19 = vpop.f32.mrb[253].mxu0  ;;  %14659 = vmatprep.mubr.msk.f32.mxu1 %vm3927_vm3, %v21067_v21 }
0x1c70   : > { %v21294_v51 = vpop.f32.mrb[254].mxu0  ;;  %14660 = vmatmul.mubr.msk.f32.vlgmr.msra.gmra.mrb[66].mxu1 %vm3927_vm3, %v21070_v29  ;;  %v22731_v29 = vpack.c.bf16 %v20528_v15, %v20524_v61 }
0x1c71   : > { %15530 = vmatpush3.bf16.msra.mxu1 %v22729_v3  ;;  %v21299_v7 = vpop.f32.mrb[255].mxu0  ;;  %14662 = vmatprep.mubr.msk.f32.mxu1 %vm3927_vm3, %v21079_v53 }
0x1c72   : > { %15532 = vmatprep.subr.bf16.mxu1 %v22730_v16 }
0x1c74   : > { %v21304_v33 = vpop.f32.mrb[0].mxu0  ;;  %14663 = vmatmul.mubr.msk.f32.gmra.mrb[68].mxu1 %vm3927_vm3, %v21083_v37 }
0x1c75   : > { %15534 = vmatpush3.bf16.msra.mxu1 %v22730_v16  ;;  %v21309_v21 = vpop.f32.mrb[1].mxu0  ;;  %14665 = vmatprep.mubr.msk.f32.mxu1 %vm3927_vm3, %v21093_v44 }
0x1c76   : > { %15568 = vmatprep.subr.bf16.mxu1 %v22731_v29 }
0x1c78   : > { %14666 = vmatmul.mubr.msk.f32.gmra.mrb[70].mxu1 %vm3927_vm3, %v21097_v62 }
0x1c79   : > { %14668 = vmatprep.mubr.msk.f32.mxu1 %vm3927_vm3, %v21111_v59 }
0x1c7c   : > { %14669 = vmatmul.mubr.msk.f32.gmra.mrb[72].mxu1 %vm3927_vm3, %v21114_v4 }
0x1d0f   : > { %v9991_v53 = vpop.f32.mrb[42].mxu1  ;;  %v10104_v37 = vpop.f32.mrb[2].mxu0 }
0x1d10   : > { %v21323_v30 = vmul.f32 %v9991_v53, %v21149_v49  ;;  %v21325_v54 = vmul.f32 %v10104_v37, %v9854_v11  ;;  %v9993_v44 = vpop.f32.mrb[43].mxu1  ;;  %v10106_v24 = vpop.f32.mrb[3].mxu0 }
0x1d11   : > { %v21328_v61 = vmul.f32 %v9993_v44, %v21151_v2  ;;  %v21330_v15 = vmul.f32 %v10106_v24, %v9856_v6 }
0x1d13   : > { %v9997_v62 = vpop.f32.mrb[44].mxu1  ;;  %v10110_v18 = vpop.f32.mrb[4].mxu0 }
0x1d14   : > { %v21333_v59 = vmul.f32 %v9997_v62, %v21157_v40  ;;  %v21335_v4 = vmul.f32 %v10110_v18, %v9860_v41  ;;  %v9999_v58 = vpop.f32.mrb[45].mxu1  ;;  %v10112_v8 = vpop.f32.mrb[5].mxu0 }
0x1d15   : > { %v21338_v49 = vmul.f32 %v9999_v58, %v21159_v39  ;;  %v21340_v12 = vmul.f32 %v10112_v8, %v9862_v47  ;;  %v16228_v8 = vld [vmem:[%s19095_s19 + $0x8] sm:$0xff] }
0x1d17   : > { %v10003_v14 = vpop.f32.mrb[46].mxu1  ;;  %v10116_v35 = vpop.f32.mrb[6].mxu0 }
0x1d18   : > { %v21343_v2 = vmul.f32 %v10003_v14, %v21165_v25  ;;  %v21346_v56 = vmul.f32 %v10116_v35, %v21252_v34  ;;  %v10005_v55 = vpop.f32.mrb[47].mxu1  ;;  %v10118_v40 = vpop.f32.mrb[7].mxu0 }
0x1d19   : > { %v21349_v38 = vmul.f32 %v10005_v55, %v21167_v17  ;;  %v21351_v5 = vmul.f32 %v10118_v40, %v9868_v22  ;;  %v16229_v55 = vld [vmem:[%s19095_s19] sm:$0xff] }
0x1d1b   : > { %v10009_v20 = vpop.f32.mrb[48].mxu1  ;;  %v10122_v39 = vpop.f32.mrb[8].mxu0 }
0x1d1c   : > { %v21354_v13 = vmul.f32 %v10009_v20, %v21173_v1  ;;  %v21356_v27 = vmul.f32 %v10122_v39, %v9872_v31  ;;  %v10011_v63 = vpop.f32.mrb[49].mxu1  ;;  %v10124_v25 = vpop.f32.mrb[9].mxu0  ;;  %v16230_v20 = vld [vmem:[%s19112_s12 + $0x8] sm:$0xff] }
0x1d1d   : > { %v21359_v42 = vmul.f32 %v10011_v63, %v21175_v32  ;;  %v21361_v28 = vmul.f32 %v10124_v25, %v9874_v50 }
0x1d1f   : > { %v10015_v11 = vpop.f32.mrb[50].mxu1  ;;  %v10128_v6 = vpop.f32.mrb[10].mxu0 }
0x1d20   : > { %v21364_v17 = vmul.f32 %v10015_v11, %v21181_v0  ;;  %v21366_v41 = vmul.f32 %v10128_v6, %v9878_v60  ;;  %v10017_v47 = vpop.f32.mrb[51].mxu1  ;;  %v10130_v34 = vpop.f32.mrb[11].mxu0  ;;  %v16231_v11 = vld [vmem:[%s19112_s12] sm:$0xff] }
0x1d21   : > { %v21369_v1 = vmul.f32 %v10017_v47, %v21183_v48  ;;  %v21371_v22 = vmul.f32 %v10130_v34, %v9880_v46  ;;  %v16232_v47 = vld [vmem:[%s19095_s19 + $0x18] sm:$0xff] }
0x1d23   : > { %v10021_v57 = vpop.f32.mrb[52].mxu1  ;;  %v10134_v3 = vpop.f32.mrb[12].mxu0 }
0x1d24   : > { %v21374_v32 = vmul.f32 %v10021_v57, %v21185_v9  ;;  %v21377_v31 = vmul.f32 %v10134_v3, %v21284_v36  ;;  %v10023_v50 = vpop.f32.mrb[53].mxu1  ;;  %v10136_v0 = vpop.f32.mrb[13].mxu0 }
0x1d25   : > { %v21380_v60 = vmul.f32 %v10023_v50, %v21187_v52  ;;  %v21383_v16 = vmul.f32 %v10136_v0, %v21290_v19  ;;  %v16233_v0 = vld [vmem:[%s19112_s12 + $0x18] sm:$0xff] }
0x1d2b   : > { %v10027_v48 = vpop.f32.mrb[54].mxu1  ;;  %v10140_v29 = vpop.f32.mrb[14].mxu0 }
0x1d2c   : > { %v21386_v46 = vmul.f32 %v10027_v48, %v21189_v10  ;;  %v21389_v9 = vmul.f32 %v10140_v29, %v21294_v51  ;;  %v10029_v53 = vpop.f32.mrb[55].mxu1  ;;  %v10142_v36 = vpop.f32.mrb[15].mxu0  ;;  %v16234_v29 = vld [vmem:[%s19095_s19 + $0x10] sm:$0xff] }
0x1d2d   : > { %v21392_v37 = vmul.f32 %v10029_v53, %v21191_v23  ;;  %v21395_v52 = vmul.f32 %v10142_v36, %v21299_v7 }
0x1d2f   : > { %v10033_v19 = vpop.f32.mrb[56].mxu1  ;;  %v10146_v44 = vpop.f32.mrb[16].mxu0 }
0x1d30   : > { %v21398_v24 = vmul.f32 %v10033_v19, %v21193_v43  ;;  %v21401_v10 = vmul.f32 %v10146_v44, %v21304_v33  ;;  %v10035_v51 = vpop.f32.mrb[57].mxu1  ;;  %v10148_v62 = vpop.f32.mrb[17].mxu0 }
0x1d31   : > { %v21404_v18 = vmul.f32 %v10035_v51, %v21195_v26  ;;  %v21407_v23 = vmul.f32 %v10148_v62, %v21309_v21  ;;  %v16235_v62 = vld [vmem:[%s19112_s12 + $0x10] sm:$0xff] }
0x1d33   : > { %v14625_v7 = vpop.f32.mrb[58].mxu1  ;;  %v14645_v58 = vpop.f32.mrb[18].mxu0 }
0x1d34   : > { %v10319_v14 = vadd.f32 %v16228_v8, %v14625_v7  ;;  %v10313_v35 = vpop.f32.mrb[59].mxu1  ;;  %v10418_v43 = vpop.f32.mrb[19].mxu0  ;;  %v10424_v39 = vadd.f32 %v16230_v20, %v14645_v58 }
0x1d35   : > { %v10314_v33 = vadd.f32 %v16229_v55, %v10313_v35  ;;  %v10419_v6 = vadd.f32 %v16231_v11, %v10418_v43  ;;  %v16238_v11 = vld [vmem:[%s19095_s19 + $0x20] sm:$0xff] }
0x1d36   : > { %v10458_v40 = vand.u32 2147483647, %v10319_v14  ;;  %v10482_v19 = vand.u32 2147483647, %v10424_v39  ;;  %v16237_v39 = vld [vmem:[%s19112_s12 + $0x28] sm:$0xff] }
0x1d37   : > { %v10457_v26 = vand.u32 2147483647, %v10314_v33  ;;  %v14628_v63 = vpop.f32.mrb[60].mxu1  ;;  %v14648_v25 = vpop.f32.mrb[20].mxu0  ;;  %v10481_v8 = vand.u32 2147483647, %v10419_v6 }
0x1d38   : > { %v10466_v21 = vsub.f32 1.0, %v10458_v40  ;;  %v10329_v34 = vadd.f32 %v16232_v47, %v14628_v63  ;;  %v10323_v57 = vpop.f32.mrb[61].mxu1  ;;  %v10428_v3 = vpop.f32.mrb[21].mxu0  ;;  %v10434_v48 = vadd.f32 %v16233_v0, %v14648_v25  ;;  %v16236_v40 = vld [vmem:[%s19095_s19 + $0x28] sm:$0xff] }
0x1d39   : > { %v10465_v50 = vsub.f32 1.0, %v10457_v26  ;;  %v10324_v53 = vadd.f32 %v16234_v29, %v10323_v57  ;;  %v10429_v7 = vadd.f32 %v16235_v62, %v10428_v3  ;;  %v16239_v57 = vld [vmem:[%s19112_s12 + $0x20] sm:$0xff] }
0x1d3a   : > { %v10460_v36 = vand.u32 2147483647, %v10329_v34  ;;  %v10474_v58 = vmax.f32 %v10466_v21, 0.0  ;;  %v10484_v55 = vand.u32 2147483647, %v10434_v48 }
0x1d3b   : > { %v10473_v44 = vmax.f32 %v10465_v50, 0.0  ;;  %v10459_v51 = vand.u32 2147483647, %v10324_v53  ;;  %v14631_v35 = vpop.f32.mrb[62].mxu1  ;;  %v14651_v43 = vpop.f32.mrb[22].mxu0  ;;  %v10490_v50 = vsub.f32 1.0, %v10482_v19 }
0x1d3c   : > { %v10468_v14 = vsub.f32 1.0, %v10460_v36  ;;  %v10339_v20 = vadd.f32 %v16236_v40, %v14631_v35  ;;  %v10333_v26 = vpop.f32.mrb[63].mxu1  ;;  %v10438_v63 = vpop.f32.mrb[23].mxu0  ;;  %v10444_v25 = vadd.f32 %v16237_v39, %v14651_v43  ;;  %v10483_v6 = vand.u32 2147483647, %v10429_v7  ;;  %v22732_v36 = vld [vmem:[#allocation166_spill] sm:$0xff] }
0x1d3d   : > { %v10467_v33 = vsub.f32 1.0, %v10459_v51  ;;  %14679 = vmatprep.mubr.msk.f32.mxu0 %vm1893_vm0, %v10473_v44  ;;  %v10334_v47 = vadd.f32 %v16238_v11, %v10333_v26  ;;  %v10439_v3 = vadd.f32 %v16239_v57, %v10438_v63  ;;  %v10489_v44 = vsub.f32 1.0, %v10481_v8  ;;  %v16242_v40 = vld [vmem:[%s19095_s19 + $0x30] sm:$0xff] }
0x1d3e   : > { %14680 = vmatmul.mubr.msk.f32.vlgmr.msra.gmra.mrb[26].mxu0 %vm1893_vm0, %v10474_v58  ;;  %v10462_v34 = vand.u32 2147483647, %v10339_v20  ;;  %v10476_v0 = vmax.f32 %v10468_v14, 0.0  ;;  %v10492_v51 = vsub.f32 1.0, %v10484_v55  ;;  %v16240_v58 = vld [vmem:[%s19095_s19 + $0x38] sm:$0xff]  ;;  %v10491_v26 = vsub.f32 1.0, %v10483_v6 }
0x1d3f   : > { %v10475_v21 = vmax.f32 %v10467_v33, 0.0  ;;  %15538 = vmatpush3.bf16.msra.mxu0 %v20747_v45  ;;  %v10461_v48 = vand.u32 2147483647, %v10334_v47  ;;  %v14634_v29 = vpop.f32.mrb[64].mxu1  ;;  %v14654_v53 = vpop.f32.mrb[24].mxu0  ;;  %v16241_v33 = vld [vmem:[%s19112_s12 + $0x38] sm:$0xff] }
0x1d40   : > { %15540 = vmatprep.subr.bf16.mxu0 %v22732_v36  ;;  %v10470_v62 = vsub.f32 1.0, %v10462_v34  ;;  %v10349_v7 = vadd.f32 %v16240_v58, %v14634_v29  ;;  %v10343_v35 = vpop.f32.mrb[65].mxu1  ;;  %v10448_v43 = vpop.f32.mrb[25].mxu0  ;;  %v10486_v45 = vand.u32 2147483647, %v10444_v25  ;;  %v10454_v14 = vadd.f32 %v16241_v33, %v14654_v53  ;;  %v16243_v55 = vld [vmem:[%s19112_s12 + $0x30] sm:$0xff] }
0x1d41   : > { %14682 = vmatprep.mubr.msk.f32.mxu0 %vm1893_vm0, %v10475_v21  ;;  %v10469_v19 = vsub.f32 1.0, %v10461_v48  ;;  %v10344_v20 = vadd.f32 %v16242_v40, %v10343_v35  ;;  %v10485_v63 = vand.u32 2147483647, %v10439_v3  ;;  %v10449_v39 = vadd.f32 %v16243_v55, %v10448_v43  ;;  %v22733_v57 = vld [vmem:[#allocation169_spill] sm:$0xff] }
0x1d42   : > { %14683 = vmatmul.mubr.msk.f32.gmra.mrb[28].mxu0 %vm1893_vm0, %v10476_v0  ;;  %v10464_v8 = vand.u32 2147483647, %v10349_v7  ;;  %v10498_v11 = vmax.f32 %v10490_v50, 0.0  ;;  %v10497_v25 = vmax.f32 %v10489_v44, 0.0  ;;  %v10500_v21 = vmax.f32 %v10492_v51, 0.0  ;;  %v22736_v55 = vld [vmem:[#allocation105_spill] sm:$0xff] }
0x1d43   : > { %15542 = vmatpush3.bf16.msra.mxu0 %v22732_v36  ;;  %v10477_v47 = vmax.f32 %v10469_v19, 0.0  ;;  %v10463_v34 = vand.u32 2147483647, %v10344_v20  ;;  %v10478_v48 = vmax.f32 %v10470_v62, 0.0  ;;  %v14661_v53 = vpop.f32.mrb[66].mxu1  ;;  %v10494_v58 = vsub.f32 1.0, %v10486_v45 }
0x1d44   : > { %15544 = vmatprep.subr.bf16.mxu0 %v22733_v57  ;;  %v10472_v29 = vsub.f32 1.0, %v10464_v8  ;;  %v10488_v35 = vand.u32 2147483647, %v10454_v14  ;;  %v10611_v6 = vmul.f32 %v14661_v53, %v10498_v11  ;;  %v10571_v3 = vpop.f32.mrb[67].mxu1  ;;  %v10499_v7 = vmax.f32 %v10491_v26, 0.0  ;;  %v22734_v45 = vld [vmem:[#allocation168_spill] sm:$0xff] }
0x1d45   : > { %v10471_v0 = vsub.f32 1.0, %v10463_v34  ;;  %14685 = vmatprep.mubr.msk.f32.mxu0 %vm1893_vm0, %v10477_v47  ;;  %v10493_v43 = vsub.f32 1.0, %v10485_v63  ;;  %v10487_v36 = vand.u32 2147483647, %v10449_v39  ;;  %v10610_v50 = vmul.f32 %v10571_v3, %v10497_v25  ;;  %v22735_v8 = vld [vmem:[#allocation104_spill] sm:$0xff]  ;;  %v22738_v47 = vld [vmem:[#allocation139_spill] sm:$0xff] }
0x1d46   : > { %14686 = vmatmul.mubr.msk.f32.gmra.mrb[30].mxu0 %vm1893_vm0, %v10478_v48  ;;  %v10480_v62 = vmax.f32 %v10472_v29, 0.0  ;;  %v10502_v40 = vmax.f32 %v10494_v58, 0.0  ;;  %v10496_v20 = vsub.f32 1.0, %v10488_v35  ;;  %v22737_v39 = vpack.c.bf16 %v22735_v8, %v22736_v55  ;;  %v22739_v34 = vld [vmem:[#allocation130_spill] sm:$0xff]  ;;  %v22741_v48 = vld [vmem:[#allocation79_spill] sm:$0xff]  ;;  %v22742_v35 = vld [vmem:[#allocation109_spill] sm:$0xff] }
0x1d47   : > { %v14664_v19 = vpop.f32.mrb[68].mxu1  ;;  %v10479_v33 = vmax.f32 %v10471_v0, 0.0  ;;  %15546 = vmatpush3.bf16.msra.mxu0 %v22733_v57  ;;  %14699 = vmatprep.mubr.msk.f32.mxu1 %vm1893_vm0, %v10610_v50  ;;  %v10501_v26 = vmax.f32 %v10493_v43, 0.0  ;;  %v10495_v63 = vsub.f32 1.0, %v10487_v36  ;;  %v22740_v57 = vpack.c.bf16 %v22738_v47, %v22739_v34  ;;  %v22743_v0 = vld [vmem:[#allocation138_spill] sm:$0xff]  ;;  %v22746_v43 = vld [vmem:[#allocation148_spill] sm:$0xff] }
0x1d48   : > { %v10613_v44 = vmul.f32 %v14664_v19, %v10500_v21  ;;  %v10581_v51 = vpop.f32.mrb[69].mxu1  ;;  %15548 = vmatprep.subr.bf16.mxu0 %v22734_v45  ;;  %14700 = vmatmul.mubr.msk.f32.vlgmr.msra.gmra.mrb[74].mxu1 %vm1893_vm0, %v10611_v6  ;;  %v10504_v53 = vmax.f32 %v10496_v20, 0.0  ;;  %v22744_v6 = vpack.c.bf16 %v22742_v35, %v22743_v0  ;;  %v22757_v8 = vld [vmem:[#allocation160_spill] sm:$0xff] }
0x1d49   : > { %v10612_v14 = vmul.f32 %v10581_v51, %v10499_v7  ;;  %14688 = vmatprep.mubr.msk.f32.mxu0 %vm1893_vm0, %v10479_v33  ;;  %15570 = vmatpush3.bf16.msra.mxu1 %v22737_v39  ;;  %v10503_v58 = vmax.f32 %v10495_v63, 0.0  ;;  %v22745_v7 = vld [vmem:[#allocation147_spill] sm:$0xff]  ;;  %v22748_v33 = vld [vmem:[#allocation78_spill] sm:$0xff]  ;;  %v22762_v34 = vld [vmem:[#allocation80_spill] sm:$0xff] }
0x1d4a   : > { %14689 = vmatmul.mubr.msk.f32.gmra.mrb[32].mxu0 %vm1893_vm0, %v10480_v62  ;;  %15572 = vmatprep.subr.bf16.mxu1 %v22740_v57  ;;  %v22747_v36 = vpack.c.bf16 %v22745_v7, %v22746_v43  ;;  %v22750_v62 = vld [vmem:[#allocation150_spill] sm:$0xff]  ;;  %v22756_v63 = vld [vmem:[#allocation163_spill] sm:$0xff]  ;;  %v22772_v0 = vld [vmem:[#allocation144_spill] sm:$0xff] }
0x1d4b   : > { %v14667_v11 = vpop.f32.mrb[70].mxu1  ;;  %15550 = vmatpush3.bf16.msra.mxu0 %v22734_v45  ;;  %14702 = vmatprep.mubr.msk.f32.mxu1 %vm1893_vm0, %v10612_v14  ;;  %v22752_v14 = vld [vmem:[#allocation161_spill] sm:$0xff]  ;;  %v22758_v55 = vpack.c.bf16 %v22756_v63, %v22757_v8  ;;  %v22759_v39 = vld [vmem:[#allocation114_spill] sm:$0xff]  ;;  %v22775_v7 = vld [vmem:[#allocation151_spill] sm:$0xff] }
0x1d4c   : > { %v10615_v25 = vmul.f32 %v14667_v11, %v10502_v40  ;;  %v10591_v21 = vpop.f32.mrb[71].mxu1  ;;  %15552 = vmatprep.subr.bf16.mxu0 %v22741_v48  ;;  %14703 = vmatmul.mubr.msk.f32.gmra.mrb[76].mxu1 %vm1893_vm0, %v10613_v44  ;;  %v22749_v44 = vld [vmem:[#allocation149_spill] sm:$0xff]  ;;  %v22753_v40 = vld [vmem:[#allocation158_spill] sm:$0xff]  ;;  %v22760_v11 = vld [vmem:[#allocation115_spill] sm:$0xff] }
0x1d4d   : > { %v10614_v29 = vmul.f32 %v10591_v21, %v10501_v26  ;;  %15574 = vmatpush3.bf16.msra.mxu1 %v22744_v6  ;;  %v22751_v45 = vpack.c.bf16 %v22749_v44, %v22750_v62  ;;  %v22754_v20 = vpack.c.bf16 %v22752_v14, %v22753_v40  ;;  %v22755_v26 = vld [vmem:[#allocation82_spill] sm:$0xff]  ;;  %v22761_v47 = vpack.c.bf16 %v22759_v39, %v22760_v11  ;;  %v22773_v6 = vld [vmem:[#allocation141_spill] sm:$0xff]  ;;  %v22776_v43 = vld [vmem:[#allocation152_spill] sm:$0xff] }
0x1d4e   : > { %15576 = vmatprep.subr.bf16.mxu1 %v22747_v36  ;;  %v22763_v57 = vld [vmem:[#allocation106_spill] sm:$0xff]  ;;  %v22777_v36 = vpack.c.bf16 %v22775_v7, %v22776_v43  ;;  %v22785_v14 = vld [vmem:[#allocation164_spill] sm:$0xff]  ;;  %v22791_v39 = vld [vmem:[#allocation143_spill] sm:$0xff] }
0x1d4f   : > { %v14670_v3 = vpop.f32.mrb[72].mxu1  ;;  %14705 = vmatprep.mubr.msk.f32.mxu1 %vm1893_vm0, %v10614_v29  ;;  %15554 = vmatpush3.bf16.msra.mxu0 %v22741_v48  ;;  %v22766_v48 = vld [vmem:[#allocation142_spill] sm:$0xff]  ;;  %v22767_v29 = vld [vmem:[#allocation108_spill] sm:$0xff]  ;;  %v22799_v7 = vld [vmem:[#allocation83_spill] sm:$0xff] }
0x1d50   : > { %v10617_v50 = vmul.f32 %v14670_v3, %v10504_v53  ;;  %v10601_v19 = vpop.f32.mrb[73].mxu1  ;;  %15556 = vmatprep.subr.bf16.mxu0 %v22748_v33  ;;  %14706 = vmatmul.mubr.msk.f32.gmra.mrb[78].mxu1 %vm1893_vm0, %v10615_v25  ;;  %v22764_v25 = vld [vmem:[#allocation107_spill] sm:$0xff]  ;;  %v22768_v53 = vpack.c.bf16 %v22766_v48, %v22767_v29  ;;  %v22774_v3 = vpack.c.bf16 %v22772_v0, %v22773_v6  ;;  %v22782_v44 = vld [vmem:[#allocation162_spill] sm:$0xff]  ;;  %v22794_v48 = vld [vmem:[#allocation145_spill] sm:$0xff] }
0x1d51   : > { %v10616_v51 = vmul.f32 %v10601_v19, %v10503_v58  ;;  %15578 = vmatpush3.bf16.msra.mxu1 %v22751_v45  ;;  %v22765_v21 = vpack.c.bf16 %v22763_v57, %v22764_v25  ;;  %v22769_v58 = vld [vmem:[#allocation116_spill] sm:$0xff]  ;;  %v22779_v19 = vld [vmem:[#allocation154_spill] sm:$0xff]  ;;  %v22784_v45 = vld [vmem:[#allocation167_spill] sm:$0xff] }
0x1d52   : > { %15580 = vmatprep.subr.bf16.mxu1 %v22754_v20  ;;  %v22786_v40 = vpack.c.bf16 %v22784_v45, %v22785_v14  ;;  %v22787_v63 = vld [vmem:[#allocation122_spill] sm:$0xff]  ;;  %v22800_v43 = vld [vmem:[#allocation84_spill] sm:$0xff]  ;;  %v22809_v14 = vld [vmem:[#allocation125_spill] sm:$0xff] }
0x1d53   : > { %14708 = vmatprep.mubr.msk.f32.mxu1 %vm1893_vm0, %v10616_v51  ;;  %15558 = vmatpush3.bf16.msra.mxu0 %v22748_v33  ;;  %v22781_v51 = vld [vmem:[#allocation165_spill] sm:$0xff]  ;;  %v22808_v45 = vld [vmem:[#allocation124_spill] sm:$0xff] }
0x1d54   : > { %15560 = vmatprep.subr.bf16.mxu0 %v22755_v26  ;;  %14709 = vmatmul.mubr.msk.f32.gmra.mrb[80].mxu1 %vm1893_vm0, %v10617_v50  ;;  %v22778_v50 = vld [vmem:[#allocation153_spill] sm:$0xff]  ;;  %v22783_v62 = vpack.c.bf16 %v22781_v51, %v22782_v44  ;;  %v22806_v44 = vld [vmem:[#allocation67_spill] sm:$0xff] }
0x1d55   : > { %15582 = vmatpush3.bf16.msra.mxu1 %v22758_v55  ;;  %11069 = vmatprep.mubr.f32.mxu1 %v21328_v61  ;;  %v22770_v61 = vld [vmem:[#allocation117_spill] sm:$0xff]  ;;  %v22780_v33 = vpack.c.bf16 %v22778_v50, %v22779_v19  ;;  %v22790_v55 = vld [vmem:[#allocation146_spill] sm:$0xff] }
0x1d56   : > { %15584 = vmatprep.subr.bf16.mxu1 %v22761_v47  ;;  %v22771_v35 = vpack.c.bf16 %v22769_v58, %v22770_v61  ;;  %v22792_v11 = vpack.c.bf16 %v22790_v55, %v22791_v39  ;;  %v22797_v58 = vld [vmem:[#allocation155_spill] sm:$0xff]  ;;  %v22802_v50 = vld [vmem:[#allocation85_spill] sm:$0xff]  ;;  %v22803_v19 = vld [vmem:[#allocation86_spill] sm:$0xff] }
0x1d57   : > { %15562 = vmatpush3.bf16.msra.mxu0 %v22755_v26  ;;  %v22805_v51 = vld [vmem:[#allocation61_spill] sm:$0xff]  ;;  %v22829_v39 = vld [vmem:[#allocation75_spill] sm:$0xff] }
0x1d58   : > { %15564 = vmatprep.subr.bf16.mxu0 %v22762_v34 }
0x1d59   : > { %15586 = vmatpush3.bf16.msra.mxu1 %v22765_v21  ;;  %v22793_v21 = vld [vmem:[#allocation156_spill] sm:$0xff] }
0x1d5a   : > { %15588 = vmatprep.subr.bf16.mxu1 %v22768_v53  ;;  %v22795_v29 = vpack.c.bf16 %v22793_v21, %v22794_v48  ;;  %v22796_v53 = vld [vmem:[#allocation159_spill] sm:$0xff] }
0x1d5b   : > { %15566 = vmatpush3.bf16.msra.mxu0 %v22762_v34  ;;  %v22798_v61 = vpack.c.bf16 %v22796_v53, %v22797_v58 }
0x1d5c   : > { %15600 = vmatprep.subr.bf16.mxu0 %v22771_v35 }
0x1d5d   : > { %15590 = vmatpush3.bf16.msra.mxu1 %v22774_v3 }
0x1d5e   : > { %15592 = vmatprep.subr.bf16.mxu1 %v22777_v36  ;;  %v22801_v36 = vpack.c.bf16 %v22799_v7, %v22800_v43  ;;  %v12511_v43 = vld [vmem:[%s22517_s16 + $0x30] sm:$0xff] }
0x1d61   : > { %15594 = vmatpush3.bf16.msra.mxu1 %v22780_v33  ;;  %v22804_v33 = vpack.c.bf16 %v22802_v50, %v22803_v19 }
0x1d62   : > { %15596 = vmatprep.subr.bf16.mxu1 %v22783_v62  ;;  %v22807_v62 = vpack.c.bf16 %v22805_v51, %v22806_v44 }
0x1d65   : > { %15598 = vmatpush3.bf16.msra.mxu1 %v22786_v40  ;;  %v22810_v40 = vpack.c.bf16 %v22808_v45, %v22809_v14 }
0x1d68   : > { %11070 = vmatmul.mubr.f32.vlgmr.msra.gmra.mrb[82].mxu1 %v21323_v30 }
0x1d69   : > { %11074 = vmatprep.mubr.f32.mxu1 %v21338_v49 }
0x1d6c   : > { %11075 = vmatmul.mubr.f32.gmra.mrb[84].mxu1 %v21333_v59 }
0x1d6d   : > { %11079 = vmatprep.mubr.f32.mxu1 %v21349_v38 }
0x1d70   : > { %11080 = vmatmul.mubr.f32.gmra.mrb[86].mxu1 %v21343_v2 }
0x1d71   : > { %11084 = vmatprep.mubr.f32.mxu1 %v21359_v42 }
0x1d74   : > { %11085 = vmatmul.mubr.f32.gmra.mrb[88].mxu1 %v21354_v13 }
0x1d75   : > { %11089 = vmatprep.mubr.f32.mxu1 %v21369_v1 }
0x1d78   : > { %11090 = vmatmul.mubr.f32.gmra.mrb[90].mxu1 %v21364_v17 }
0x1d79   : > { %11094 = vmatprep.mubr.f32.mxu1 %v21380_v60 }
0x1d7c   : > { %11095 = vmatmul.mubr.f32.gmra.mrb[92].mxu1 %v21374_v32 }
0x1d7d   : > { %11099 = vmatprep.mubr.f32.mxu1 %v21392_v37 }
0x1d80   : > { %11100 = vmatmul.mubr.f32.gmra.mrb[94].mxu1 %v21386_v46 }
0x1d81   : > { %11104 = vmatprep.mubr.f32.mxu1 %v21404_v18 }
0x1d84   : > { %11105 = vmatmul.mubr.f32.gmra.mrb[96].mxu1 %v21398_v24  ;;  %v22788_v24 = vld [vmem:[#allocation123_spill] sm:$0xff] }
0x1d85   : > { %v22789_v8 = vpack.c.bf16 %v22787_v63, %v22788_v24 }
0x1e11   : > { %v14681_v30 = vpop.f32.mrb[26].mxu0 }
0x1e12   : > { %v10708_v59 = vpop.f32.mrb[27].mxu0 }
0x1e15   : > { %v14684_v49 = vpop.f32.mrb[28].mxu0 }
0x1e16   : > { %v10718_v2 = vpop.f32.mrb[29].mxu0 }
0x1e19   : > { %v14687_v38 = vpop.f32.mrb[30].mxu0 }
0x1e1a   : > { %v10728_v13 = vpop.f32.mrb[31].mxu0 }
0x1e1b   : > { %v14701_v42 = vpop.f32.mrb[74].mxu1 }
0x1e1c   : > { %v10877_v17 = vmul.f32 %v14701_v42, %v14681_v30  ;;  %v10837_v1 = vpop.f32.mrb[75].mxu1  ;;  %v22811_v30 = vld [vmem:[#allocation62_spill] sm:$0xff]  ;;  %v22817_v42 = vld [vmem:[#allocation65_spill] sm:$0xff] }
0x1e1d   : > { %v14690_v60 = vpop.f32.mrb[32].mxu0  ;;  %v10876_v20 = vmul.f32 %v10837_v1, %v10708_v59  ;;  %v22812_v59 = vld [vmem:[#allocation135_spill] sm:$0xff] }
0x1e1e   : > { %v10738_v32 = vpop.f32.mrb[33].mxu0 }
0x1e1f   : > { %v14704_v26 = vpop.f32.mrb[76].mxu1  ;;  %14743 = vmatprep.mubr.f32.mxu0 %v10876_v20  ;;  %v22821_v20 = vld [vmem:[#allocation70_spill] sm:$0xff] }
0x1e20   : > { %v10879_v37 = vmul.f32 %v14704_v26, %v14684_v49  ;;  %v10847_v46 = vpop.f32.mrb[77].mxu1  ;;  %14744 = vmatmul.mubr.f32.vlgmr.msra.gmra.mrb[34].mxu0 %v10877_v17  ;;  %v22813_v49 = vpack.c.bf16 %v22811_v30, %v22812_v59  ;;  %v22818_v17 = vld [vmem:[#allocation64_spill] sm:$0xff]  ;;  %v22824_v26 = vld [vmem:[#allocation69_spill] sm:$0xff] }
0x1e21   : > { %v10878_v18 = vmul.f32 %v10847_v46, %v10718_v2  ;;  %15602 = vmatpush3.bf16.msra.mxu0 %v22789_v8  ;;  %v22814_v2 = vld [vmem:[#allocation66_spill] sm:$0xff]  ;;  %v22819_v1 = vpack.c.bf16 %v22817_v42, %v22818_v17  ;;  %v22826_v46 = vld [vmem:[#allocation73_spill] sm:$0xff] }
0x1e22   : > { %15604 = vmatprep.subr.bf16.mxu0 %v22792_v11  ;;  %v22830_v11 = vld [vmem:[#allocation74_spill] sm:$0xff] }
0x1e23   : > { %v14707_v47 = vpop.f32.mrb[78].mxu1  ;;  %14746 = vmatprep.mubr.f32.mxu0 %v10878_v18  ;;  %v22827_v18 = vld [vmem:[#allocation72_spill] sm:$0xff] }
0x1e24   : > { %v10881_v34 = vmul.f32 %v14707_v47, %v14687_v38  ;;  %v10857_v57 = vpop.f32.mrb[79].mxu1  ;;  %14747 = vmatmul.mubr.f32.gmra.mrb[36].mxu0 %v10879_v37  ;;  %v22815_v38 = vld [vmem:[#allocation63_spill] sm:$0xff]  ;;  %v22828_v63 = vpack.c.bf16 %v22826_v46, %v22827_v18  ;;  %v22831_v47 = vpack.c.bf16 %v22829_v39, %v22830_v11 }
0x1e25   : > { %v10880_v25 = vmul.f32 %v10857_v57, %v10728_v13  ;;  %15606 = vmatpush3.bf16.msra.mxu0 %v22795_v29  ;;  %v22816_v13 = vpack.c.bf16 %v22814_v2, %v22815_v38 }
0x1e26   : > { %15608 = vmatprep.subr.bf16.mxu0 %v22798_v61 }
0x1e27   : > { %v14710_v35 = vpop.f32.mrb[80].mxu1  ;;  %14749 = vmatprep.mubr.f32.mxu0 %v10880_v25 }
0x1e28   : > { %v10883_v0 = vmul.f32 %v14710_v35, %v14690_v60  ;;  %v10867_v6 = vpop.f32.mrb[81].mxu1  ;;  %14750 = vmatmul.mubr.f32.gmra.mrb[38].mxu0 %v10881_v34  ;;  %v22820_v60 = vld [vmem:[#allocation68_spill] sm:$0xff] }
0x1e29   : > { %v10882_v3 = vmul.f32 %v10867_v6, %v10738_v32  ;;  %15610 = vmatpush3.bf16.msra.mxu0 %v22801_v36  ;;  %v22822_v32 = vpack.c.bf16 %v22820_v60, %v22821_v20  ;;  %v12512_v36 = vld [vmem:[%s22517_s16 + $0x38] sm:$0xff] }
0x1e2a   : > { %15612 = vmatprep.subr.bf16.mxu0 %v22804_v33 }
0x1e2b   : > { %14752 = vmatprep.mubr.f32.mxu0 %v10882_v3 }
0x1e2c   : > { %14753 = vmatmul.mubr.f32.gmra.mrb[40].mxu0 %v10883_v0 }
0x1e2d   : > { %15614 = vmatpush3.bf16.msra.mxu0 %v22807_v62  ;;  %11174 = vmatprep.mubr.f32.mxu0 %v21330_v15  ;;  %v22823_v15 = vld [vmem:[#allocation71_spill] sm:$0xff] }
0x1e2e   : > { %15616 = vmatprep.subr.bf16.mxu0 %v22810_v40  ;;  %v22825_v37 = vpack.c.bf16 %v22823_v15, %v22824_v26 }
0x1e31   : > { %15618 = vmatpush3.bf16.msra.mxu0 %v22813_v49 }
0x1e32   : > { %15620 = vmatprep.subr.bf16.mxu0 %v22816_v13 }
0x1e35   : > { %15622 = vmatpush3.bf16.msra.mxu0 %v22819_v1 }
0x1e36   : > { %15624 = vmatprep.subr.bf16.mxu0 %v22822_v32 }
0x1e39   : > { %15626 = vmatpush3.bf16.msra.mxu0 %v22825_v37 }
0x1e3a   : > { %15628 = vmatprep.subr.bf16.mxu0 %v22828_v63 }
0x1e3b   : > { %v13785_v24 = vpop.f32.mrb[82].mxu1 }
0x1e3c   : > { %v13786_v8 = vpop.f32.mrb[83].mxu1 }
0x1e3d   : > { %v13787_v55 = vadd.f32 %v13786_v8, %v13785_v24  ;;  %15630 = vmatpush3.bf16.msra.mxu0 %v22831_v47 }
0x1e3f   : > { %v13788_v34 = vpop.f32.mrb[84].mxu1 }
0x1e40   : > { %v13789_v57 = vpop.f32.mrb[85].mxu1  ;;  %11175 = vmatmul.mubr.f32.vlgmr.msra.gmra.mrb[42].mxu0 %v21325_v54 }
0x1e41   : > { %v13790_v25 = vadd.f32 %v13789_v57, %v13788_v34  ;;  %11179 = vmatprep.mubr.f32.mxu0 %v21340_v12 }
0x1e43   : > { %v13791_v21 = vpop.f32.mrb[86].mxu1 }
0x1e44   : > { %v13792_v48 = vpop.f32.mrb[87].mxu1  ;;  %11180 = vmatmul.mubr.f32.gmra.mrb[44].mxu0 %v21335_v4 }
0x1e45   : > { %v13793_v29 = vadd.f32 %v13792_v48, %v13791_v21  ;;  %11184 = vmatprep.mubr.f32.mxu0 %v21351_v5 }
0x1e47   : > { %v13794_v53 = vpop.f32.mrb[88].mxu1 }
0x1e48   : > { %v13795_v58 = vpop.f32.mrb[89].mxu1  ;;  %11185 = vmatmul.mubr.f32.gmra.mrb[46].mxu0 %v21346_v56 }
0x1e49   : > { %v13796_v61 = vadd.f32 %v13795_v58, %v13794_v53  ;;  %11189 = vmatprep.mubr.f32.mxu0 %v21361_v28 }
0x1e4b   : > { %v13797_v35 = vpop.f32.mrb[90].mxu1 }
0x1e4c   : > { %v13798_v0 = vpop.f32.mrb[91].mxu1  ;;  %11190 = vmatmul.mubr.f32.gmra.mrb[48].mxu0 %v21356_v27 }
0x1e4d   : > { %v13799_v54 = vadd.f32 %v13798_v0, %v13797_v35  ;;  %11194 = vmatprep.mubr.f32.mxu0 %v21371_v22 }
0x1e4f   : > { %v13800_v12 = vpop.f32.mrb[92].mxu1 }
0x1e50   : > { %v13801_v4 = vpop.f32.mrb[93].mxu1  ;;  %11195 = vmatmul.mubr.f32.gmra.mrb[50].mxu0 %v21366_v41  ;;  %v12509_v41 = vld [vmem:[%s22517_s16 + $0x20] sm:$0xff] }
0x1e51   : > { %v13802_v5 = vadd.f32 %v13801_v4, %v13800_v12  ;;  %11199 = vmatprep.mubr.f32.mxu0 %v21383_v16  ;;  %v12510_v16 = vld [vmem:[%s22517_s16 + $0x28] sm:$0xff] }
0x1e52   : > { %v15631_v7 = vpack.c.bf16 %v12510_v16, %v12509_v41 }
0x1e53   : > { %v13803_v56 = vpop.f32.mrb[94].mxu1 }
0x1e54   : > { %v13804_v6 = vpop.f32.mrb[95].mxu1  ;;  %11200 = vmatmul.mubr.f32.gmra.mrb[52].mxu0 %v21377_v31  ;;  %15632 = vmatprep.subr.bf16.mxu1 %v15631_v7  ;;  %v15635_v31 = vpack.c.bf16 %v12512_v36, %v12511_v43 }
0x1e55   : > { %v13805_v28 = vadd.f32 %v13804_v6, %v13803_v56  ;;  %11204 = vmatprep.mubr.f32.mxu0 %v21395_v52  ;;  %15634 = vmatpush3.bf16.msra.mxu1 %v15631_v7  ;;  %v22832_v6 = vld [vmem:[#allocation126_spill] sm:$0xff] }
0x1e56   : > { %15636 = vmatprep.subr.bf16.mxu1 %v15635_v31 }
0x1e57   : > { %v13806_v27 = vpop.f32.mrb[96].mxu1 }
0x1e58   : > { %v13807_v22 = vpop.f32.mrb[97].mxu1  ;;  %11205 = vmatmul.mubr.f32.gmra.mrb[54].mxu0 %v21389_v9 }
0x1e59   : > { %v13808_v3 = vadd.f32 %v13807_v22, %v13806_v27  ;;  %11209 = vmatprep.mubr.f32.mxu0 %v21407_v23  ;;  %15638 = vmatpush3.bf16.msra.mxu1 %v15635_v31  ;;  %v22833_v27 = vld [vmem:[#allocation127_spill] sm:$0xff]  ;;  %v22834_v31 = vld [vmem:[#allocation129_spill] sm:$0xff] }
0x1e5c   : > { %11210 = vmatmul.mubr.f32.gmra.mrb[56].mxu0 %v21401_v10 }
0x1ef3   : > { %v14745_v52 = vpop.f32.mrb[34].mxu0 }
0x1ef4   : > { %v11077_v50 = vadd.f32 %v14745_v52, %v13790_v25  ;;  %v10966_v19 = vpop.f32.mrb[35].mxu0 }
0x1ef5   : > { %v11072_v33 = vadd.f32 %v13787_v55, %v10966_v19 }
0x1ef7   : > { %v14748_v9 = vpop.f32.mrb[36].mxu0 }
0x1ef8   : > { %v11087_v51 = vadd.f32 %v14748_v9, %v13796_v61  ;;  %v10976_v44 = vpop.f32.mrb[37].mxu0 }
0x1ef9   : > { %v11082_v23 = vadd.f32 %v13793_v29, %v10976_v44 }
0x1efb   : > { %v14751_v62 = vpop.f32.mrb[38].mxu0 }
0x1efc   : > { %v11097_v10 = vadd.f32 %v14751_v62, %v13802_v5  ;;  %v10986_v45 = vpop.f32.mrb[39].mxu0 }
0x1efd   : > { %v11092_v14 = vadd.f32 %v13799_v54, %v10986_v45  ;;  %v12769_v54 = vld [vmem:[%s22518_s28 + $0x1] ss:$0 sm:$0xff] }
0x1eff   : > { %v14754_v40 = vpop.f32.mrb[40].mxu0 }
0x1f00   : > { %v11107_v30 = vadd.f32 %v14754_v40, %v13808_v3  ;;  %v10996_v59 = vpop.f32.mrb[41].mxu0 }
0x1f01   : > { %v11102_v49 = vadd.f32 %v13805_v28, %v10996_v59 }
0x1f13   : > { %v13841_v2 = vpop.f32.mrb[42].mxu0 }
0x1f14   : > { %v13842_v38 = vpop.f32.mrb[43].mxu0 }
0x1f15   : > { %v13843_v13 = vadd.f32 %v13842_v38, %v13841_v2 }
0x1f17   : > { %v11177_v42 = vadd.f32 %v13843_v13, %v11072_v33  ;;  %v13844_v17 = vpop.f32.mrb[44].mxu0 }
0x1f18   : > { %v13845_v1 = vpop.f32.mrb[45].mxu0 }
0x1f19   : > { %v13846_v60 = vadd.f32 %v13845_v1, %v13844_v17  ;;  %14763 = vmatprep.mubr.msk.f32.mxu1 %vm1893_vm0, %v11177_v42  ;;  %v22838_v42 = vld [vmem:[#allocation140_spill] sm:$0xff]  ;;  %v22839_v1 = vld [vmem:[#allocation102_spill] sm:$0xff] }
0x1f1b   : > { %v11182_v20 = vadd.f32 %v13846_v60, %v11077_v50  ;;  %v13847_v32 = vpop.f32.mrb[46].mxu0  ;;  %v22835_v50 = vld [vmem:[#allocation137_spill] sm:$0xff] }
0x1f1c   : > { %v13848_v15 = vpop.f32.mrb[47].mxu0 }
0x1f1d   : > { %v13849_v26 = vadd.f32 %v13848_v15, %v13847_v32  ;;  %14764 = vmatmul.mubr.msk.f32.vlgmr.msra.gmra.mrb[98].mxu1 %vm1893_vm0, %v11182_v20 }
0x1f1f   : > { %v11187_v37 = vadd.f32 %v13849_v26, %v11082_v23  ;;  %v13850_v46 = vpop.f32.mrb[48].mxu0 }
0x1f20   : > { %v13851_v18 = vpop.f32.mrb[49].mxu0 }
0x1f21   : > { %v13852_v63 = vadd.f32 %v13851_v18, %v13850_v46  ;;  %14766 = vmatprep.mubr.msk.f32.mxu1 %vm1893_vm0, %v11187_v37 }
0x1f23   : > { %v11192_v24 = vadd.f32 %v13852_v63, %v11087_v51  ;;  %v13853_v8 = vpop.f32.mrb[50].mxu0 }
0x1f24   : > { %v13854_v55 = vpop.f32.mrb[51].mxu0 }
0x1f25   : > { %v13855_v39 = vadd.f32 %v13854_v55, %v13853_v8  ;;  %14767 = vmatmul.mubr.msk.f32.gmra.mrb[100].mxu1 %vm1893_vm0, %v11192_v24 }
0x1f27   : > { %v11197_v11 = vadd.f32 %v13855_v39, %v11092_v14  ;;  %v13856_v47 = vpop.f32.mrb[52].mxu0  ;;  %v22837_v14 = vld [vmem:[#allocation128_spill] sm:$0xff] }
0x1f28   : > { %v13857_v34 = vpop.f32.mrb[53].mxu0 }
0x1f29   : > { %v13858_v57 = vadd.f32 %v13857_v34, %v13856_v47  ;;  %14769 = vmatprep.mubr.msk.f32.mxu1 %vm1893_vm0, %v11197_v11 }
0x1f2b   : > { %v11202_v25 = vadd.f32 %v13858_v57, %v11097_v10  ;;  %v13859_v21 = vpop.f32.mrb[54].mxu0  ;;  %v22836_v10 = vld [vmem:[#allocation103_spill] sm:$0xff] }
0x1f2c   : > { %v13860_v48 = vpop.f32.mrb[55].mxu0 }
0x1f2d   : > { %v13861_v29 = vadd.f32 %v13860_v48, %v13859_v21  ;;  %14770 = vmatmul.mubr.msk.f32.gmra.mrb[102].mxu1 %vm1893_vm0, %v11202_v25 }
0x1f2f   : > { %v11207_v53 = vadd.f32 %v13861_v29, %v11102_v49  ;;  %v13862_v58 = vpop.f32.mrb[56].mxu0 }
0x1f30   : > { %v13863_v61 = vpop.f32.mrb[57].mxu0 }
0x1f31   : > { %v13864_v35 = vadd.f32 %v13863_v61, %v13862_v58  ;;  %14772 = vmatprep.mubr.msk.f32.mxu1 %vm1893_vm0, %v11207_v53 }
0x1f33   : > { %v11212_v0 = vadd.f32 %v13864_v35, %v11107_v30 }
0x1f35   : > { %14773 = vmatmul.mubr.msk.f32.gmra.mrb[104].mxu1 %vm1893_vm0, %v11212_v0 }
0x1ff0   : > { %v14765_v12 = vpop.f32.mrb[98].mxu1 }
0x1ff1   : > { %v11317_v4 = vadd.f32 %v14765_v12, %v12769_v54  ;;  %v11311_v5 = vpop.f32.mrb[99].mxu1 }
0x1ff2   : > { %v11312_v56 = vadd.f32 %v12769_v54, %v11311_v5 }
0x1ff3   : > { %v11351_v28 = vadd.f32 %v11317_v4, %v22832_v6 }
0x1ff4   : > { %v11350_v22 = vadd.f32 %v11312_v56, %v22833_v27 }
0x1ff5   : > { %v11361_v3 = vsel %vm1893_vm0, %v11351_v28, 0.0 }
0x1ff6   : > { %11362 = vadd.xlane.f32.xlu1 %v11361_v3  ;;  %v11358_v41 = vsel %vm1893_vm0, %v11350_v22, 0.0 }
0x1ff7   : > { %11359 = vadd.xlane.f32.xlu0 %v11358_v41 }
0x1ff8   : > { %v14768_v16 = vpop.f32.mrb[100].mxu1 }
0x1ff9   : > { %v11327_v7 = vadd.f32 %v14768_v16, %v12769_v54  ;;  %v11321_v43 = vpop.f32.mrb[101].mxu1 }
0x1ffa   : > { %v11322_v36 = vadd.f32 %v12769_v54, %v11321_v43 }
0x1ffb   : > { %v11353_v52 = vadd.f32 %v11327_v7, %v22834_v31 }
0x1ffc   : > { %v11352_v19 = vadd.f32 %v11322_v36, %v22835_v50  ;;  %v12514_v50 = vld [vmem:[%s22527_s30 + $0x20] sm:$0xff] }
0x1ffd   : > { %v11367_v33 = vsel %vm1893_vm0, %v11353_v52, 0.0 }
0x1ffe   : > { %11368 = vadd.xlane.f32.xlu1 %v11367_v33  ;;  %v11364_v9 = vsel %vm1893_vm0, %v11352_v19, 0.0 }
0x1fff   : > { %11365 = vadd.xlane.f32.xlu0 %v11364_v9  ;;  %v12516_v9 = vld [vmem:[%s22527_s30 + $0x30] sm:$0xff] }
0x2000   : > { %v14771_v51 = vpop.f32.mrb[102].mxu1 }
0x2001   : > { %v11337_v44 = vadd.f32 %v14771_v51, %v12769_v54  ;;  %v11331_v23 = vpop.f32.mrb[103].mxu1  ;;  %v12517_v51 = vld [vmem:[%s22527_s30 + $0x38] sm:$0xff] }
0x2002   : > { %v11332_v62 = vadd.f32 %v12769_v54, %v11331_v23  ;;  %v12518_v23 = vld [vmem:[%s22528_s0 + $0x40] sm:$0xff] }
0x2003   : > { %v11355_v45 = vadd.f32 %v11337_v44, %v22836_v10  ;;  %v15643_v44 = vpack.c.bf16 %v12517_v51, %v12516_v9  ;;  %v12520_v10 = vld [vmem:[%s22528_s0 + $0x50] sm:$0xff] }
0x2004   : > { %v11354_v40 = vadd.f32 %v11332_v62, %v22837_v14  ;;  %v12519_v62 = vld [vmem:[%s22528_s0 + $0x48] sm:$0xff]  ;;  %v12521_v14 = vld [vmem:[%s22528_s0 + $0x58] sm:$0xff] }
0x2005   : > { %v11373_v30 = vsel %vm1893_vm0, %v11355_v45, 0.0 }
0x2006   : > { %11374 = vadd.xlane.f32.xlu1 %v11373_v30  ;;  %v11370_v59 = vsel %vm1893_vm0, %v11354_v40, 0.0  ;;  %v12522_v30 = vld [vmem:[%s22528_s0 + $0x60] sm:$0xff] }
0x2007   : > { %11371 = vadd.xlane.f32.xlu0 %v11370_v59  ;;  %v12523_v59 = vld [vmem:[%s22528_s0 + $0x68] sm:$0xff] }
0x2008   : > { %v14774_v49 = vpop.f32.mrb[104].mxu1 }
0x2009   : > { %v11347_v2 = vadd.f32 %v14774_v49, %v12769_v54  ;;  %v11341_v38 = vpop.f32.mrb[105].mxu1  ;;  %v15655_v49 = vpack.c.bf16 %v12523_v59, %v12522_v30  ;;  %v12525_v30 = vld [vmem:[%s22528_s0 + $0x78] sm:$0xff]  ;;  %v12780_v59 = vld [vmem:[#allocation6 + $0x1] ss:$0 sm:$0xff] }
0x200a   : > { %v11342_v13 = vadd.f32 %v12769_v54, %v11341_v38 }
0x200b   : > { %v11357_v17 = vadd.f32 %v11347_v2, %v22838_v42 }
0x200c   : > { %v11356_v60 = vadd.f32 %v11342_v13, %v22839_v1 }
0x200d   : > { %v11379_v20 = vsel %vm1893_vm0, %v11357_v17, 0.0 }
0x200e   : > { %11380 = vadd.xlane.f32.xlu1 %v11379_v20  ;;  %v11376_v32 = vsel %vm1893_vm0, %v11356_v60, 0.0 }
0x200f   : > { %11377 = vadd.xlane.f32.xlu0 %v11376_v32 }
0x2083   : > { %v11363_v15 = vpop.xlane.xlu1 %11362 }
0x2084   : > { %v11383_v26 = vmul.f32 0.03125, %v11363_v15  ;;  %v11360_v37 = vpop.xlane.xlu0 %11359 }
0x2085   : > { %v11382_v46 = vmul.f32 0.03125, %v11360_v37 }
0x2086   : > { %v21610_v18 = vsub.f32 %v11351_v28, %v11383_v26 }
0x2087   : > { %v21612_v63 = vsub.f32 %v11350_v22, %v11382_v46 }
0x2088   : > { %v11399_v24 = vmul.f32 %v21610_v18, %v21610_v18 }
0x2089   : > { %v11398_v8 = vmul.f32 %v21612_v63, %v21612_v63 }
0x208a   : > { %v11409_v55 = vsel %vm1893_vm0, %v11399_v24, 0.0  ;;  %v12778_v24 = vld [vmem:[#allocation2 + $0x1] ss:$0 sm:$0xff] }
0x208b   : > { %v11369_v39 = vpop.xlane.xlu1 %11368  ;;  %11410 = vadd.xlane.f32.xlu1 %v11409_v55  ;;  %v11406_v11 = vsel %vm1893_vm0, %v11398_v8, 0.0 }
0x208c   : > { %v11385_v47 = vmul.f32 0.03125, %v11369_v39  ;;  %v11366_v34 = vpop.xlane.xlu0 %11365  ;;  %11407 = vadd.xlane.f32.xlu0 %v11406_v11 }
0x208d   : > { %v11384_v57 = vmul.f32 0.03125, %v11366_v34 }
0x208e   : > { %v21620_v25 = vsub.f32 %v11353_v52, %v11385_v47 }
0x208f   : > { %v21622_v21 = vsub.f32 %v11352_v19, %v11384_v57  ;;  %v12515_v19 = vld [vmem:[%s22527_s30 + $0x28] sm:$0xff]  ;;  %v12779_v57 = vld [vmem:[#allocation4 + $0x1] ss:$0 sm:$0xff] }
0x2090   : > { %v11401_v48 = vmul.f32 %v21620_v25, %v21620_v25  ;;  %v15639_v33 = vpack.c.bf16 %v12515_v19, %v12514_v50 }
0x2091   : > { %v11400_v29 = vmul.f32 %v21622_v21, %v21622_v21 }
0x2092   : > { %v11415_v53 = vsel %vm1893_vm0, %v11401_v48, 0.0  ;;  %15640 = vmatprep.subr.bf16.mxu1 %v15639_v33 }
0x2093   : > { %v11375_v58 = vpop.xlane.xlu1 %11374  ;;  %11416 = vadd.xlane.f32.xlu1 %v11415_v53  ;;  %v11412_v61 = vsel %vm1893_vm0, %v11400_v29, 0.0  ;;  %15642 = vmatpush3.bf16.msra.mxu1 %v15639_v33 }
0x2094   : > { %v11387_v35 = vmul.f32 0.03125, %v11375_v58  ;;  %v11372_v0 = vpop.xlane.xlu0 %11371  ;;  %11413 = vadd.xlane.f32.xlu0 %v11412_v61  ;;  %15644 = vmatprep.subr.bf16.mxu1 %v15643_v44 }
0x2095   : > { %v11386_v54 = vmul.f32 0.03125, %v11372_v0 }
0x2096   : > { %v21630_v12 = vsub.f32 %v11355_v45, %v11387_v35  ;;  %v15647_v45 = vpack.c.bf16 %v12519_v62, %v12518_v23 }
0x2097   : > { %v21632_v4 = vsub.f32 %v11354_v40, %v11386_v54  ;;  %15646 = vmatpush3.bf16.msra.mxu1 %v15643_v44  ;;  %v15651_v40 = vpack.c.bf16 %v12521_v14, %v12520_v10 }
0x2098   : > { %v11403_v5 = vmul.f32 %v21630_v12, %v21630_v12  ;;  %15648 = vmatprep.subr.bf16.mxu0 %v15647_v45 }
0x2099   : > { %v11402_v56 = vmul.f32 %v21632_v4, %v21632_v4  ;;  %15650 = vmatpush3.bf16.msra.mxu0 %v15647_v45 }
0x209a   : > { %v11421_v6 = vsel %vm1893_vm0, %v11403_v5, 0.0  ;;  %15652 = vmatprep.subr.bf16.mxu0 %v15651_v40 }
0x209b   : > { %11422 = vadd.xlane.f32.xlu1 %v11421_v6  ;;  %v11381_v28 = vpop.xlane.xlu1 %11380  ;;  %v11418_v27 = vsel %vm1893_vm0, %v11402_v56, 0.0 }
0x209c   : > { %v11389_v22 = vmul.f32 0.03125, %v11381_v28  ;;  %11419 = vadd.xlane.f32.xlu0 %v11418_v27  ;;  %v11378_v3 = vpop.xlane.xlu0 %11377 }
0x209d   : > { %v11388_v41 = vmul.f32 0.03125, %v11378_v3  ;;  %15654 = vmatpush3.bf16.msra.mxu0 %v15651_v40  ;;  %v12524_v40 = vld [vmem:[%s22528_s0 + $0x70] sm:$0xff] }
0x209e   : > { %v21640_v16 = vsub.f32 %v11357_v17, %v11389_v22  ;;  %15656 = vmatprep.subr.bf16.mxu0 %v15655_v49 }
0x209f   : > { %v21642_v7 = vsub.f32 %v11356_v60, %v11388_v41 }
0x20a0   : > { %v11405_v43 = vmul.f32 %v21640_v16, %v21640_v16 }
0x20a1   : > { %v11404_v36 = vmul.f32 %v21642_v7, %v21642_v7  ;;  %15658 = vmatpush3.bf16.msra.mxu0 %v15655_v49 }
0x20a2   : > { %v11427_v31 = vsel %vm1893_vm0, %v11405_v43, 0.0 }
0x20a3   : > { %11428 = vadd.xlane.f32.xlu1 %v11427_v31  ;;  %v11424_v52 = vsel %vm1893_vm0, %v11404_v36, 0.0 }
0x20a4   : > { %11425 = vadd.xlane.f32.xlu0 %v11424_v52 }
0x2118   : > { %v11411_v2 = vpop.xlane.xlu1 %11410 }
0x2119   : > { %v11431_v38 = vmul.f32 0.03125, %v11411_v2  ;;  %v11408_v13 = vpop.xlane.xlu0 %11407 }
0x211a   : > { %v11430_v42 = vmul.f32 0.03125, %v11408_v13 }
0x211b   : > { %v11439_v17 = vadd.f32 1e-05, %v11431_v38 }
0x211c   : > { %v11438_v1 = vadd.f32 1e-05, %v11430_v42 }
0x211d   : > { %16014 = vrsqrt.f32 %v11439_v17 }
0x211e   : > { %16016 = vrsqrt.f32 %v11438_v1 }
0x2120   : > { %v11417_v60 = vpop.xlane.xlu1 %11416 }
0x2121   : > { %v11433_v20 = vmul.f32 0.03125, %v11417_v60  ;;  %v11414_v32 = vpop.xlane.xlu0 %11413 }
0x2122   : > { %v11432_v15 = vmul.f32 0.03125, %v11414_v32 }
0x2123   : > { %v11441_v26 = vadd.f32 1e-05, %v11433_v20 }
0x2124   : > { %v11440_v37 = vadd.f32 1e-05, %v11432_v15 }
0x2125   : > { %16018 = vrsqrt.f32 %v11441_v26 }
0x2126   : > { %16020 = vrsqrt.f32 %v11440_v37 }
0x2127   : > { %v16015_v46 = vpop.eup %16014 }
0x2128   : > { %v16017_v8 = vpop.eup %16016  ;;  %v11455_v55 = vmul.f32 %v16015_v46, %v21610_v18  ;;  %v11423_v39 = vpop.xlane.xlu1 %11422 }
0x2129   : > { %v11435_v11 = vmul.f32 0.03125, %v11423_v39  ;;  %v11420_v47 = vpop.xlane.xlu0 %11419  ;;  %v11454_v34 = vmul.f32 %v16017_v8, %v21612_v63 }
0x212a   : > { %v11469_v48 = vmul.f32 %v12778_v24, %v11455_v55  ;;  %v11434_v29 = vmul.f32 0.03125, %v11420_v47 }
0x212b   : > { %v11443_v53 = vadd.f32 1e-05, %v11435_v11  ;;  %v11468_v58 = vmul.f32 %v12778_v24, %v11454_v34 }
0x212c   : > { %v11442_v61 = vadd.f32 1e-05, %v11434_v29  ;;  %v21664_v0 = vadd.f32 %v12779_v57, %v11469_v48  ;;  %v12789_v29 = vld [vmem:[#allocation7 + $0x1] ss:$0 sm:$0xff] }
0x212d   : > { %16022 = vrsqrt.f32 %v11443_v53  ;;  %v21662_v35 = vadd.f32 %v12779_v57, %v11468_v58 }
0x212e   : > { %16024 = vrsqrt.f32 %v11442_v61 }
0x212f   : > { %v16019_v54 = vpop.eup %16018  ;;  %14783 = vmatprep.mubr.msk.f32.mxu1 %vm1893_vm0, %v21662_v35 }
0x2130   : > { %v16021_v18 = vpop.eup %16020  ;;  %v11457_v5 = vmul.f32 %v16019_v54, %v21620_v25  ;;  %v11429_v63 = vpop.xlane.xlu1 %11428  ;;  %14784 = vmatmul.mubr.msk.f32.vlgmr.msra.gmra.mrb[106].mxu1 %vm1893_vm0, %v21664_v0 }
0x2131   : > { %v11437_v56 = vmul.f32 0.03125, %v11429_v63  ;;  %v11426_v6 = vpop.xlane.xlu0 %11425  ;;  %v11456_v28 = vmul.f32 %v16021_v18, %v21622_v21 }
0x2132   : > { %v11471_v27 = vmul.f32 %v12778_v24, %v11457_v5  ;;  %v11436_v22 = vmul.f32 0.03125, %v11426_v6 }
0x2133   : > { %v11445_v3 = vadd.f32 1e-05, %v11437_v56  ;;  %v11470_v41 = vmul.f32 %v12778_v24, %v11456_v28 }
0x2134   : > { %v11444_v43 = vadd.f32 1e-05, %v11436_v22  ;;  %v21674_v31 = vadd.f32 %v12779_v57, %v11471_v27 }
0x2135   : > { %16026 = vrsqrt.f32 %v11445_v3  ;;  %v21672_v36 = vadd.f32 %v12779_v57, %v11470_v41 }
0x2136   : > { %16028 = vrsqrt.f32 %v11444_v43 }
0x2137   : > { %v16023_v25 = vpop.eup %16022  ;;  %14786 = vmatprep.mubr.msk.f32.mxu1 %vm1893_vm0, %v21672_v36 }
0x2138   : > { %v16025_v52 = vpop.eup %16024  ;;  %v11459_v50 = vmul.f32 %v16023_v25, %v21630_v12  ;;  %14787 = vmatmul.mubr.msk.f32.gmra.mrb[108].mxu1 %vm1893_vm0, %v21674_v31 }
0x2139   : > { %v11458_v21 = vmul.f32 %v16025_v52, %v21632_v4 }
0x213a   : > { %v11473_v19 = vmul.f32 %v12778_v24, %v11459_v50 }
0x213b   : > { %v11472_v33 = vmul.f32 %v12778_v24, %v11458_v21 }
0x213c   : > { %v21684_v51 = vadd.f32 %v12779_v57, %v11473_v19 }
0x213d   : > { %v21682_v9 = vadd.f32 %v12779_v57, %v11472_v33 }
0x213f   : > { %v16027_v44 = vpop.eup %16026  ;;  %14789 = vmatprep.mubr.msk.f32.mxu1 %vm1893_vm0, %v21682_v9 }
0x2140   : > { %v16029_v23 = vpop.eup %16028  ;;  %v11461_v12 = vmul.f32 %v16027_v44, %v21640_v16  ;;  %14790 = vmatmul.mubr.msk.f32.gmra.mrb[110].mxu1 %vm1893_vm0, %v21684_v51  ;;  %v15659_v16 = vpack.c.bf16 %v12525_v30, %v12524_v40 }
0x2141   : > { %v11460_v4 = vmul.f32 %v16029_v23, %v21642_v7 }
0x2142   : > { %v11475_v62 = vmul.f32 %v12778_v24, %v11461_v12  ;;  %15660 = vmatprep.subr.bf16.mxu0 %v15659_v16 }
0x2143   : > { %v11474_v10 = vmul.f32 %v12778_v24, %v11460_v4  ;;  %15662 = vmatpush3.bf16.msra.mxu0 %v15659_v16 }
0x2144   : > { %v21694_v14 = vadd.f32 %v12779_v57, %v11475_v62 }
0x2145   : > { %v21692_v45 = vadd.f32 %v12779_v57, %v11474_v10 }
0x2147   : > { %14792 = vmatprep.mubr.msk.f32.mxu1 %vm1893_vm0, %v21692_v45 }
0x2148   : > { %14793 = vmatmul.mubr.msk.f32.gmra.mrb[112].mxu1 %vm1893_vm0, %v21694_v14 }
0x2203   : > { %v14785_v49 = vpop.f32.mrb[106].mxu1 }
0x2204   : > { %v11592_v7 = vadd.f32 %v14785_v49, %v12780_v59  ;;  %v11586_v2 = vpop.f32.mrb[107].mxu1 }
0x2205   : > { %v11587_v38 = vadd.f32 %v12780_v59, %v11586_v2 }
0x2206   : > { %v11626_v42 = vmax.f32 %v11592_v7, 0.0 }
0x2207   : > { %v11625_v13 = vmax.f32 %v11587_v38, 0.0 }
0x2209   : > { %14811 = vmatprep.mubr.msk.f32.mxu0 %vm4584_vm4, %v11625_v13 }
0x220a   : > { %14812 = vmatmul.mubr.msk.f32.vlgmr.msra.gmra.mrb[58].mxu0 %vm4584_vm4, %v11626_v42 }
0x220b   : > { %v14788_v17 = vpop.f32.mrb[108].mxu1 }
0x220c   : > { %v11602_v1 = vadd.f32 %v14788_v17, %v12780_v59  ;;  %v11596_v60 = vpop.f32.mrb[109].mxu1 }
0x220d   : > { %v11597_v20 = vadd.f32 %v12780_v59, %v11596_v60 }
0x220e   : > { %v11628_v15 = vmax.f32 %v11602_v1, 0.0 }
0x220f   : > { %v11627_v32 = vmax.f32 %v11597_v20, 0.0 }
0x2211   : > { %14814 = vmatprep.mubr.msk.f32.mxu0 %vm4584_vm4, %v11627_v32 }
0x2212   : > { %14815 = vmatmul.mubr.msk.f32.gmra.mrb[60].mxu0 %vm4584_vm4, %v11628_v15 }
0x2213   : > { %v14791_v26 = vpop.f32.mrb[110].mxu1 }
0x2214   : > { %v11612_v37 = vadd.f32 %v14791_v26, %v12780_v59  ;;  %v11606_v46 = vpop.f32.mrb[111].mxu1 }
0x2215   : > { %v11607_v24 = vadd.f32 %v12780_v59, %v11606_v46 }
0x2216   : > { %v11630_v55 = vmax.f32 %v11612_v37, 0.0 }
0x2217   : > { %v11629_v8 = vmax.f32 %v11607_v24, 0.0 }
0x2219   : > { %14817 = vmatprep.mubr.msk.f32.mxu0 %vm4584_vm4, %v11629_v8 }
0x221a   : > { %14818 = vmatmul.mubr.msk.f32.gmra.mrb[62].mxu0 %vm4584_vm4, %v11630_v55 }
0x221b   : > { %v14794_v39 = vpop.f32.mrb[112].mxu1 }
0x221c   : > { %v11622_v11 = vadd.f32 %v14794_v39, %v12780_v59  ;;  %v11616_v47 = vpop.f32.mrb[113].mxu1 }
0x221d   : > { %v11617_v34 = vadd.f32 %v12780_v59, %v11616_v47 }
0x221e   : > { %v11632_v48 = vmax.f32 %v11622_v11, 0.0 }
0x221f   : > { %v11631_v57 = vmax.f32 %v11617_v34, 0.0 }
0x2221   : > { %14820 = vmatprep.mubr.msk.f32.mxu0 %vm4584_vm4, %v11631_v57 }
0x2222   : > { %14821 = vmatmul.mubr.msk.f32.gmra.mrb[64].mxu0 %vm4584_vm4, %v11632_v48 }
0x22dd   : > { %v14813_v53 = vpop.f32.mrb[58].mxu0 }
0x22de   : > { %v11735_v58 = vadd.f32 %v14813_v53, %v12789_v29  ;;  %v11729_v61 = vpop.f32.mrb[59].mxu0 }
0x22df   : > { %v11730_v54 = vadd.f32 %v12789_v29, %v11729_v61 }
0x22e0   : > { %v11769_v18 = vadd.f32 %v11735_v58, %v21664_v0 }
0x22e1   : > { %v11768_v5 = vadd.f32 %v11730_v54, %v21662_v35 }
0x22e2   : > { %v11779_v63 = vsel %vm1893_vm0, %v11769_v18, 0.0 }
0x22e3   : > { %11780 = vadd.xlane.f32.xlu1 %v11779_v63  ;;  %v11776_v56 = vsel %vm1893_vm0, %v11768_v5, 0.0 }
0x22e4   : > { %11777 = vadd.xlane.f32.xlu0 %v11776_v56 }
0x22e5   : > { %v14816_v6 = vpop.f32.mrb[60].mxu0 }
0x22e6   : > { %v11745_v28 = vadd.f32 %v14816_v6, %v12789_v29  ;;  %v11739_v27 = vpop.f32.mrb[61].mxu0 }
0x22e7   : > { %v11740_v22 = vadd.f32 %v12789_v29, %v11739_v27 }
0x22e8   : > { %v11771_v3 = vadd.f32 %v11745_v28, %v21674_v31 }
0x22e9   : > { %v11770_v41 = vadd.f32 %v11740_v22, %v21672_v36 }
0x22ea   : > { %v11785_v43 = vsel %vm1893_vm0, %v11771_v3, 0.0 }
0x22eb   : > { %11786 = vadd.xlane.f32.xlu1 %v11785_v43  ;;  %v11782_v0 = vsel %vm1893_vm0, %v11770_v41, 0.0 }
0x22ec   : > { %11783 = vadd.xlane.f32.xlu0 %v11782_v0 }
0x22ed   : > { %v14819_v35 = vpop.f32.mrb[62].mxu0 }
0x22ee   : > { %v11755_v25 = vadd.f32 %v14819_v35, %v12789_v29  ;;  %v11749_v52 = vpop.f32.mrb[63].mxu0 }
0x22ef   : > { %v11750_v50 = vadd.f32 %v12789_v29, %v11749_v52 }
0x22f0   : > { %v11773_v21 = vadd.f32 %v11755_v25, %v21684_v51 }
0x22f1   : > { %v11772_v19 = vadd.f32 %v11750_v50, %v21682_v9 }
0x22f2   : > { %v11791_v33 = vsel %vm1893_vm0, %v11773_v21, 0.0 }
0x22f3   : > { %11792 = vadd.xlane.f32.xlu1 %v11791_v33  ;;  %v11788_v31 = vsel %vm1893_vm0, %v11772_v19, 0.0 }
0x22f4   : > { %11789 = vadd.xlane.f32.xlu0 %v11788_v31 }
0x22f5   : > { %v14822_v36 = vpop.f32.mrb[64].mxu0 }
0x22f6   : > { %v11765_v44 = vadd.f32 %v14822_v36, %v12789_v29  ;;  %v11759_v23 = vpop.f32.mrb[65].mxu0 }
0x22f7   : > { %v11760_v12 = vadd.f32 %v12789_v29, %v11759_v23 }
0x22f8   : > { %v11775_v4 = vadd.f32 %v11765_v44, %v21694_v14  ;;  %v12799_v44 = vld [vmem:[#allocation10 + $0x1] ss:$0 sm:$0xff] }
0x22f9   : > { %v11774_v62 = vadd.f32 %v11760_v12, %v21692_v45 }
0x22fa   : > { %v11797_v10 = vsel %vm1893_vm0, %v11775_v4, 0.0 }
0x22fb   : > { %11798 = vadd.xlane.f32.xlu1 %v11797_v10  ;;  %v11794_v51 = vsel %vm1893_vm0, %v11774_v62, 0.0 }
0x22fc   : > { %11795 = vadd.xlane.f32.xlu0 %v11794_v51 }
0x2370   : > { %v11781_v9 = vpop.xlane.xlu1 %11780 }
0x2371   : > { %v11801_v40 = vmul.f32 0.03125, %v11781_v9  ;;  %v11778_v30 = vpop.xlane.xlu0 %11777 }
0x2372   : > { %v11800_v16 = vmul.f32 0.03125, %v11778_v30 }
0x2373   : > { %v21726_v59 = vsub.f32 %v11769_v18, %v11801_v40 }
0x2374   : > { %v21728_v49 = vsub.f32 %v11768_v5, %v11800_v16 }
0x2375   : > { %v11817_v7 = vmul.f32 %v21726_v59, %v21726_v59 }
0x2376   : > { %v11816_v45 = vmul.f32 %v21728_v49, %v21728_v49 }
0x2377   : > { %v11827_v14 = vsel %vm1893_vm0, %v11817_v7, 0.0 }
0x2378   : > { %v11787_v2 = vpop.xlane.xlu1 %11786  ;;  %11828 = vadd.xlane.f32.xlu1 %v11827_v14  ;;  %v11824_v38 = vsel %vm1893_vm0, %v11816_v45, 0.0 }
0x2379   : > { %v11803_v13 = vmul.f32 0.03125, %v11787_v2  ;;  %11825 = vadd.xlane.f32.xlu0 %v11824_v38  ;;  %v11784_v42 = vpop.xlane.xlu0 %11783 }
0x237a   : > { %v11802_v17 = vmul.f32 0.03125, %v11784_v42 }
0x237b   : > { %v21736_v1 = vsub.f32 %v11771_v3, %v11803_v13 }
0x237c   : > { %v21738_v60 = vsub.f32 %v11770_v41, %v11802_v17 }
0x237d   : > { %v11819_v20 = vmul.f32 %v21736_v1, %v21736_v1 }
0x237e   : > { %v11818_v32 = vmul.f32 %v21738_v60, %v21738_v60 }
0x237f   : > { %v11833_v15 = vsel %vm1893_vm0, %v11819_v20, 0.0 }
0x2380   : > { %v11793_v26 = vpop.xlane.xlu1 %11792  ;;  %11834 = vadd.xlane.f32.xlu1 %v11833_v15  ;;  %v11830_v37 = vsel %vm1893_vm0, %v11818_v32, 0.0 }
0x2381   : > { %v11805_v46 = vmul.f32 0.03125, %v11793_v26  ;;  %11831 = vadd.xlane.f32.xlu0 %v11830_v37  ;;  %v11790_v24 = vpop.xlane.xlu0 %11789 }
0x2382   : > { %v11804_v8 = vmul.f32 0.03125, %v11790_v24 }
0x2383   : > { %v21746_v55 = vsub.f32 %v11773_v21, %v11805_v46 }
0x2384   : > { %v21748_v39 = vsub.f32 %v11772_v19, %v11804_v8  ;;  %v12798_v19 = vld [vmem:[#allocation9 + $0x1] ss:$0 sm:$0xff] }
0x2385   : > { %v11821_v11 = vmul.f32 %v21746_v55, %v21746_v55 }
0x2386   : > { %v11820_v47 = vmul.f32 %v21748_v39, %v21748_v39 }
0x2387   : > { %v11839_v34 = vsel %vm1893_vm0, %v11821_v11, 0.0 }
0x2388   : > { %11840 = vadd.xlane.f32.xlu1 %v11839_v34  ;;  %v11799_v57 = vpop.xlane.xlu1 %11798  ;;  %v11836_v48 = vsel %vm1893_vm0, %v11820_v47, 0.0 }
0x2389   : > { %v11807_v29 = vmul.f32 0.03125, %v11799_v57  ;;  %11837 = vadd.xlane.f32.xlu0 %v11836_v48  ;;  %v11796_v53 = vpop.xlane.xlu0 %11795 }
0x238a   : > { %v11806_v58 = vmul.f32 0.03125, %v11796_v53 }
0x238b   : > { %v21756_v61 = vsub.f32 %v11775_v4, %v11807_v29 }
0x238c   : > { %v21758_v54 = vsub.f32 %v11774_v62, %v11806_v58 }
0x238d   : > { %v11823_v18 = vmul.f32 %v21756_v61, %v21756_v61 }
0x238e   : > { %v11822_v5 = vmul.f32 %v21758_v54, %v21758_v54 }
0x238f   : > { %v11845_v63 = vsel %vm1893_vm0, %v11823_v18, 0.0 }
0x2390   : > { %11846 = vadd.xlane.f32.xlu1 %v11845_v63  ;;  %v11842_v56 = vsel %vm1893_vm0, %v11822_v5, 0.0 }
0x2391   : > { %11843 = vadd.xlane.f32.xlu0 %v11842_v56 }
0x2405   : > { %v11829_v6 = vpop.xlane.xlu1 %11828 }
0x2406   : > { %v11849_v28 = vmul.f32 0.03125, %v11829_v6  ;;  %v11826_v27 = vpop.xlane.xlu0 %11825 }
0x2407   : > { %v11848_v22 = vmul.f32 0.03125, %v11826_v27 }
0x2408   : > { %v11857_v3 = vadd.f32 1e-05, %v11849_v28 }
0x2409   : > { %v11856_v41 = vadd.f32 1e-05, %v11848_v22 }
0x240a   : > { %16030 = vrsqrt.f32 %v11857_v3 }
0x240b   : > { %16032 = vrsqrt.f32 %v11856_v41 }
0x240d   : > { %v11835_v43 = vpop.xlane.xlu1 %11834 }
0x240e   : > { %v11851_v0 = vmul.f32 0.03125, %v11835_v43  ;;  %v11832_v35 = vpop.xlane.xlu0 %11831 }
0x240f   : > { %v11850_v25 = vmul.f32 0.03125, %v11832_v35 }
0x2410   : > { %v11859_v52 = vadd.f32 1e-05, %v11851_v0 }
0x2411   : > { %v11858_v50 = vadd.f32 1e-05, %v11850_v25 }
0x2412   : > { %16034 = vrsqrt.f32 %v11859_v52 }
0x2413   : > { %16036 = vrsqrt.f32 %v11858_v50 }
0x2414   : > { %v16031_v21 = vpop.eup %16030 }
0x2415   : > { %v16033_v33 = vpop.eup %16032  ;;  %v11873_v31 = vmul.f32 %v16031_v21, %v21726_v59  ;;  %v11841_v36 = vpop.xlane.xlu1 %11840 }
0x2416   : > { %v11872_v23 = vmul.f32 %v16033_v33, %v21728_v49  ;;  %v11853_v12 = vmul.f32 0.03125, %v11841_v36  ;;  %v11838_v4 = vpop.xlane.xlu0 %11837 }
0x2417   : > { %v11887_v62 = vmul.f32 %v12798_v19, %v11873_v31  ;;  %v11852_v10 = vmul.f32 0.03125, %v11838_v4 }
0x2418   : > { %v11886_v51 = vmul.f32 %v12798_v19, %v11872_v23  ;;  %v11861_v9 = vadd.f32 1e-05, %v11853_v12 }
0x2419   : > { %v11901_v40 = vadd.f32 %v12799_v44, %v11887_v62  ;;  %v11860_v30 = vadd.f32 1e-05, %v11852_v10 }
0x241a   : > { %v11900_v16 = vadd.f32 %v12799_v44, %v11886_v51  ;;  %16038 = vrsqrt.f32 %v11861_v9 }
0x241b   : > { %11909 = vst.msk [vmem:[%s21770_s15 + $0x8] sm:$0xff] %vm1893_vm0, %v11901_v40  ;;  %16040 = vrsqrt.f32 %v11860_v30 }
0x241c   : > { %v16035_v59 = vpop.eup %16034  ;;  %11908 = vst.msk [vmem:[%s21770_s15] sm:$0xff] %vm1893_vm0, %v11900_v16 }
0x241d   : > { %v16037_v49 = vpop.eup %16036  ;;  %v11875_v7 = vmul.f32 %v16035_v59, %v21736_v1  ;;  %v11847_v45 = vpop.xlane.xlu1 %11846 }
0x241e   : > { %v11874_v14 = vmul.f32 %v16037_v49, %v21738_v60  ;;  %v11855_v2 = vmul.f32 0.03125, %v11847_v45  ;;  %v11844_v38 = vpop.xlane.xlu0 %11843 }
0x241f   : > { %v11889_v13 = vmul.f32 %v12798_v19, %v11875_v7  ;;  %v11854_v42 = vmul.f32 0.03125, %v11844_v38 }
0x2420   : > { %v11888_v17 = vmul.f32 %v12798_v19, %v11874_v14  ;;  %v11863_v20 = vadd.f32 1e-05, %v11855_v2 }
0x2421   : > { %v11903_v32 = vadd.f32 %v12799_v44, %v11889_v13  ;;  %v11862_v15 = vadd.f32 1e-05, %v11854_v42 }
0x2422   : > { %v11902_v26 = vadd.f32 %v12799_v44, %v11888_v17  ;;  %16042 = vrsqrt.f32 %v11863_v20 }
0x2423   : > { %11911 = vst.msk [vmem:[%s21770_s15 + $0x18] sm:$0xff] %vm1893_vm0, %v11903_v32  ;;  %16044 = vrsqrt.f32 %v11862_v15 }
0x2424   : > { %v16039_v1 = vpop.eup %16038  ;;  %11910 = vst.msk [vmem:[%s21770_s15 + $0x10] sm:$0xff] %vm1893_vm0, %v11902_v26 }
0x2425   : > { %v16041_v37 = vpop.eup %16040  ;;  %v11877_v60 = vmul.f32 %v16039_v1, %v21746_v55 }
0x2426   : > { %v11876_v46 = vmul.f32 %v16041_v37, %v21748_v39 }
0x2427   : > { %v11891_v24 = vmul.f32 %v12798_v19, %v11877_v60 }
0x2428   : > { %v11890_v8 = vmul.f32 %v12798_v19, %v11876_v46 }
0x2429   : > { %v11905_v11 = vadd.f32 %v12799_v44, %v11891_v24 }
0x242a   : > { %v11904_v47 = vadd.f32 %v12799_v44, %v11890_v8 }
0x242b   : > { %11913 = vst.msk [vmem:[%s21770_s15 + $0x28] sm:$0xff] %vm1893_vm0, %v11905_v11 }
0x242c   : > { %v16043_v34 = vpop.eup %16042  ;;  %11912 = vst.msk [vmem:[%s21770_s15 + $0x20] sm:$0xff] %vm1893_vm0, %v11904_v47 }
0x242d   : > { %v16045_v57 = vpop.eup %16044  ;;  %v11879_v48 = vmul.f32 %v16043_v34, %v21756_v61 }
0x242e   : > { %v11878_v29 = vmul.f32 %v16045_v57, %v21758_v54 }
0x242f   : > { %v11893_v53 = vmul.f32 %v12798_v19, %v11879_v48 }
0x2430   : > { %v11892_v55 = vmul.f32 %v12798_v19, %v11878_v29 }
0x2431   : > { %v11907_v58 = vadd.f32 %v12799_v44, %v11893_v53 }
0x2432   : > { %v11906_v18 = vadd.f32 %v12799_v44, %v11892_v55 }
0x2433   : > { %11915 = vst.msk [vmem:[%s21770_s15 + $0x38] sm:$0xff] %vm1893_vm0, %v11907_v58 }
0x2434   : > { %11914 = vst.msk [vmem:[%s21770_s15 + $0x30] sm:$0xff] %vm1893_vm0, %v11906_v18 }
0x2435 PF: > { %s22842_s18 = sld [smem:[#allocation59_spill]] }
0x243b   : > { %s115_s15 = sadd.s32 1, %s22842_s18  }
0x243c   : > { %p112_p13 = scmp.ge.s32.totalorder %s115_s15, 4  }
0x243e   :  { %114 = sbr.rel (!%p112_p13) target bundleno = 103 (0x67), region = 372 }
0x2445   :  { %11937 = vsyncpa [#allocation3], 1 }
0x2446   :  { %11939 = vsyncpa [#allocation3 + $0x1], 1 }
0x2447   :  { %11940 = vsyncpa [#allocation5], 1 }
0x2448   :  { %11941 = vsyncpa [#allocation8], 1 }
0x2449   :  { %11942 = vsyncpa [#allocation11], 1 }

</bundles_post_ra>
